<compile_context>
chip_gen: v7x
topology: tpu7x:2x2x1
jax: 0.10.0
libtpu: 0.0.40
codegen_flags: <defaults>
</compile_context>

<pallas_src>
import numpy as np

import jax
import jax.numpy as jnp
from jax.experimental import pallas as pl
from jax.experimental.pallas import tpu as pltpu


# Starting input depth-plane of the 4-plane receptive-field slab for each
# pooled-depth group d2 (covers conv-output depths {2*d2, 2*d2+1} +/- 1).
_CONV1_PLANE_STARTS = (0, 1, 3, 4)


# ----------------------------------------------------------------------------
# One-time weight preprocessing helpers (host side, outside the jitted forward)
# ----------------------------------------------------------------------------
def _pooled_tap_positions(dq, hq, wq):
    """Conv-output positions ordered (pool-tap-major, then pooled-pos row-major)."""
    pos = []
    for dd in range(2):
        for hh in range(2):
            for ww in range(2):
                for d2 in range(dq):
                    for h2 in range(hq):
                        for w2 in range(wq):
                            pos.append((2 * d2 + dd, 2 * h2 + hh, 2 * w2 + ww))
    return pos


def _conv_as_dense_matrix(w, in_shape, pad, out_positions):
    """Unroll a stride-1 3x3x3 Conv3d over a tiny input grid into a dense matmul.

    w: (Cout, Cin, 3, 3, 3) torch-layout weights (numpy).
    Rows are the NDHWC-flat input (per batch): ((di*Hi + hi)*Wi + wi)*Cin + ci.
    Columns are (out_position_index, cout) in the order given by out_positions.
    The conv's zero padding is encoded by leaving out-of-range taps at 0.
    """
    cout, cin = w.shape[0], w.shape[1]
    di_, hi_, wi_ = in_shape
    a = np.zeros((di_ * hi_ * wi_ * cin, len(out_positions) * cout), np.float32)
    for oi, (do, ho, wo) in enumerate(out_positions):
        for kd in range(3):
            di = do + kd - pad
            if di < 0 or di >= di_:
                continue
            for kh in range(3):
                hi = ho + kh - pad
                if hi < 0 or hi >= hi_:
                    continue
                for kw in range(3):
                    wi = wo + kw - pad
                    if wi < 0 or wi >= wi_:
                        continue
                    r0 = ((di * hi_ + hi) * wi_ + wi) * cin
                    a[r0:r0 + cin, oi * cout:(oi + 1) * cout] = w[:, :, kd, kh, kw].T
    return a


def _conv1_grouped_matrix(w1):
    """conv1 (Cin=1) as 4 pooled-depth-grouped dense matmuls over 4-plane slabs.

    Returns (4, 128, 2048) float32.  Group d2 contracts the input depth-plane
    slab [start, start+4) (flattened (d-start, h, w) -> 128 rows) against
    columns ordered (pool-tap (dd,hh,ww) major, then pooled (h2,w2), then cout),
    i.e. 8 tap blocks of 256 columns each.  This removes ~75% of the structural
    zeros of the previous single (256, 8192) matrix.
    """
    cout = w1.shape[0]                                          # 32
    a = np.zeros((4, 4 * 8 * 4, 8 * 4 * 2 * cout), np.float32)  # (4, 128, 2048)
    for d2 in range(4):
        s = _CONV1_PLANE_STARTS[d2]
        ti = 0
        for dd in range(2):
            for hh in range(2):
                for ww in range(2):
                    for h2 in range(4):
                        for w2 in range(2):
                            do, ho, wo = 2 * d2 + dd, 2 * h2 + hh, 2 * w2 + ww
                            col0 = ti * (4 * 2 * cout) + (h2 * 2 + w2) * cout
                            for kd in range(3):
                                di = do + kd - 1
                                if di < 0 or di >= 8:
                                    continue
                                assert 0 <= di - s < 4
                                for kh in range(3):
                                    hi = ho + kh - 1
                                    if hi < 0 or hi >= 8:
                                        continue
                                    for kw in range(3):
                                        wi = wo + kw - 1
                                        if wi < 0 or wi >= 4:
                                            continue
                                        row = (di - s) * 32 + hi * 4 + wi
                                        a[d2, row, col0:col0 + cout] = w1[:, 0, kd, kh, kw]
                    ti += 1
    return a


# ----------------------------------------------------------------------------
# Raw parameter init (deterministic, PyTorch-like uniform(-1/sqrt(fan_in), +))
# ----------------------------------------------------------------------------
def _uniform(key, shape, fan_in):
    bound = 1.0 / np.sqrt(fan_in)
    return jax.random.uniform(key, shape, jnp.float32, -bound, bound)


def init_params(key):
    """Raw parameters in PyTorch layout."""
    ks = jax.random.split(key, 10)
    p = {}
    p["w1"] = _uniform(ks[0], (32, 1, 3, 3, 3), 1 * 27)
    p["b1"] = _uniform(ks[1], (32,), 1 * 27)
    p["w2"] = _uniform(ks[2], (64, 32, 3, 3, 3), 32 * 27)
    p["b2"] = _uniform(ks[3], (64,), 32 * 27)
    p["w3"] = _uniform(ks[4], (128, 64, 3, 3, 3), 64 * 27)
    p["b3"] = _uniform(ks[5], (128,), 64 * 27)
    p["bn_gamma"] = jnp.ones((128,), jnp.float32)
    p["bn_beta"] = jnp.zeros((128,), jnp.float32)
    p["bn_mean"] = jnp.zeros((128,), jnp.float32)
    p["bn_var"] = jnp.ones((128,), jnp.float32)
    p["fc1_w"] = _uniform(ks[6], (32, 512), 512)   # torch Linear: (out, in)
    p["fc1_b"] = _uniform(ks[7], (32,), 512)
    p["fc2_w"] = _uniform(ks[8], (1, 32), 32)
    p["fc2_b"] = _uniform(ks[9], (1,), 32)
    return p


def prepare_params(raw, eps=1e-5):
    """One-time preprocessing of torch-layout weights into the fused-kernel layout.

    Runs once on the host; the jitted forward sees only the final matrices.
    Big matmul operands are stored bf16 (f32 accumulation in-kernel); small
    bias / BN rows stay f32.
    """
    w1, b1 = np.asarray(raw["w1"]), np.asarray(raw["b1"])
    w2, b2 = np.asarray(raw["w2"]), np.asarray(raw["b2"])
    w3, b3 = np.asarray(raw["w3"]), np.asarray(raw["b3"])

    # conv1: grouped by pooled depth d2 -> (4, 128, 2048); pooled grid (4,4,2) x 32ch
    a1 = _conv1_grouped_matrix(w1)
    b1t = np.tile(b1, 4 * 4 * 2)[None, :]                      # (1, 1024)
    # conv2: input grid (4,4,2) x 32ch  -> pooled output grid (2,2,1) x 64ch
    a2 = _conv_as_dense_matrix(w2, (4, 4, 2), 1, _pooled_tap_positions(2, 2, 1))
    b2t = np.tile(b2, 2 * 2 * 1)[None, :]                      # (1, 256)
    # conv3 (padding=2): input grid (2,2,1) x 64ch -> pooled output grid (2,2,1) x 128ch
    # (floor-mode pooling drops conv3's w=2 plane, so it is never computed.)
    a3 = _conv_as_dense_matrix(w3, (2, 2, 1), 2, _pooled_tap_positions(2, 2, 1))
    b3t = np.tile(b3, 2 * 2 * 1)[None, :]                      # (1, 512)

    # BatchNorm3d eval-mode affine (applied after conv3's ReLU + pool).
    gamma, beta = np.asarray(raw["bn_gamma"]), np.asarray(raw["bn_beta"])
    mean, var = np.asarray(raw["bn_mean"]), np.asarray(raw["bn_var"])
    scale = gamma / np.sqrt(var + eps)
    shift = beta - mean * scale
    bn_scale = np.tile(scale, 4)[None, :]                      # (1, 512)
    bn_shift = np.tile(shift, 4)[None, :]                      # (1, 512)

    # fc1: fold the torch NCDHW flatten order (col = c*4 + pos) into a one-time
    # permutation so it consumes the kernel's (pos*128 + c) activation layout;
    # pad out-features 32 -> 128 lanes.
    fc1_w, fc1_b = np.asarray(raw["fc1_w"]), np.asarray(raw["fc1_b"])
    w4 = fc1_w.reshape(32, 128, 4).transpose(2, 1, 0).reshape(512, 32)
    w4 = np.pad(w4, ((0, 0), (0, 96)))                         # (512, 128)
    b4 = np.pad(fc1_b, (0, 96))[None, :]                       # (1, 128)

    # fc2: 32 -> 1, zero-padded to 128x128 so every in-kernel tile is lane-aligned.
    fc2_w, fc2_b = np.asarray(raw["fc2_w"]), np.asarray(raw["fc2_b"])
    w5 = np.zeros((128, 128), np.float32)
    w5[:32, 0] = fc2_w[0]
    b5 = np.zeros((1, 128), np.float32)
    b5[0, 0] = fc2_b[0]

    big = dict(a1=a1, a2=a2, a3=a3, w4=w4, w5=w5)               # bf16 matmul operands
    small = dict(b1=b1t, b2=b2t, b3=b3t, bn_scale=bn_scale,     # f32 bias / affine rows
                 bn_shift=bn_shift, b4=b4, b5=b5)
    out = {k: jnp.asarray(v, dtype=jnp.bfloat16) for k, v in big.items()}
    out.update({k: jnp.asarray(v, dtype=jnp.float32) for k, v in small.items()})
    return out


# ----------------------------------------------------------------------------
# The single fused Pallas kernel (whole forward pass; big weights streamed from
# HBM via manual async copies so their DMA overlaps earlier layers' MXU work).
# ----------------------------------------------------------------------------
def _net4_v2_kernel(xg_ref,
                    a1_hbm, a2_hbm, a3_hbm, w4_hbm, w5_hbm,
                    b1_ref, b2_ref, b3_ref, bns_ref, bnt_ref, b4_ref, b5_ref,
                    o_ref,
                    a1_v, a2_v, a3_v, w4_v, w5_v, sem):
    f32 = jnp.float32
    bf16 = jnp.bfloat16

    # Kick off every weight DMA now; the DMA queue drains them in use-order
    # while the MXU works on earlier layers (DMA/compute overlap).  Each layer
    # only waits on the matrix it is about to consume.
    copies = [pltpu.make_async_copy(a1_hbm.at[g], a1_v.at[g], sem.at[g])
              for g in range(4)]
    copies.append(pltpu.make_async_copy(a2_hbm, a2_v, sem.at[4]))
    copies.append(pltpu.make_async_copy(a3_hbm, a3_v, sem.at[5]))
    copies.append(pltpu.make_async_copy(w4_hbm, w4_v, sem.at[6]))
    copies.append(pltpu.make_async_copy(w5_hbm, w5_v, sem.at[7]))
    for cp in copies:
        cp.start()

    def tap_max_pool(h_bf16, w_ref, ncols):
        # w_ref columns hold the 8 MaxPool(2,2,2) taps in `ncols`-wide blocks
        # (pooled_positions * Cout, a multiple of 128 lanes).  ReLU and max
        # commute (ReLU monotone, bias identical across taps), so
        #   pool(relu(conv)) == relu(max_t(conv_tap_t) + bias).
        m = jnp.dot(h_bf16, w_ref[:, 0:ncols], preferred_element_type=f32)
        for t in range(1, 8):
            m = jnp.maximum(
                m, jnp.dot(h_bf16, w_ref[:, t * ncols:(t + 1) * ncols],
                           preferred_element_type=f32))
        return m

    # ---- conv1 + ReLU + MaxPool, grouped by pooled depth d2 (Cin=1) -------
    # Group d2 contracts only its 4-plane input slab (K=128); columns are
    # 8 tap blocks of 256 = (h2,w2 pos)*32ch, maxed pairwise on the VPU.
    pieces = []
    for d2 in range(4):
        copies[d2].wait()
        r = jnp.dot(xg_ref[d2], a1_v[d2], preferred_element_type=f32)  # (M, 2048)
        m = r[:, 0:256]
        for t in range(1, 8):
            m = jnp.maximum(m, r[:, t * 256:(t + 1) * 256])
        pieces.append(m)
    h = jnp.concatenate(pieces, axis=1)                 # (M, 1024) = (d2,h2,w2,c)
    h = jnp.maximum(h + b1_ref[...], 0.0)

    # ---- conv2 + ReLU + MaxPool --------------------------------------------
    copies[4].wait()
    h = jnp.maximum(tap_max_pool(h.astype(bf16), a2_v, 256) + b2_ref[...], 0.0)

    # ---- conv3 + ReLU + MaxPool --------------------------------------------
    copies[5].wait()
    h = jnp.maximum(tap_max_pool(h.astype(bf16), a3_v, 512) + b3_ref[...], 0.0)

    # ---- BatchNorm3d (eval-mode affine, applied after ReLU + pool) ---------
    h = h * bns_ref[...] + bnt_ref[...]

    # ---- fc1 + ReLU ---------------------------------------------------------
    copies[6].wait()
    h = jnp.maximum(
        jnp.dot(h.astype(bf16), w4_v[...], preferred_element_type=f32)
        + b4_ref[...], 0.0)

    # TODO(synk): Dropout(p=0.5) training-mode random mask not reproduced (identity in eval mode).

    # ---- fc2 ----------------------------------------------------------------
    copies[7].wait()
    o_ref[...] = (jnp.dot(h.astype(bf16), w5_v[...], preferred_element_type=f32)
                  + b5_ref[...])                        # (M, 128); column 0 is the output


def net4_v2_forward(params, x_ncdhw):
    """Forward pass of Net4_v2.  x_ncdhw: (N, 1, 8, 8, 4) float32 (PyTorch NCDHW)."""
    n = x_ncdhw.shape[0]
    assert x_ncdhw.shape[1:] == (1, 8, 8, 4), "expected (N, 1, 8, 8, 4) input"
    mp = max(16, ((n + 15) // 16) * 16)         # pad batch for bf16 sublane packing
    x3 = x_ncdhw.astype(jnp.bfloat16).reshape(n, 8, 32)          # (N, d, h*w), C=1
    x3 = jnp.pad(x3, ((0, mp - n), (0, 0), (0, 0)))
    # Per-pooled-d2 receptive-field slabs of 4 depth planes -> (4, MP, 128).
    xg = jnp.stack([x3[:, s:s + 4, :].reshape(mp, 128)
                    for s in _CONV1_PLANE_STARTS], axis=0)

    vmem = pl.BlockSpec(memory_space=pltpu.MemorySpace.VMEM)
    hbm = pl.BlockSpec(memory_space=pl.ANY)

    out = pl.pallas_call(
        _net4_v2_kernel,
        out_shape=jax.ShapeDtypeStruct((mp, 128), jnp.float32),
        in_specs=[vmem,                       # xg (activations, tiny)
                  hbm, hbm, hbm, hbm, hbm,    # a1, a2, a3, w4, w5 (manual DMA)
                  vmem, vmem, vmem, vmem, vmem, vmem, vmem],  # bias / BN rows
        out_specs=vmem,
        scratch_shapes=[
            pltpu.VMEM((4, 128, 2048), jnp.bfloat16),   # a1 (grouped)
            pltpu.VMEM((1024, 2048), jnp.bfloat16),     # a2
            pltpu.VMEM((256, 4096), jnp.bfloat16),      # a3
            pltpu.VMEM((512, 128), jnp.bfloat16),       # w4
            pltpu.VMEM((128, 128), jnp.bfloat16),       # w5
            pltpu.SemaphoreType.DMA((8,)),
        ],
        # ~8.2 MiB resident (bf16 weights + tiny activations); 32 MiB leaves
        # headroom for Mosaic scratch and stays well under v7x's 64 MiB VMEM.
        compiler_params=pltpu.CompilerParams(vmem_limit_bytes=32 * 1024 * 1024),
    )(xg, params["a1"], params["a2"], params["a3"], params["w4"], params["w5"],
      params["b1"], params["b2"], params["b3"], params["bn_scale"],
      params["bn_shift"], params["b4"], params["b5"])
    return out[:n, :1]                                   # (N, 1)


if __name__ == "__main__":
    key = jax.random.PRNGKey(0)
    k_param, k_x = jax.random.split(key)
    raw = init_params(k_param)
    params = prepare_params(raw)   # one-time host-side weight preprocessing (not in hot path)
    # Input spatial (D, H, W) = (8, 8, 4): after three MaxPool3d(2) stages the
    # bn output is (N, 128, 2, 2, 1) -> 512 features, matching fc1.
    x = jax.random.normal(k_x, (2, 1, 8, 8, 4), jnp.float32)   # NCDHW like PyTorch
    fwd = jax.jit(net4_v2_forward)
    y = jax.block_until_ready(fwd(params, x))
    assert y.shape == (2, 1) and y.dtype == jnp.float32
    print("KERNEL_OK")
</pallas_src>

<mosaic_0001>
module attributes {stable_mosaic.version = 11 : i64} {
  func.func @_net4_v2_kernel(%arg0: memref<4x16x128xbf16, #tpu.memory_space<vmem>>, %arg1: memref<4x128x2048xbf16, #tpu.memory_space<any>>, %arg2: memref<1024x2048xbf16, #tpu.memory_space<any>>, %arg3: memref<256x4096xbf16, #tpu.memory_space<any>>, %arg4: memref<512x128xbf16, #tpu.memory_space<any>>, %arg5: memref<128x128xbf16, #tpu.memory_space<any>>, %arg6: memref<1x1024xf32, #tpu.memory_space<vmem>>, %arg7: memref<1x256xf32, #tpu.memory_space<vmem>>, %arg8: memref<1x512xf32, #tpu.memory_space<vmem>>, %arg9: memref<1x512xf32, #tpu.memory_space<vmem>>, %arg10: memref<1x512xf32, #tpu.memory_space<vmem>>, %arg11: memref<1x128xf32, #tpu.memory_space<vmem>>, %arg12: memref<1x128xf32, #tpu.memory_space<vmem>>, %arg13: memref<16x128xf32, #tpu.memory_space<vmem>>, %arg14: memref<4x128x2048xbf16, #tpu.memory_space<vmem>>, %arg15: memref<1024x2048xbf16, #tpu.memory_space<vmem>>, %arg16: memref<256x4096xbf16, #tpu.memory_space<vmem>>, %arg17: memref<512x128xbf16, #tpu.memory_space<vmem>>, %arg18: memref<128x128xbf16, #tpu.memory_space<vmem>>, %arg19: memref<8x!tpu.dma_semaphore, #tpu.memory_space<semaphore_mem>>) attributes {dimension_semantics = [], scalar_prefetch = 0 : i64, scratch_operands = 6 : i64, tpu.core_type = #tpu.core_type<tc>} {
    %c0_i32 = arith.constant 0 : i32
    %c0_i32_0 = arith.constant 0 : i32
    %c0_i32_1 = arith.constant 0 : i32
    %c0_i32_2 = arith.constant 0 : i32
    %c0_i32_3 = arith.constant 0 : i32
    %0 = tpu.memref_slice %arg1[%c0_i32, %c0_i32_2, %c0_i32_3] : memref<4x128x2048xbf16, #tpu.memory_space<any>> -> memref<1x128x2048xbf16, #tpu.memory_space<any>>
    %1 = tpu.memref_squeeze %0 : memref<1x128x2048xbf16, #tpu.memory_space<any>> -> memref<128x2048xbf16, #tpu.memory_space<any>>
    %c0_i32_4 = arith.constant 0 : i32
    %c0_i32_5 = arith.constant 0 : i32
    %2 = tpu.memref_slice %arg14[%c0_i32_0, %c0_i32_4, %c0_i32_5] : memref<4x128x2048xbf16, #tpu.memory_space<vmem>> -> memref<1x128x2048xbf16, #tpu.memory_space<vmem>>
    %3 = tpu.memref_squeeze %2 : memref<1x128x2048xbf16, #tpu.memory_space<vmem>> -> memref<128x2048xbf16, #tpu.memory_space<vmem>>
    %4 = tpu.memref_slice %arg19[%c0_i32_1] : memref<8x!tpu.dma_semaphore, #tpu.memory_space<semaphore_mem>> -> memref<1x!tpu.dma_semaphore, #tpu.memory_space<semaphore_mem>>
    %5 = tpu.memref_squeeze %4 : memref<1x!tpu.dma_semaphore, #tpu.memory_space<semaphore_mem>> -> memref<!tpu.dma_semaphore, #tpu.memory_space<semaphore_mem>>
    tpu.enqueue_dma source(%1 : memref<128x2048xbf16, #tpu.memory_space<any>>) target(%3 : memref<128x2048xbf16, #tpu.memory_space<vmem>>) target_semaphore(%5 : memref<!tpu.dma_semaphore, #tpu.memory_space<semaphore_mem>>)
    %c1_i32 = arith.constant 1 : i32
    %c1_i32_6 = arith.constant 1 : i32
    %c1_i32_7 = arith.constant 1 : i32
    %c0_i32_8 = arith.constant 0 : i32
    %c0_i32_9 = arith.constant 0 : i32
    %6 = tpu.memref_slice %arg1[%c1_i32, %c0_i32_8, %c0_i32_9] : memref<4x128x2048xbf16, #tpu.memory_space<any>> -> memref<1x128x2048xbf16, #tpu.memory_space<any>>
    %7 = tpu.memref_squeeze %6 : memref<1x128x2048xbf16, #tpu.memory_space<any>> -> memref<128x2048xbf16, #tpu.memory_space<any>>
    %c0_i32_10 = arith.constant 0 : i32
    %c0_i32_11 = arith.constant 0 : i32
    %8 = tpu.memref_slice %arg14[%c1_i32_6, %c0_i32_10, %c0_i32_11] : memref<4x128x2048xbf16, #tpu.memory_space<vmem>> -> memref<1x128x2048xbf16, #tpu.memory_space<vmem>>
    %9 = tpu.memref_squeeze %8 : memref<1x128x2048xbf16, #tpu.memory_space<vmem>> -> memref<128x2048xbf16, #tpu.memory_space<vmem>>
    %10 = tpu.memref_slice %arg19[%c1_i32_7] : memref<8x!tpu.dma_semaphore, #tpu.memory_space<semaphore_mem>> -> memref<1x!tpu.dma_semaphore, #tpu.memory_space<semaphore_mem>>
    %11 = tpu.memref_squeeze %10 : memref<1x!tpu.dma_semaphore, #tpu.memory_space<semaphore_mem>> -> memref<!tpu.dma_semaphore, #tpu.memory_space<semaphore_mem>>
    tpu.enqueue_dma source(%7 : memref<128x2048xbf16, #tpu.memory_space<any>>) target(%9 : memref<128x2048xbf16, #tpu.memory_space<vmem>>) target_semaphore(%11 : memref<!tpu.dma_semaphore, #tpu.memory_space<semaphore_mem>>)
    %c2_i32 = arith.constant 2 : i32
    %c2_i32_12 = arith.constant 2 : i32
    %c2_i32_13 = arith.constant 2 : i32
    %c0_i32_14 = arith.constant 0 : i32
    %c0_i32_15 = arith.constant 0 : i32
    %12 = tpu.memref_slice %arg1[%c2_i32, %c0_i32_14, %c0_i32_15] : memref<4x128x2048xbf16, #tpu.memory_space<any>> -> memref<1x128x2048xbf16, #tpu.memory_space<any>>
    %13 = tpu.memref_squeeze %12 : memref<1x128x2048xbf16, #tpu.memory_space<any>> -> memref<128x2048xbf16, #tpu.memory_space<any>>
    %c0_i32_16 = arith.constant 0 : i32
    %c0_i32_17 = arith.constant 0 : i32
    %14 = tpu.memref_slice %arg14[%c2_i32_12, %c0_i32_16, %c0_i32_17] : memref<4x128x2048xbf16, #tpu.memory_space<vmem>> -> memref<1x128x2048xbf16, #tpu.memory_space<vmem>>
    %15 = tpu.memref_squeeze %14 : memref<1x128x2048xbf16, #tpu.memory_space<vmem>> -> memref<128x2048xbf16, #tpu.memory_space<vmem>>
    %16 = tpu.memref_slice %arg19[%c2_i32_13] : memref<8x!tpu.dma_semaphore, #tpu.memory_space<semaphore_mem>> -> memref<1x!tpu.dma_semaphore, #tpu.memory_space<semaphore_mem>>
    %17 = tpu.memref_squeeze %16 : memref<1x!tpu.dma_semaphore, #tpu.memory_space<semaphore_mem>> -> memref<!tpu.dma_semaphore, #tpu.memory_space<semaphore_mem>>
    tpu.enqueue_dma source(%13 : memref<128x2048xbf16, #tpu.memory_space<any>>) target(%15 : memref<128x2048xbf16, #tpu.memory_space<vmem>>) target_semaphore(%17 : memref<!tpu.dma_semaphore, #tpu.memory_space<semaphore_mem>>)
    %c3_i32 = arith.constant 3 : i32
    %c3_i32_18 = arith.constant 3 : i32
    %c3_i32_19 = arith.constant 3 : i32
    %c0_i32_20 = arith.constant 0 : i32
    %c0_i32_21 = arith.constant 0 : i32
    %18 = tpu.memref_slice %arg1[%c3_i32, %c0_i32_20, %c0_i32_21] : memref<4x128x2048xbf16, #tpu.memory_space<any>> -> memref<1x128x2048xbf16, #tpu.memory_space<any>>
    %19 = tpu.memref_squeeze %18 : memref<1x128x2048xbf16, #tpu.memory_space<any>> -> memref<128x2048xbf16, #tpu.memory_space<any>>
    %c0_i32_22 = arith.constant 0 : i32
    %c0_i32_23 = arith.constant 0 : i32
    %20 = tpu.memref_slice %arg14[%c3_i32_18, %c0_i32_22, %c0_i32_23] : memref<4x128x2048xbf16, #tpu.memory_space<vmem>> -> memref<1x128x2048xbf16, #tpu.memory_space<vmem>>
    %21 = tpu.memref_squeeze %20 : memref<1x128x2048xbf16, #tpu.memory_space<vmem>> -> memref<128x2048xbf16, #tpu.memory_space<vmem>>
    %22 = tpu.memref_slice %arg19[%c3_i32_19] : memref<8x!tpu.dma_semaphore, #tpu.memory_space<semaphore_mem>> -> memref<1x!tpu.dma_semaphore, #tpu.memory_space<semaphore_mem>>
    %23 = tpu.memref_squeeze %22 : memref<1x!tpu.dma_semaphore, #tpu.memory_space<semaphore_mem>> -> memref<!tpu.dma_semaphore, #tpu.memory_space<semaphore_mem>>
    tpu.enqueue_dma source(%19 : memref<128x2048xbf16, #tpu.memory_space<any>>) target(%21 : memref<128x2048xbf16, #tpu.memory_space<vmem>>) target_semaphore(%23 : memref<!tpu.dma_semaphore, #tpu.memory_space<semaphore_mem>>)
    %c4_i32 = arith.constant 4 : i32
    %24 = tpu.memref_slice %arg19[%c4_i32] : memref<8x!tpu.dma_semaphore, #tpu.memory_space<semaphore_mem>> -> memref<1x!tpu.dma_semaphore, #tpu.memory_space<semaphore_mem>>
    %25 = tpu.memref_squeeze %24 : memref<1x!tpu.dma_semaphore, #tpu.memory_space<semaphore_mem>> -> memref<!tpu.dma_semaphore, #tpu.memory_space<semaphore_mem>>
    tpu.enqueue_dma source(%arg2 : memref<1024x2048xbf16, #tpu.memory_space<any>>) target(%arg15 : memref<1024x2048xbf16, #tpu.memory_space<vmem>>) target_semaphore(%25 : memref<!tpu.dma_semaphore, #tpu.memory_space<semaphore_mem>>)
    %c5_i32 = arith.constant 5 : i32
    %26 = tpu.memref_slice %arg19[%c5_i32] : memref<8x!tpu.dma_semaphore, #tpu.memory_space<semaphore_mem>> -> memref<1x!tpu.dma_semaphore, #tpu.memory_space<semaphore_mem>>
    %27 = tpu.memref_squeeze %26 : memref<1x!tpu.dma_semaphore, #tpu.memory_space<semaphore_mem>> -> memref<!tpu.dma_semaphore, #tpu.memory_space<semaphore_mem>>
    tpu.enqueue_dma source(%arg3 : memref<256x4096xbf16, #tpu.memory_space<any>>) target(%arg16 : memref<256x4096xbf16, #tpu.memory_space<vmem>>) target_semaphore(%27 : memref<!tpu.dma_semaphore, #tpu.memory_space<semaphore_mem>>)
    %c6_i32 = arith.constant 6 : i32
    %28 = tpu.memref_slice %arg19[%c6_i32] : memref<8x!tpu.dma_semaphore, #tpu.memory_space<semaphore_mem>> -> memref<1x!tpu.dma_semaphore, #tpu.memory_space<semaphore_mem>>
    %29 = tpu.memref_squeeze %28 : memref<1x!tpu.dma_semaphore, #tpu.memory_space<semaphore_mem>> -> memref<!tpu.dma_semaphore, #tpu.memory_space<semaphore_mem>>
    tpu.enqueue_dma source(%arg4 : memref<512x128xbf16, #tpu.memory_space<any>>) target(%arg17 : memref<512x128xbf16, #tpu.memory_space<vmem>>) target_semaphore(%29 : memref<!tpu.dma_semaphore, #tpu.memory_space<semaphore_mem>>)
    %c7_i32 = arith.constant 7 : i32
    %30 = tpu.memref_slice %arg19[%c7_i32] : memref<8x!tpu.dma_semaphore, #tpu.memory_space<semaphore_mem>> -> memref<1x!tpu.dma_semaphore, #tpu.memory_space<semaphore_mem>>
    %31 = tpu.memref_squeeze %30 : memref<1x!tpu.dma_semaphore, #tpu.memory_space<semaphore_mem>> -> memref<!tpu.dma_semaphore, #tpu.memory_space<semaphore_mem>>
    tpu.enqueue_dma source(%arg5 : memref<128x128xbf16, #tpu.memory_space<any>>) target(%arg18 : memref<128x128xbf16, #tpu.memory_space<vmem>>) target_semaphore(%31 : memref<!tpu.dma_semaphore, #tpu.memory_space<semaphore_mem>>)
    %c0_i32_24 = arith.constant 0 : i32
    %c0_i32_25 = arith.constant 0 : i32
    %c0_i32_26 = arith.constant 0 : i32
    %c0_i32_27 = arith.constant 0 : i32
    %c0_i32_28 = arith.constant 0 : i32
    %32 = tpu.memref_slice %arg1[%c0_i32_24, %c0_i32_27, %c0_i32_28] : memref<4x128x2048xbf16, #tpu.memory_space<any>> -> memref<1x128x2048xbf16, #tpu.memory_space<any>>
    %33 = tpu.memref_squeeze %32 : memref<1x128x2048xbf16, #tpu.memory_space<any>> -> memref<128x2048xbf16, #tpu.memory_space<any>>
    %c0_i32_29 = arith.constant 0 : i32
    %c0_i32_30 = arith.constant 0 : i32
    %34 = tpu.memref_slice %arg14[%c0_i32_25, %c0_i32_29, %c0_i32_30] : memref<4x128x2048xbf16, #tpu.memory_space<vmem>> -> memref<1x128x2048xbf16, #tpu.memory_space<vmem>>
    %35 = tpu.memref_squeeze %34 : memref<1x128x2048xbf16, #tpu.memory_space<vmem>> -> memref<128x2048xbf16, #tpu.memory_space<vmem>>
    %36 = tpu.memref_slice %arg19[%c0_i32_26] : memref<8x!tpu.dma_semaphore, #tpu.memory_space<semaphore_mem>> -> memref<1x!tpu.dma_semaphore, #tpu.memory_space<semaphore_mem>>
    %37 = tpu.memref_squeeze %36 : memref<1x!tpu.dma_semaphore, #tpu.memory_space<semaphore_mem>> -> memref<!tpu.dma_semaphore, #tpu.memory_space<semaphore_mem>>
    tpu.wait_dma2 semaphore(%37 : memref<!tpu.dma_semaphore, #tpu.memory_space<semaphore_mem>>) src(%33 : memref<128x2048xbf16, #tpu.memory_space<any>>) dst(%35 : memref<128x2048xbf16, #tpu.memory_space<vmem>>)
    %c0 = arith.constant 0 : index
    %c0_31 = arith.constant 0 : index
    %c0_32 = arith.constant 0 : index
    %38 = vector.load %arg0[%c0, %c0_31, %c0_32] : memref<4x16x128xbf16, #tpu.memory_space<vmem>>, vector<1x16x128xbf16>
    %39 = vector.shape_cast %38 : vector<1x16x128xbf16> to vector<16x128xbf16>
    %c0_33 = arith.constant 0 : index
    %c0_34 = arith.constant 0 : index
    %c0_35 = arith.constant 0 : index
    %40 = vector.load %arg14[%c0_33, %c0_34, %c0_35] : memref<4x128x2048xbf16, #tpu.memory_space<vmem>>, vector<1x128x2048xbf16>
    %41 = vector.shape_cast %40 : vector<1x128x2048xbf16> to vector<128x2048xbf16>
    %cst = arith.constant dense<0.000000e+00> : vector<16x2048xf32>
    %42 = tpu.matmul %39, %41, %cst {dimension_numbers = #tpu.dot_dimension_numbers<[1], [0], [0], [1], [0, 0, 1, 1], [], []>} : vector<16x128xbf16>, vector<128x2048xbf16>, vector<16x2048xf32> -> vector<16x2048xf32>
    %43 = vector.extract_strided_slice %42 {offsets = [0, 0], sizes = [16, 256], strides = [1, 1]} : vector<16x2048xf32> to vector<16x256xf32>
    %44 = vector.extract_strided_slice %42 {offsets = [0, 256], sizes = [16, 256], strides = [1, 1]} : vector<16x2048xf32> to vector<16x256xf32>
    %45 = arith.maximumf %43, %44 : vector<16x256xf32>
    %46 = vector.extract_strided_slice %42 {offsets = [0, 512], sizes = [16, 256], strides = [1, 1]} : vector<16x2048xf32> to vector<16x256xf32>
    %47 = arith.maximumf %45, %46 : vector<16x256xf32>
    %48 = vector.extract_strided_slice %42 {offsets = [0, 768], sizes = [16, 256], strides = [1, 1]} : vector<16x2048xf32> to vector<16x256xf32>
    %49 = arith.maximumf %47, %48 : vector<16x256xf32>
    %50 = vector.extract_strided_slice %42 {offsets = [0, 1024], sizes = [16, 256], strides = [1, 1]} : vector<16x2048xf32> to vector<16x256xf32>
    %51 = arith.maximumf %49, %50 : vector<16x256xf32>
    %52 = vector.extract_strided_slice %42 {offsets = [0, 1280], sizes = [16, 256], strides = [1, 1]} : vector<16x2048xf32> to vector<16x256xf32>
    %53 = arith.maximumf %51, %52 : vector<16x256xf32>
    %54 = vector.extract_strided_slice %42 {offsets = [0, 1536], sizes = [16, 256], strides = [1, 1]} : vector<16x2048xf32> to vector<16x256xf32>
    %55 = arith.maximumf %53, %54 : vector<16x256xf32>
    %56 = vector.extract_strided_slice %42 {offsets = [0, 1792], sizes = [16, 256], strides = [1, 1]} : vector<16x2048xf32> to vector<16x256xf32>
    %57 = arith.maximumf %55, %56 : vector<16x256xf32>
    %c1_i32_36 = arith.constant 1 : i32
    %c1_i32_37 = arith.constant 1 : i32
    %c1_i32_38 = arith.constant 1 : i32
    %c0_i32_39 = arith.constant 0 : i32
    %c0_i32_40 = arith.constant 0 : i32
    %58 = tpu.memref_slice %arg1[%c1_i32_36, %c0_i32_39, %c0_i32_40] : memref<4x128x2048xbf16, #tpu.memory_space<any>> -> memref<1x128x2048xbf16, #tpu.memory_space<any>>
    %59 = tpu.memref_squeeze %58 : memref<1x128x2048xbf16, #tpu.memory_space<any>> -> memref<128x2048xbf16, #tpu.memory_space<any>>
    %c0_i32_41 = arith.constant 0 : i32
    %c0_i32_42 = arith.constant 0 : i32
    %60 = tpu.memref_slice %arg14[%c1_i32_37, %c0_i32_41, %c0_i32_42] : memref<4x128x2048xbf16, #tpu.memory_space<vmem>> -> memref<1x128x2048xbf16, #tpu.memory_space<vmem>>
    %61 = tpu.memref_squeeze %60 : memref<1x128x2048xbf16, #tpu.memory_space<vmem>> -> memref<128x2048xbf16, #tpu.memory_space<vmem>>
    %62 = tpu.memref_slice %arg19[%c1_i32_38] : memref<8x!tpu.dma_semaphore, #tpu.memory_space<semaphore_mem>> -> memref<1x!tpu.dma_semaphore, #tpu.memory_space<semaphore_mem>>
    %63 = tpu.memref_squeeze %62 : memref<1x!tpu.dma_semaphore, #tpu.memory_space<semaphore_mem>> -> memref<!tpu.dma_semaphore, #tpu.memory_space<semaphore_mem>>
    tpu.wait_dma2 semaphore(%63 : memref<!tpu.dma_semaphore, #tpu.memory_space<semaphore_mem>>) src(%59 : memref<128x2048xbf16, #tpu.memory_space<any>>) dst(%61 : memref<128x2048xbf16, #tpu.memory_space<vmem>>)
    %c1 = arith.constant 1 : index
    %c0_43 = arith.constant 0 : index
    %c0_44 = arith.constant 0 : index
    %64 = vector.load %arg0[%c1, %c0_43, %c0_44] : memref<4x16x128xbf16, #tpu.memory_space<vmem>>, vector<1x16x128xbf16>
    %65 = vector.shape_cast %64 : vector<1x16x128xbf16> to vector<16x128xbf16>
    %c1_45 = arith.constant 1 : index
    %c0_46 = arith.constant 0 : index
    %c0_47 = arith.constant 0 : index
    %66 = vector.load %arg14[%c1_45, %c0_46, %c0_47] : memref<4x128x2048xbf16, #tpu.memory_space<vmem>>, vector<1x128x2048xbf16>
    %67 = vector.shape_cast %66 : vector<1x128x2048xbf16> to vector<128x2048xbf16>
    %cst_48 = arith.constant dense<0.000000e+00> : vector<16x2048xf32>
    %68 = tpu.matmul %65, %67, %cst_48 {dimension_numbers = #tpu.dot_dimension_numbers<[1], [0], [0], [1], [0, 0, 1, 1], [], []>} : vector<16x128xbf16>, vector<128x2048xbf16>, vector<16x2048xf32> -> vector<16x2048xf32>
    %69 = vector.extract_strided_slice %68 {offsets = [0, 0], sizes = [16, 256], strides = [1, 1]} : vector<16x2048xf32> to vector<16x256xf32>
    %70 = vector.extract_strided_slice %68 {offsets = [0, 256], sizes = [16, 256], strides = [1, 1]} : vector<16x2048xf32> to vector<16x256xf32>
    %71 = arith.maximumf %69, %70 : vector<16x256xf32>
    %72 = vector.extract_strided_slice %68 {offsets = [0, 512], sizes = [16, 256], strides = [1, 1]} : vector<16x2048xf32> to vector<16x256xf32>
    %73 = arith.maximumf %71, %72 : vector<16x256xf32>
    %74 = vector.extract_strided_slice %68 {offsets = [0, 768], sizes = [16, 256], strides = [1, 1]} : vector<16x2048xf32> to vector<16x256xf32>
    %75 = arith.maximumf %73, %74 : vector<16x256xf32>
    %76 = vector.extract_strided_slice %68 {offsets = [0, 1024], sizes = [16, 256], strides = [1, 1]} : vector<16x2048xf32> to vector<16x256xf32>
    %77 = arith.maximumf %75, %76 : vector<16x256xf32>
    %78 = vector.extract_strided_slice %68 {offsets = [0, 1280], sizes = [16, 256], strides = [1, 1]} : vector<16x2048xf32> to vector<16x256xf32>
    %79 = arith.maximumf %77, %78 : vector<16x256xf32>
    %80 = vector.extract_strided_slice %68 {offsets = [0, 1536], sizes = [16, 256], strides = [1, 1]} : vector<16x2048xf32> to vector<16x256xf32>
    %81 = arith.maximumf %79, %80 : vector<16x256xf32>
    %82 = vector.extract_strided_slice %68 {offsets = [0, 1792], sizes = [16, 256], strides = [1, 1]} : vector<16x2048xf32> to vector<16x256xf32>
    %83 = arith.maximumf %81, %82 : vector<16x256xf32>
    %c2_i32_49 = arith.constant 2 : i32
    %c2_i32_50 = arith.constant 2 : i32
    %c2_i32_51 = arith.constant 2 : i32
    %c0_i32_52 = arith.constant 0 : i32
    %c0_i32_53 = arith.constant 0 : i32
    %84 = tpu.memref_slice %arg1[%c2_i32_49, %c0_i32_52, %c0_i32_53] : memref<4x128x2048xbf16, #tpu.memory_space<any>> -> memref<1x128x2048xbf16, #tpu.memory_space<any>>
    %85 = tpu.memref_squeeze %84 : memref<1x128x2048xbf16, #tpu.memory_space<any>> -> memref<128x2048xbf16, #tpu.memory_space<any>>
    %c0_i32_54 = arith.constant 0 : i32
    %c0_i32_55 = arith.constant 0 : i32
    %86 = tpu.memref_slice %arg14[%c2_i32_50, %c0_i32_54, %c0_i32_55] : memref<4x128x2048xbf16, #tpu.memory_space<vmem>> -> memref<1x128x2048xbf16, #tpu.memory_space<vmem>>
    %87 = tpu.memref_squeeze %86 : memref<1x128x2048xbf16, #tpu.memory_space<vmem>> -> memref<128x2048xbf16, #tpu.memory_space<vmem>>
    %88 = tpu.memref_slice %arg19[%c2_i32_51] : memref<8x!tpu.dma_semaphore, #tpu.memory_space<semaphore_mem>> -> memref<1x!tpu.dma_semaphore, #tpu.memory_space<semaphore_mem>>
    %89 = tpu.memref_squeeze %88 : memref<1x!tpu.dma_semaphore, #tpu.memory_space<semaphore_mem>> -> memref<!tpu.dma_semaphore, #tpu.memory_space<semaphore_mem>>
    tpu.wait_dma2 semaphore(%89 : memref<!tpu.dma_semaphore, #tpu.memory_space<semaphore_mem>>) src(%85 : memref<128x2048xbf16, #tpu.memory_space<any>>) dst(%87 : memref<128x2048xbf16, #tpu.memory_space<vmem>>)
    %c2 = arith.constant 2 : index
    %c0_56 = arith.constant 0 : index
    %c0_57 = arith.constant 0 : index
    %90 = vector.load %arg0[%c2, %c0_56, %c0_57] : memref<4x16x128xbf16, #tpu.memory_space<vmem>>, vector<1x16x128xbf16>
    %91 = vector.shape_cast %90 : vector<1x16x128xbf16> to vector<16x128xbf16>
    %c2_58 = arith.constant 2 : index
    %c0_59 = arith.constant 0 : index
    %c0_60 = arith.constant 0 : index
    %92 = vector.load %arg14[%c2_58, %c0_59, %c0_60] : memref<4x128x2048xbf16, #tpu.memory_space<vmem>>, vector<1x128x2048xbf16>
    %93 = vector.shape_cast %92 : vector<1x128x2048xbf16> to vector<128x2048xbf16>
    %cst_61 = arith.constant dense<0.000000e+00> : vector<16x2048xf32>
    %94 = tpu.matmul %91, %93, %cst_61 {dimension_numbers = #tpu.dot_dimension_numbers<[1], [0], [0], [1], [0, 0, 1, 1], [], []>} : vector<16x128xbf16>, vector<128x2048xbf16>, vector<16x2048xf32> -> vector<16x2048xf32>
    %95 = vector.extract_strided_slice %94 {offsets = [0, 0], sizes = [16, 256], strides = [1, 1]} : vector<16x2048xf32> to vector<16x256xf32>
    %96 = vector.extract_strided_slice %94 {offsets = [0, 256], sizes = [16, 256], strides = [1, 1]} : vector<16x2048xf32> to vector<16x256xf32>
    %97 = arith.maximumf %95, %96 : vector<16x256xf32>
    %98 = vector.extract_strided_slice %94 {offsets = [0, 512], sizes = [16, 256], strides = [1, 1]} : vector<16x2048xf32> to vector<16x256xf32>
    %99 = arith.maximumf %97, %98 : vector<16x256xf32>
    %100 = vector.extract_strided_slice %94 {offsets = [0, 768], sizes = [16, 256], strides = [1, 1]} : vector<16x2048xf32> to vector<16x256xf32>
    %101 = arith.maximumf %99, %100 : vector<16x256xf32>
    %102 = vector.extract_strided_slice %94 {offsets = [0, 1024], sizes = [16, 256], strides = [1, 1]} : vector<16x2048xf32> to vector<16x256xf32>
    %103 = arith.maximumf %101, %102 : vector<16x256xf32>
    %104 = vector.extract_strided_slice %94 {offsets = [0, 1280], sizes = [16, 256], strides = [1, 1]} : vector<16x2048xf32> to vector<16x256xf32>
    %105 = arith.maximumf %103, %104 : vector<16x256xf32>
    %106 = vector.extract_strided_slice %94 {offsets = [0, 1536], sizes = [16, 256], strides = [1, 1]} : vector<16x2048xf32> to vector<16x256xf32>
    %107 = arith.maximumf %105, %106 : vector<16x256xf32>
    %108 = vector.extract_strided_slice %94 {offsets = [0, 1792], sizes = [16, 256], strides = [1, 1]} : vector<16x2048xf32> to vector<16x256xf32>
    %109 = arith.maximumf %107, %108 : vector<16x256xf32>
    %c3_i32_62 = arith.constant 3 : i32
    %c3_i32_63 = arith.constant 3 : i32
    %c3_i32_64 = arith.constant 3 : i32
    %c0_i32_65 = arith.constant 0 : i32
    %c0_i32_66 = arith.constant 0 : i32
    %110 = tpu.memref_slice %arg1[%c3_i32_62, %c0_i32_65, %c0_i32_66] : memref<4x128x2048xbf16, #tpu.memory_space<any>> -> memref<1x128x2048xbf16, #tpu.memory_space<any>>
    %111 = tpu.memref_squeeze %110 : memref<1x128x2048xbf16, #tpu.memory_space<any>> -> memref<128x2048xbf16, #tpu.memory_space<any>>
    %c0_i32_67 = arith.constant 0 : i32
    %c0_i32_68 = arith.constant 0 : i32
    %112 = tpu.memref_slice %arg14[%c3_i32_63, %c0_i32_67, %c0_i32_68] : memref<4x128x2048xbf16, #tpu.memory_space<vmem>> -> memref<1x128x2048xbf16, #tpu.memory_space<vmem>>
    %113 = tpu.memref_squeeze %112 : memref<1x128x2048xbf16, #tpu.memory_space<vmem>> -> memref<128x2048xbf16, #tpu.memory_space<vmem>>
    %114 = tpu.memref_slice %arg19[%c3_i32_64] : memref<8x!tpu.dma_semaphore, #tpu.memory_space<semaphore_mem>> -> memref<1x!tpu.dma_semaphore, #tpu.memory_space<semaphore_mem>>
    %115 = tpu.memref_squeeze %114 : memref<1x!tpu.dma_semaphore, #tpu.memory_space<semaphore_mem>> -> memref<!tpu.dma_semaphore, #tpu.memory_space<semaphore_mem>>
    tpu.wait_dma2 semaphore(%115 : memref<!tpu.dma_semaphore, #tpu.memory_space<semaphore_mem>>) src(%111 : memref<128x2048xbf16, #tpu.memory_space<any>>) dst(%113 : memref<128x2048xbf16, #tpu.memory_space<vmem>>)
    %c3 = arith.constant 3 : index
    %c0_69 = arith.constant 0 : index
    %c0_70 = arith.constant 0 : index
    %116 = vector.load %arg0[%c3, %c0_69, %c0_70] : memref<4x16x128xbf16, #tpu.memory_space<vmem>>, vector<1x16x128xbf16>
    %117 = vector.shape_cast %116 : vector<1x16x128xbf16> to vector<16x128xbf16>
    %c3_71 = arith.constant 3 : index
    %c0_72 = arith.constant 0 : index
    %c0_73 = arith.constant 0 : index
    %118 = vector.load %arg14[%c3_71, %c0_72, %c0_73] : memref<4x128x2048xbf16, #tpu.memory_space<vmem>>, vector<1x128x2048xbf16>
    %119 = vector.shape_cast %118 : vector<1x128x2048xbf16> to vector<128x2048xbf16>
    %cst_74 = arith.constant dense<0.000000e+00> : vector<16x2048xf32>
    %120 = tpu.matmul %117, %119, %cst_74 {dimension_numbers = #tpu.dot_dimension_numbers<[1], [0], [0], [1], [0, 0, 1, 1], [], []>} : vector<16x128xbf16>, vector<128x2048xbf16>, vector<16x2048xf32> -> vector<16x2048xf32>
    %121 = vector.extract_strided_slice %120 {offsets = [0, 0], sizes = [16, 256], strides = [1, 1]} : vector<16x2048xf32> to vector<16x256xf32>
    %122 = vector.extract_strided_slice %120 {offsets = [0, 256], sizes = [16, 256], strides = [1, 1]} : vector<16x2048xf32> to vector<16x256xf32>
    %123 = arith.maximumf %121, %122 : vector<16x256xf32>
    %124 = vector.extract_strided_slice %120 {offsets = [0, 512], sizes = [16, 256], strides = [1, 1]} : vector<16x2048xf32> to vector<16x256xf32>
    %125 = arith.maximumf %123, %124 : vector<16x256xf32>
    %126 = vector.extract_strided_slice %120 {offsets = [0, 768], sizes = [16, 256], strides = [1, 1]} : vector<16x2048xf32> to vector<16x256xf32>
    %127 = arith.maximumf %125, %126 : vector<16x256xf32>
    %128 = vector.extract_strided_slice %120 {offsets = [0, 1024], sizes = [16, 256], strides = [1, 1]} : vector<16x2048xf32> to vector<16x256xf32>
    %129 = arith.maximumf %127, %128 : vector<16x256xf32>
    %130 = vector.extract_strided_slice %120 {offsets = [0, 1280], sizes = [16, 256], strides = [1, 1]} : vector<16x2048xf32> to vector<16x256xf32>
    %131 = arith.maximumf %129, %130 : vector<16x256xf32>
    %132 = vector.extract_strided_slice %120 {offsets = [0, 1536], sizes = [16, 256], strides = [1, 1]} : vector<16x2048xf32> to vector<16x256xf32>
    %133 = arith.maximumf %131, %132 : vector<16x256xf32>
    %134 = vector.extract_strided_slice %120 {offsets = [0, 1792], sizes = [16, 256], strides = [1, 1]} : vector<16x2048xf32> to vector<16x256xf32>
    %135 = arith.maximumf %133, %134 : vector<16x256xf32>
    %136 = tpu.concatenate %57, %83, %109, %135 in 1 : vector<16x256xf32>, vector<16x256xf32>, vector<16x256xf32>, vector<16x256xf32> -> vector<16x1024xf32>
    %c0_75 = arith.constant 0 : index
    %c0_76 = arith.constant 0 : index
    %137 = vector.load %arg6[%c0_75, %c0_76] : memref<1x1024xf32, #tpu.memory_space<vmem>>, vector<1x1024xf32>
    %138 = vector.broadcast %137 : vector<1x1024xf32> to vector<16x1024xf32>
    %139 = arith.addf %136, %138 : vector<16x1024xf32>
    %cst_77 = arith.constant 0.000000e+00 : f32
    %140 = vector.broadcast %cst_77 : f32 to vector<16x1024xf32>
    %141 = arith.maximumf %139, %140 : vector<16x1024xf32>
    %c4_i32_78 = arith.constant 4 : i32
    %142 = tpu.memref_slice %arg19[%c4_i32_78] : memref<8x!tpu.dma_semaphore, #tpu.memory_space<semaphore_mem>> -> memref<1x!tpu.dma_semaphore, #tpu.memory_space<semaphore_mem>>
    %143 = tpu.memref_squeeze %142 : memref<1x!tpu.dma_semaphore, #tpu.memory_space<semaphore_mem>> -> memref<!tpu.dma_semaphore, #tpu.memory_space<semaphore_mem>>
    tpu.wait_dma2 semaphore(%143 : memref<!tpu.dma_semaphore, #tpu.memory_space<semaphore_mem>>) src(%arg2 : memref<1024x2048xbf16, #tpu.memory_space<any>>) dst(%arg15 : memref<1024x2048xbf16, #tpu.memory_space<vmem>>)
    %144 = arith.truncf %141 : vector<16x1024xf32> to vector<16x1024xbf16>
    %c0_79 = arith.constant 0 : index
    %c0_80 = arith.constant 0 : index
    %145 = vector.load %arg15[%c0_79, %c0_80] : memref<1024x2048xbf16, #tpu.memory_space<vmem>>, vector<1024x256xbf16>
    %cst_81 = arith.constant dense<0.000000e+00> : vector<16x256xf32>
    %146 = tpu.matmul %144, %145, %cst_81 {dimension_numbers = #tpu.dot_dimension_numbers<[1], [0], [0], [1], [0, 0, 1, 1], [], []>} : vector<16x1024xbf16>, vector<1024x256xbf16>, vector<16x256xf32> -> vector<16x256xf32>
    %c0_82 = arith.constant 0 : index
    %c256 = arith.constant 256 : index
    %147 = vector.load %arg15[%c0_82, %c256] : memref<1024x2048xbf16, #tpu.memory_space<vmem>>, vector<1024x256xbf16>
    %cst_83 = arith.constant dense<0.000000e+00> : vector<16x256xf32>
    %148 = tpu.matmul %144, %147, %cst_83 {dimension_numbers = #tpu.dot_dimension_numbers<[1], [0], [0], [1], [0, 0, 1, 1], [], []>} : vector<16x1024xbf16>, vector<1024x256xbf16>, vector<16x256xf32> -> vector<16x256xf32>
    %149 = arith.maximumf %146, %148 : vector<16x256xf32>
    %c0_84 = arith.constant 0 : index
    %c512 = arith.constant 512 : index
    %150 = vector.load %arg15[%c0_84, %c512] : memref<1024x2048xbf16, #tpu.memory_space<vmem>>, vector<1024x256xbf16>
    %cst_85 = arith.constant dense<0.000000e+00> : vector<16x256xf32>
    %151 = tpu.matmul %144, %150, %cst_85 {dimension_numbers = #tpu.dot_dimension_numbers<[1], [0], [0], [1], [0, 0, 1, 1], [], []>} : vector<16x1024xbf16>, vector<1024x256xbf16>, vector<16x256xf32> -> vector<16x256xf32>
    %152 = arith.maximumf %149, %151 : vector<16x256xf32>
    %c0_86 = arith.constant 0 : index
    %c768 = arith.constant 768 : index
    %153 = vector.load %arg15[%c0_86, %c768] : memref<1024x2048xbf16, #tpu.memory_space<vmem>>, vector<1024x256xbf16>
    %cst_87 = arith.constant dense<0.000000e+00> : vector<16x256xf32>
    %154 = tpu.matmul %144, %153, %cst_87 {dimension_numbers = #tpu.dot_dimension_numbers<[1], [0], [0], [1], [0, 0, 1, 1], [], []>} : vector<16x1024xbf16>, vector<1024x256xbf16>, vector<16x256xf32> -> vector<16x256xf32>
    %155 = arith.maximumf %152, %154 : vector<16x256xf32>
    %c0_88 = arith.constant 0 : index
    %c1024 = arith.constant 1024 : index
    %156 = vector.load %arg15[%c0_88, %c1024] : memref<1024x2048xbf16, #tpu.memory_space<vmem>>, vector<1024x256xbf16>
    %cst_89 = arith.constant dense<0.000000e+00> : vector<16x256xf32>
    %157 = tpu.matmul %144, %156, %cst_89 {dimension_numbers = #tpu.dot_dimension_numbers<[1], [0], [0], [1], [0, 0, 1, 1], [], []>} : vector<16x1024xbf16>, vector<1024x256xbf16>, vector<16x256xf32> -> vector<16x256xf32>
    %158 = arith.maximumf %155, %157 : vector<16x256xf32>
    %c0_90 = arith.constant 0 : index
    %c1280 = arith.constant 1280 : index
    %159 = vector.load %arg15[%c0_90, %c1280] : memref<1024x2048xbf16, #tpu.memory_space<vmem>>, vector<1024x256xbf16>
    %cst_91 = arith.constant dense<0.000000e+00> : vector<16x256xf32>
    %160 = tpu.matmul %144, %159, %cst_91 {dimension_numbers = #tpu.dot_dimension_numbers<[1], [0], [0], [1], [0, 0, 1, 1], [], []>} : vector<16x1024xbf16>, vector<1024x256xbf16>, vector<16x256xf32> -> vector<16x256xf32>
    %161 = arith.maximumf %158, %160 : vector<16x256xf32>
    %c0_92 = arith.constant 0 : index
    %c1536 = arith.constant 1536 : index
    %162 = vector.load %arg15[%c0_92, %c1536] : memref<1024x2048xbf16, #tpu.memory_space<vmem>>, vector<1024x256xbf16>
    %cst_93 = arith.constant dense<0.000000e+00> : vector<16x256xf32>
    %163 = tpu.matmul %144, %162, %cst_93 {dimension_numbers = #tpu.dot_dimension_numbers<[1], [0], [0], [1], [0, 0, 1, 1], [], []>} : vector<16x1024xbf16>, vector<1024x256xbf16>, vector<16x256xf32> -> vector<16x256xf32>
    %164 = arith.maximumf %161, %163 : vector<16x256xf32>
    %c0_94 = arith.constant 0 : index
    %c1792 = arith.constant 1792 : index
    %165 = vector.load %arg15[%c0_94, %c1792] : memref<1024x2048xbf16, #tpu.memory_space<vmem>>, vector<1024x256xbf16>
    %cst_95 = arith.constant dense<0.000000e+00> : vector<16x256xf32>
    %166 = tpu.matmul %144, %165, %cst_95 {dimension_numbers = #tpu.dot_dimension_numbers<[1], [0], [0], [1], [0, 0, 1, 1], [], []>} : vector<16x1024xbf16>, vector<1024x256xbf16>, vector<16x256xf32> -> vector<16x256xf32>
    %167 = arith.maximumf %164, %166 : vector<16x256xf32>
    %c0_96 = arith.constant 0 : index
    %c0_97 = arith.constant 0 : index
    %168 = vector.load %arg7[%c0_96, %c0_97] : memref<1x256xf32, #tpu.memory_space<vmem>>, vector<1x256xf32>
    %169 = vector.broadcast %168 : vector<1x256xf32> to vector<16x256xf32>
    %170 = arith.addf %167, %169 : vector<16x256xf32>
    %cst_98 = arith.constant 0.000000e+00 : f32
    %171 = vector.broadcast %cst_98 : f32 to vector<16x256xf32>
    %172 = arith.maximumf %170, %171 : vector<16x256xf32>
    %c5_i32_99 = arith.constant 5 : i32
    %173 = tpu.memref_slice %arg19[%c5_i32_99] : memref<8x!tpu.dma_semaphore, #tpu.memory_space<semaphore_mem>> -> memref<1x!tpu.dma_semaphore, #tpu.memory_space<semaphore_mem>>
    %174 = tpu.memref_squeeze %173 : memref<1x!tpu.dma_semaphore, #tpu.memory_space<semaphore_mem>> -> memref<!tpu.dma_semaphore, #tpu.memory_space<semaphore_mem>>
    tpu.wait_dma2 semaphore(%174 : memref<!tpu.dma_semaphore, #tpu.memory_space<semaphore_mem>>) src(%arg3 : memref<256x4096xbf16, #tpu.memory_space<any>>) dst(%arg16 : memref<256x4096xbf16, #tpu.memory_space<vmem>>)
    %175 = arith.truncf %172 : vector<16x256xf32> to vector<16x256xbf16>
    %c0_100 = arith.constant 0 : index
    %c0_101 = arith.constant 0 : index
    %176 = vector.load %arg16[%c0_100, %c0_101] : memref<256x4096xbf16, #tpu.memory_space<vmem>>, vector<256x512xbf16>
    %cst_102 = arith.constant dense<0.000000e+00> : vector<16x512xf32>
    %177 = tpu.matmul %175, %176, %cst_102 {dimension_numbers = #tpu.dot_dimension_numbers<[1], [0], [0], [1], [0, 0, 1, 1], [], []>} : vector<16x256xbf16>, vector<256x512xbf16>, vector<16x512xf32> -> vector<16x512xf32>
    %c0_103 = arith.constant 0 : index
    %c512_104 = arith.constant 512 : index
    %178 = vector.load %arg16[%c0_103, %c512_104] : memref<256x4096xbf16, #tpu.memory_space<vmem>>, vector<256x512xbf16>
    %cst_105 = arith.constant dense<0.000000e+00> : vector<16x512xf32>
    %179 = tpu.matmul %175, %178, %cst_105 {dimension_numbers = #tpu.dot_dimension_numbers<[1], [0], [0], [1], [0, 0, 1, 1], [], []>} : vector<16x256xbf16>, vector<256x512xbf16>, vector<16x512xf32> -> vector<16x512xf32>
    %180 = arith.maximumf %177, %179 : vector<16x512xf32>
    %c0_106 = arith.constant 0 : index
    %c1024_107 = arith.constant 1024 : index
    %181 = vector.load %arg16[%c0_106, %c1024_107] : memref<256x4096xbf16, #tpu.memory_space<vmem>>, vector<256x512xbf16>
    %cst_108 = arith.constant dense<0.000000e+00> : vector<16x512xf32>
    %182 = tpu.matmul %175, %181, %cst_108 {dimension_numbers = #tpu.dot_dimension_numbers<[1], [0], [0], [1], [0, 0, 1, 1], [], []>} : vector<16x256xbf16>, vector<256x512xbf16>, vector<16x512xf32> -> vector<16x512xf32>
    %183 = arith.maximumf %180, %182 : vector<16x512xf32>
    %c0_109 = arith.constant 0 : index
    %c1536_110 = arith.constant 1536 : index
    %184 = vector.load %arg16[%c0_109, %c1536_110] : memref<256x4096xbf16, #tpu.memory_space<vmem>>, vector<256x512xbf16>
    %cst_111 = arith.constant dense<0.000000e+00> : vector<16x512xf32>
    %185 = tpu.matmul %175, %184, %cst_111 {dimension_numbers = #tpu.dot_dimension_numbers<[1], [0], [0], [1], [0, 0, 1, 1], [], []>} : vector<16x256xbf16>, vector<256x512xbf16>, vector<16x512xf32> -> vector<16x512xf32>
    %186 = arith.maximumf %183, %185 : vector<16x512xf32>
    %c0_112 = arith.constant 0 : index
    %c2048 = arith.constant 2048 : index
    %187 = vector.load %arg16[%c0_112, %c2048] : memref<256x4096xbf16, #tpu.memory_space<vmem>>, vector<256x512xbf16>
    %cst_113 = arith.constant dense<0.000000e+00> : vector<16x512xf32>
    %188 = tpu.matmul %175, %187, %cst_113 {dimension_numbers = #tpu.dot_dimension_numbers<[1], [0], [0], [1], [0, 0, 1, 1], [], []>} : vector<16x256xbf16>, vector<256x512xbf16>, vector<16x512xf32> -> vector<16x512xf32>
    %189 = arith.maximumf %186, %188 : vector<16x512xf32>
    %c0_114 = arith.constant 0 : index
    %c2560 = arith.constant 2560 : index
    %190 = vector.load %arg16[%c0_114, %c2560] : memref<256x4096xbf16, #tpu.memory_space<vmem>>, vector<256x512xbf16>
    %cst_115 = arith.constant dense<0.000000e+00> : vector<16x512xf32>
    %191 = tpu.matmul %175, %190, %cst_115 {dimension_numbers = #tpu.dot_dimension_numbers<[1], [0], [0], [1], [0, 0, 1, 1], [], []>} : vector<16x256xbf16>, vector<256x512xbf16>, vector<16x512xf32> -> vector<16x512xf32>
    %192 = arith.maximumf %189, %191 : vector<16x512xf32>
    %c0_116 = arith.constant 0 : index
    %c3072 = arith.constant 3072 : index
    %193 = vector.load %arg16[%c0_116, %c3072] : memref<256x4096xbf16, #tpu.memory_space<vmem>>, vector<256x512xbf16>
    %cst_117 = arith.constant dense<0.000000e+00> : vector<16x512xf32>
    %194 = tpu.matmul %175, %193, %cst_117 {dimension_numbers = #tpu.dot_dimension_numbers<[1], [0], [0], [1], [0, 0, 1, 1], [], []>} : vector<16x256xbf16>, vector<256x512xbf16>, vector<16x512xf32> -> vector<16x512xf32>
    %195 = arith.maximumf %192, %194 : vector<16x512xf32>
    %c0_118 = arith.constant 0 : index
    %c3584 = arith.constant 3584 : index
    %196 = vector.load %arg16[%c0_118, %c3584] : memref<256x4096xbf16, #tpu.memory_space<vmem>>, vector<256x512xbf16>
    %cst_119 = arith.constant dense<0.000000e+00> : vector<16x512xf32>
    %197 = tpu.matmul %175, %196, %cst_119 {dimension_numbers = #tpu.dot_dimension_numbers<[1], [0], [0], [1], [0, 0, 1, 1], [], []>} : vector<16x256xbf16>, vector<256x512xbf16>, vector<16x512xf32> -> vector<16x512xf32>
    %198 = arith.maximumf %195, %197 : vector<16x512xf32>
    %c0_120 = arith.constant 0 : index
    %c0_121 = arith.constant 0 : index
    %199 = vector.load %arg8[%c0_120, %c0_121] : memref<1x512xf32, #tpu.memory_space<vmem>>, vector<1x512xf32>
    %200 = vector.broadcast %199 : vector<1x512xf32> to vector<16x512xf32>
    %201 = arith.addf %198, %200 : vector<16x512xf32>
    %cst_122 = arith.constant 0.000000e+00 : f32
    %202 = vector.broadcast %cst_122 : f32 to vector<16x512xf32>
    %203 = arith.maximumf %201, %202 : vector<16x512xf32>
    %c0_123 = arith.constant 0 : index
    %c0_124 = arith.constant 0 : index
    %204 = vector.load %arg9[%c0_123, %c0_124] : memref<1x512xf32, #tpu.memory_space<vmem>>, vector<1x512xf32>
    %205 = vector.broadcast %204 : vector<1x512xf32> to vector<16x512xf32>
    %206 = arith.mulf %203, %205 : vector<16x512xf32>
    %c0_125 = arith.constant 0 : index
    %c0_126 = arith.constant 0 : index
    %207 = vector.load %arg10[%c0_125, %c0_126] : memref<1x512xf32, #tpu.memory_space<vmem>>, vector<1x512xf32>
    %208 = vector.broadcast %207 : vector<1x512xf32> to vector<16x512xf32>
    %209 = arith.addf %206, %208 : vector<16x512xf32>
    %c6_i32_127 = arith.constant 6 : i32
    %210 = tpu.memref_slice %arg19[%c6_i32_127] : memref<8x!tpu.dma_semaphore, #tpu.memory_space<semaphore_mem>> -> memref<1x!tpu.dma_semaphore, #tpu.memory_space<semaphore_mem>>
    %211 = tpu.memref_squeeze %210 : memref<1x!tpu.dma_semaphore, #tpu.memory_space<semaphore_mem>> -> memref<!tpu.dma_semaphore, #tpu.memory_space<semaphore_mem>>
    tpu.wait_dma2 semaphore(%211 : memref<!tpu.dma_semaphore, #tpu.memory_space<semaphore_mem>>) src(%arg4 : memref<512x128xbf16, #tpu.memory_space<any>>) dst(%arg17 : memref<512x128xbf16, #tpu.memory_space<vmem>>)
    %212 = arith.truncf %209 : vector<16x512xf32> to vector<16x512xbf16>
    %c0_128 = arith.constant 0 : index
    %c0_129 = arith.constant 0 : index
    %213 = vector.load %arg17[%c0_128, %c0_129] : memref<512x128xbf16, #tpu.memory_space<vmem>>, vector<512x128xbf16>
    %cst_130 = arith.constant dense<0.000000e+00> : vector<16x128xf32>
    %214 = tpu.matmul %212, %213, %cst_130 {dimension_numbers = #tpu.dot_dimension_numbers<[1], [0], [0], [1], [0, 0, 1, 1], [], []>} : vector<16x512xbf16>, vector<512x128xbf16>, vector<16x128xf32> -> vector<16x128xf32>
    %c0_131 = arith.constant 0 : index
    %c0_132 = arith.constant 0 : index
    %215 = vector.load %arg11[%c0_131, %c0_132] : memref<1x128xf32, #tpu.memory_space<vmem>>, vector<1x128xf32>
    %216 = vector.broadcast %215 : vector<1x128xf32> to vector<16x128xf32>
    %217 = arith.addf %214, %216 : vector<16x128xf32>
    %cst_133 = arith.constant 0.000000e+00 : f32
    %218 = vector.broadcast %cst_133 : f32 to vector<16x128xf32>
    %219 = arith.maximumf %217, %218 : vector<16x128xf32>
    %c7_i32_134 = arith.constant 7 : i32
    %220 = tpu.memref_slice %arg19[%c7_i32_134] : memref<8x!tpu.dma_semaphore, #tpu.memory_space<semaphore_mem>> -> memref<1x!tpu.dma_semaphore, #tpu.memory_space<semaphore_mem>>
    %221 = tpu.memref_squeeze %220 : memref<1x!tpu.dma_semaphore, #tpu.memory_space<semaphore_mem>> -> memref<!tpu.dma_semaphore, #tpu.memory_space<semaphore_mem>>
    tpu.wait_dma2 semaphore(%221 : memref<!tpu.dma_semaphore, #tpu.memory_space<semaphore_mem>>) src(%arg5 : memref<128x128xbf16, #tpu.memory_space<any>>) dst(%arg18 : memref<128x128xbf16, #tpu.memory_space<vmem>>)
    %222 = arith.truncf %219 : vector<16x128xf32> to vector<16x128xbf16>
    %c0_135 = arith.constant 0 : index
    %c0_136 = arith.constant 0 : index
    %223 = vector.load %arg18[%c0_135, %c0_136] : memref<128x128xbf16, #tpu.memory_space<vmem>>, vector<128x128xbf16>
    %cst_137 = arith.constant dense<0.000000e+00> : vector<16x128xf32>
    %224 = tpu.matmul %222, %223, %cst_137 {dimension_numbers = #tpu.dot_dimension_numbers<[1], [0], [0], [1], [0, 0, 1, 1], [], []>} : vector<16x128xbf16>, vector<128x128xbf16>, vector<16x128xf32> -> vector<16x128xf32>
    %c0_138 = arith.constant 0 : index
    %c0_139 = arith.constant 0 : index
    %225 = vector.load %arg12[%c0_138, %c0_139] : memref<1x128xf32, #tpu.memory_space<vmem>>, vector<1x128xf32>
    %226 = vector.broadcast %225 : vector<1x128xf32> to vector<16x128xf32>
    %227 = arith.addf %224, %226 : vector<16x128xf32>
    %c0_140 = arith.constant 0 : index
    %c0_141 = arith.constant 0 : index
    %228 = vector.load %arg13[%c0_140, %c0_141] : memref<16x128xf32, #tpu.memory_space<vmem>>, vector<16x128xf32>
    tpu.vector_store %arg13[%c0_140, %c0_141], %227 {strides = array<i32>} : memref<16x128xf32, #tpu.memory_space<vmem>>, vector<16x128xf32>,
    return
  }
}

</mosaic_0001>

<bundles_post_ra>
// kernel: net4_v2_forward.1
= control target key start
LH: loop header
LB: loop body
LE: loop exit
PB: predicated region body
PF: predicated region fallthrough
CT: control target
= control target key end

     0   :  { %18 = vsyncpa [#allocation9], 0  ;;  %s8035_s0 = inlined_call_operand.vmem [shape: bf16[4,16,128], index: 0, kind: input, shape index: {}]   ;;  %s8036_s1 = inlined_call_operand.hbm [shape: bf16[4,128,2048], index: 1, kind: input, shape index: {}]   ;;  %s8037_s2 = inlined_call_operand.hbm [shape: bf16[1024,2048], index: 2, kind: input, shape index: {}]   ;;  %s8038_s3 = inlined_call_operand.hbm [shape: bf16[256,4096], index: 3, kind: input, shape index: {}]   ;;  %s8039_s4 = inlined_call_operand.hbm [shape: bf16[512,128], index: 4, kind: input, shape index: {}]   ;;  %s8040_s5 = inlined_call_operand.hbm [shape: bf16[128,128], index: 5, kind: input, shape index: {}]   ;;  %s8041_s6 = inlined_call_operand.hbm [shape: f32[1,1024], index: 6, kind: input, shape index: {}]   ;;  %s8042_s7 = inlined_call_operand.hbm [shape: f32[1,256], index: 7, kind: input, shape index: {}]   ;;  %s8043_s8 = inlined_call_operand.hbm [shape: f32[1,512], index: 8, kind: input, shape index: {}]   ;;  %s8044_s9 = inlined_call_operand.hbm [shape: f32[1,512], index: 9, kind: input, shape index: {}]   ;;  %s8045_s10 = inlined_call_operand.hbm [shape: f32[1,512], index: 10, kind: input, shape index: {}]   ;;  %s8046_s11 = inlined_call_operand.hbm [shape: f32[1,128], index: 11, kind: input, shape index: {}]   ;;  %s8047_s12 = inlined_call_operand.hbm [shape: f32[1,128], index: 12, kind: input, shape index: {}]   ;;  %s8048_s13 = inlined_call_operand.vmem [shape: f32[16,128], index: 13, kind: output, shape index: {}]  }
   0x1   :  { %19 = vsyncpa [#allocation11], 0 }
   0x2   :  { %20 = vsyncpa [#allocation14], 0 }
   0x3   :  { %21 = vsyncpa [#allocation17], 0  ;;  %s7017_s25 = smov [#allocation10]   ;;  %s7018_s27 = smov [#allocation13]  }
   0x4   :  { %s40_s26 = sshll.u32 %s7017_s25, 4  ;;  %s60_s28 = sshll.u32 %s7018_s27, 4  ;;  %s41_s26 = int_to_ptr.vmem [resolvable:$true] %s40_s26  ;;  %s61_s28 = int_to_ptr.vmem [resolvable:$true] %s60_s28 }
   0x5   :  { %s6795_s14 = scalar_lea.hbm %s8042_s7, 32 }
   0x6   :  { %p6796_p0 = scmp.ne.s32.totalorder %s8042_s7, %s6795_s14  ;;  %p6799_p1 = scmp.lt.u32.totalorder %s6795_s14, %s8042_s7 }
   0x8   :  { %p6801_p2 = pnand %p6799_p1, %p6796_p0 }
   0xa   :  { %6804 = shalt.err (!%p6801_p2)
}
   0xb   :  { %s6805_s19 = scalar_lea.vmem %s41_s26, 32  ;;  %p6810_p4 = scmp.lt.s32.totalorder %s41_s26, %s41_s26 }
   0xc   :  { %p6806_p3 = scmp.ne.s32.totalorder %s41_s26, %s6805_s19  ;;  %p6811_p5 = scmp.lt.s32.totalorder %s6805_s19, %s6805_s19 }
   0xe   :  { %p6812_p6 = por %p6811_p5, %p6810_p4 }
  0x10   :  { %p6813_p7 = pnand %p6812_p6, %p6806_p3 }
  0x12   :  { %6816 = shalt.err (!%p6813_p7)
}
  0x13   :  { %43 = dma.hbm_to_vmem [thread:$0]  %s8042_s7, 32, %s41_s26, [#allocation11]  }
  0x14   :  { %s6817_s24 = scalar_lea.hbm %s8044_s9, 64 }
  0x15   :  { %p6818_p8 = scmp.ne.s32.totalorder %s8044_s9, %s6817_s24  ;;  %p6821_p9 = scmp.lt.u32.totalorder %s6817_s24, %s8044_s9 }
  0x17   :  { %p6823_p10 = pnand %p6821_p9, %p6818_p8 }
  0x19   :  { %6826 = shalt.err (!%p6823_p10)
}
  0x1a   :  { %s6827_s14 = scalar_lea.vmem %s61_s28, 64  ;;  %p6832_p12 = scmp.lt.s32.totalorder %s61_s28, %s61_s28 }
  0x1b   :  { %p6828_p11 = scmp.ne.s32.totalorder %s61_s28, %s6827_s14  ;;  %p6833_p13 = scmp.lt.s32.totalorder %s6827_s14, %s6827_s14 }
  0x1d   :  { %p6834_p0 = por %p6833_p13, %p6832_p12 }
  0x1f   :  { %p6835_p1 = pnand %p6834_p0, %p6828_p11 }
  0x21   :  { %6838 = shalt.err (!%p6835_p1)
}
  0x22   :  { %63 = dma.hbm_to_vmem [thread:$0]  %s8044_s9, 64, %s61_s28, [#allocation14]  }
  0x23   :  { %s7019_s15 = smov [#allocation16]   ;;  %s7020_s17 = smov [#allocation8]  }
  0x24   :  { %s80_s16 = sshll.u32 %s7019_s15, 4  ;;  %s30_s18 = sshll.u32 %s7020_s17, 4  ;;  %s81_s16 = int_to_ptr.vmem [resolvable:$true] %s80_s16  ;;  %s31_s18 = int_to_ptr.vmem [resolvable:$true] %s30_s18 }
  0x25   :  { %s6839_s21 = scalar_lea.hbm %s8046_s11, 16 }
  0x26   :  { %p6840_p2 = scmp.ne.s32.totalorder %s8046_s11, %s6839_s21  ;;  %p6843_p3 = scmp.lt.u32.totalorder %s6839_s21, %s8046_s11 }
  0x28   :  { %p6845_p4 = pnand %p6843_p3, %p6840_p2 }
  0x2a   :  { %6848 = shalt.err (!%p6845_p4)
}
  0x2b   :  { %s6849_s9 = scalar_lea.vmem %s81_s16, 16  ;;  %s6853_s28 = scalar_lea.vmem %s81_s16, 32 }
  0x2c   :  { %p6850_p5 = scmp.ne.s32.totalorder %s81_s16, %s6849_s9  ;;  %p6854_p6 = scmp.lt.s32.totalorder %s81_s16, %s81_s16 }
  0x2d   :  { %p6855_p7 = scmp.lt.s32.totalorder %s6853_s28, %s6849_s9 }
  0x2f   :  { %p6856_p8 = por %p6855_p7, %p6854_p6 }
  0x31   :  { %p6857_p9 = pnand %p6856_p8, %p6850_p5 }
  0x33   :  { %6860 = shalt.err (!%p6857_p9)
}
  0x34   :  { %83 = dma.hbm_to_vmem [thread:$0]  %s8046_s11, 16, %s81_s16, [#allocation17]  }
  0x35   :  { %s6861_s7 = scalar_lea.hbm %s8041_s6, 128 }
  0x36   :  { %p6862_p10 = scmp.ne.s32.totalorder %s8041_s6, %s6861_s7  ;;  %p6865_p11 = scmp.lt.u32.totalorder %s6861_s7, %s8041_s6 }
  0x38   :  { %p6867_p12 = pnand %p6865_p11, %p6862_p10 }
  0x3a   :  { %6870 = shalt.err (!%p6867_p12)
}
  0x3b   :  { %s6871_s20 = scalar_lea.vmem %s31_s18, 128  ;;  %p6876_p0 = scmp.lt.s32.totalorder %s31_s18, %s31_s18 }
  0x3c   :  { %p6872_p13 = scmp.ne.s32.totalorder %s31_s18, %s6871_s20  ;;  %p6877_p1 = scmp.lt.s32.totalorder %s6871_s20, %s6871_s20 }
  0x3e   :  { %p6878_p2 = por %p6877_p1, %p6876_p0 }
  0x40   :  { %p6879_p3 = pnand %p6878_p2, %p6872_p13 }
  0x42   :  { %6882 = shalt.err (!%p6879_p3)
}
  0x43   :  { %33 = dma.hbm_to_vmem [thread:$0]  %s8041_s6, 128, %s31_s18, [#allocation9]  }
  0x44   :  { %s7021_s21 = smov [#allocation12]   ;;  %s7022_s23 = smov [#allocation15]  }
  0x45   :  { %s50_s22 = sshll.u32 %s7021_s21, 4  ;;  %s70_s24 = sshll.u32 %s7022_s23, 4  ;;  %s51_s22 = int_to_ptr.vmem [resolvable:$true] %s50_s22  ;;  %s71_s24 = int_to_ptr.vmem [resolvable:$true] %s70_s24 }
  0x46   :  { %s6883_s28 = scalar_lea.hbm %s8043_s8, 64 }
  0x47   :  { %p6884_p4 = scmp.ne.s32.totalorder %s8043_s8, %s6883_s28  ;;  %p6887_p5 = scmp.lt.u32.totalorder %s6883_s28, %s8043_s8 }
  0x49   :  { %p6889_p6 = pnand %p6887_p5, %p6884_p4 }
  0x4b   :  { %6892 = shalt.err (!%p6889_p6)
}
  0x4c   :  { %s6893_s6 = scalar_lea.vmem %s51_s22, 64  ;;  %p6898_p8 = scmp.lt.s32.totalorder %s51_s22, %s51_s22 }
  0x4d   :  { %p6894_p7 = scmp.ne.s32.totalorder %s51_s22, %s6893_s6  ;;  %p6899_p9 = scmp.lt.s32.totalorder %s6893_s6, %s6893_s6 }
  0x4f   :  { %p6900_p10 = por %p6899_p9, %p6898_p8 }
  0x51   :  { %p6901_p11 = pnand %p6900_p10, %p6894_p7 }
  0x53   :  { %6904 = shalt.err (!%p6901_p11)
}
  0x54   :  { %53 = dma.hbm_to_vmem [thread:$0]  %s8043_s8, 64, %s51_s22, [#allocation11]  }
  0x55   :  { %s6905_s17 = scalar_lea.hbm %s8045_s10, 64 }
  0x56   :  { %p6906_p12 = scmp.ne.s32.totalorder %s8045_s10, %s6905_s17  ;;  %p6909_p13 = scmp.lt.u32.totalorder %s6905_s17, %s8045_s10 }
  0x58   :  { %p6911_p0 = pnand %p6909_p13, %p6906_p12 }
  0x5a   :  { %6914 = shalt.err (!%p6911_p0)
}
  0x5b   :  { %s6915_s21 = scalar_lea.vmem %s71_s24, 64  ;;  %p6920_p2 = scmp.lt.s32.totalorder %s71_s24, %s71_s24 }
  0x5c   :  { %p6916_p1 = scmp.ne.s32.totalorder %s71_s24, %s6915_s21  ;;  %p6921_p3 = scmp.lt.s32.totalorder %s6915_s21, %s6915_s21 }
  0x5e   :  { %p6922_p4 = por %p6921_p3, %p6920_p2 }
  0x60   :  { %p6923_p5 = pnand %p6922_p4, %p6916_p1 }
  0x62   :  { %6926 = shalt.err (!%p6923_p5)
}
  0x63   :  { %73 = dma.hbm_to_vmem [thread:$0]  %s8045_s10, 64, %s71_s24, [#allocation14]  }
  0x64   :  { %s7023_s23 = smov [#allocation18]   ;;  %s6927_s27 = scalar_lea.hbm %s8047_s12, 16 }
  0x65   :  { %s90_s25 = sshll.u32 %s7023_s23, 4  ;;  %p6928_p6 = scmp.ne.s32.totalorder %s8047_s12, %s6927_s27  ;;  %s91_s25 = int_to_ptr.vmem [resolvable:$true] %s90_s25 }
  0x66   :  { %p6931_p7 = scmp.lt.u32.totalorder %s6927_s27, %s8047_s12 }
  0x68   :  { %p6933_p8 = pnand %p6931_p7, %p6928_p6 }
  0x6a   :  { %6936 = shalt.err (!%p6933_p8)
}
  0x6b   :  { %s6937_s18 = scalar_lea.vmem %s91_s25, 16  ;;  %s6941_s10 = scalar_lea.vmem %s91_s25, 32 }
  0x6c   :  { %p6938_p9 = scmp.ne.s32.totalorder %s91_s25, %s6937_s18  ;;  %p6942_p10 = scmp.lt.s32.totalorder %s91_s25, %s91_s25 }
  0x6d   :  { %p6943_p11 = scmp.lt.s32.totalorder %s6941_s10, %s6937_s18 }
  0x6f   :  { %p6944_p12 = por %p6943_p11, %p6942_p10 }
  0x71   :  { %p6945_p13 = pnand %p6944_p12, %p6938_p9 }
  0x73   :  { %6948 = shalt.err (!%p6945_p13)
}
  0x74   :  { %93 = dma.hbm_to_vmem [thread:$0]  %s8047_s12, 16, %s91_s25, [#allocation17]  }
  0x75   :  { %6993 = dma.done.wait [#allocation9], 128  }
  0x76   :  { %6994 = vsyncadd [#allocation9], 4294967168 }
  0x77   :  { %6995 = dma.done.wait [#allocation11], 96  }
  0x78   :  { %6996 = vsyncadd [#allocation11], 4294967200 }
  0x79   :  { %6997 = dma.done.wait [#allocation14], 128  }
  0x7a   :  { %6998 = vsyncadd [#allocation14], 4294967168 }
  0x7b   :  { %6999 = dma.done.wait [#allocation17], 32  }
  0x7c   :  { %7000 = vsyncadd [#allocation17], 4294967264  ;;  %s120_s26 = sld [smem:[#allocation0]]   ;;  %s7024_s15 = smov 2048  }
  0x7d   :  { %132 = sst [smem:[#allocation20]] %s7024_s15  ;;  %s7025_s17 = smov 16  }
  0x7e   :  { %134 = sst [smem:[#allocation20 + $0x1]] %s7024_s15  ;;  %s7026_s19 = smov 64  }
  0x7f   :  { %136 = sst [smem:[#allocation20 + $0x2]] %s7025_s17  ;;  %s7027_s12 = smov 128  }
  0x80   :  { %138 = sst [smem:[#allocation20 + $0x3]] %s7026_s19  ;;  %s7028_s20 = smov 2  }
  0x81   :  { %140 = sst [smem:[#allocation20 + $0x4]] %s7027_s12  ;;  %s7029_s16 = smov 1024  }
  0x82   :  { %142 = sst [smem:[#allocation20 + $0x5]] %s7028_s20  ;;  %s6551_s11 = sshll.u32 %s120_s26, 26 }
  0x83   :  { %144 = sst [smem:[#allocation20 + $0x6]] %s7029_s16  ;;  %s7217_s21 = sadd.s32 134217728, %s6551_s11 }
  0x84   :  { %146 = sst [smem:[#allocation20 + $0x7]] %s7026_s19  ;;  %s7030_s8 = smov 4  }
  0x85   :  { %148 = sst [smem:[#allocation20 + $0x8]] %s7030_s8  ;;  %s7031_s22 = smov [#allocation2]  }
  0x86   :  { %s128_s23 = sshll.u32 %s7031_s22, 4  ;;  %s7032_s25 = smov [#allocation7]   ;;  %s129_s23 = int_to_ptr.vmem [resolvable:$true] %s128_s23 }
  0x87   :  { %s7033_s9 = smov [#allocation19]   ;;  %s7034_s29 = smov [#allocation2 + $0x400]  }
  0x88   :  { %150 = dma.general %s8036_s1, 16384, %s129_s23, %s7032_s25, %s7033_s9, [#allocation20], %s7217_s21, 0  }
  0x89   :  { %169 = sst [smem:[#allocation22]] %s7024_s15  ;;  %s165_s30 = sshll.u32 %s7034_s29, 4  ;;  %s166_s30 = int_to_ptr.vmem [resolvable:$true] %s165_s30 }
  0x8a   :  { %171 = sst [smem:[#allocation22 + $0x1]] %s7024_s15  ;;  %s151_s18 = scalar_lea.hbm %s8036_s1, 16384 }
  0x8b   :  { %173 = sst [smem:[#allocation22 + $0x2]] %s7025_s17  ;;  %s7035_s10 = smov [#allocation7 + $0x1]  }
  0x8c   :  { %175 = sst [smem:[#allocation22 + $0x3]] %s7026_s19  ;;  %s7036_s24 = smov [#allocation21]  }
  0x8d   :  { %177 = sst [smem:[#allocation22 + $0x4]] %s7027_s12  ;;  %s7037_s7 = smov [#allocation2 + $0x800]  }
  0x8e   :  { %179 = sst [smem:[#allocation22 + $0x5]] %s7028_s20  ;;  %s202_s26 = sshll.u32 %s7037_s7, 4  ;;  %s203_s26 = int_to_ptr.vmem [resolvable:$true] %s202_s26 }
  0x8f   :  { %181 = sst [smem:[#allocation22 + $0x6]] %s7029_s16  ;;  %s188_s23 = scalar_lea.hbm %s8036_s1, 32768 }
  0x90   :  { %183 = sst [smem:[#allocation22 + $0x7]] %s7026_s19  ;;  %s7038_s25 = smov [#allocation7 + $0x2]  }
  0x91   :  { %185 = sst [smem:[#allocation22 + $0x8]] %s7030_s8  ;;  %s7039_s9 = smov [#allocation23]  }
  0x92   :  { %187 = dma.general %s151_s18, 16384, %s166_s30, %s7035_s10, %s7036_s24, [#allocation22], %s7217_s21, 0  }
  0x93   :  { %206 = sst [smem:[#allocation24]] %s7024_s15  ;;  %s7040_s28 = smov [#allocation2 + $0xc00]  }
  0x94   :  { %208 = sst [smem:[#allocation24 + $0x1]] %s7024_s15  ;;  %s239_s27 = sshll.u32 %s7040_s28, 4  ;;  %s240_s27 = int_to_ptr.vmem [resolvable:$true] %s239_s27 }
  0x95   :  { %210 = sst [smem:[#allocation24 + $0x2]] %s7025_s17  ;;  %s225_s14 = scalar_lea.hbm %s8036_s1, 49152 }
  0x96   :  { %212 = sst [smem:[#allocation24 + $0x3]] %s7026_s19  ;;  %s7041_s6 = smov [#allocation3]  }
  0x97   :  { %214 = sst [smem:[#allocation24 + $0x4]] %s7027_s12  ;;  %s274_s18 = sshll.u32 %s7041_s6, 4  ;;  %s275_s18 = int_to_ptr.vmem [resolvable:$true] %s274_s18 }
  0x98   :  { %216 = sst [smem:[#allocation24 + $0x5]] %s7028_s20  ;;  %s7042_s10 = smov [#allocation7 + $0x3]  }
  0x99   :  { %218 = sst [smem:[#allocation24 + $0x6]] %s7029_s16  ;;  %s7043_s24 = smov [#allocation25]  }
  0x9a   :  { %220 = sst [smem:[#allocation24 + $0x7]] %s7026_s19  ;;  %s7044_s1 = smov [#allocation4]  }
  0x9b   :  { %222 = sst [smem:[#allocation24 + $0x8]] %s7030_s8  ;;  %s7272_s7 = sshll.u32 %s7044_s1, 4  ;;  %s310_s7 = int_to_ptr.vmem [resolvable:$true] %s7272_s7 }
  0x9c   :  { %224 = dma.general %s188_s23, 16384, %s203_s26, %s7038_s25, %s7039_s9, [#allocation24], %s7217_s21, 0  }
  0x9d   :  { %243 = sst [smem:[#allocation26]] %s7024_s15  ;;  %s7045_s26 = smov [#allocation7 + $0x4]  }
  0x9e   :  { %245 = sst [smem:[#allocation26 + $0x1]] %s7024_s15  ;;  %s7046_s11 = smov [#allocation27]  }
  0x9f   :  { %247 = sst [smem:[#allocation26 + $0x2]] %s7025_s17  ;;  %s7047_s23 = smov 4096  }
  0xa0   :  { %249 = sst [smem:[#allocation26 + $0x3]] %s7026_s19  ;;  %s7048_s25 = smov 32  }
  0xa1   :  { %251 = sst [smem:[#allocation26 + $0x4]] %s7027_s12  ;;  %s7050_s28 = smov [#allocation6]  }
  0xa2   :  { %253 = sst [smem:[#allocation26 + $0x5]] %s7028_s20  ;;  %s7052_s29 = smov [#allocation29]  }
  0xa3   :  { %255 = sst [smem:[#allocation26 + $0x6]] %s7029_s16 }
  0xa4   :  { %257 = sst [smem:[#allocation26 + $0x7]] %s7026_s19 }
  0xa5   :  { %259 = sst [smem:[#allocation26 + $0x8]] %s7030_s8 }
  0xa6   :  { %261 = dma.general %s225_s14, 16384, %s240_s27, %s7042_s10, %s7043_s24, [#allocation26], %s7217_s21, 0  }
  0xa7   :  { %278 = sst [smem:[#allocation28]] %s7024_s15  ;;  %s352_s27 = sshll.u32 %s7050_s28, 4  ;;  %s7286_s27 = int_to_ptr.vmem [resolvable:$true] %s352_s27 }
  0xa8   :  { %280 = sst [smem:[#allocation28 + $0x1]] %s7024_s15 }
  0xa9   :  { %282 = sst [smem:[#allocation28 + $0x2]] %s7025_s17 }
  0xaa   :  { %284 = sst [smem:[#allocation28 + $0x3]] %s7026_s19 }
  0xab   :  { %286 = sst [smem:[#allocation28 + $0x4]] %s7027_s12 }
  0xac   :  { %288 = sst [smem:[#allocation28 + $0x5]] %s7028_s20 }
  0xad   :  { %290 = sst [smem:[#allocation28 + $0x6]] %s7029_s16  ;;  %s7049_s16 = smov [#allocation5]  }
  0xae   :  { %292 = sst [smem:[#allocation28 + $0x7]] %s7026_s19  ;;  %s340_s9 = sshll.u32 %s7049_s16, 4  ;;  %s341_s9 = int_to_ptr.vmem [resolvable:$true] %s340_s9 }
  0xaf   :  { %294 = sst [smem:[#allocation28 + $0x8]] %s7030_s8 }
  0xb0   :  { %296 = dma.general %s8037_s2, 131072, %s275_s18, %s7045_s26, %s7046_s11, [#allocation28], %s7217_s21, 0  }
  0xb1   :  { %313 = sst [smem:[#allocation30]] %s7047_s23  ;;  %s7051_s2 = smov [#allocation7 + $0x5]  }
  0xb2   :  { %315 = sst [smem:[#allocation30 + $0x1]] %s7047_s23 }
  0xb3   :  { %317 = sst [smem:[#allocation30 + $0x2]] %s7048_s25 }
  0xb4   :  { %319 = sst [smem:[#allocation30 + $0x3]] %s7026_s19 }
  0xb5   :  { %321 = sst [smem:[#allocation30 + $0x4]] %s7027_s12 }
  0xb6   :  { %323 = sst [smem:[#allocation30 + $0x5]] %s7028_s20  ;;  %s6949_s20 = scalar_lea.hbm %s8039_s4, 4096 }
  0xb7   :  { %325 = sst [smem:[#allocation30 + $0x6]] %s7024_s15  ;;  %p6950_p0 = scmp.ne.s32.totalorder %s8039_s4, %s6949_s20 }
  0xb8   :  { %327 = sst [smem:[#allocation30 + $0x7]] %s7026_s19  ;;  %p6953_p1 = scmp.lt.u32.totalorder %s6949_s20, %s8039_s4 }
  0xb9   :  { %329 = sst [smem:[#allocation30 + $0x8]] %s7030_s8 }
  0xba   :  { %331 = dma.general %s8038_s3, 65536, %s310_s7, %s7051_s2, %s7052_s29, [#allocation30], %s7217_s21, 0  }
  0xbb   :  { %p6955_p2 = pnand %p6953_p1, %p6950_p0 }
  0xbd   :  { %6958 = shalt.err (!%p6955_p2)  }
  0xbe   :  { %s6959_s8 = scalar_lea.vmem %s341_s9, 4096  ;;  %p6964_p4 = scmp.lt.s32.totalorder %s341_s9, %s341_s9 }
  0xbf   :  { %p6960_p3 = scmp.ne.s32.totalorder %s341_s9, %s6959_s8  ;;  %p6965_p5 = scmp.lt.s32.totalorder %s6959_s8, %s6959_s8 }
  0xc1   :  { %p6966_p6 = por %p6965_p5, %p6964_p4 }
  0xc3   :  { %p6967_p7 = pnand %p6966_p6, %p6960_p3 }
  0xc5   :  { %6970 = shalt.err (!%p6967_p7)  }
  0xc6   :  { %343 = dma.hbm_to_vmem [thread:$0]  %s8039_s4, 4096, %s341_s9, [#allocation7 + $0x6] }
  0xc7   :  { %s6971_s7 = scalar_lea.hbm %s8040_s5, 1024 }
  0xc8   :  { %p6972_p8 = scmp.ne.s32.totalorder %s8040_s5, %s6971_s7  ;;  %p6975_p9 = scmp.lt.u32.totalorder %s6971_s7, %s8040_s5 }
  0xca   :  { %p6977_p10 = pnand %p6975_p9, %p6972_p8 }
  0xcc   :  { %6980 = shalt.err (!%p6977_p10)  }
  0xcd   :  { %s6981_s23 = scalar_lea.vmem %s7286_s27, 1024  ;;  %p6986_p12 = scmp.lt.s32.totalorder %s7286_s27, %s7286_s27 }
  0xce   :  { %p6982_p11 = scmp.ne.s32.totalorder %s7286_s27, %s6981_s23  ;;  %p6987_p13 = scmp.lt.s32.totalorder %s6981_s23, %s6981_s23 }
  0xd0   :  { %p6988_p0 = por %p6987_p13, %p6986_p12 }
  0xd2   :  { %p6989_p1 = pnand %p6988_p0, %p6982_p11 }
  0xd4   :  { %6992 = shalt.err (!%p6989_p1)  }
  0xd5   :  { %355 = dma.hbm_to_vmem [thread:$0]  %s8040_s5, 1024, %s7286_s27, [#allocation7 + $0x7] }
  0xd6   :  { %7001 = dma.done.wait [#allocation7], 16384 }
  0xd7   :  { %7002 = vsyncadd [#allocation7], 4294950912  ;;  %v7053_v0 = vmov 0   ;;  %v363_v1 = vld [vmem:[#allocation2 + $0x8] sm:$0xff]  ;;  %v365_v2 = vld [vmem:[#allocation2 + $0x18] sm:$0xff] }
  0xd8   :  { %528 = vmatprep.mubr.bf16.mxu0 %v7053_v0  ;;  %571 = vmatprep.mubr.bf16.mxu1 %v7053_v0  ;;  %v362_v3 = vld [vmem:[#allocation2] sm:$0xff]  ;;  %v364_v4 = vld [vmem:[#allocation2 + $0x10] sm:$0xff]  ;;  %v379_v5 = vld [vmem:[#allocation2 + $0x88] sm:$0xff] }
  0xd9   :  { %496 = vmatprep.subr.bf16.mxu0 %v363_v1  ;;  %539 = vmatprep.subr.bf16.mxu1 %v365_v2  ;;  %v381_v6 = vld [vmem:[#allocation2 + $0x98] sm:$0xff]  ;;  %v378_v7 = vld [vmem:[#allocation2 + $0x80] sm:$0xff]  ;;  %v380_v8 = vld [vmem:[#allocation2 + $0x90] sm:$0xff] }
  0xda   :  { %497 = vmatpush1.bf16.msra.mxu0 %v362_v3  ;;  %540 = vmatpush1.bf16.msra.mxu1 %v364_v4  ;;  %v395_v9 = vld [vmem:[#allocation2 + $0x108] sm:$0xff]  ;;  %v397_v10 = vld [vmem:[#allocation2 + $0x118] sm:$0xff]  ;;  %v394_v11 = vld [vmem:[#allocation2 + $0x100] sm:$0xff] }
  0xdb   :  { %498 = vmatprep.subr.bf16.mxu0 %v379_v5  ;;  %541 = vmatprep.subr.bf16.mxu1 %v381_v6  ;;  %v396_v12 = vld [vmem:[#allocation2 + $0x110] sm:$0xff]  ;;  %v411_v13 = vld [vmem:[#allocation2 + $0x188] sm:$0xff]  ;;  %v413_v14 = vld [vmem:[#allocation2 + $0x198] sm:$0xff] }
  0xdc   :  { %v410_v15 = vld [vmem:[#allocation2 + $0x180] sm:$0xff]  ;;  %v412_v16 = vld [vmem:[#allocation2 + $0x190] sm:$0xff]  ;;  %v427_v17 = vld [vmem:[#allocation2 + $0x208] sm:$0xff] }
  0xdd   :  { %v429_v18 = vld [vmem:[#allocation2 + $0x218] sm:$0xff]  ;;  %v426_v19 = vld [vmem:[#allocation2 + $0x200] sm:$0xff]  ;;  %v428_v20 = vld [vmem:[#allocation2 + $0x210] sm:$0xff] }
  0xde   :  { %499 = vmatpush1.bf16.msra.mxu0 %v378_v7  ;;  %542 = vmatpush1.bf16.msra.mxu1 %v380_v8  ;;  %v443_v21 = vld [vmem:[#allocation2 + $0x288] sm:$0xff]  ;;  %v445_v22 = vld [vmem:[#allocation2 + $0x298] sm:$0xff]  ;;  %v442_v23 = vld [vmem:[#allocation2 + $0x280] sm:$0xff] }
  0xdf   :  { %500 = vmatprep.subr.bf16.mxu0 %v395_v9  ;;  %543 = vmatprep.subr.bf16.mxu1 %v397_v10  ;;  %v444_v24 = vld [vmem:[#allocation2 + $0x290] sm:$0xff]  ;;  %v459_v25 = vld [vmem:[#allocation2 + $0x308] sm:$0xff]  ;;  %v461_v26 = vld [vmem:[#allocation2 + $0x318] sm:$0xff] }
  0xe0   :  { %v458_v27 = vld [vmem:[#allocation2 + $0x300] sm:$0xff]  ;;  %v460_v28 = vld [vmem:[#allocation2 + $0x310] sm:$0xff]  ;;  %v475_v29 = vld [vmem:[#allocation2 + $0x388] sm:$0xff] }
  0xe1   :  { %v477_v30 = vld [vmem:[#allocation2 + $0x398] sm:$0xff]  ;;  %v474_v31 = vld [vmem:[#allocation2 + $0x380] sm:$0xff]  ;;  %v476_v32 = vld [vmem:[#allocation2 + $0x390] sm:$0xff] }
  0xe2   :  { %501 = vmatpush1.bf16.msra.mxu0 %v394_v11  ;;  %544 = vmatpush1.bf16.msra.mxu1 %v396_v12  ;;  %v367_v33 = vld [vmem:[#allocation2 + $0x28] sm:$0xff]  ;;  %v369_v34 = vld [vmem:[#allocation2 + $0x38] sm:$0xff]  ;;  %v7326_v35 = vld [vmem:[%s8035_s0] sm:$0xff]  }
  0xe3   :  { %502 = vmatprep.subr.bf16.mxu0 %v411_v13  ;;  %545 = vmatprep.subr.bf16.mxu1 %v413_v14  ;;  %v366_v36 = vld [vmem:[#allocation2 + $0x20] sm:$0xff]  ;;  %v368_v37 = vld [vmem:[#allocation2 + $0x30] sm:$0xff]  ;;  %v383_v38 = vld [vmem:[#allocation2 + $0xa8] sm:$0xff] }
  0xe4   :  { %v385_v39 = vld [vmem:[#allocation2 + $0xb8] sm:$0xff]  ;;  %v382_v40 = vld [vmem:[#allocation2 + $0xa0] sm:$0xff]  ;;  %v384_v41 = vld [vmem:[#allocation2 + $0xb0] sm:$0xff] }
  0xe5   :  { %v399_v42 = vld [vmem:[#allocation2 + $0x128] sm:$0xff]  ;;  %v401_v43 = vld [vmem:[#allocation2 + $0x138] sm:$0xff]  ;;  %v398_v44 = vld [vmem:[#allocation2 + $0x120] sm:$0xff] }
  0xe6   :  { %503 = vmatpush1.bf16.msra.mxu0 %v410_v15  ;;  %546 = vmatpush1.bf16.msra.mxu1 %v412_v16  ;;  %v400_v45 = vld [vmem:[#allocation2 + $0x130] sm:$0xff]  ;;  %v415_v46 = vld [vmem:[#allocation2 + $0x1a8] sm:$0xff]  ;;  %v417_v47 = vld [vmem:[#allocation2 + $0x1b8] sm:$0xff] }
  0xe7   :  { %504 = vmatprep.subr.bf16.mxu0 %v427_v17  ;;  %547 = vmatprep.subr.bf16.mxu1 %v429_v18  ;;  %v414_v48 = vld [vmem:[#allocation2 + $0x1a0] sm:$0xff]  ;;  %v416_v49 = vld [vmem:[#allocation2 + $0x1b0] sm:$0xff]  ;;  %v431_v50 = vld [vmem:[#allocation2 + $0x228] sm:$0xff] }
  0xe8   :  { %v433_v51 = vld [vmem:[#allocation2 + $0x238] sm:$0xff]  ;;  %v430_v52 = vld [vmem:[#allocation2 + $0x220] sm:$0xff]  ;;  %v432_v53 = vld [vmem:[#allocation2 + $0x230] sm:$0xff] }
  0xe9   :  { %v447_v54 = vld [vmem:[#allocation2 + $0x2a8] sm:$0xff]  ;;  %v449_v55 = vld [vmem:[#allocation2 + $0x2b8] sm:$0xff]  ;;  %v446_v56 = vld [vmem:[#allocation2 + $0x2a0] sm:$0xff] }
  0xea   :  { %505 = vmatpush1.bf16.msra.mxu0 %v426_v19  ;;  %548 = vmatpush1.bf16.msra.mxu1 %v428_v20  ;;  %v448_v57 = vld [vmem:[#allocation2 + $0x2b0] sm:$0xff]  ;;  %v463_v58 = vld [vmem:[#allocation2 + $0x328] sm:$0xff]  ;;  %v465_v59 = vld [vmem:[#allocation2 + $0x338] sm:$0xff] }
  0xeb   :  { %506 = vmatprep.subr.bf16.mxu0 %v443_v21  ;;  %549 = vmatprep.subr.bf16.mxu1 %v445_v22  ;;  %v462_v60 = vld [vmem:[#allocation2 + $0x320] sm:$0xff]  ;;  %v464_v61 = vld [vmem:[#allocation2 + $0x330] sm:$0xff]  ;;  %v479_v62 = vld [vmem:[#allocation2 + $0x3a8] sm:$0xff] }
  0xec   :  { %v481_v63 = vld [vmem:[#allocation2 + $0x3b8] sm:$0xff]  ;;  %v478_v1 = vld [vmem:[#allocation2 + $0x3a0] sm:$0xff]  ;;  %v480_v2 = vld [vmem:[#allocation2 + $0x3b0] sm:$0xff] }
  0xed   :  { %v371_v3 = vld [vmem:[#allocation2 + $0x48] sm:$0xff]  ;;  %v373_v4 = vld [vmem:[#allocation2 + $0x58] sm:$0xff]  ;;  %v370_v5 = vld [vmem:[#allocation2 + $0x40] sm:$0xff] }
  0xee   :  { %507 = vmatpush1.bf16.msra.mxu0 %v442_v23  ;;  %550 = vmatpush1.bf16.msra.mxu1 %v444_v24  ;;  %v372_v6 = vld [vmem:[#allocation2 + $0x50] sm:$0xff]  ;;  %v387_v7 = vld [vmem:[#allocation2 + $0xc8] sm:$0xff]  ;;  %v389_v8 = vld [vmem:[#allocation2 + $0xd8] sm:$0xff] }
  0xef   :  { %508 = vmatprep.subr.bf16.mxu0 %v459_v25  ;;  %551 = vmatprep.subr.bf16.mxu1 %v461_v26  ;;  %v386_v9 = vld [vmem:[#allocation2 + $0xc0] sm:$0xff]  ;;  %v388_v10 = vld [vmem:[#allocation2 + $0xd0] sm:$0xff]  ;;  %v403_v11 = vld [vmem:[#allocation2 + $0x148] sm:$0xff] }
  0xf0   :  { %v405_v12 = vld [vmem:[#allocation2 + $0x158] sm:$0xff]  ;;  %v402_v13 = vld [vmem:[#allocation2 + $0x140] sm:$0xff]  ;;  %v404_v14 = vld [vmem:[#allocation2 + $0x150] sm:$0xff] }
  0xf1   :  { %v419_v15 = vld [vmem:[#allocation2 + $0x1c8] sm:$0xff]  ;;  %v421_v16 = vld [vmem:[#allocation2 + $0x1d8] sm:$0xff]  ;;  %v418_v17 = vld [vmem:[#allocation2 + $0x1c0] sm:$0xff] }
  0xf2   :  { %509 = vmatpush1.bf16.msra.mxu0 %v458_v27  ;;  %552 = vmatpush1.bf16.msra.mxu1 %v460_v28  ;;  %v420_v18 = vld [vmem:[#allocation2 + $0x1d0] sm:$0xff]  ;;  %v435_v19 = vld [vmem:[#allocation2 + $0x248] sm:$0xff]  ;;  %v437_v20 = vld [vmem:[#allocation2 + $0x258] sm:$0xff] }
  0xf3   :  { %510 = vmatprep.subr.bf16.mxu0 %v475_v29  ;;  %553 = vmatprep.subr.bf16.mxu1 %v477_v30  ;;  %v434_v21 = vld [vmem:[#allocation2 + $0x240] sm:$0xff]  ;;  %v436_v22 = vld [vmem:[#allocation2 + $0x250] sm:$0xff]  ;;  %v451_v23 = vld [vmem:[#allocation2 + $0x2c8] sm:$0xff] }
  0xf4   :  { %v453_v24 = vld [vmem:[#allocation2 + $0x2d8] sm:$0xff]  ;;  %v450_v25 = vld [vmem:[#allocation2 + $0x2c0] sm:$0xff]  ;;  %v452_v26 = vld [vmem:[#allocation2 + $0x2d0] sm:$0xff] }
  0xf5   :  { %v467_v27 = vld [vmem:[#allocation2 + $0x348] sm:$0xff]  ;;  %v469_v28 = vld [vmem:[#allocation2 + $0x358] sm:$0xff]  ;;  %v466_v29 = vld [vmem:[#allocation2 + $0x340] sm:$0xff] }
  0xf6   :  { %511 = vmatpush1.bf16.msra.mxu0 %v474_v31  ;;  %554 = vmatpush1.bf16.msra.mxu1 %v476_v32  ;;  %v468_v30 = vld [vmem:[#allocation2 + $0x350] sm:$0xff]  ;;  %v483_v31 = vld [vmem:[#allocation2 + $0x3c8] sm:$0xff]  ;;  %v485_v32 = vld [vmem:[#allocation2 + $0x3d8] sm:$0xff] }
  0xf7   :  { %582 = vmatprep.subr.bf16.mxu0 %v367_v33  ;;  %625 = vmatprep.subr.bf16.mxu1 %v369_v34  ;;  %v482_v33 = vld [vmem:[#allocation2 + $0x3c0] sm:$0xff]  ;;  %v484_v34 = vld [vmem:[#allocation2 + $0x3d0] sm:$0xff] }
  0xf9   :  { %529 = vmatmul.mubr.bf16.vlgmr.msra.gmra.mrb[0].mxu0 %v7326_v35  ;;  %572 = vmatmul.mubr.bf16.vlgmr.msra.gmra.mrb[0].mxu1 %v7326_v35 }
  0xfa   :  { %583 = vmatpush1.bf16.msra.mxu0 %v366_v36  ;;  %626 = vmatpush1.bf16.msra.mxu1 %v368_v37  ;;  %v375_v36 = vld [vmem:[#allocation2 + $0x68] sm:$0xff]  ;;  %v377_v37 = vld [vmem:[#allocation2 + $0x78] sm:$0xff] }
  0xfb   :  { %584 = vmatprep.subr.bf16.mxu0 %v383_v38  ;;  %627 = vmatprep.subr.bf16.mxu1 %v385_v39  ;;  %v374_v38 = vld [vmem:[#allocation2 + $0x60] sm:$0xff]  ;;  %v376_v39 = vld [vmem:[#allocation2 + $0x70] sm:$0xff] }
  0xfc   :  { %614 = vmatprep.mubr.bf16.mxu0 %v7053_v0  ;;  %657 = vmatprep.mubr.bf16.mxu1 %v7053_v0 }
  0xfe   :  { %585 = vmatpush1.bf16.msra.mxu0 %v382_v40  ;;  %628 = vmatpush1.bf16.msra.mxu1 %v384_v41  ;;  %v391_v40 = vld [vmem:[#allocation2 + $0xe8] sm:$0xff]  ;;  %v393_v41 = vld [vmem:[#allocation2 + $0xf8] sm:$0xff] }
  0xff   :  { %586 = vmatprep.subr.bf16.mxu0 %v399_v42  ;;  %629 = vmatprep.subr.bf16.mxu1 %v401_v43  ;;  %v390_v42 = vld [vmem:[#allocation2 + $0xe0] sm:$0xff]  ;;  %v392_v43 = vld [vmem:[#allocation2 + $0xf0] sm:$0xff] }
 0x102   :  { %587 = vmatpush1.bf16.msra.mxu0 %v398_v44  ;;  %630 = vmatpush1.bf16.msra.mxu1 %v400_v45  ;;  %v407_v44 = vld [vmem:[#allocation2 + $0x168] sm:$0xff]  ;;  %v409_v45 = vld [vmem:[#allocation2 + $0x178] sm:$0xff] }
 0x103   :  { %588 = vmatprep.subr.bf16.mxu0 %v415_v46  ;;  %631 = vmatprep.subr.bf16.mxu1 %v417_v47  ;;  %v406_v46 = vld [vmem:[#allocation2 + $0x160] sm:$0xff]  ;;  %v408_v47 = vld [vmem:[#allocation2 + $0x170] sm:$0xff] }
 0x106   :  { %589 = vmatpush1.bf16.msra.mxu0 %v414_v48  ;;  %632 = vmatpush1.bf16.msra.mxu1 %v416_v49  ;;  %v423_v48 = vld [vmem:[#allocation2 + $0x1e8] sm:$0xff]  ;;  %v425_v49 = vld [vmem:[#allocation2 + $0x1f8] sm:$0xff] }
 0x107   :  { %590 = vmatprep.subr.bf16.mxu0 %v431_v50  ;;  %633 = vmatprep.subr.bf16.mxu1 %v433_v51  ;;  %v422_v50 = vld [vmem:[#allocation2 + $0x1e0] sm:$0xff]  ;;  %v424_v51 = vld [vmem:[#allocation2 + $0x1f0] sm:$0xff] }
 0x10a   :  { %591 = vmatpush1.bf16.msra.mxu0 %v430_v52  ;;  %634 = vmatpush1.bf16.msra.mxu1 %v432_v53  ;;  %v439_v52 = vld [vmem:[#allocation2 + $0x268] sm:$0xff]  ;;  %v441_v53 = vld [vmem:[#allocation2 + $0x278] sm:$0xff] }
 0x10b   :  { %592 = vmatprep.subr.bf16.mxu0 %v447_v54  ;;  %635 = vmatprep.subr.bf16.mxu1 %v449_v55  ;;  %v438_v54 = vld [vmem:[#allocation2 + $0x260] sm:$0xff]  ;;  %v440_v55 = vld [vmem:[#allocation2 + $0x270] sm:$0xff] }
 0x10e   :  { %593 = vmatpush1.bf16.msra.mxu0 %v446_v56  ;;  %636 = vmatpush1.bf16.msra.mxu1 %v448_v57  ;;  %v455_v56 = vld [vmem:[#allocation2 + $0x2e8] sm:$0xff]  ;;  %v457_v57 = vld [vmem:[#allocation2 + $0x2f8] sm:$0xff] }
 0x10f   :  { %594 = vmatprep.subr.bf16.mxu0 %v463_v58  ;;  %637 = vmatprep.subr.bf16.mxu1 %v465_v59  ;;  %v454_v58 = vld [vmem:[#allocation2 + $0x2e0] sm:$0xff]  ;;  %v456_v59 = vld [vmem:[#allocation2 + $0x2f0] sm:$0xff] }
 0x112   :  { %595 = vmatpush1.bf16.msra.mxu0 %v462_v60  ;;  %638 = vmatpush1.bf16.msra.mxu1 %v464_v61  ;;  %v471_v60 = vld [vmem:[#allocation2 + $0x368] sm:$0xff]  ;;  %v473_v61 = vld [vmem:[#allocation2 + $0x378] sm:$0xff] }
 0x113   :  { %596 = vmatprep.subr.bf16.mxu0 %v479_v62  ;;  %639 = vmatprep.subr.bf16.mxu1 %v481_v63  ;;  %v470_v62 = vld [vmem:[#allocation2 + $0x360] sm:$0xff]  ;;  %v472_v63 = vld [vmem:[#allocation2 + $0x370] sm:$0xff] }
 0x116   :  { %597 = vmatpush1.bf16.msra.mxu0 %v478_v1  ;;  %640 = vmatpush1.bf16.msra.mxu1 %v480_v2  ;;  %v487_v1 = vld [vmem:[#allocation2 + $0x3e8] sm:$0xff]  ;;  %v489_v2 = vld [vmem:[#allocation2 + $0x3f8] sm:$0xff] }
 0x117   :  { %668 = vmatprep.subr.bf16.mxu0 %v371_v3  ;;  %711 = vmatprep.subr.bf16.mxu1 %v373_v4  ;;  %v486_v3 = vld [vmem:[#allocation2 + $0x3e0] sm:$0xff]  ;;  %v488_v4 = vld [vmem:[#allocation2 + $0x3f0] sm:$0xff] }
 0x119   :  { %615 = vmatmul.mubr.bf16.vlgmr.msra.gmra.mrb[4].mxu0 %v7326_v35  ;;  %658 = vmatmul.mubr.bf16.vlgmr.msra.gmra.mrb[4].mxu1 %v7326_v35 }
 0x11a   :  { %669 = vmatpush1.bf16.msra.mxu0 %v370_v5  ;;  %712 = vmatpush1.bf16.msra.mxu1 %v372_v6 }
 0x11b   :  { %670 = vmatprep.subr.bf16.mxu0 %v387_v7  ;;  %713 = vmatprep.subr.bf16.mxu1 %v389_v8 }
 0x11c   :  { %700 = vmatprep.mubr.bf16.mxu0 %v7053_v0  ;;  %743 = vmatprep.mubr.bf16.mxu1 %v7053_v0 }
 0x11e   :  { %671 = vmatpush1.bf16.msra.mxu0 %v386_v9  ;;  %714 = vmatpush1.bf16.msra.mxu1 %v388_v10 }
 0x11f   :  { %672 = vmatprep.subr.bf16.mxu0 %v403_v11  ;;  %715 = vmatprep.subr.bf16.mxu1 %v405_v12 }
 0x122   :  { %673 = vmatpush1.bf16.msra.mxu0 %v402_v13  ;;  %716 = vmatpush1.bf16.msra.mxu1 %v404_v14 }
 0x123   :  { %674 = vmatprep.subr.bf16.mxu0 %v419_v15  ;;  %717 = vmatprep.subr.bf16.mxu1 %v421_v16 }
 0x126   :  { %675 = vmatpush1.bf16.msra.mxu0 %v418_v17  ;;  %718 = vmatpush1.bf16.msra.mxu1 %v420_v18 }
 0x127   :  { %676 = vmatprep.subr.bf16.mxu0 %v435_v19  ;;  %719 = vmatprep.subr.bf16.mxu1 %v437_v20 }
 0x12a   :  { %677 = vmatpush1.bf16.msra.mxu0 %v434_v21  ;;  %720 = vmatpush1.bf16.msra.mxu1 %v436_v22 }
 0x12b   :  { %678 = vmatprep.subr.bf16.mxu0 %v451_v23  ;;  %721 = vmatprep.subr.bf16.mxu1 %v453_v24 }
 0x12e   :  { %679 = vmatpush1.bf16.msra.mxu0 %v450_v25  ;;  %722 = vmatpush1.bf16.msra.mxu1 %v452_v26 }
 0x12f   :  { %680 = vmatprep.subr.bf16.mxu0 %v467_v27  ;;  %723 = vmatprep.subr.bf16.mxu1 %v469_v28 }
 0x132   :  { %681 = vmatpush1.bf16.msra.mxu0 %v466_v29  ;;  %724 = vmatpush1.bf16.msra.mxu1 %v468_v30 }
 0x133   :  { %682 = vmatprep.subr.bf16.mxu0 %v483_v31  ;;  %725 = vmatprep.subr.bf16.mxu1 %v485_v32 }
 0x136   :  { %683 = vmatpush1.bf16.msra.mxu0 %v482_v33  ;;  %726 = vmatpush1.bf16.msra.mxu1 %v484_v34 }
 0x137   :  { %754 = vmatprep.subr.bf16.mxu0 %v375_v36  ;;  %797 = vmatprep.subr.bf16.mxu1 %v377_v37 }
 0x139   :  { %701 = vmatmul.mubr.bf16.vlgmr.msra.gmra.mrb[8].mxu0 %v7326_v35  ;;  %744 = vmatmul.mubr.bf16.vlgmr.msra.gmra.mrb[8].mxu1 %v7326_v35 }
 0x13a   :  { %755 = vmatpush1.bf16.msra.mxu0 %v374_v38  ;;  %798 = vmatpush1.bf16.msra.mxu1 %v376_v39 }
 0x13b   :  { %756 = vmatprep.subr.bf16.mxu0 %v391_v40  ;;  %799 = vmatprep.subr.bf16.mxu1 %v393_v41 }
 0x13c   :  { %786 = vmatprep.mubr.bf16.mxu0 %v7053_v0  ;;  %829 = vmatprep.mubr.bf16.mxu1 %v7053_v0 }
 0x13e   :  { %757 = vmatpush1.bf16.msra.mxu0 %v390_v42  ;;  %800 = vmatpush1.bf16.msra.mxu1 %v392_v43 }
 0x13f   :  { %758 = vmatprep.subr.bf16.mxu0 %v407_v44  ;;  %801 = vmatprep.subr.bf16.mxu1 %v409_v45 }
 0x142   :  { %759 = vmatpush1.bf16.msra.mxu0 %v406_v46  ;;  %802 = vmatpush1.bf16.msra.mxu1 %v408_v47 }
 0x143   :  { %760 = vmatprep.subr.bf16.mxu0 %v423_v48  ;;  %803 = vmatprep.subr.bf16.mxu1 %v425_v49 }
 0x146   :  { %761 = vmatpush1.bf16.msra.mxu0 %v422_v50  ;;  %804 = vmatpush1.bf16.msra.mxu1 %v424_v51 }
 0x147   :  { %762 = vmatprep.subr.bf16.mxu0 %v439_v52  ;;  %805 = vmatprep.subr.bf16.mxu1 %v441_v53 }
 0x14a   :  { %763 = vmatpush1.bf16.msra.mxu0 %v438_v54  ;;  %806 = vmatpush1.bf16.msra.mxu1 %v440_v55 }
 0x14b   :  { %764 = vmatprep.subr.bf16.mxu0 %v455_v56  ;;  %807 = vmatprep.subr.bf16.mxu1 %v457_v57 }
 0x14e   :  { %765 = vmatpush1.bf16.msra.mxu0 %v454_v58  ;;  %808 = vmatpush1.bf16.msra.mxu1 %v456_v59 }
 0x14f   :  { %766 = vmatprep.subr.bf16.mxu0 %v471_v60  ;;  %809 = vmatprep.subr.bf16.mxu1 %v473_v61 }
 0x152   :  { %767 = vmatpush1.bf16.msra.mxu0 %v470_v62  ;;  %810 = vmatpush1.bf16.msra.mxu1 %v472_v63 }
 0x153   :  { %768 = vmatprep.subr.bf16.mxu0 %v487_v1  ;;  %811 = vmatprep.subr.bf16.mxu1 %v489_v2 }
 0x156   :  { %769 = vmatpush1.bf16.msra.mxu0 %v486_v3  ;;  %812 = vmatpush1.bf16.msra.mxu1 %v488_v4 }
 0x159   :  { %787 = vmatmul.mubr.bf16.vlgmr.msra.gmra.mrb[12].mxu0 %v7326_v35  ;;  %830 = vmatmul.mubr.bf16.vlgmr.msra.gmra.mrb[12].mxu1 %v7326_v35 }
 0x1cc   :  { %v530_v5 = vpop.f32.mrb[0].mxu0  ;;  %v573_v6 = vpop.f32.mrb[0].mxu1 }
 0x1cd   :  { %v840_v7 = vmax.f32 %v530_v5, %v573_v6  ;;  %v532_v8 = vpop.f32.mrb[1].mxu0  ;;  %v575_v9 = vpop.f32.mrb[1].mxu1 }
 0x1ce   :  { %v841_v10 = vmax.f32 %v532_v8, %v575_v9  ;;  %v534_v11 = vpop.f32.mrb[2].mxu0  ;;  %v577_v12 = vpop.f32.mrb[2].mxu1 }
 0x1cf   :  { %v842_v13 = vmax.f32 %v534_v11, %v577_v12  ;;  %v536_v14 = vpop.f32.mrb[3].mxu0  ;;  %v579_v15 = vpop.f32.mrb[3].mxu1 }
 0x1d0   :  { %v843_v16 = vmax.f32 %v536_v14, %v579_v15 }
 0x1ec   :  { %v616_v17 = vpop.f32.mrb[4].mxu0  ;;  %v659_v18 = vpop.f32.mrb[4].mxu1 }
 0x1ed   :  { %v844_v19 = vmax.f32 %v840_v7, %v616_v17  ;;  %v618_v20 = vpop.f32.mrb[5].mxu0  ;;  %v661_v21 = vpop.f32.mrb[5].mxu1 }
 0x1ee   :  { %v845_v22 = vmax.f32 %v841_v10, %v618_v20  ;;  %v620_v23 = vpop.f32.mrb[6].mxu0  ;;  %v663_v35 = vpop.f32.mrb[6].mxu1 }
 0x1ef   :  { %v848_v24 = vmax.f32 %v844_v19, %v659_v18  ;;  %v846_v25 = vmax.f32 %v842_v13, %v620_v23  ;;  %v622_v26 = vpop.f32.mrb[7].mxu0  ;;  %v665_v27 = vpop.f32.mrb[7].mxu1 }
 0x1f0   :  { %v849_v28 = vmax.f32 %v845_v22, %v661_v21  ;;  %v847_v29 = vmax.f32 %v843_v16, %v622_v26 }
 0x1f1   :  { %v850_v30 = vmax.f32 %v846_v25, %v663_v35 }
 0x1f2   :  { %v851_v31 = vmax.f32 %v847_v29, %v665_v27 }
 0x20c   :  { %v702_v32 = vpop.f32.mrb[8].mxu0  ;;  %v745_v33 = vpop.f32.mrb[8].mxu1 }
 0x20d   :  { %v852_v34 = vmax.f32 %v848_v24, %v702_v32  ;;  %v704_v36 = vpop.f32.mrb[9].mxu0  ;;  %v747_v37 = vpop.f32.mrb[9].mxu1 }
 0x20e   :  { %v853_v38 = vmax.f32 %v849_v28, %v704_v36  ;;  %v706_v39 = vpop.f32.mrb[10].mxu0  ;;  %v749_v40 = vpop.f32.mrb[10].mxu1 }
 0x20f   :  { %v856_v41 = vmax.f32 %v852_v34, %v745_v33  ;;  %v854_v42 = vmax.f32 %v850_v30, %v706_v39  ;;  %v708_v43 = vpop.f32.mrb[11].mxu0  ;;  %v751_v44 = vpop.f32.mrb[11].mxu1 }
 0x210   :  { %v857_v45 = vmax.f32 %v853_v38, %v747_v37  ;;  %v855_v46 = vmax.f32 %v851_v31, %v708_v43 }
 0x211   :  { %v858_v47 = vmax.f32 %v854_v42, %v749_v40 }
 0x212   :  { %v859_v48 = vmax.f32 %v855_v46, %v751_v44 }
 0x22c   :  { %v788_v49 = vpop.f32.mrb[12].mxu0  ;;  %v7342_v50 = vpop.f32.mrb[12].mxu1 }
 0x22d   :  { %v7344_v51 = vmax.f32 %v856_v41, %v788_v49  ;;  %v790_v52 = vpop.f32.mrb[13].mxu0  ;;  %v7346_v53 = vpop.f32.mrb[13].mxu1 }
 0x22e   :  { %v7348_v54 = vmax.f32 %v857_v45, %v790_v52  ;;  %v792_v55 = vpop.f32.mrb[14].mxu0  ;;  %v7350_v56 = vpop.f32.mrb[14].mxu1 }
 0x22f   :  { %v864_v57 = vmax.f32 %v7344_v51, %v7342_v50  ;;  %v7354_v58 = vmax.f32 %v858_v47, %v792_v55  ;;  %v794_v59 = vpop.f32.mrb[15].mxu0  ;;  %v7356_v60 = vpop.f32.mrb[15].mxu1 }
 0x230   :  { %v865_v61 = vmax.f32 %v7348_v54, %v7346_v53  ;;  %v7360_v62 = vmax.f32 %v859_v48, %v794_v59 }
 0x231   :  { %v866_v63 = vmax.f32 %v7354_v58, %v7350_v56 }
 0x232   :  { %v867_v1 = vmax.f32 %v7360_v62, %v7356_v60 }
 0x233   :  { %7003 = dma.done.wait [#allocation7 + $0x1], 16384 }
 0x234   :  { %7004 = vsyncadd [#allocation7 + $0x1], 4294950912  ;;  %1039 = vmatprep.mubr.bf16.mxu0 %v7053_v0  ;;  %1082 = vmatprep.mubr.bf16.mxu1 %v7053_v0  ;;  %v874_v2 = vld [vmem:[#allocation2 + $0x408] sm:$0xff]  ;;  %v876_v3 = vld [vmem:[#allocation2 + $0x418] sm:$0xff] }
 0x235   :  { %v873_v4 = vld [vmem:[#allocation2 + $0x400] sm:$0xff]  ;;  %1007 = vmatprep.subr.bf16.mxu0 %v874_v2  ;;  %1050 = vmatprep.subr.bf16.mxu1 %v876_v3  ;;  %v875_v5 = vld [vmem:[#allocation2 + $0x410] sm:$0xff]  ;;  %v890_v6 = vld [vmem:[#allocation2 + $0x488] sm:$0xff] }
 0x236   :  { %v892_v7 = vld [vmem:[#allocation2 + $0x498] sm:$0xff]  ;;  %1008 = vmatpush1.bf16.msra.mxu0 %v873_v4  ;;  %1051 = vmatpush1.bf16.msra.mxu1 %v875_v5  ;;  %v889_v8 = vld [vmem:[#allocation2 + $0x480] sm:$0xff]  ;;  %v891_v9 = vld [vmem:[#allocation2 + $0x490] sm:$0xff] }
 0x237   :  { %1009 = vmatprep.subr.bf16.mxu0 %v890_v6  ;;  %1052 = vmatprep.subr.bf16.mxu1 %v892_v7  ;;  %v906_v10 = vld [vmem:[#allocation2 + $0x508] sm:$0xff]  ;;  %v908_v11 = vld [vmem:[#allocation2 + $0x518] sm:$0xff]  ;;  %v905_v12 = vld [vmem:[#allocation2 + $0x500] sm:$0xff] }
 0x238   :  { %v907_v13 = vld [vmem:[#allocation2 + $0x510] sm:$0xff]  ;;  %v922_v14 = vld [vmem:[#allocation2 + $0x588] sm:$0xff]  ;;  %v924_v15 = vld [vmem:[#allocation2 + $0x598] sm:$0xff] }
 0x239   :  { %v921_v16 = vld [vmem:[#allocation2 + $0x580] sm:$0xff]  ;;  %v923_v17 = vld [vmem:[#allocation2 + $0x590] sm:$0xff]  ;;  %v938_v18 = vld [vmem:[#allocation2 + $0x608] sm:$0xff] }
 0x23a   :  { %1010 = vmatpush1.bf16.msra.mxu0 %v889_v8  ;;  %1053 = vmatpush1.bf16.msra.mxu1 %v891_v9  ;;  %v940_v19 = vld [vmem:[#allocation2 + $0x618] sm:$0xff]  ;;  %v937_v20 = vld [vmem:[#allocation2 + $0x600] sm:$0xff]  ;;  %v939_v21 = vld [vmem:[#allocation2 + $0x610] sm:$0xff] }
 0x23b   :  { %1011 = vmatprep.subr.bf16.mxu0 %v906_v10  ;;  %1054 = vmatprep.subr.bf16.mxu1 %v908_v11  ;;  %v954_v22 = vld [vmem:[#allocation2 + $0x688] sm:$0xff]  ;;  %v956_v23 = vld [vmem:[#allocation2 + $0x698] sm:$0xff]  ;;  %v953_v35 = vld [vmem:[#allocation2 + $0x680] sm:$0xff] }
 0x23c   :  { %v955_v24 = vld [vmem:[#allocation2 + $0x690] sm:$0xff]  ;;  %v970_v25 = vld [vmem:[#allocation2 + $0x708] sm:$0xff]  ;;  %v972_v26 = vld [vmem:[#allocation2 + $0x718] sm:$0xff] }
 0x23d   :  { %v969_v27 = vld [vmem:[#allocation2 + $0x700] sm:$0xff]  ;;  %v971_v28 = vld [vmem:[#allocation2 + $0x710] sm:$0xff]  ;;  %v986_v29 = vld [vmem:[#allocation2 + $0x788] sm:$0xff] }
 0x23e   :  { %1012 = vmatpush1.bf16.msra.mxu0 %v905_v12  ;;  %1055 = vmatpush1.bf16.msra.mxu1 %v907_v13  ;;  %v988_v30 = vld [vmem:[#allocation2 + $0x798] sm:$0xff]  ;;  %v985_v31 = vld [vmem:[#allocation2 + $0x780] sm:$0xff]  ;;  %v987_v32 = vld [vmem:[#allocation2 + $0x790] sm:$0xff] }
 0x23f   :  { %1013 = vmatprep.subr.bf16.mxu0 %v922_v14  ;;  %1056 = vmatprep.subr.bf16.mxu1 %v924_v15  ;;  %v878_v33 = vld [vmem:[#allocation2 + $0x428] sm:$0xff]  ;;  %v880_v34 = vld [vmem:[#allocation2 + $0x438] sm:$0xff]  ;;  %v877_v37 = vld [vmem:[#allocation2 + $0x420] sm:$0xff] }
 0x240   :  { %v7371_v36 = vld [vmem:[%s8035_s0 + $0x8] sm:$0xff]   ;;  %v879_v38 = vld [vmem:[#allocation2 + $0x430] sm:$0xff]  ;;  %v896_v40 = vld [vmem:[#allocation2 + $0x4b8] sm:$0xff] }
 0x241   :  { %v894_v39 = vld [vmem:[#allocation2 + $0x4a8] sm:$0xff]  ;;  %v893_v41 = vld [vmem:[#allocation2 + $0x4a0] sm:$0xff]  ;;  %v895_v42 = vld [vmem:[#allocation2 + $0x4b0] sm:$0xff] }
 0x242   :  { %1014 = vmatpush1.bf16.msra.mxu0 %v921_v16  ;;  %1057 = vmatpush1.bf16.msra.mxu1 %v923_v17  ;;  %v910_v43 = vld [vmem:[#allocation2 + $0x528] sm:$0xff]  ;;  %v912_v44 = vld [vmem:[#allocation2 + $0x538] sm:$0xff]  ;;  %v909_v45 = vld [vmem:[#allocation2 + $0x520] sm:$0xff] }
 0x243   :  { %1015 = vmatprep.subr.bf16.mxu0 %v938_v18  ;;  %1058 = vmatprep.subr.bf16.mxu1 %v940_v19  ;;  %v911_v46 = vld [vmem:[#allocation2 + $0x530] sm:$0xff]  ;;  %v926_v47 = vld [vmem:[#allocation2 + $0x5a8] sm:$0xff]  ;;  %v928_v48 = vld [vmem:[#allocation2 + $0x5b8] sm:$0xff] }
 0x244   :  { %v925_v49 = vld [vmem:[#allocation2 + $0x5a0] sm:$0xff]  ;;  %v927_v52 = vld [vmem:[#allocation2 + $0x5b0] sm:$0xff]  ;;  %v942_v55 = vld [vmem:[#allocation2 + $0x628] sm:$0xff] }
 0x245   :  { %v944_v59 = vld [vmem:[#allocation2 + $0x638] sm:$0xff]  ;;  %v941_v2 = vld [vmem:[#allocation2 + $0x620] sm:$0xff]  ;;  %v943_v3 = vld [vmem:[#allocation2 + $0x630] sm:$0xff] }
 0x246   :  { %1016 = vmatpush1.bf16.msra.mxu0 %v937_v20  ;;  %1059 = vmatpush1.bf16.msra.mxu1 %v939_v21  ;;  %v958_v4 = vld [vmem:[#allocation2 + $0x6a8] sm:$0xff]  ;;  %v960_v5 = vld [vmem:[#allocation2 + $0x6b8] sm:$0xff]  ;;  %v957_v6 = vld [vmem:[#allocation2 + $0x6a0] sm:$0xff] }
 0x247   :  { %1017 = vmatprep.subr.bf16.mxu0 %v954_v22  ;;  %1060 = vmatprep.subr.bf16.mxu1 %v956_v23  ;;  %v959_v7 = vld [vmem:[#allocation2 + $0x6b0] sm:$0xff]  ;;  %v974_v8 = vld [vmem:[#allocation2 + $0x728] sm:$0xff]  ;;  %v976_v9 = vld [vmem:[#allocation2 + $0x738] sm:$0xff] }
 0x248   :  { %v973_v10 = vld [vmem:[#allocation2 + $0x720] sm:$0xff]  ;;  %v975_v11 = vld [vmem:[#allocation2 + $0x730] sm:$0xff]  ;;  %v990_v12 = vld [vmem:[#allocation2 + $0x7a8] sm:$0xff] }
 0x249   :  { %v992_v13 = vld [vmem:[#allocation2 + $0x7b8] sm:$0xff]  ;;  %v989_v14 = vld [vmem:[#allocation2 + $0x7a0] sm:$0xff]  ;;  %v991_v15 = vld [vmem:[#allocation2 + $0x7b0] sm:$0xff] }
 0x24a   :  { %1018 = vmatpush1.bf16.msra.mxu0 %v953_v35  ;;  %1061 = vmatpush1.bf16.msra.mxu1 %v955_v24  ;;  %v882_v16 = vld [vmem:[#allocation2 + $0x448] sm:$0xff]  ;;  %v884_v17 = vld [vmem:[#allocation2 + $0x458] sm:$0xff]  ;;  %v881_v18 = vld [vmem:[#allocation2 + $0x440] sm:$0xff] }
 0x24b   :  { %1019 = vmatprep.subr.bf16.mxu0 %v970_v25  ;;  %1062 = vmatprep.subr.bf16.mxu1 %v972_v26  ;;  %v883_v19 = vld [vmem:[#allocation2 + $0x450] sm:$0xff]  ;;  %v898_v20 = vld [vmem:[#allocation2 + $0x4c8] sm:$0xff]  ;;  %v900_v21 = vld [vmem:[#allocation2 + $0x4d8] sm:$0xff] }
 0x24c   :  { %v897_v22 = vld [vmem:[#allocation2 + $0x4c0] sm:$0xff]  ;;  %v899_v23 = vld [vmem:[#allocation2 + $0x4d0] sm:$0xff]  ;;  %v914_v35 = vld [vmem:[#allocation2 + $0x548] sm:$0xff] }
 0x24d   :  { %v916_v24 = vld [vmem:[#allocation2 + $0x558] sm:$0xff]  ;;  %v913_v25 = vld [vmem:[#allocation2 + $0x540] sm:$0xff]  ;;  %v915_v26 = vld [vmem:[#allocation2 + $0x550] sm:$0xff] }
 0x24e   :  { %1020 = vmatpush1.bf16.msra.mxu0 %v969_v27  ;;  %1063 = vmatpush1.bf16.msra.mxu1 %v971_v28  ;;  %v930_v27 = vld [vmem:[#allocation2 + $0x5c8] sm:$0xff]  ;;  %v932_v28 = vld [vmem:[#allocation2 + $0x5d8] sm:$0xff] }
 0x24f   :  { %1021 = vmatprep.subr.bf16.mxu0 %v986_v29  ;;  %1064 = vmatprep.subr.bf16.mxu1 %v988_v30  ;;  %v929_v29 = vld [vmem:[#allocation2 + $0x5c0] sm:$0xff]  ;;  %v931_v30 = vld [vmem:[#allocation2 + $0x5d0] sm:$0xff] }
 0x252   :  { %1022 = vmatpush1.bf16.msra.mxu0 %v985_v31  ;;  %1065 = vmatpush1.bf16.msra.mxu1 %v987_v32  ;;  %v946_v31 = vld [vmem:[#allocation2 + $0x648] sm:$0xff]  ;;  %v948_v32 = vld [vmem:[#allocation2 + $0x658] sm:$0xff] }
 0x253   :  { %1093 = vmatprep.subr.bf16.mxu0 %v878_v33  ;;  %1136 = vmatprep.subr.bf16.mxu1 %v880_v34  ;;  %v945_v33 = vld [vmem:[#allocation2 + $0x640] sm:$0xff]  ;;  %v947_v34 = vld [vmem:[#allocation2 + $0x650] sm:$0xff] }
 0x255   :  { %1040 = vmatmul.mubr.bf16.vlgmr.msra.gmra.mrb[16].mxu0 %v7371_v36  ;;  %1083 = vmatmul.mubr.bf16.vlgmr.msra.gmra.mrb[16].mxu1 %v7371_v36 }
 0x256   :  { %1094 = vmatpush1.bf16.msra.mxu0 %v877_v37  ;;  %1137 = vmatpush1.bf16.msra.mxu1 %v879_v38  ;;  %v962_v37 = vld [vmem:[#allocation2 + $0x6c8] sm:$0xff]  ;;  %v964_v38 = vld [vmem:[#allocation2 + $0x6d8] sm:$0xff] }
 0x257   :  { %1095 = vmatprep.subr.bf16.mxu0 %v894_v39  ;;  %1138 = vmatprep.subr.bf16.mxu1 %v896_v40  ;;  %v961_v39 = vld [vmem:[#allocation2 + $0x6c0] sm:$0xff]  ;;  %v963_v40 = vld [vmem:[#allocation2 + $0x6d0] sm:$0xff] }
 0x258   :  { %1125 = vmatprep.mubr.bf16.mxu0 %v7053_v0  ;;  %1168 = vmatprep.mubr.bf16.mxu1 %v7053_v0 }
 0x25a   :  { %1096 = vmatpush1.bf16.msra.mxu0 %v893_v41  ;;  %1139 = vmatpush1.bf16.msra.mxu1 %v895_v42  ;;  %v978_v41 = vld [vmem:[#allocation2 + $0x748] sm:$0xff]  ;;  %v980_v42 = vld [vmem:[#allocation2 + $0x758] sm:$0xff] }
 0x25b   :  { %1097 = vmatprep.subr.bf16.mxu0 %v910_v43  ;;  %1140 = vmatprep.subr.bf16.mxu1 %v912_v44  ;;  %v977_v43 = vld [vmem:[#allocation2 + $0x740] sm:$0xff]  ;;  %v979_v44 = vld [vmem:[#allocation2 + $0x750] sm:$0xff] }
 0x25e   :  { %1098 = vmatpush1.bf16.msra.mxu0 %v909_v45  ;;  %1141 = vmatpush1.bf16.msra.mxu1 %v911_v46  ;;  %v994_v45 = vld [vmem:[#allocation2 + $0x7c8] sm:$0xff]  ;;  %v996_v46 = vld [vmem:[#allocation2 + $0x7d8] sm:$0xff] }
 0x25f   :  { %1099 = vmatprep.subr.bf16.mxu0 %v926_v47  ;;  %1142 = vmatprep.subr.bf16.mxu1 %v928_v48  ;;  %v993_v47 = vld [vmem:[#allocation2 + $0x7c0] sm:$0xff]  ;;  %v995_v48 = vld [vmem:[#allocation2 + $0x7d0] sm:$0xff] }
 0x262   :  { %1100 = vmatpush1.bf16.msra.mxu0 %v925_v49  ;;  %1143 = vmatpush1.bf16.msra.mxu1 %v927_v52  ;;  %v886_v49 = vld [vmem:[#allocation2 + $0x468] sm:$0xff]  ;;  %v888_v52 = vld [vmem:[#allocation2 + $0x478] sm:$0xff] }
 0x263   :  { %1101 = vmatprep.subr.bf16.mxu0 %v942_v55  ;;  %1144 = vmatprep.subr.bf16.mxu1 %v944_v59  ;;  %v885_v55 = vld [vmem:[#allocation2 + $0x460] sm:$0xff]  ;;  %v887_v59 = vld [vmem:[#allocation2 + $0x470] sm:$0xff] }
 0x266   :  { %1102 = vmatpush1.bf16.msra.mxu0 %v941_v2  ;;  %1145 = vmatpush1.bf16.msra.mxu1 %v943_v3  ;;  %v902_v2 = vld [vmem:[#allocation2 + $0x4e8] sm:$0xff]  ;;  %v904_v3 = vld [vmem:[#allocation2 + $0x4f8] sm:$0xff] }
 0x267   :  { %1103 = vmatprep.subr.bf16.mxu0 %v958_v4  ;;  %1146 = vmatprep.subr.bf16.mxu1 %v960_v5  ;;  %v901_v4 = vld [vmem:[#allocation2 + $0x4e0] sm:$0xff]  ;;  %v903_v5 = vld [vmem:[#allocation2 + $0x4f0] sm:$0xff] }
 0x26a   :  { %1104 = vmatpush1.bf16.msra.mxu0 %v957_v6  ;;  %1147 = vmatpush1.bf16.msra.mxu1 %v959_v7  ;;  %v918_v6 = vld [vmem:[#allocation2 + $0x568] sm:$0xff]  ;;  %v920_v7 = vld [vmem:[#allocation2 + $0x578] sm:$0xff] }
 0x26b   :  { %1105 = vmatprep.subr.bf16.mxu0 %v974_v8  ;;  %1148 = vmatprep.subr.bf16.mxu1 %v976_v9  ;;  %v917_v8 = vld [vmem:[#allocation2 + $0x560] sm:$0xff]  ;;  %v919_v9 = vld [vmem:[#allocation2 + $0x570] sm:$0xff] }
 0x26e   :  { %1106 = vmatpush1.bf16.msra.mxu0 %v973_v10  ;;  %1149 = vmatpush1.bf16.msra.mxu1 %v975_v11  ;;  %v934_v10 = vld [vmem:[#allocation2 + $0x5e8] sm:$0xff]  ;;  %v936_v11 = vld [vmem:[#allocation2 + $0x5f8] sm:$0xff] }
 0x26f   :  { %1107 = vmatprep.subr.bf16.mxu0 %v990_v12  ;;  %1150 = vmatprep.subr.bf16.mxu1 %v992_v13  ;;  %v933_v12 = vld [vmem:[#allocation2 + $0x5e0] sm:$0xff]  ;;  %v935_v13 = vld [vmem:[#allocation2 + $0x5f0] sm:$0xff] }
 0x272   :  { %1108 = vmatpush1.bf16.msra.mxu0 %v989_v14  ;;  %1151 = vmatpush1.bf16.msra.mxu1 %v991_v15  ;;  %v950_v14 = vld [vmem:[#allocation2 + $0x668] sm:$0xff]  ;;  %v952_v15 = vld [vmem:[#allocation2 + $0x678] sm:$0xff] }
 0x273   :  { %1179 = vmatprep.subr.bf16.mxu0 %v882_v16  ;;  %1222 = vmatprep.subr.bf16.mxu1 %v884_v17  ;;  %v949_v16 = vld [vmem:[#allocation2 + $0x660] sm:$0xff]  ;;  %v951_v17 = vld [vmem:[#allocation2 + $0x670] sm:$0xff] }
 0x275   :  { %1126 = vmatmul.mubr.bf16.vlgmr.msra.gmra.mrb[20].mxu0 %v7371_v36  ;;  %1169 = vmatmul.mubr.bf16.vlgmr.msra.gmra.mrb[20].mxu1 %v7371_v36 }
 0x276   :  { %1180 = vmatpush1.bf16.msra.mxu0 %v881_v18  ;;  %1223 = vmatpush1.bf16.msra.mxu1 %v883_v19  ;;  %v966_v18 = vld [vmem:[#allocation2 + $0x6e8] sm:$0xff]  ;;  %v968_v19 = vld [vmem:[#allocation2 + $0x6f8] sm:$0xff] }
 0x277   :  { %1181 = vmatprep.subr.bf16.mxu0 %v898_v20  ;;  %1224 = vmatprep.subr.bf16.mxu1 %v900_v21  ;;  %v965_v20 = vld [vmem:[#allocation2 + $0x6e0] sm:$0xff]  ;;  %v967_v21 = vld [vmem:[#allocation2 + $0x6f0] sm:$0xff] }
 0x278   :  { %1211 = vmatprep.mubr.bf16.mxu0 %v7053_v0  ;;  %1254 = vmatprep.mubr.bf16.mxu1 %v7053_v0 }
 0x27a   :  { %1182 = vmatpush1.bf16.msra.mxu0 %v897_v22  ;;  %1225 = vmatpush1.bf16.msra.mxu1 %v899_v23  ;;  %v982_v22 = vld [vmem:[#allocation2 + $0x768] sm:$0xff]  ;;  %v984_v23 = vld [vmem:[#allocation2 + $0x778] sm:$0xff] }
 0x27b   :  { %1183 = vmatprep.subr.bf16.mxu0 %v914_v35  ;;  %1226 = vmatprep.subr.bf16.mxu1 %v916_v24  ;;  %v981_v35 = vld [vmem:[#allocation2 + $0x760] sm:$0xff]  ;;  %v983_v24 = vld [vmem:[#allocation2 + $0x770] sm:$0xff] }
 0x27e   :  { %1184 = vmatpush1.bf16.msra.mxu0 %v913_v25  ;;  %1227 = vmatpush1.bf16.msra.mxu1 %v915_v26  ;;  %v998_v25 = vld [vmem:[#allocation2 + $0x7e8] sm:$0xff]  ;;  %v1000_v26 = vld [vmem:[#allocation2 + $0x7f8] sm:$0xff] }
 0x27f   :  { %1185 = vmatprep.subr.bf16.mxu0 %v930_v27  ;;  %1228 = vmatprep.subr.bf16.mxu1 %v932_v28  ;;  %v997_v27 = vld [vmem:[#allocation2 + $0x7e0] sm:$0xff]  ;;  %v999_v28 = vld [vmem:[#allocation2 + $0x7f0] sm:$0xff] }
 0x282   :  { %1186 = vmatpush1.bf16.msra.mxu0 %v929_v29  ;;  %1229 = vmatpush1.bf16.msra.mxu1 %v931_v30 }
 0x283   :  { %1187 = vmatprep.subr.bf16.mxu0 %v946_v31  ;;  %1230 = vmatprep.subr.bf16.mxu1 %v948_v32 }
 0x286   :  { %1188 = vmatpush1.bf16.msra.mxu0 %v945_v33  ;;  %1231 = vmatpush1.bf16.msra.mxu1 %v947_v34 }
 0x287   :  { %1189 = vmatprep.subr.bf16.mxu0 %v962_v37  ;;  %1232 = vmatprep.subr.bf16.mxu1 %v964_v38 }
 0x28a   :  { %1190 = vmatpush1.bf16.msra.mxu0 %v961_v39  ;;  %1233 = vmatpush1.bf16.msra.mxu1 %v963_v40 }
 0x28b   :  { %1191 = vmatprep.subr.bf16.mxu0 %v978_v41  ;;  %1234 = vmatprep.subr.bf16.mxu1 %v980_v42 }
 0x28e   :  { %1192 = vmatpush1.bf16.msra.mxu0 %v977_v43  ;;  %1235 = vmatpush1.bf16.msra.mxu1 %v979_v44 }
 0x28f   :  { %1193 = vmatprep.subr.bf16.mxu0 %v994_v45  ;;  %1236 = vmatprep.subr.bf16.mxu1 %v996_v46 }
 0x292   :  { %1194 = vmatpush1.bf16.msra.mxu0 %v993_v47  ;;  %1237 = vmatpush1.bf16.msra.mxu1 %v995_v48 }
 0x293   :  { %1265 = vmatprep.subr.bf16.mxu0 %v886_v49  ;;  %1308 = vmatprep.subr.bf16.mxu1 %v888_v52 }
 0x295   :  { %1212 = vmatmul.mubr.bf16.vlgmr.msra.gmra.mrb[24].mxu0 %v7371_v36  ;;  %1255 = vmatmul.mubr.bf16.vlgmr.msra.gmra.mrb[24].mxu1 %v7371_v36 }
 0x296   :  { %1266 = vmatpush1.bf16.msra.mxu0 %v885_v55  ;;  %1309 = vmatpush1.bf16.msra.mxu1 %v887_v59 }
 0x297   :  { %1267 = vmatprep.subr.bf16.mxu0 %v902_v2  ;;  %1310 = vmatprep.subr.bf16.mxu1 %v904_v3 }
 0x298   :  { %1297 = vmatprep.mubr.bf16.mxu0 %v7053_v0  ;;  %1340 = vmatprep.mubr.bf16.mxu1 %v7053_v0 }
 0x29a   :  { %1268 = vmatpush1.bf16.msra.mxu0 %v901_v4  ;;  %1311 = vmatpush1.bf16.msra.mxu1 %v903_v5 }
 0x29b   :  { %1269 = vmatprep.subr.bf16.mxu0 %v918_v6  ;;  %1312 = vmatprep.subr.bf16.mxu1 %v920_v7 }
 0x29e   :  { %1270 = vmatpush1.bf16.msra.mxu0 %v917_v8  ;;  %1313 = vmatpush1.bf16.msra.mxu1 %v919_v9 }
 0x29f   :  { %1271 = vmatprep.subr.bf16.mxu0 %v934_v10  ;;  %1314 = vmatprep.subr.bf16.mxu1 %v936_v11 }
 0x2a2   :  { %1272 = vmatpush1.bf16.msra.mxu0 %v933_v12  ;;  %1315 = vmatpush1.bf16.msra.mxu1 %v935_v13 }
 0x2a3   :  { %1273 = vmatprep.subr.bf16.mxu0 %v950_v14  ;;  %1316 = vmatprep.subr.bf16.mxu1 %v952_v15 }
 0x2a6   :  { %1274 = vmatpush1.bf16.msra.mxu0 %v949_v16  ;;  %1317 = vmatpush1.bf16.msra.mxu1 %v951_v17 }
 0x2a7   :  { %1275 = vmatprep.subr.bf16.mxu0 %v966_v18  ;;  %1318 = vmatprep.subr.bf16.mxu1 %v968_v19 }
 0x2aa   :  { %1276 = vmatpush1.bf16.msra.mxu0 %v965_v20  ;;  %1319 = vmatpush1.bf16.msra.mxu1 %v967_v21 }
 0x2ab   :  { %1277 = vmatprep.subr.bf16.mxu0 %v982_v22  ;;  %1320 = vmatprep.subr.bf16.mxu1 %v984_v23 }
 0x2ae   :  { %1278 = vmatpush1.bf16.msra.mxu0 %v981_v35  ;;  %1321 = vmatpush1.bf16.msra.mxu1 %v983_v24 }
 0x2af   :  { %1279 = vmatprep.subr.bf16.mxu0 %v998_v25  ;;  %1322 = vmatprep.subr.bf16.mxu1 %v1000_v26 }
 0x2b2   :  { %1280 = vmatpush1.bf16.msra.mxu0 %v997_v27  ;;  %1323 = vmatpush1.bf16.msra.mxu1 %v999_v28 }
 0x2b5   :  { %1298 = vmatmul.mubr.bf16.vlgmr.msra.gmra.mrb[28].mxu0 %v7371_v36  ;;  %1341 = vmatmul.mubr.bf16.vlgmr.msra.gmra.mrb[28].mxu1 %v7371_v36 }
 0x328   :  { %v1041_v29 = vpop.f32.mrb[16].mxu0  ;;  %v1084_v30 = vpop.f32.mrb[16].mxu1 }
 0x329   :  { %v1351_v31 = vmax.f32 %v1041_v29, %v1084_v30  ;;  %v1043_v32 = vpop.f32.mrb[17].mxu0  ;;  %v1086_v33 = vpop.f32.mrb[17].mxu1 }
 0x32a   :  { %v1352_v34 = vmax.f32 %v1043_v32, %v1086_v33  ;;  %v1045_v37 = vpop.f32.mrb[18].mxu0  ;;  %v1088_v38 = vpop.f32.mrb[18].mxu1 }
 0x32b   :  { %v1353_v39 = vmax.f32 %v1045_v37, %v1088_v38  ;;  %v1047_v40 = vpop.f32.mrb[19].mxu0  ;;  %v1090_v41 = vpop.f32.mrb[19].mxu1 }
 0x32c   :  { %v1354_v42 = vmax.f32 %v1047_v40, %v1090_v41 }
 0x348   :  { %v1127_v43 = vpop.f32.mrb[20].mxu0  ;;  %v1170_v44 = vpop.f32.mrb[20].mxu1 }
 0x349   :  { %v1355_v45 = vmax.f32 %v1351_v31, %v1127_v43  ;;  %v1129_v46 = vpop.f32.mrb[21].mxu0  ;;  %v1172_v47 = vpop.f32.mrb[21].mxu1 }
 0x34a   :  { %v1356_v48 = vmax.f32 %v1352_v34, %v1129_v46  ;;  %v1131_v49 = vpop.f32.mrb[22].mxu0  ;;  %v1174_v36 = vpop.f32.mrb[22].mxu1 }
 0x34b   :  { %v1359_v52 = vmax.f32 %v1355_v45, %v1170_v44  ;;  %v1357_v55 = vmax.f32 %v1353_v39, %v1131_v49  ;;  %v1133_v59 = vpop.f32.mrb[23].mxu0  ;;  %v1176_v2 = vpop.f32.mrb[23].mxu1 }
 0x34c   :  { %v1360_v3 = vmax.f32 %v1356_v48, %v1172_v47  ;;  %v1358_v4 = vmax.f32 %v1354_v42, %v1133_v59 }
 0x34d   :  { %v1361_v5 = vmax.f32 %v1357_v55, %v1174_v36 }
 0x34e   :  { %v1362_v6 = vmax.f32 %v1358_v4, %v1176_v2 }
 0x368   :  { %v1213_v7 = vpop.f32.mrb[24].mxu0  ;;  %v1256_v8 = vpop.f32.mrb[24].mxu1 }
 0x369   :  { %v1363_v9 = vmax.f32 %v1359_v52, %v1213_v7  ;;  %v1215_v10 = vpop.f32.mrb[25].mxu0  ;;  %v1258_v11 = vpop.f32.mrb[25].mxu1 }
 0x36a   :  { %v1364_v12 = vmax.f32 %v1360_v3, %v1215_v10  ;;  %v1217_v13 = vpop.f32.mrb[26].mxu0  ;;  %v1260_v14 = vpop.f32.mrb[26].mxu1 }
 0x36b   :  { %v1367_v15 = vmax.f32 %v1363_v9, %v1256_v8  ;;  %v1365_v16 = vmax.f32 %v1361_v5, %v1217_v13  ;;  %v1219_v17 = vpop.f32.mrb[27].mxu0  ;;  %v1262_v18 = vpop.f32.mrb[27].mxu1 }
 0x36c   :  { %v1368_v19 = vmax.f32 %v1364_v12, %v1258_v11  ;;  %v1366_v20 = vmax.f32 %v1362_v6, %v1219_v17 }
 0x36d   :  { %v1369_v21 = vmax.f32 %v1365_v16, %v1260_v14 }
 0x36e   :  { %v1370_v22 = vmax.f32 %v1366_v20, %v1262_v18 }
 0x388   :  { %v1299_v23 = vpop.f32.mrb[28].mxu0  ;;  %v7387_v35 = vpop.f32.mrb[28].mxu1 }
 0x389   :  { %v7389_v24 = vmax.f32 %v1367_v15, %v1299_v23  ;;  %v1301_v25 = vpop.f32.mrb[29].mxu0  ;;  %v7391_v26 = vpop.f32.mrb[29].mxu1 }
 0x38a   :  { %v7393_v27 = vmax.f32 %v1368_v19, %v1301_v25  ;;  %v1303_v28 = vpop.f32.mrb[30].mxu0  ;;  %v7395_v29 = vpop.f32.mrb[30].mxu1 }
 0x38b   :  { %v1375_v30 = vmax.f32 %v7389_v24, %v7387_v35  ;;  %v7399_v31 = vmax.f32 %v1369_v21, %v1303_v28  ;;  %v1305_v32 = vpop.f32.mrb[31].mxu0  ;;  %v7401_v33 = vpop.f32.mrb[31].mxu1 }
 0x38c   :  { %v1376_v34 = vmax.f32 %v7393_v27, %v7391_v26  ;;  %v7405_v37 = vmax.f32 %v1370_v22, %v1305_v32 }
 0x38d   :  { %v1377_v38 = vmax.f32 %v7399_v31, %v7395_v29 }
 0x38e   :  { %v1378_v39 = vmax.f32 %v7405_v37, %v7401_v33 }
 0x38f   :  { %7005 = dma.done.wait [#allocation7 + $0x2], 16384 }
 0x390   :  { %7006 = vsyncadd [#allocation7 + $0x2], 4294950912  ;;  %1550 = vmatprep.mubr.bf16.mxu0 %v7053_v0  ;;  %1593 = vmatprep.mubr.bf16.mxu1 %v7053_v0  ;;  %v1385_v40 = vld [vmem:[#allocation2 + $0x808] sm:$0xff]  ;;  %v1387_v41 = vld [vmem:[#allocation2 + $0x818] sm:$0xff] }
 0x391   :  { %v1384_v42 = vld [vmem:[#allocation2 + $0x800] sm:$0xff]  ;;  %1518 = vmatprep.subr.bf16.mxu0 %v1385_v40  ;;  %1561 = vmatprep.subr.bf16.mxu1 %v1387_v41  ;;  %v1386_v43 = vld [vmem:[#allocation2 + $0x810] sm:$0xff]  ;;  %v1401_v44 = vld [vmem:[#allocation2 + $0x888] sm:$0xff] }
 0x392   :  { %v1403_v45 = vld [vmem:[#allocation2 + $0x898] sm:$0xff]  ;;  %1519 = vmatpush1.bf16.msra.mxu0 %v1384_v42  ;;  %1562 = vmatpush1.bf16.msra.mxu1 %v1386_v43  ;;  %v1400_v46 = vld [vmem:[#allocation2 + $0x880] sm:$0xff]  ;;  %v1402_v47 = vld [vmem:[#allocation2 + $0x890] sm:$0xff] }
 0x393   :  { %1520 = vmatprep.subr.bf16.mxu0 %v1401_v44  ;;  %1563 = vmatprep.subr.bf16.mxu1 %v1403_v45  ;;  %v1417_v48 = vld [vmem:[#allocation2 + $0x908] sm:$0xff]  ;;  %v1419_v49 = vld [vmem:[#allocation2 + $0x918] sm:$0xff]  ;;  %v1416_v36 = vld [vmem:[#allocation2 + $0x900] sm:$0xff] }
 0x394   :  { %v1418_v52 = vld [vmem:[#allocation2 + $0x910] sm:$0xff]  ;;  %v1433_v55 = vld [vmem:[#allocation2 + $0x988] sm:$0xff]  ;;  %v1435_v59 = vld [vmem:[#allocation2 + $0x998] sm:$0xff] }
 0x395   :  { %v1432_v2 = vld [vmem:[#allocation2 + $0x980] sm:$0xff]  ;;  %v1434_v3 = vld [vmem:[#allocation2 + $0x990] sm:$0xff]  ;;  %v1449_v4 = vld [vmem:[#allocation2 + $0xa08] sm:$0xff] }
 0x396   :  { %1521 = vmatpush1.bf16.msra.mxu0 %v1400_v46  ;;  %1564 = vmatpush1.bf16.msra.mxu1 %v1402_v47  ;;  %v1451_v5 = vld [vmem:[#allocation2 + $0xa18] sm:$0xff]  ;;  %v1448_v6 = vld [vmem:[#allocation2 + $0xa00] sm:$0xff]  ;;  %v1450_v7 = vld [vmem:[#allocation2 + $0xa10] sm:$0xff] }
 0x397   :  { %1522 = vmatprep.subr.bf16.mxu0 %v1417_v48  ;;  %1565 = vmatprep.subr.bf16.mxu1 %v1419_v49  ;;  %v1465_v8 = vld [vmem:[#allocation2 + $0xa88] sm:$0xff]  ;;  %v1467_v9 = vld [vmem:[#allocation2 + $0xa98] sm:$0xff]  ;;  %v1464_v10 = vld [vmem:[#allocation2 + $0xa80] sm:$0xff] }
 0x398   :  { %v1466_v11 = vld [vmem:[#allocation2 + $0xa90] sm:$0xff]  ;;  %v1481_v12 = vld [vmem:[#allocation2 + $0xb08] sm:$0xff]  ;;  %v1483_v13 = vld [vmem:[#allocation2 + $0xb18] sm:$0xff] }
 0x399   :  { %v1480_v14 = vld [vmem:[#allocation2 + $0xb00] sm:$0xff]  ;;  %v1482_v15 = vld [vmem:[#allocation2 + $0xb10] sm:$0xff]  ;;  %v1497_v16 = vld [vmem:[#allocation2 + $0xb88] sm:$0xff] }
 0x39a   :  { %1523 = vmatpush1.bf16.msra.mxu0 %v1416_v36  ;;  %1566 = vmatpush1.bf16.msra.mxu1 %v1418_v52  ;;  %v1499_v17 = vld [vmem:[#allocation2 + $0xb98] sm:$0xff]  ;;  %v1496_v18 = vld [vmem:[#allocation2 + $0xb80] sm:$0xff]  ;;  %v1498_v19 = vld [vmem:[#allocation2 + $0xb90] sm:$0xff] }
 0x39b   :  { %1524 = vmatprep.subr.bf16.mxu0 %v1433_v55  ;;  %1567 = vmatprep.subr.bf16.mxu1 %v1435_v59  ;;  %v1389_v20 = vld [vmem:[#allocation2 + $0x828] sm:$0xff]  ;;  %v1391_v21 = vld [vmem:[#allocation2 + $0x838] sm:$0xff]  ;;  %v7416_v22 = vld [vmem:[%s8035_s0 + $0x10] sm:$0xff]  }
 0x39c   :  { %v1388_v23 = vld [vmem:[#allocation2 + $0x820] sm:$0xff]  ;;  %v1390_v25 = vld [vmem:[#allocation2 + $0x830] sm:$0xff]  ;;  %v1405_v28 = vld [vmem:[#allocation2 + $0x8a8] sm:$0xff] }
 0x39d   :  { %v1407_v32 = vld [vmem:[#allocation2 + $0x8b8] sm:$0xff]  ;;  %v1404_v40 = vld [vmem:[#allocation2 + $0x8a0] sm:$0xff]  ;;  %v1406_v41 = vld [vmem:[#allocation2 + $0x8b0] sm:$0xff] }
 0x39e   :  { %1525 = vmatpush1.bf16.msra.mxu0 %v1432_v2  ;;  %1568 = vmatpush1.bf16.msra.mxu1 %v1434_v3  ;;  %v1421_v42 = vld [vmem:[#allocation2 + $0x928] sm:$0xff]  ;;  %v1423_v43 = vld [vmem:[#allocation2 + $0x938] sm:$0xff]  ;;  %v1420_v44 = vld [vmem:[#allocation2 + $0x920] sm:$0xff] }
 0x39f   :  { %1526 = vmatprep.subr.bf16.mxu0 %v1449_v4  ;;  %1569 = vmatprep.subr.bf16.mxu1 %v1451_v5  ;;  %v1422_v45 = vld [vmem:[#allocation2 + $0x930] sm:$0xff]  ;;  %v1437_v46 = vld [vmem:[#allocation2 + $0x9a8] sm:$0xff]  ;;  %v1439_v47 = vld [vmem:[#allocation2 + $0x9b8] sm:$0xff] }
 0x3a0   :  { %v1436_v48 = vld [vmem:[#allocation2 + $0x9a0] sm:$0xff]  ;;  %v1438_v49 = vld [vmem:[#allocation2 + $0x9b0] sm:$0xff]  ;;  %v1453_v36 = vld [vmem:[#allocation2 + $0xa28] sm:$0xff] }
 0x3a1   :  { %v1455_v52 = vld [vmem:[#allocation2 + $0xa38] sm:$0xff]  ;;  %v1452_v55 = vld [vmem:[#allocation2 + $0xa20] sm:$0xff]  ;;  %v1454_v59 = vld [vmem:[#allocation2 + $0xa30] sm:$0xff] }
 0x3a2   :  { %1527 = vmatpush1.bf16.msra.mxu0 %v1448_v6  ;;  %1570 = vmatpush1.bf16.msra.mxu1 %v1450_v7  ;;  %v1469_v2 = vld [vmem:[#allocation2 + $0xaa8] sm:$0xff]  ;;  %v1471_v3 = vld [vmem:[#allocation2 + $0xab8] sm:$0xff]  ;;  %v1468_v4 = vld [vmem:[#allocation2 + $0xaa0] sm:$0xff] }
 0x3a3   :  { %1528 = vmatprep.subr.bf16.mxu0 %v1465_v8  ;;  %1571 = vmatprep.subr.bf16.mxu1 %v1467_v9  ;;  %v1470_v5 = vld [vmem:[#allocation2 + $0xab0] sm:$0xff]  ;;  %v1485_v6 = vld [vmem:[#allocation2 + $0xb28] sm:$0xff]  ;;  %v1487_v7 = vld [vmem:[#allocation2 + $0xb38] sm:$0xff] }
 0x3a4   :  { %v1484_v8 = vld [vmem:[#allocation2 + $0xb20] sm:$0xff]  ;;  %v1486_v9 = vld [vmem:[#allocation2 + $0xb30] sm:$0xff] }
 0x3a6   :  { %1529 = vmatpush1.bf16.msra.mxu0 %v1464_v10  ;;  %1572 = vmatpush1.bf16.msra.mxu1 %v1466_v11  ;;  %v1501_v10 = vld [vmem:[#allocation2 + $0xba8] sm:$0xff]  ;;  %v1503_v11 = vld [vmem:[#allocation2 + $0xbb8] sm:$0xff] }
 0x3a7   :  { %1530 = vmatprep.subr.bf16.mxu0 %v1481_v12  ;;  %1573 = vmatprep.subr.bf16.mxu1 %v1483_v13  ;;  %v1500_v12 = vld [vmem:[#allocation2 + $0xba0] sm:$0xff]  ;;  %v1502_v13 = vld [vmem:[#allocation2 + $0xbb0] sm:$0xff] }
 0x3aa   :  { %1531 = vmatpush1.bf16.msra.mxu0 %v1480_v14  ;;  %1574 = vmatpush1.bf16.msra.mxu1 %v1482_v15  ;;  %v1393_v14 = vld [vmem:[#allocation2 + $0x848] sm:$0xff]  ;;  %v1395_v15 = vld [vmem:[#allocation2 + $0x858] sm:$0xff] }
 0x3ab   :  { %1532 = vmatprep.subr.bf16.mxu0 %v1497_v16  ;;  %1575 = vmatprep.subr.bf16.mxu1 %v1499_v17  ;;  %v1392_v16 = vld [vmem:[#allocation2 + $0x840] sm:$0xff]  ;;  %v1394_v17 = vld [vmem:[#allocation2 + $0x850] sm:$0xff] }
 0x3ae   :  { %1533 = vmatpush1.bf16.msra.mxu0 %v1496_v18  ;;  %1576 = vmatpush1.bf16.msra.mxu1 %v1498_v19  ;;  %v1409_v18 = vld [vmem:[#allocation2 + $0x8c8] sm:$0xff]  ;;  %v1411_v19 = vld [vmem:[#allocation2 + $0x8d8] sm:$0xff] }
 0x3af   :  { %1604 = vmatprep.subr.bf16.mxu0 %v1389_v20  ;;  %1647 = vmatprep.subr.bf16.mxu1 %v1391_v21  ;;  %v1408_v20 = vld [vmem:[#allocation2 + $0x8c0] sm:$0xff]  ;;  %v1410_v21 = vld [vmem:[#allocation2 + $0x8d0] sm:$0xff] }
 0x3b1   :  { %1551 = vmatmul.mubr.bf16.vlgmr.msra.gmra.mrb[32].mxu0 %v7416_v22  ;;  %1594 = vmatmul.mubr.bf16.vlgmr.msra.gmra.mrb[32].mxu1 %v7416_v22 }
 0x3b2   :  { %1605 = vmatpush1.bf16.msra.mxu0 %v1388_v23  ;;  %1648 = vmatpush1.bf16.msra.mxu1 %v1390_v25  ;;  %v1425_v23 = vld [vmem:[#allocation2 + $0x948] sm:$0xff]  ;;  %v1427_v25 = vld [vmem:[#allocation2 + $0x958] sm:$0xff] }
 0x3b3   :  { %1606 = vmatprep.subr.bf16.mxu0 %v1405_v28  ;;  %1649 = vmatprep.subr.bf16.mxu1 %v1407_v32  ;;  %v1424_v28 = vld [vmem:[#allocation2 + $0x940] sm:$0xff]  ;;  %v1426_v32 = vld [vmem:[#allocation2 + $0x950] sm:$0xff] }
 0x3b4   :  { %1636 = vmatprep.mubr.bf16.mxu0 %v7053_v0  ;;  %1679 = vmatprep.mubr.bf16.mxu1 %v7053_v0 }
 0x3b6   :  { %1607 = vmatpush1.bf16.msra.mxu0 %v1404_v40  ;;  %1650 = vmatpush1.bf16.msra.mxu1 %v1406_v41  ;;  %v1441_v40 = vld [vmem:[#allocation2 + $0x9c8] sm:$0xff]  ;;  %v1443_v41 = vld [vmem:[#allocation2 + $0x9d8] sm:$0xff] }
 0x3b7   :  { %1608 = vmatprep.subr.bf16.mxu0 %v1421_v42  ;;  %1651 = vmatprep.subr.bf16.mxu1 %v1423_v43  ;;  %v1440_v42 = vld [vmem:[#allocation2 + $0x9c0] sm:$0xff]  ;;  %v1442_v43 = vld [vmem:[#allocation2 + $0x9d0] sm:$0xff] }
 0x3ba   :  { %1609 = vmatpush1.bf16.msra.mxu0 %v1420_v44  ;;  %1652 = vmatpush1.bf16.msra.mxu1 %v1422_v45  ;;  %v1457_v44 = vld [vmem:[#allocation2 + $0xa48] sm:$0xff]  ;;  %v1459_v45 = vld [vmem:[#allocation2 + $0xa58] sm:$0xff] }
 0x3bb   :  { %1610 = vmatprep.subr.bf16.mxu0 %v1437_v46  ;;  %1653 = vmatprep.subr.bf16.mxu1 %v1439_v47  ;;  %v1456_v46 = vld [vmem:[#allocation2 + $0xa40] sm:$0xff]  ;;  %v1458_v47 = vld [vmem:[#allocation2 + $0xa50] sm:$0xff] }
 0x3be   :  { %1611 = vmatpush1.bf16.msra.mxu0 %v1436_v48  ;;  %1654 = vmatpush1.bf16.msra.mxu1 %v1438_v49  ;;  %v1473_v48 = vld [vmem:[#allocation2 + $0xac8] sm:$0xff]  ;;  %v1475_v49 = vld [vmem:[#allocation2 + $0xad8] sm:$0xff] }
 0x3bf   :  { %1612 = vmatprep.subr.bf16.mxu0 %v1453_v36  ;;  %1655 = vmatprep.subr.bf16.mxu1 %v1455_v52  ;;  %v1472_v36 = vld [vmem:[#allocation2 + $0xac0] sm:$0xff]  ;;  %v1474_v52 = vld [vmem:[#allocation2 + $0xad0] sm:$0xff] }
 0x3c2   :  { %1613 = vmatpush1.bf16.msra.mxu0 %v1452_v55  ;;  %1656 = vmatpush1.bf16.msra.mxu1 %v1454_v59  ;;  %v1489_v55 = vld [vmem:[#allocation2 + $0xb48] sm:$0xff]  ;;  %v1491_v59 = vld [vmem:[#allocation2 + $0xb58] sm:$0xff] }
 0x3c3   :  { %1614 = vmatprep.subr.bf16.mxu0 %v1469_v2  ;;  %1657 = vmatprep.subr.bf16.mxu1 %v1471_v3  ;;  %v1488_v2 = vld [vmem:[#allocation2 + $0xb40] sm:$0xff]  ;;  %v1490_v3 = vld [vmem:[#allocation2 + $0xb50] sm:$0xff] }
 0x3c6   :  { %1615 = vmatpush1.bf16.msra.mxu0 %v1468_v4  ;;  %1658 = vmatpush1.bf16.msra.mxu1 %v1470_v5  ;;  %v1505_v4 = vld [vmem:[#allocation2 + $0xbc8] sm:$0xff]  ;;  %v1507_v5 = vld [vmem:[#allocation2 + $0xbd8] sm:$0xff] }
 0x3c7   :  { %1616 = vmatprep.subr.bf16.mxu0 %v1485_v6  ;;  %1659 = vmatprep.subr.bf16.mxu1 %v1487_v7  ;;  %v1504_v6 = vld [vmem:[#allocation2 + $0xbc0] sm:$0xff]  ;;  %v1506_v7 = vld [vmem:[#allocation2 + $0xbd0] sm:$0xff] }
 0x3ca   :  { %1617 = vmatpush1.bf16.msra.mxu0 %v1484_v8  ;;  %1660 = vmatpush1.bf16.msra.mxu1 %v1486_v9  ;;  %v1397_v8 = vld [vmem:[#allocation2 + $0x868] sm:$0xff]  ;;  %v1399_v9 = vld [vmem:[#allocation2 + $0x878] sm:$0xff] }
 0x3cb   :  { %1618 = vmatprep.subr.bf16.mxu0 %v1501_v10  ;;  %1661 = vmatprep.subr.bf16.mxu1 %v1503_v11  ;;  %v1396_v10 = vld [vmem:[#allocation2 + $0x860] sm:$0xff]  ;;  %v1398_v11 = vld [vmem:[#allocation2 + $0x870] sm:$0xff] }
 0x3ce   :  { %1619 = vmatpush1.bf16.msra.mxu0 %v1500_v12  ;;  %1662 = vmatpush1.bf16.msra.mxu1 %v1502_v13  ;;  %v1413_v12 = vld [vmem:[#allocation2 + $0x8e8] sm:$0xff]  ;;  %v1415_v13 = vld [vmem:[#allocation2 + $0x8f8] sm:$0xff] }
 0x3cf   :  { %1690 = vmatprep.subr.bf16.mxu0 %v1393_v14  ;;  %1733 = vmatprep.subr.bf16.mxu1 %v1395_v15  ;;  %v1412_v14 = vld [vmem:[#allocation2 + $0x8e0] sm:$0xff]  ;;  %v1414_v15 = vld [vmem:[#allocation2 + $0x8f0] sm:$0xff] }
 0x3d1   :  { %1637 = vmatmul.mubr.bf16.vlgmr.msra.gmra.mrb[36].mxu0 %v7416_v22  ;;  %1680 = vmatmul.mubr.bf16.vlgmr.msra.gmra.mrb[36].mxu1 %v7416_v22 }
 0x3d2   :  { %1691 = vmatpush1.bf16.msra.mxu0 %v1392_v16  ;;  %1734 = vmatpush1.bf16.msra.mxu1 %v1394_v17  ;;  %v1429_v16 = vld [vmem:[#allocation2 + $0x968] sm:$0xff]  ;;  %v1431_v17 = vld [vmem:[#allocation2 + $0x978] sm:$0xff] }
 0x3d3   :  { %1692 = vmatprep.subr.bf16.mxu0 %v1409_v18  ;;  %1735 = vmatprep.subr.bf16.mxu1 %v1411_v19  ;;  %v1428_v18 = vld [vmem:[#allocation2 + $0x960] sm:$0xff]  ;;  %v1430_v19 = vld [vmem:[#allocation2 + $0x970] sm:$0xff] }
 0x3d4   :  { %1722 = vmatprep.mubr.bf16.mxu0 %v7053_v0  ;;  %1765 = vmatprep.mubr.bf16.mxu1 %v7053_v0 }
 0x3d6   :  { %1693 = vmatpush1.bf16.msra.mxu0 %v1408_v20  ;;  %1736 = vmatpush1.bf16.msra.mxu1 %v1410_v21  ;;  %v1445_v20 = vld [vmem:[#allocation2 + $0x9e8] sm:$0xff]  ;;  %v1447_v21 = vld [vmem:[#allocation2 + $0x9f8] sm:$0xff] }
 0x3d7   :  { %1694 = vmatprep.subr.bf16.mxu0 %v1425_v23  ;;  %1737 = vmatprep.subr.bf16.mxu1 %v1427_v25  ;;  %v1444_v23 = vld [vmem:[#allocation2 + $0x9e0] sm:$0xff]  ;;  %v1446_v25 = vld [vmem:[#allocation2 + $0x9f0] sm:$0xff] }
 0x3da   :  { %1695 = vmatpush1.bf16.msra.mxu0 %v1424_v28  ;;  %1738 = vmatpush1.bf16.msra.mxu1 %v1426_v32  ;;  %v1461_v28 = vld [vmem:[#allocation2 + $0xa68] sm:$0xff]  ;;  %v1463_v32 = vld [vmem:[#allocation2 + $0xa78] sm:$0xff] }
 0x3db   :  { %1696 = vmatprep.subr.bf16.mxu0 %v1441_v40  ;;  %1739 = vmatprep.subr.bf16.mxu1 %v1443_v41  ;;  %v1460_v40 = vld [vmem:[#allocation2 + $0xa60] sm:$0xff]  ;;  %v1462_v41 = vld [vmem:[#allocation2 + $0xa70] sm:$0xff] }
 0x3de   :  { %1697 = vmatpush1.bf16.msra.mxu0 %v1440_v42  ;;  %1740 = vmatpush1.bf16.msra.mxu1 %v1442_v43  ;;  %v1477_v42 = vld [vmem:[#allocation2 + $0xae8] sm:$0xff]  ;;  %v1479_v43 = vld [vmem:[#allocation2 + $0xaf8] sm:$0xff] }
 0x3df   :  { %1698 = vmatprep.subr.bf16.mxu0 %v1457_v44  ;;  %1741 = vmatprep.subr.bf16.mxu1 %v1459_v45  ;;  %v1476_v44 = vld [vmem:[#allocation2 + $0xae0] sm:$0xff]  ;;  %v1478_v45 = vld [vmem:[#allocation2 + $0xaf0] sm:$0xff] }
 0x3e2   :  { %1699 = vmatpush1.bf16.msra.mxu0 %v1456_v46  ;;  %1742 = vmatpush1.bf16.msra.mxu1 %v1458_v47  ;;  %v1493_v46 = vld [vmem:[#allocation2 + $0xb68] sm:$0xff]  ;;  %v1495_v47 = vld [vmem:[#allocation2 + $0xb78] sm:$0xff] }
 0x3e3   :  { %1700 = vmatprep.subr.bf16.mxu0 %v1473_v48  ;;  %1743 = vmatprep.subr.bf16.mxu1 %v1475_v49  ;;  %v1492_v48 = vld [vmem:[#allocation2 + $0xb60] sm:$0xff]  ;;  %v1494_v49 = vld [vmem:[#allocation2 + $0xb70] sm:$0xff] }
 0x3e6   :  { %1701 = vmatpush1.bf16.msra.mxu0 %v1472_v36  ;;  %1744 = vmatpush1.bf16.msra.mxu1 %v1474_v52  ;;  %v1509_v36 = vld [vmem:[#allocation2 + $0xbe8] sm:$0xff]  ;;  %v1511_v52 = vld [vmem:[#allocation2 + $0xbf8] sm:$0xff] }
 0x3e7   :  { %1702 = vmatprep.subr.bf16.mxu0 %v1489_v55  ;;  %1745 = vmatprep.subr.bf16.mxu1 %v1491_v59  ;;  %v1508_v55 = vld [vmem:[#allocation2 + $0xbe0] sm:$0xff]  ;;  %v1510_v59 = vld [vmem:[#allocation2 + $0xbf0] sm:$0xff] }
 0x3ea   :  { %1703 = vmatpush1.bf16.msra.mxu0 %v1488_v2  ;;  %1746 = vmatpush1.bf16.msra.mxu1 %v1490_v3 }
 0x3eb   :  { %1704 = vmatprep.subr.bf16.mxu0 %v1505_v4  ;;  %1747 = vmatprep.subr.bf16.mxu1 %v1507_v5 }
 0x3ee   :  { %1705 = vmatpush1.bf16.msra.mxu0 %v1504_v6  ;;  %1748 = vmatpush1.bf16.msra.mxu1 %v1506_v7 }
 0x3ef   :  { %1776 = vmatprep.subr.bf16.mxu0 %v1397_v8  ;;  %1819 = vmatprep.subr.bf16.mxu1 %v1399_v9 }
 0x3f1   :  { %1723 = vmatmul.mubr.bf16.vlgmr.msra.gmra.mrb[40].mxu0 %v7416_v22  ;;  %1766 = vmatmul.mubr.bf16.vlgmr.msra.gmra.mrb[40].mxu1 %v7416_v22 }
 0x3f2   :  { %1777 = vmatpush1.bf16.msra.mxu0 %v1396_v10  ;;  %1820 = vmatpush1.bf16.msra.mxu1 %v1398_v11 }
 0x3f3   :  { %1778 = vmatprep.subr.bf16.mxu0 %v1413_v12  ;;  %1821 = vmatprep.subr.bf16.mxu1 %v1415_v13 }
 0x3f4   :  { %1808 = vmatprep.mubr.bf16.mxu0 %v7053_v0  ;;  %1851 = vmatprep.mubr.bf16.mxu1 %v7053_v0 }
 0x3f6   :  { %1779 = vmatpush1.bf16.msra.mxu0 %v1412_v14  ;;  %1822 = vmatpush1.bf16.msra.mxu1 %v1414_v15 }
 0x3f7   :  { %1780 = vmatprep.subr.bf16.mxu0 %v1429_v16  ;;  %1823 = vmatprep.subr.bf16.mxu1 %v1431_v17 }
 0x3fa   :  { %1781 = vmatpush1.bf16.msra.mxu0 %v1428_v18  ;;  %1824 = vmatpush1.bf16.msra.mxu1 %v1430_v19 }
 0x3fb   :  { %1782 = vmatprep.subr.bf16.mxu0 %v1445_v20  ;;  %1825 = vmatprep.subr.bf16.mxu1 %v1447_v21 }
 0x3fe   :  { %1783 = vmatpush1.bf16.msra.mxu0 %v1444_v23  ;;  %1826 = vmatpush1.bf16.msra.mxu1 %v1446_v25 }
 0x3ff   :  { %1784 = vmatprep.subr.bf16.mxu0 %v1461_v28  ;;  %1827 = vmatprep.subr.bf16.mxu1 %v1463_v32 }
 0x402   :  { %1785 = vmatpush1.bf16.msra.mxu0 %v1460_v40  ;;  %1828 = vmatpush1.bf16.msra.mxu1 %v1462_v41 }
 0x403   :  { %1786 = vmatprep.subr.bf16.mxu0 %v1477_v42  ;;  %1829 = vmatprep.subr.bf16.mxu1 %v1479_v43 }
 0x406   :  { %1787 = vmatpush1.bf16.msra.mxu0 %v1476_v44  ;;  %1830 = vmatpush1.bf16.msra.mxu1 %v1478_v45 }
 0x407   :  { %1788 = vmatprep.subr.bf16.mxu0 %v1493_v46  ;;  %1831 = vmatprep.subr.bf16.mxu1 %v1495_v47 }
 0x40a   :  { %1789 = vmatpush1.bf16.msra.mxu0 %v1492_v48  ;;  %1832 = vmatpush1.bf16.msra.mxu1 %v1494_v49 }
 0x40b   :  { %1790 = vmatprep.subr.bf16.mxu0 %v1509_v36  ;;  %1833 = vmatprep.subr.bf16.mxu1 %v1511_v52 }
 0x40e   :  { %1791 = vmatpush1.bf16.msra.mxu0 %v1508_v55  ;;  %1834 = vmatpush1.bf16.msra.mxu1 %v1510_v59 }
 0x411   :  { %1809 = vmatmul.mubr.bf16.vlgmr.msra.gmra.mrb[44].mxu0 %v7416_v22  ;;  %1852 = vmatmul.mubr.bf16.vlgmr.msra.gmra.mrb[44].mxu1 %v7416_v22 }
 0x484   :  { %v1552_v2 = vpop.f32.mrb[32].mxu0  ;;  %v1595_v3 = vpop.f32.mrb[32].mxu1 }
 0x485   :  { %v1862_v4 = vmax.f32 %v1552_v2, %v1595_v3  ;;  %v1554_v5 = vpop.f32.mrb[33].mxu0  ;;  %v1597_v6 = vpop.f32.mrb[33].mxu1 }
 0x486   :  { %v1863_v7 = vmax.f32 %v1554_v5, %v1597_v6  ;;  %v1556_v8 = vpop.f32.mrb[34].mxu0  ;;  %v1599_v9 = vpop.f32.mrb[34].mxu1 }
 0x487   :  { %v1864_v10 = vmax.f32 %v1556_v8, %v1599_v9  ;;  %v1558_v11 = vpop.f32.mrb[35].mxu0  ;;  %v1601_v12 = vpop.f32.mrb[35].mxu1 }
 0x488   :  { %v1865_v13 = vmax.f32 %v1558_v11, %v1601_v12 }
 0x4a4   :  { %v1638_v14 = vpop.f32.mrb[36].mxu0  ;;  %v1681_v15 = vpop.f32.mrb[36].mxu1 }
 0x4a5   :  { %v1866_v16 = vmax.f32 %v1862_v4, %v1638_v14  ;;  %v1640_v17 = vpop.f32.mrb[37].mxu0  ;;  %v1683_v18 = vpop.f32.mrb[37].mxu1 }
 0x4a6   :  { %v1867_v19 = vmax.f32 %v1863_v7, %v1640_v17  ;;  %v1642_v20 = vpop.f32.mrb[38].mxu0  ;;  %v1685_v22 = vpop.f32.mrb[38].mxu1 }
 0x4a7   :  { %v1870_v21 = vmax.f32 %v1866_v16, %v1681_v15  ;;  %v1868_v23 = vmax.f32 %v1864_v10, %v1642_v20  ;;  %v1644_v25 = vpop.f32.mrb[39].mxu0  ;;  %v1687_v28 = vpop.f32.mrb[39].mxu1 }
 0x4a8   :  { %v1871_v32 = vmax.f32 %v1867_v19, %v1683_v18  ;;  %v1869_v40 = vmax.f32 %v1865_v13, %v1644_v25 }
 0x4a9   :  { %v1872_v41 = vmax.f32 %v1868_v23, %v1685_v22 }
 0x4aa   :  { %v1873_v42 = vmax.f32 %v1869_v40, %v1687_v28 }
 0x4c4   :  { %v1724_v43 = vpop.f32.mrb[40].mxu0  ;;  %v1767_v44 = vpop.f32.mrb[40].mxu1 }
 0x4c5   :  { %v1874_v45 = vmax.f32 %v1870_v21, %v1724_v43  ;;  %v1726_v46 = vpop.f32.mrb[41].mxu0  ;;  %v1769_v47 = vpop.f32.mrb[41].mxu1 }
 0x4c6   :  { %v1875_v48 = vmax.f32 %v1871_v32, %v1726_v46  ;;  %v1728_v49 = vpop.f32.mrb[42].mxu0  ;;  %v1771_v36 = vpop.f32.mrb[42].mxu1 }
 0x4c7   :  { %v1878_v52 = vmax.f32 %v1874_v45, %v1767_v44  ;;  %v1876_v55 = vmax.f32 %v1872_v41, %v1728_v49  ;;  %v1730_v59 = vpop.f32.mrb[43].mxu0  ;;  %v1773_v2 = vpop.f32.mrb[43].mxu1 }
 0x4c8   :  { %v1879_v3 = vmax.f32 %v1875_v48, %v1769_v47  ;;  %v1877_v4 = vmax.f32 %v1873_v42, %v1730_v59 }
 0x4c9   :  { %v1880_v5 = vmax.f32 %v1876_v55, %v1771_v36 }
 0x4ca   :  { %v1881_v6 = vmax.f32 %v1877_v4, %v1773_v2 }
 0x4e4   :  { %v1810_v7 = vpop.f32.mrb[44].mxu0  ;;  %v7432_v8 = vpop.f32.mrb[44].mxu1 }
 0x4e5   :  { %v7434_v9 = vmax.f32 %v1878_v52, %v1810_v7  ;;  %v1812_v10 = vpop.f32.mrb[45].mxu0  ;;  %v7436_v11 = vpop.f32.mrb[45].mxu1 }
 0x4e6   :  { %v7438_v12 = vmax.f32 %v1879_v3, %v1812_v10  ;;  %v1814_v13 = vpop.f32.mrb[46].mxu0  ;;  %v7440_v14 = vpop.f32.mrb[46].mxu1 }
 0x4e7   :  { %v1886_v15 = vmax.f32 %v7434_v9, %v7432_v8  ;;  %v7444_v16 = vmax.f32 %v1880_v5, %v1814_v13  ;;  %v1816_v17 = vpop.f32.mrb[47].mxu0  ;;  %v7446_v18 = vpop.f32.mrb[47].mxu1 }
 0x4e8   :  { %v1887_v19 = vmax.f32 %v7438_v12, %v7436_v11  ;;  %v7450_v20 = vmax.f32 %v1881_v6, %v1816_v17 }
 0x4e9   :  { %v1888_v22 = vmax.f32 %v7444_v16, %v7440_v14 }
 0x4ea   :  { %v1889_v21 = vmax.f32 %v7450_v20, %v7446_v18 }
 0x4eb   :  { %7007 = dma.done.wait [#allocation7 + $0x3], 16384 }
 0x4ec   :  { %7008 = vsyncadd [#allocation7 + $0x3], 4294950912  ;;  %2061 = vmatprep.mubr.bf16.mxu0 %v7053_v0  ;;  %2104 = vmatprep.mubr.bf16.mxu1 %v7053_v0  ;;  %v1896_v23 = vld [vmem:[#allocation2 + $0xc08] sm:$0xff]  ;;  %v1898_v25 = vld [vmem:[#allocation2 + $0xc18] sm:$0xff] }
 0x4ed   :  { %v1895_v28 = vld [vmem:[#allocation2 + $0xc00] sm:$0xff]  ;;  %2029 = vmatprep.subr.bf16.mxu0 %v1896_v23  ;;  %2072 = vmatprep.subr.bf16.mxu1 %v1898_v25  ;;  %v1897_v32 = vld [vmem:[#allocation2 + $0xc10] sm:$0xff]  ;;  %v1912_v40 = vld [vmem:[#allocation2 + $0xc88] sm:$0xff] }
 0x4ee   :  { %v1914_v41 = vld [vmem:[#allocation2 + $0xc98] sm:$0xff]  ;;  %2030 = vmatpush1.bf16.msra.mxu0 %v1895_v28  ;;  %2073 = vmatpush1.bf16.msra.mxu1 %v1897_v32  ;;  %v1911_v42 = vld [vmem:[#allocation2 + $0xc80] sm:$0xff]  ;;  %v1913_v43 = vld [vmem:[#allocation2 + $0xc90] sm:$0xff] }
 0x4ef   :  { %2031 = vmatprep.subr.bf16.mxu0 %v1912_v40  ;;  %2074 = vmatprep.subr.bf16.mxu1 %v1914_v41  ;;  %v1928_v44 = vld [vmem:[#allocation2 + $0xd08] sm:$0xff]  ;;  %v1930_v45 = vld [vmem:[#allocation2 + $0xd18] sm:$0xff]  ;;  %v1927_v46 = vld [vmem:[#allocation2 + $0xd00] sm:$0xff] }
 0x4f0   :  { %v1929_v47 = vld [vmem:[#allocation2 + $0xd10] sm:$0xff]  ;;  %v1944_v48 = vld [vmem:[#allocation2 + $0xd88] sm:$0xff]  ;;  %v1946_v49 = vld [vmem:[#allocation2 + $0xd98] sm:$0xff] }
 0x4f1   :  { %v1943_v36 = vld [vmem:[#allocation2 + $0xd80] sm:$0xff]  ;;  %v1945_v52 = vld [vmem:[#allocation2 + $0xd90] sm:$0xff]  ;;  %v1960_v55 = vld [vmem:[#allocation2 + $0xe08] sm:$0xff] }
 0x4f2   :  { %2032 = vmatpush1.bf16.msra.mxu0 %v1911_v42  ;;  %2075 = vmatpush1.bf16.msra.mxu1 %v1913_v43  ;;  %v1962_v59 = vld [vmem:[#allocation2 + $0xe18] sm:$0xff]  ;;  %v1959_v2 = vld [vmem:[#allocation2 + $0xe00] sm:$0xff]  ;;  %v1961_v3 = vld [vmem:[#allocation2 + $0xe10] sm:$0xff] }
 0x4f3   :  { %2033 = vmatprep.subr.bf16.mxu0 %v1928_v44  ;;  %2076 = vmatprep.subr.bf16.mxu1 %v1930_v45  ;;  %v1976_v4 = vld [vmem:[#allocation2 + $0xe88] sm:$0xff]  ;;  %v1978_v5 = vld [vmem:[#allocation2 + $0xe98] sm:$0xff]  ;;  %v1975_v6 = vld [vmem:[#allocation2 + $0xe80] sm:$0xff] }
 0x4f4   :  { %v1977_v7 = vld [vmem:[#allocation2 + $0xe90] sm:$0xff]  ;;  %v1992_v10 = vld [vmem:[#allocation2 + $0xf08] sm:$0xff]  ;;  %v1994_v13 = vld [vmem:[#allocation2 + $0xf18] sm:$0xff] }
 0x4f5   :  { %v1991_v17 = vld [vmem:[#allocation2 + $0xf00] sm:$0xff]  ;;  %v1993_v23 = vld [vmem:[#allocation2 + $0xf10] sm:$0xff]  ;;  %v2008_v25 = vld [vmem:[#allocation2 + $0xf88] sm:$0xff] }
 0x4f6   :  { %2034 = vmatpush1.bf16.msra.mxu0 %v1927_v46  ;;  %2077 = vmatpush1.bf16.msra.mxu1 %v1929_v47  ;;  %v2010_v28 = vld [vmem:[#allocation2 + $0xf98] sm:$0xff]  ;;  %v2007_v32 = vld [vmem:[#allocation2 + $0xf80] sm:$0xff]  ;;  %v2009_v40 = vld [vmem:[#allocation2 + $0xf90] sm:$0xff] }
 0x4f7   :  { %2035 = vmatprep.subr.bf16.mxu0 %v1944_v48  ;;  %2078 = vmatprep.subr.bf16.mxu1 %v1946_v49  ;;  %v1900_v41 = vld [vmem:[#allocation2 + $0xc28] sm:$0xff]  ;;  %v1902_v42 = vld [vmem:[#allocation2 + $0xc38] sm:$0xff]  ;;  %v1899_v44 = vld [vmem:[#allocation2 + $0xc20] sm:$0xff] }
 0x4f8   :  { %v7461_v43 = vld [vmem:[%s8035_s0 + $0x18] sm:$0xff]   ;;  %v1901_v45 = vld [vmem:[#allocation2 + $0xc30] sm:$0xff]  ;;  %v1916_v46 = vld [vmem:[#allocation2 + $0xca8] sm:$0xff] }
 0x4f9   :  { %v1918_v47 = vld [vmem:[#allocation2 + $0xcb8] sm:$0xff]  ;;  %v1915_v48 = vld [vmem:[#allocation2 + $0xca0] sm:$0xff]  ;;  %v1917_v49 = vld [vmem:[#allocation2 + $0xcb0] sm:$0xff] }
 0x4fa   :  { %2036 = vmatpush1.bf16.msra.mxu0 %v1943_v36  ;;  %2079 = vmatpush1.bf16.msra.mxu1 %v1945_v52  ;;  %v1932_v36 = vld [vmem:[#allocation2 + $0xd28] sm:$0xff]  ;;  %v1934_v52 = vld [vmem:[#allocation2 + $0xd38] sm:$0xff] }
 0x4fb   :  { %2037 = vmatprep.subr.bf16.mxu0 %v1960_v55  ;;  %2080 = vmatprep.subr.bf16.mxu1 %v1962_v59  ;;  %v1931_v55 = vld [vmem:[#allocation2 + $0xd20] sm:$0xff]  ;;  %v1933_v59 = vld [vmem:[#allocation2 + $0xd30] sm:$0xff] }
 0x4fe   :  { %2038 = vmatpush1.bf16.msra.mxu0 %v1959_v2  ;;  %2081 = vmatpush1.bf16.msra.mxu1 %v1961_v3  ;;  %v1948_v2 = vld [vmem:[#allocation2 + $0xda8] sm:$0xff]  ;;  %v1950_v3 = vld [vmem:[#allocation2 + $0xdb8] sm:$0xff] }
 0x4ff   :  { %2039 = vmatprep.subr.bf16.mxu0 %v1976_v4  ;;  %2082 = vmatprep.subr.bf16.mxu1 %v1978_v5  ;;  %v1947_v4 = vld [vmem:[#allocation2 + $0xda0] sm:$0xff]  ;;  %v1949_v5 = vld [vmem:[#allocation2 + $0xdb0] sm:$0xff] }
 0x502   :  { %2040 = vmatpush1.bf16.msra.mxu0 %v1975_v6  ;;  %2083 = vmatpush1.bf16.msra.mxu1 %v1977_v7  ;;  %v1964_v6 = vld [vmem:[#allocation2 + $0xe28] sm:$0xff]  ;;  %v1966_v7 = vld [vmem:[#allocation2 + $0xe38] sm:$0xff] }
 0x503   :  { %2041 = vmatprep.subr.bf16.mxu0 %v1992_v10  ;;  %2084 = vmatprep.subr.bf16.mxu1 %v1994_v13  ;;  %v1963_v10 = vld [vmem:[#allocation2 + $0xe20] sm:$0xff]  ;;  %v1965_v13 = vld [vmem:[#allocation2 + $0xe30] sm:$0xff] }
 0x506   :  { %2042 = vmatpush1.bf16.msra.mxu0 %v1991_v17  ;;  %2085 = vmatpush1.bf16.msra.mxu1 %v1993_v23  ;;  %v1980_v17 = vld [vmem:[#allocation2 + $0xea8] sm:$0xff]  ;;  %v1982_v23 = vld [vmem:[#allocation2 + $0xeb8] sm:$0xff] }
 0x507   :  { %2043 = vmatprep.subr.bf16.mxu0 %v2008_v25  ;;  %2086 = vmatprep.subr.bf16.mxu1 %v2010_v28  ;;  %v1979_v25 = vld [vmem:[#allocation2 + $0xea0] sm:$0xff]  ;;  %v1981_v28 = vld [vmem:[#allocation2 + $0xeb0] sm:$0xff] }
 0x50a   :  { %2044 = vmatpush1.bf16.msra.mxu0 %v2007_v32  ;;  %2087 = vmatpush1.bf16.msra.mxu1 %v2009_v40  ;;  %v1996_v32 = vld [vmem:[#allocation2 + $0xf28] sm:$0xff]  ;;  %v1998_v40 = vld [vmem:[#allocation2 + $0xf38] sm:$0xff] }
 0x50b   :  { %2115 = vmatprep.subr.bf16.mxu0 %v1900_v41  ;;  %2158 = vmatprep.subr.bf16.mxu1 %v1902_v42  ;;  %v1995_v41 = vld [vmem:[#allocation2 + $0xf20] sm:$0xff]  ;;  %v1997_v42 = vld [vmem:[#allocation2 + $0xf30] sm:$0xff] }
 0x50d   :  { %2062 = vmatmul.mubr.bf16.vlgmr.msra.gmra.mrb[48].mxu0 %v7461_v43  ;;  %2105 = vmatmul.mubr.bf16.vlgmr.msra.gmra.mrb[48].mxu1 %v7461_v43 }
 0x50e   :  { %2116 = vmatpush1.bf16.msra.mxu0 %v1899_v44  ;;  %2159 = vmatpush1.bf16.msra.mxu1 %v1901_v45  ;;  %v2012_v44 = vld [vmem:[#allocation2 + $0xfa8] sm:$0xff]  ;;  %v2014_v45 = vld [vmem:[#allocation2 + $0xfb8] sm:$0xff] }
 0x50f   :  { %2117 = vmatprep.subr.bf16.mxu0 %v1916_v46  ;;  %2160 = vmatprep.subr.bf16.mxu1 %v1918_v47  ;;  %v2011_v46 = vld [vmem:[#allocation2 + $0xfa0] sm:$0xff]  ;;  %v2013_v47 = vld [vmem:[#allocation2 + $0xfb0] sm:$0xff] }
 0x510   :  { %2147 = vmatprep.mubr.bf16.mxu0 %v7053_v0  ;;  %2190 = vmatprep.mubr.bf16.mxu1 %v7053_v0 }
 0x512   :  { %2118 = vmatpush1.bf16.msra.mxu0 %v1915_v48  ;;  %2161 = vmatpush1.bf16.msra.mxu1 %v1917_v49  ;;  %v1904_v48 = vld [vmem:[#allocation2 + $0xc48] sm:$0xff]  ;;  %v1906_v49 = vld [vmem:[#allocation2 + $0xc58] sm:$0xff] }
 0x513   :  { %2119 = vmatprep.subr.bf16.mxu0 %v1932_v36  ;;  %2162 = vmatprep.subr.bf16.mxu1 %v1934_v52  ;;  %v1903_v36 = vld [vmem:[#allocation2 + $0xc40] sm:$0xff]  ;;  %v1905_v52 = vld [vmem:[#allocation2 + $0xc50] sm:$0xff] }
 0x516   :  { %2120 = vmatpush1.bf16.msra.mxu0 %v1931_v55  ;;  %2163 = vmatpush1.bf16.msra.mxu1 %v1933_v59  ;;  %v1920_v55 = vld [vmem:[#allocation2 + $0xcc8] sm:$0xff]  ;;  %v1922_v59 = vld [vmem:[#allocation2 + $0xcd8] sm:$0xff] }
 0x517   :  { %2121 = vmatprep.subr.bf16.mxu0 %v1948_v2  ;;  %2164 = vmatprep.subr.bf16.mxu1 %v1950_v3  ;;  %v1919_v2 = vld [vmem:[#allocation2 + $0xcc0] sm:$0xff]  ;;  %v1921_v3 = vld [vmem:[#allocation2 + $0xcd0] sm:$0xff] }
 0x51a   :  { %2122 = vmatpush1.bf16.msra.mxu0 %v1947_v4  ;;  %2165 = vmatpush1.bf16.msra.mxu1 %v1949_v5  ;;  %v1936_v4 = vld [vmem:[#allocation2 + $0xd48] sm:$0xff]  ;;  %v1938_v5 = vld [vmem:[#allocation2 + $0xd58] sm:$0xff] }
 0x51b   :  { %2123 = vmatprep.subr.bf16.mxu0 %v1964_v6  ;;  %2166 = vmatprep.subr.bf16.mxu1 %v1966_v7  ;;  %v1935_v6 = vld [vmem:[#allocation2 + $0xd40] sm:$0xff]  ;;  %v1937_v7 = vld [vmem:[#allocation2 + $0xd50] sm:$0xff] }
 0x51e   :  { %2124 = vmatpush1.bf16.msra.mxu0 %v1963_v10  ;;  %2167 = vmatpush1.bf16.msra.mxu1 %v1965_v13  ;;  %v1952_v10 = vld [vmem:[#allocation2 + $0xdc8] sm:$0xff]  ;;  %v1954_v13 = vld [vmem:[#allocation2 + $0xdd8] sm:$0xff] }
 0x51f   :  { %2125 = vmatprep.subr.bf16.mxu0 %v1980_v17  ;;  %2168 = vmatprep.subr.bf16.mxu1 %v1982_v23  ;;  %v1951_v17 = vld [vmem:[#allocation2 + $0xdc0] sm:$0xff]  ;;  %v1953_v23 = vld [vmem:[#allocation2 + $0xdd0] sm:$0xff] }
 0x522   :  { %2126 = vmatpush1.bf16.msra.mxu0 %v1979_v25  ;;  %2169 = vmatpush1.bf16.msra.mxu1 %v1981_v28  ;;  %v1968_v25 = vld [vmem:[#allocation2 + $0xe48] sm:$0xff]  ;;  %v1970_v28 = vld [vmem:[#allocation2 + $0xe58] sm:$0xff] }
 0x523   :  { %2127 = vmatprep.subr.bf16.mxu0 %v1996_v32  ;;  %2170 = vmatprep.subr.bf16.mxu1 %v1998_v40  ;;  %v1967_v32 = vld [vmem:[#allocation2 + $0xe40] sm:$0xff]  ;;  %v1969_v40 = vld [vmem:[#allocation2 + $0xe50] sm:$0xff] }
 0x526   :  { %2128 = vmatpush1.bf16.msra.mxu0 %v1995_v41  ;;  %2171 = vmatpush1.bf16.msra.mxu1 %v1997_v42  ;;  %v1984_v41 = vld [vmem:[#allocation2 + $0xec8] sm:$0xff]  ;;  %v1986_v42 = vld [vmem:[#allocation2 + $0xed8] sm:$0xff] }
 0x527   :  { %2129 = vmatprep.subr.bf16.mxu0 %v2012_v44  ;;  %2172 = vmatprep.subr.bf16.mxu1 %v2014_v45  ;;  %v1983_v44 = vld [vmem:[#allocation2 + $0xec0] sm:$0xff]  ;;  %v1985_v45 = vld [vmem:[#allocation2 + $0xed0] sm:$0xff] }
 0x52a   :  { %2130 = vmatpush1.bf16.msra.mxu0 %v2011_v46  ;;  %2173 = vmatpush1.bf16.msra.mxu1 %v2013_v47  ;;  %v2000_v46 = vld [vmem:[#allocation2 + $0xf48] sm:$0xff]  ;;  %v2002_v47 = vld [vmem:[#allocation2 + $0xf58] sm:$0xff] }
 0x52b   :  { %2201 = vmatprep.subr.bf16.mxu0 %v1904_v48  ;;  %2244 = vmatprep.subr.bf16.mxu1 %v1906_v49  ;;  %v1999_v48 = vld [vmem:[#allocation2 + $0xf40] sm:$0xff]  ;;  %v2001_v49 = vld [vmem:[#allocation2 + $0xf50] sm:$0xff] }
 0x52d   :  { %2148 = vmatmul.mubr.bf16.vlgmr.msra.gmra.mrb[52].mxu0 %v7461_v43  ;;  %2191 = vmatmul.mubr.bf16.vlgmr.msra.gmra.mrb[52].mxu1 %v7461_v43 }
 0x52e   :  { %2202 = vmatpush1.bf16.msra.mxu0 %v1903_v36  ;;  %2245 = vmatpush1.bf16.msra.mxu1 %v1905_v52  ;;  %v2016_v36 = vld [vmem:[#allocation2 + $0xfc8] sm:$0xff]  ;;  %v2018_v52 = vld [vmem:[#allocation2 + $0xfd8] sm:$0xff] }
 0x52f   :  { %2203 = vmatprep.subr.bf16.mxu0 %v1920_v55  ;;  %2246 = vmatprep.subr.bf16.mxu1 %v1922_v59  ;;  %v2015_v55 = vld [vmem:[#allocation2 + $0xfc0] sm:$0xff]  ;;  %v2017_v59 = vld [vmem:[#allocation2 + $0xfd0] sm:$0xff] }
 0x530   :  { %2233 = vmatprep.mubr.bf16.mxu0 %v7053_v0  ;;  %2276 = vmatprep.mubr.bf16.mxu1 %v7053_v0 }
 0x532   :  { %2204 = vmatpush1.bf16.msra.mxu0 %v1919_v2  ;;  %2247 = vmatpush1.bf16.msra.mxu1 %v1921_v3  ;;  %v1908_v2 = vld [vmem:[#allocation2 + $0xc68] sm:$0xff]  ;;  %v1910_v3 = vld [vmem:[#allocation2 + $0xc78] sm:$0xff] }
 0x533   :  { %2205 = vmatprep.subr.bf16.mxu0 %v1936_v4  ;;  %2248 = vmatprep.subr.bf16.mxu1 %v1938_v5  ;;  %v1907_v4 = vld [vmem:[#allocation2 + $0xc60] sm:$0xff]  ;;  %v1909_v5 = vld [vmem:[#allocation2 + $0xc70] sm:$0xff] }
 0x536   :  { %2206 = vmatpush1.bf16.msra.mxu0 %v1935_v6  ;;  %2249 = vmatpush1.bf16.msra.mxu1 %v1937_v7  ;;  %v1924_v6 = vld [vmem:[#allocation2 + $0xce8] sm:$0xff]  ;;  %v1926_v7 = vld [vmem:[#allocation2 + $0xcf8] sm:$0xff] }
 0x537   :  { %2207 = vmatprep.subr.bf16.mxu0 %v1952_v10  ;;  %2250 = vmatprep.subr.bf16.mxu1 %v1954_v13  ;;  %v1923_v10 = vld [vmem:[#allocation2 + $0xce0] sm:$0xff]  ;;  %v1925_v13 = vld [vmem:[#allocation2 + $0xcf0] sm:$0xff] }
 0x53a   :  { %2208 = vmatpush1.bf16.msra.mxu0 %v1951_v17  ;;  %2251 = vmatpush1.bf16.msra.mxu1 %v1953_v23  ;;  %v1940_v17 = vld [vmem:[#allocation2 + $0xd68] sm:$0xff]  ;;  %v1942_v23 = vld [vmem:[#allocation2 + $0xd78] sm:$0xff] }
 0x53b   :  { %2209 = vmatprep.subr.bf16.mxu0 %v1968_v25  ;;  %2252 = vmatprep.subr.bf16.mxu1 %v1970_v28  ;;  %v1939_v25 = vld [vmem:[#allocation2 + $0xd60] sm:$0xff]  ;;  %v1941_v28 = vld [vmem:[#allocation2 + $0xd70] sm:$0xff] }
 0x53e   :  { %2210 = vmatpush1.bf16.msra.mxu0 %v1967_v32  ;;  %2253 = vmatpush1.bf16.msra.mxu1 %v1969_v40  ;;  %v1956_v32 = vld [vmem:[#allocation2 + $0xde8] sm:$0xff]  ;;  %v1958_v40 = vld [vmem:[#allocation2 + $0xdf8] sm:$0xff] }
 0x53f   :  { %2211 = vmatprep.subr.bf16.mxu0 %v1984_v41  ;;  %2254 = vmatprep.subr.bf16.mxu1 %v1986_v42  ;;  %v1955_v41 = vld [vmem:[#allocation2 + $0xde0] sm:$0xff]  ;;  %v1957_v42 = vld [vmem:[#allocation2 + $0xdf0] sm:$0xff] }
 0x542   :  { %2212 = vmatpush1.bf16.msra.mxu0 %v1983_v44  ;;  %2255 = vmatpush1.bf16.msra.mxu1 %v1985_v45  ;;  %v1972_v44 = vld [vmem:[#allocation2 + $0xe68] sm:$0xff]  ;;  %v1974_v45 = vld [vmem:[#allocation2 + $0xe78] sm:$0xff] }
 0x543   :  { %2213 = vmatprep.subr.bf16.mxu0 %v2000_v46  ;;  %2256 = vmatprep.subr.bf16.mxu1 %v2002_v47  ;;  %v1973_v46 = vld [vmem:[#allocation2 + $0xe70] sm:$0xff]  ;;  %v1988_v47 = vld [vmem:[#allocation2 + $0xee8] sm:$0xff] }
 0x546   :  { %2214 = vmatpush1.bf16.msra.mxu0 %v1999_v48  ;;  %2257 = vmatpush1.bf16.msra.mxu1 %v2001_v49  ;;  %v1990_v48 = vld [vmem:[#allocation2 + $0xef8] sm:$0xff]  ;;  %v1987_v49 = vld [vmem:[#allocation2 + $0xee0] sm:$0xff] }
 0x547   :  { %2215 = vmatprep.subr.bf16.mxu0 %v2016_v36  ;;  %2258 = vmatprep.subr.bf16.mxu1 %v2018_v52  ;;  %v1989_v36 = vld [vmem:[#allocation2 + $0xef0] sm:$0xff]  ;;  %v2004_v52 = vld [vmem:[#allocation2 + $0xf68] sm:$0xff] }
 0x54a   :  { %2216 = vmatpush1.bf16.msra.mxu0 %v2015_v55  ;;  %2259 = vmatpush1.bf16.msra.mxu1 %v2017_v59  ;;  %v2006_v55 = vld [vmem:[#allocation2 + $0xf78] sm:$0xff]  ;;  %v2003_v59 = vld [vmem:[#allocation2 + $0xf60] sm:$0xff] }
 0x54b   :  { %2287 = vmatprep.subr.bf16.mxu0 %v1908_v2  ;;  %2330 = vmatprep.subr.bf16.mxu1 %v1910_v3  ;;  %v2005_v2 = vld [vmem:[#allocation2 + $0xf70] sm:$0xff]  ;;  %v2020_v3 = vld [vmem:[#allocation2 + $0xfe8] sm:$0xff] }
 0x54d   :  { %2234 = vmatmul.mubr.bf16.vlgmr.msra.gmra.mrb[56].mxu0 %v7461_v43  ;;  %2277 = vmatmul.mubr.bf16.vlgmr.msra.gmra.mrb[56].mxu1 %v7461_v43 }
 0x54e   :  { %2288 = vmatpush1.bf16.msra.mxu0 %v1907_v4  ;;  %2331 = vmatpush1.bf16.msra.mxu1 %v1909_v5  ;;  %v2022_v4 = vld [vmem:[#allocation2 + $0xff8] sm:$0xff]  ;;  %v2019_v5 = vld [vmem:[#allocation2 + $0xfe0] sm:$0xff] }
 0x54f   :  { %2289 = vmatprep.subr.bf16.mxu0 %v1924_v6  ;;  %2332 = vmatprep.subr.bf16.mxu1 %v1926_v7  ;;  %v2021_v6 = vld [vmem:[#allocation2 + $0xff0] sm:$0xff]  ;;  %v2403_v7 = vlaneseq }
 0x550   :  { %2319 = vmatprep.mubr.bf16.mxu0 %v7053_v0  ;;  %2362 = vmatprep.mubr.bf16.mxu1 %v7053_v0  ;;  %v1971_v0 = vld [vmem:[#allocation2 + $0xe60] sm:$0xff] }
 0x552   :  { %2290 = vmatpush1.bf16.msra.mxu0 %v1923_v10  ;;  %2333 = vmatpush1.bf16.msra.mxu1 %v1925_v13  ;;  %v7477_v10 = vshrl.u32 %v2403_v7, 7 }
 0x553   :  { %2291 = vmatprep.subr.bf16.mxu0 %v1940_v17  ;;  %2334 = vmatprep.subr.bf16.mxu1 %v1942_v23 }
 0x554   :  { %v7480_v13 = vsub.s32 0, %v7477_v10  ;;  %v7483_v17 = vsub.s32 1, %v7477_v10  ;;  %v7486_v23 = vsub.s32 2, %v7477_v10 }
 0x556   :  { %2292 = vmatpush1.bf16.msra.mxu0 %v1939_v25  ;;  %2335 = vmatpush1.bf16.msra.mxu1 %v1941_v28  ;;  %v7489_v25 = vsub.s32 3, %v7477_v10  ;;  %v7491_v28 = vld [vmem:[#allocation8] sm:$0xff] }
 0x557   :  { %2293 = vmatprep.subr.bf16.mxu0 %v1956_v32  ;;  %2336 = vmatprep.subr.bf16.mxu1 %v1958_v40  ;;  %v2421_v32 = vsub.s32 4, %v7477_v10  ;;  %v2406_v40 = vrot.slane %v7491_v28, %v7480_v13 }
 0x559   :  { %v7538_v53 = vadd.f32 %v2406_v40, %v866_v63 }
 0x55a   :  { %2294 = vmatpush1.bf16.msra.mxu0 %v1955_v41  ;;  %2337 = vmatpush1.bf16.msra.mxu1 %v1957_v42  ;;  %v2410_v41 = vrot.slane %v7491_v28, %v7483_v17  ;;  %v2414_v42 = vrot.slane %v7491_v28, %v7486_v23 }
 0x55b   :  { %2295 = vmatprep.subr.bf16.mxu0 %v1972_v44  ;;  %2338 = vmatprep.subr.bf16.mxu1 %v1974_v45  ;;  %v2418_v44 = vrot.slane %v7491_v28, %v7489_v25  ;;  %v2422_v45 = vrot.slane %v7491_v28, %v2421_v32  ;;  %v2467_v26 = vmax.f32 %v7538_v53, 0.0 }
 0x55c   :  { %v7543_v54 = vadd.f32 %v2410_v41, %v867_v1 }
 0x55d   :  { %v7528_v50 = vadd.f32 %v2422_v45, %v1886_v15  ;;  %v7558_v56 = vadd.f32 %v2422_v45, %v1888_v22 }
 0x55e   :  { %2296 = vmatpush1.bf16.msra.mxu0 %v1971_v0  ;;  %2339 = vmatpush1.bf16.msra.mxu1 %v1973_v46  ;;  %v7508_v46 = vadd.f32 %v2406_v40, %v864_v57  ;;  %v7548_v57 = vadd.f32 %v2414_v42, %v1377_v38  ;;  %v2468_v27 = vmax.f32 %v7543_v54, 0.0 }
 0x55f   :  { %2297 = vmatprep.subr.bf16.mxu0 %v1988_v47  ;;  %2340 = vmatprep.subr.bf16.mxu1 %v1990_v48  ;;  %v7513_v47 = vadd.f32 %v2410_v41, %v865_v61  ;;  %v7518_v48 = vadd.f32 %v2414_v42, %v1375_v30  ;;  %v7553_v61 = vadd.f32 %v2418_v44, %v1378_v39  ;;  %v2463_v35 = vmax.f32 %v7528_v50, 0.0 }
 0x560   :  { %v2459_v60 = vmax.f32 %v7508_v46, 0.0  ;;  %v2469_v29 = vmax.f32 %v7548_v57, 0.0  ;;  %v2471_v31 = vmax.f32 %v7558_v56, 0.0 }
 0x561   :  { %v2460_v62 = vmax.f32 %v7513_v47, 0.0  ;;  %v2461_v63 = vmax.f32 %v7518_v48, 0.0  ;;  %v2470_v30 = vmax.f32 %v7553_v61, 0.0 }
 0x562   :  { %2298 = vmatpush1.bf16.msra.mxu0 %v1987_v49  ;;  %2341 = vmatpush1.bf16.msra.mxu1 %v1989_v36  ;;  %v7523_v49 = vadd.f32 %v2418_v44, %v1376_v34 }
 0x563   :  { %2299 = vmatprep.subr.bf16.mxu0 %v2004_v52  ;;  %2342 = vmatprep.subr.bf16.mxu1 %v2006_v55 }
 0x564   :  { %v2462_v1 = vmax.f32 %v7523_v49, 0.0 }
 0x566   :  { %2300 = vmatpush1.bf16.msra.mxu0 %v2003_v59  ;;  %2343 = vmatpush1.bf16.msra.mxu1 %v2005_v2 }
 0x567   :  { %2301 = vmatprep.subr.bf16.mxu0 %v2020_v3  ;;  %2344 = vmatprep.subr.bf16.mxu1 %v2022_v4 }
 0x56a   :  { %2302 = vmatpush1.bf16.msra.mxu0 %v2019_v5  ;;  %2345 = vmatpush1.bf16.msra.mxu1 %v2021_v6 }
 0x56d   :  { %2320 = vmatmul.mubr.bf16.vlgmr.msra.gmra.mrb[60].mxu0 %v7461_v43  ;;  %2363 = vmatmul.mubr.bf16.vlgmr.msra.gmra.mrb[60].mxu1 %v7461_v43  ;;  %v2425_v43 = vsub.s32 5, %v7477_v10 }
 0x56f   :  { %v2426_v0 = vrot.slane %v7491_v28, %v2425_v43 }
 0x571   :  { %v7533_v51 = vadd.f32 %v2426_v0, %v1887_v19  ;;  %v7563_v58 = vadd.f32 %v2426_v0, %v1889_v21 }
 0x573   :  { %v2464_v24 = vmax.f32 %v7533_v51, 0.0  ;;  %v2472_v33 = vmax.f32 %v7563_v58, 0.0 }
 0x5e0   :  { %v2063_v34 = vpop.f32.mrb[48].mxu0  ;;  %v2106_v37 = vpop.f32.mrb[48].mxu1 }
 0x5e1   :  { %v2373_v38 = vmax.f32 %v2063_v34, %v2106_v37  ;;  %v2065_v39 = vpop.f32.mrb[49].mxu0  ;;  %v2108_v8 = vpop.f32.mrb[49].mxu1 }
 0x5e2   :  { %v2374_v9 = vmax.f32 %v2065_v39, %v2108_v8  ;;  %v2067_v11 = vpop.f32.mrb[50].mxu0  ;;  %v2110_v12 = vpop.f32.mrb[50].mxu1 }
 0x5e3   :  { %v2375_v14 = vmax.f32 %v2067_v11, %v2110_v12  ;;  %v2069_v15 = vpop.f32.mrb[51].mxu0  ;;  %v2112_v16 = vpop.f32.mrb[51].mxu1 }
 0x5e4   :  { %v2376_v18 = vmax.f32 %v2069_v15, %v2112_v16  ;;  %v2429_v16 = vsub.s32 6, %v7477_v10 }
 0x600   :  { %v2149_v19 = vpop.f32.mrb[52].mxu0  ;;  %v2192_v20 = vpop.f32.mrb[52].mxu1 }
 0x601   :  { %v2377_v22 = vmax.f32 %v2373_v38, %v2149_v19  ;;  %v2151_v21 = vpop.f32.mrb[53].mxu0  ;;  %v2194_v36 = vpop.f32.mrb[53].mxu1 }
 0x602   :  { %v2378_v52 = vmax.f32 %v2374_v9, %v2151_v21  ;;  %v2153_v55 = vpop.f32.mrb[54].mxu0  ;;  %v2196_v59 = vpop.f32.mrb[54].mxu1  ;;  %v2430_v21 = vrot.slane %v7491_v28, %v2429_v16 }
 0x603   :  { %v2381_v2 = vmax.f32 %v2377_v22, %v2192_v20  ;;  %v2379_v3 = vmax.f32 %v2375_v14, %v2153_v55  ;;  %v2155_v4 = vpop.f32.mrb[55].mxu0  ;;  %v2198_v5 = vpop.f32.mrb[55].mxu1 }
 0x604   :  { %v2382_v6 = vmax.f32 %v2378_v52, %v2194_v36  ;;  %v2380_v7 = vmax.f32 %v2376_v18, %v2155_v4  ;;  %v2433_v18 = vsub.s32 7, %v7477_v10 }
 0x605   :  { %v2383_v32 = vmax.f32 %v2379_v3, %v2196_v59 }
 0x606   :  { %v2384_v43 = vmax.f32 %v2380_v7, %v2198_v5  ;;  %v2434_v59 = vrot.slane %v7491_v28, %v2433_v18 }
 0x620   :  { %v2235_v40 = vpop.f32.mrb[56].mxu0  ;;  %v2278_v41 = vpop.f32.mrb[56].mxu1 }
 0x621   :  { %v2385_v42 = vmax.f32 %v2381_v2, %v2235_v40  ;;  %v2237_v44 = vpop.f32.mrb[57].mxu0  ;;  %v2280_v45 = vpop.f32.mrb[57].mxu1 }
 0x622   :  { %v2386_v0 = vmax.f32 %v2382_v6, %v2237_v44  ;;  %v2239_v34 = vpop.f32.mrb[58].mxu0  ;;  %v2282_v37 = vpop.f32.mrb[58].mxu1 }
 0x623   :  { %v2389_v38 = vmax.f32 %v2385_v42, %v2278_v41  ;;  %v2387_v39 = vmax.f32 %v2383_v32, %v2239_v34  ;;  %v2241_v8 = vpop.f32.mrb[59].mxu0  ;;  %v2284_v9 = vpop.f32.mrb[59].mxu1 }
 0x624   :  { %v2390_v11 = vmax.f32 %v2386_v0, %v2280_v45  ;;  %v2388_v12 = vmax.f32 %v2384_v43, %v2241_v8 }
 0x625   :  { %v2391_v14 = vmax.f32 %v2387_v39, %v2282_v37 }
 0x626   :  { %v2392_v15 = vmax.f32 %v2388_v12, %v2284_v9 }
 0x640   :  { %v2321_v19 = vpop.f32.mrb[60].mxu0  ;;  %v2364_v20 = vpop.f32.mrb[60].mxu1 }
 0x641   :  { %v2393_v22 = vmax.f32 %v2389_v38, %v2321_v19  ;;  %v2323_v36 = vpop.f32.mrb[61].mxu0  ;;  %v2366_v52 = vpop.f32.mrb[61].mxu1 }
 0x642   :  { %v2394_v55 = vmax.f32 %v2390_v11, %v2323_v36  ;;  %v2325_v2 = vpop.f32.mrb[62].mxu0  ;;  %v2368_v3 = vpop.f32.mrb[62].mxu1 }
 0x643   :  { %v2397_v4 = vmax.f32 %v2393_v22, %v2364_v20  ;;  %v2395_v5 = vmax.f32 %v2391_v14, %v2325_v2  ;;  %v2327_v6 = vpop.f32.mrb[63].mxu0  ;;  %v2370_v7 = vpop.f32.mrb[63].mxu1 }
 0x644   :  { %v2398_v32 = vmax.f32 %v2394_v55, %v2366_v52  ;;  %v2396_v43 = vmax.f32 %v2392_v15, %v2327_v6 }
 0x645   :  { %v7581_v40 = vadd.f32 %v2430_v21, %v2397_v4  ;;  %v2399_v10 = vmax.f32 %v2395_v5, %v2368_v3 }
 0x646   :  { %v7583_v41 = vadd.f32 %v2434_v59, %v2398_v32  ;;  %v2400_v42 = vmax.f32 %v2396_v43, %v2370_v7 }
 0x647   :  { %v2465_v44 = vmax.f32 %v7581_v40, 0.0  ;;  %v7586_v45 = vadd.f32 %v2430_v21, %v2399_v10 }
 0x648   :  { %v2466_v28 = vmax.f32 %v7583_v41, 0.0  ;;  %v7589_v0 = vadd.f32 %v2434_v59, %v2400_v42 }
 0x649   :  { %v2473_v34 = vmax.f32 %v7586_v45, 0.0 }
 0x64a   :  { %v2474_v37 = vmax.f32 %v7589_v0, 0.0 }
 0x64b   :  { %7009 = dma.done.wait [#allocation7 + $0x4], 131072 }
 0x64c   :  { %7010 = vsyncadd [#allocation7 + $0x4], 4294836224  ;;  %v7597_v38 = vpack.c.bf16 %v2468_v27, %v2460_v62  ;;  %v2488_v39 = vld [vmem:[#allocation3 + $0x8] sm:$0xff]  ;;  %v2788_v8 = vld [vmem:[#allocation3 + $0x18] sm:$0xff] }
 0x64d   :  { %v2487_v9 = vld [vmem:[#allocation3] sm:$0xff]  ;;  %2615 = vmatprep.subr.bf16.mxu0 %v2488_v39  ;;  %2915 = vmatprep.subr.bf16.mxu1 %v2788_v8  ;;  %v2787_v11 = vld [vmem:[#allocation3 + $0x10] sm:$0xff]  ;;  %v2490_v12 = vld [vmem:[#allocation3 + $0x88] sm:$0xff] }
 0x64e   :  { %2647 = vmatprep.mubr.bf16.mxu0 %v7597_v38  ;;  %2947 = vmatprep.mubr.bf16.mxu1 %v7597_v38  ;;  %v2790_v14 = vld [vmem:[#allocation3 + $0x98] sm:$0xff]  ;;  %v2489_v47 = vld [vmem:[#allocation3 + $0x80] sm:$0xff]  ;;  %v2789_v54 = vld [vmem:[#allocation3 + $0x90] sm:$0xff] }
 0x64f   :  { %2616 = vmatpush1.bf16.msra.mxu0 %v2487_v9  ;;  %2916 = vmatpush1.bf16.msra.mxu1 %v2787_v11  ;;  %v2492_v62 = vld [vmem:[#allocation3 + $0x108] sm:$0xff]  ;;  %v2792_v27 = vld [vmem:[#allocation3 + $0x118] sm:$0xff]  ;;  %v2491_v15 = vld [vmem:[#allocation3 + $0x100] sm:$0xff] }
 0x650   :  { %2617 = vmatprep.subr.bf16.mxu0 %v2490_v12  ;;  %2917 = vmatprep.subr.bf16.mxu1 %v2790_v14  ;;  %v2791_v16 = vld [vmem:[#allocation3 + $0x110] sm:$0xff]  ;;  %v2494_v18 = vld [vmem:[#allocation3 + $0x188] sm:$0xff]  ;;  %v2794_v19 = vld [vmem:[#allocation3 + $0x198] sm:$0xff] }
 0x651   :  { %v2493_v20 = vld [vmem:[#allocation3 + $0x180] sm:$0xff]  ;;  %v2793_v22 = vld [vmem:[#allocation3 + $0x190] sm:$0xff]  ;;  %v2496_v21 = vld [vmem:[#allocation3 + $0x208] sm:$0xff] }
 0x652   :  { %v2796_v36 = vld [vmem:[#allocation3 + $0x218] sm:$0xff]  ;;  %v2495_v52 = vld [vmem:[#allocation3 + $0x200] sm:$0xff]  ;;  %v2795_v55 = vld [vmem:[#allocation3 + $0x210] sm:$0xff] }
 0x653   :  { %2618 = vmatpush1.bf16.msra.mxu0 %v2489_v47  ;;  %2918 = vmatpush1.bf16.msra.mxu1 %v2789_v54  ;;  %v2498_v59 = vld [vmem:[#allocation3 + $0x288] sm:$0xff]  ;;  %v2798_v2 = vld [vmem:[#allocation3 + $0x298] sm:$0xff]  ;;  %v2497_v3 = vld [vmem:[#allocation3 + $0x280] sm:$0xff] }
 0x654   :  { %2619 = vmatprep.subr.bf16.mxu0 %v2492_v62  ;;  %2919 = vmatprep.subr.bf16.mxu1 %v2792_v27  ;;  %v2797_v4 = vld [vmem:[#allocation3 + $0x290] sm:$0xff]  ;;  %v2500_v5 = vld [vmem:[#allocation3 + $0x308] sm:$0xff]  ;;  %v2800_v6 = vld [vmem:[#allocation3 + $0x318] sm:$0xff] }
 0x655   :  { %v2499_v7 = vld [vmem:[#allocation3 + $0x300] sm:$0xff]  ;;  %v2799_v32 = vld [vmem:[#allocation3 + $0x310] sm:$0xff]  ;;  %v2502_v43 = vld [vmem:[#allocation3 + $0x388] sm:$0xff] }
 0x656   :  { %v2802_v10 = vld [vmem:[#allocation3 + $0x398] sm:$0xff]  ;;  %v2501_v42 = vld [vmem:[#allocation3 + $0x380] sm:$0xff]  ;;  %v2801_v39 = vld [vmem:[#allocation3 + $0x390] sm:$0xff] }
 0x657   :  { %2620 = vmatpush1.bf16.msra.mxu0 %v2491_v15  ;;  %2920 = vmatpush1.bf16.msra.mxu1 %v2791_v16  ;;  %v2504_v8 = vld [vmem:[#allocation3 + $0x408] sm:$0xff]  ;;  %v2804_v9 = vld [vmem:[#allocation3 + $0x418] sm:$0xff]  ;;  %v2503_v11 = vld [vmem:[#allocation3 + $0x400] sm:$0xff] }
 0x658   :  { %2621 = vmatprep.subr.bf16.mxu0 %v2494_v18  ;;  %2921 = vmatprep.subr.bf16.mxu1 %v2794_v19  ;;  %v2803_v12 = vld [vmem:[#allocation3 + $0x410] sm:$0xff]  ;;  %v2506_v14 = vld [vmem:[#allocation3 + $0x488] sm:$0xff]  ;;  %v2806_v47 = vld [vmem:[#allocation3 + $0x498] sm:$0xff] }
 0x659   :  { %v2505_v54 = vld [vmem:[#allocation3 + $0x480] sm:$0xff]  ;;  %v2805_v62 = vld [vmem:[#allocation3 + $0x490] sm:$0xff]  ;;  %v2508_v27 = vld [vmem:[#allocation3 + $0x508] sm:$0xff] }
 0x65a   :  { %v2808_v15 = vld [vmem:[#allocation3 + $0x518] sm:$0xff]  ;;  %v2507_v16 = vld [vmem:[#allocation3 + $0x500] sm:$0xff]  ;;  %v2807_v18 = vld [vmem:[#allocation3 + $0x510] sm:$0xff] }
 0x65b   :  { %2622 = vmatpush1.bf16.msra.mxu0 %v2493_v20  ;;  %2922 = vmatpush1.bf16.msra.mxu1 %v2793_v22  ;;  %v2510_v19 = vld [vmem:[#allocation3 + $0x588] sm:$0xff]  ;;  %v2810_v20 = vld [vmem:[#allocation3 + $0x598] sm:$0xff]  ;;  %v2509_v22 = vld [vmem:[#allocation3 + $0x580] sm:$0xff] }
 0x65c   :  { %2623 = vmatprep.subr.bf16.mxu0 %v2496_v21  ;;  %2923 = vmatprep.subr.bf16.mxu1 %v2796_v36  ;;  %v2809_v21 = vld [vmem:[#allocation3 + $0x590] sm:$0xff]  ;;  %v2512_v36 = vld [vmem:[#allocation3 + $0x608] sm:$0xff]  ;;  %v2521_v46 = vld [vmem:[#allocation3 + $0x880] sm:$0xff] }
 0x65d   :  { %v2821_v53 = vld [vmem:[#allocation3 + $0x890] sm:$0xff]  ;;  %v2523_v49 = vld [vmem:[#allocation3 + $0x900] sm:$0xff]  ;;  %v2590_v0 = vld [vmem:[#allocation3 + $0x1988] sm:$0xff] }
 0x65e   :  { %v2823_v61 = vld [vmem:[#allocation3 + $0x910] sm:$0xff]  ;;  %v2553_v48 = vld [vmem:[#allocation3 + $0x1080] sm:$0xff] }
 0x65f   :  { %2624 = vmatpush1.bf16.msra.mxu0 %v2495_v52  ;;  %2924 = vmatpush1.bf16.msra.mxu1 %v2795_v55  ;;  %v2812_v52 = vld [vmem:[#allocation3 + $0x618] sm:$0xff]  ;;  %v2511_v55 = vld [vmem:[#allocation3 + $0x600] sm:$0xff]  ;;  %v2853_v57 = vld [vmem:[#allocation3 + $0x1090] sm:$0xff] }
 0x660   :  { %2625 = vmatprep.subr.bf16.mxu0 %v2498_v59  ;;  %2925 = vmatprep.subr.bf16.mxu1 %v2798_v2  ;;  %v2811_v59 = vld [vmem:[#allocation3 + $0x610] sm:$0xff]  ;;  %v2514_v2 = vld [vmem:[#allocation3 + $0x688] sm:$0xff]  ;;  %v2555_v51 = vld [vmem:[#allocation3 + $0x1100] sm:$0xff] }
 0x661   :  { %v2855_v58 = vld [vmem:[#allocation3 + $0x1110] sm:$0xff]  ;;  %v2585_v50 = vld [vmem:[#allocation3 + $0x1880] sm:$0xff] }
 0x662   :  { %v2885_v56 = vld [vmem:[#allocation3 + $0x1890] sm:$0xff]  ;;  %v2587_v41 = vld [vmem:[#allocation3 + $0x1900] sm:$0xff] }
 0x663   :  { %2626 = vmatpush1.bf16.msra.mxu0 %v2497_v3  ;;  %2926 = vmatpush1.bf16.msra.mxu1 %v2797_v4  ;;  %v2814_v3 = vld [vmem:[#allocation3 + $0x698] sm:$0xff]  ;;  %v2513_v4 = vld [vmem:[#allocation3 + $0x680] sm:$0xff]  ;;  %v3397_v45 = vld [vmem:[#allocation3 + $0xb0] sm:$0xff] }
 0x664   :  { %2627 = vmatprep.subr.bf16.mxu0 %v2500_v5  ;;  %2927 = vmatprep.subr.bf16.mxu1 %v2800_v6  ;;  %v2813_v5 = vld [vmem:[#allocation3 + $0x690] sm:$0xff]  ;;  %v2516_v6 = vld [vmem:[#allocation3 + $0x708] sm:$0xff]  ;;  %v3093_v40 = vld [vmem:[#allocation3 + $0xa0] sm:$0xff] }
 0x667   :  { %2628 = vmatpush1.bf16.msra.mxu0 %v2499_v7  ;;  %2928 = vmatpush1.bf16.msra.mxu1 %v2799_v32  ;;  %v2816_v7 = vld [vmem:[#allocation3 + $0x718] sm:$0xff]  ;;  %v2515_v32 = vld [vmem:[#allocation3 + $0x700] sm:$0xff] }
 0x668   :  { %2629 = vmatprep.subr.bf16.mxu0 %v2502_v43  ;;  %2929 = vmatprep.subr.bf16.mxu1 %v2802_v10  ;;  %v2815_v43 = vld [vmem:[#allocation3 + $0x710] sm:$0xff]  ;;  %v2518_v10 = vld [vmem:[#allocation3 + $0x788] sm:$0xff] }
 0x66b   :  { %2630 = vmatpush1.bf16.msra.mxu0 %v2501_v42  ;;  %2930 = vmatpush1.bf16.msra.mxu1 %v2801_v39  ;;  %v2818_v42 = vld [vmem:[#allocation3 + $0x798] sm:$0xff]  ;;  %v2517_v39 = vld [vmem:[#allocation3 + $0x780] sm:$0xff] }
 0x66c   :  { %2631 = vmatprep.subr.bf16.mxu0 %v2504_v8  ;;  %2931 = vmatprep.subr.bf16.mxu1 %v2804_v9  ;;  %v2817_v8 = vld [vmem:[#allocation3 + $0x790] sm:$0xff]  ;;  %v2520_v9 = vld [vmem:[#allocation3 + $0x808] sm:$0xff] }
 0x66f   :  { %2632 = vmatpush1.bf16.msra.mxu0 %v2503_v11  ;;  %2932 = vmatpush1.bf16.msra.mxu1 %v2803_v12  ;;  %v2820_v11 = vld [vmem:[#allocation3 + $0x818] sm:$0xff]  ;;  %v7605_v12 = vpack.c.bf16 %v2467_v26, %v2459_v60  ;;  %v2524_v60 = vld [vmem:[#allocation3 + $0x908] sm:$0xff] }
 0x670   :  { %2633 = vmatprep.subr.bf16.mxu0 %v2506_v14  ;;  %2933 = vmatprep.subr.bf16.mxu1 %v2806_v47  ;;  %v2519_v14 = vld [vmem:[#allocation3 + $0x800] sm:$0xff]  ;;  %v2819_v47 = vld [vmem:[#allocation3 + $0x810] sm:$0xff]  ;;  %v2824_v26 = vld [vmem:[#allocation3 + $0x918] sm:$0xff] }
 0x673   :  { %2634 = vmatpush1.bf16.msra.mxu0 %v2505_v54  ;;  %2934 = vmatpush1.bf16.msra.mxu1 %v2805_v62  ;;  %v2522_v54 = vld [vmem:[#allocation3 + $0x888] sm:$0xff]  ;;  %v2822_v62 = vld [vmem:[#allocation3 + $0x898] sm:$0xff] }
 0x674   :  { %2635 = vmatprep.subr.bf16.mxu0 %v2508_v27  ;;  %2935 = vmatprep.subr.bf16.mxu1 %v2808_v15  ;;  %v7611_v27 = vpack.c.bf16 %v2470_v30, %v2462_v1  ;;  %v2526_v1 = vld [vmem:[#allocation3 + $0x988] sm:$0xff]  ;;  %v2826_v30 = vld [vmem:[#allocation3 + $0x998] sm:$0xff]  ;;  %v2525_v15 = vld [vmem:[#allocation3 + $0x980] sm:$0xff] }
 0x677   :  { %2636 = vmatpush1.bf16.msra.mxu0 %v2507_v16  ;;  %2936 = vmatpush1.bf16.msra.mxu1 %v2807_v18  ;;  %v2825_v16 = vld [vmem:[#allocation3 + $0x990] sm:$0xff]  ;;  %v2528_v18 = vld [vmem:[#allocation3 + $0xa08] sm:$0xff] }
 0x678   :  { %2637 = vmatprep.subr.bf16.mxu0 %v2510_v19  ;;  %2937 = vmatprep.subr.bf16.mxu1 %v2810_v20  ;;  %v2828_v19 = vld [vmem:[#allocation3 + $0xa18] sm:$0xff]  ;;  %v2527_v20 = vld [vmem:[#allocation3 + $0xa00] sm:$0xff] }
 0x67b   :  { %2638 = vmatpush1.bf16.msra.mxu0 %v2509_v22  ;;  %2938 = vmatpush1.bf16.msra.mxu1 %v2809_v21  ;;  %v2827_v22 = vld [vmem:[#allocation3 + $0xa10] sm:$0xff]  ;;  %v2530_v21 = vld [vmem:[#allocation3 + $0xa88] sm:$0xff] }
 0x67c   :  { %2639 = vmatprep.subr.bf16.mxu0 %v2512_v36  ;;  %2939 = vmatprep.subr.bf16.mxu1 %v2812_v52  ;;  %v2830_v36 = vld [vmem:[#allocation3 + $0xa98] sm:$0xff]  ;;  %v2529_v52 = vld [vmem:[#allocation3 + $0xa80] sm:$0xff] }
 0x67f   :  { %2640 = vmatpush1.bf16.msra.mxu0 %v2511_v55  ;;  %2940 = vmatpush1.bf16.msra.mxu1 %v2811_v59  ;;  %v2829_v55 = vld [vmem:[#allocation3 + $0xa90] sm:$0xff]  ;;  %v2532_v59 = vld [vmem:[#allocation3 + $0xb08] sm:$0xff] }
 0x680   :  { %2641 = vmatprep.subr.bf16.mxu0 %v2514_v2  ;;  %2941 = vmatprep.subr.bf16.mxu1 %v2814_v3  ;;  %v2832_v2 = vld [vmem:[#allocation3 + $0xb18] sm:$0xff]  ;;  %v2531_v3 = vld [vmem:[#allocation3 + $0xb00] sm:$0xff] }
 0x683   :  { %2642 = vmatpush1.bf16.msra.mxu0 %v2513_v4  ;;  %2942 = vmatpush1.bf16.msra.mxu1 %v2813_v5  ;;  %v2831_v4 = vld [vmem:[#allocation3 + $0xb10] sm:$0xff]  ;;  %v2534_v5 = vld [vmem:[#allocation3 + $0xb88] sm:$0xff] }
 0x684   :  { %2643 = vmatprep.subr.bf16.mxu0 %v2516_v6  ;;  %2943 = vmatprep.subr.bf16.mxu1 %v2816_v7  ;;  %v2834_v6 = vld [vmem:[#allocation3 + $0xb98] sm:$0xff]  ;;  %v2533_v7 = vld [vmem:[#allocation3 + $0xb80] sm:$0xff] }
 0x687   :  { %2644 = vmatpush1.bf16.msra.mxu0 %v2515_v32  ;;  %2944 = vmatpush1.bf16.msra.mxu1 %v2815_v43  ;;  %v2833_v32 = vld [vmem:[#allocation3 + $0xb90] sm:$0xff]  ;;  %v2536_v43 = vld [vmem:[#allocation3 + $0xc08] sm:$0xff] }
 0x688   :  { %2645 = vmatprep.subr.bf16.mxu0 %v2518_v10  ;;  %2945 = vmatprep.subr.bf16.mxu1 %v2818_v42  ;;  %v2836_v10 = vld [vmem:[#allocation3 + $0xc18] sm:$0xff]  ;;  %v2535_v42 = vld [vmem:[#allocation3 + $0xc00] sm:$0xff] }
 0x68b   :  { %2646 = vmatpush1.bf16.msra.mxu0 %v2517_v39  ;;  %2946 = vmatpush1.bf16.msra.mxu1 %v2817_v8  ;;  %v2835_v39 = vld [vmem:[#allocation3 + $0xc10] sm:$0xff]  ;;  %v2538_v8 = vld [vmem:[#allocation3 + $0xc88] sm:$0xff] }
 0x68c   :  { %2658 = vmatprep.subr.bf16.mxu0 %v2520_v9  ;;  %2958 = vmatprep.subr.bf16.mxu1 %v2820_v11  ;;  %v2838_v9 = vld [vmem:[#allocation3 + $0xc98] sm:$0xff]  ;;  %v2537_v11 = vld [vmem:[#allocation3 + $0xc80] sm:$0xff] }
 0x68e   :  { %2648 = vmatmul.mubr.bf16.vlgmr.msra.gmra.mrb[64].mxu0 %v7605_v12  ;;  %2948 = vmatmul.mubr.bf16.vlgmr.msra.gmra.mrb[64].mxu1 %v7605_v12 }
 0x68f   :  { %2659 = vmatpush1.bf16.msra.mxu0 %v2519_v14  ;;  %2959 = vmatpush1.bf16.msra.mxu1 %v2819_v47  ;;  %v2837_v14 = vld [vmem:[#allocation3 + $0xc90] sm:$0xff]  ;;  %v2540_v47 = vld [vmem:[#allocation3 + $0xd08] sm:$0xff] }
 0x690   :  { %2660 = vmatprep.subr.bf16.mxu0 %v2522_v54  ;;  %2960 = vmatprep.subr.bf16.mxu1 %v2822_v62  ;;  %v2840_v54 = vld [vmem:[#allocation3 + $0xd18] sm:$0xff]  ;;  %v2539_v62 = vld [vmem:[#allocation3 + $0xd00] sm:$0xff] }
 0x691   :  { %2690 = vmatprep.mubr.bf16.mxu0 %v7611_v27  ;;  %2990 = vmatprep.mubr.bf16.mxu1 %v7611_v27 }
 0x693   :  { %2661 = vmatpush1.bf16.msra.mxu0 %v2521_v46  ;;  %2961 = vmatpush1.bf16.msra.mxu1 %v2821_v53  ;;  %v2839_v46 = vld [vmem:[#allocation3 + $0xd10] sm:$0xff]  ;;  %v2542_v53 = vld [vmem:[#allocation3 + $0xd88] sm:$0xff] }
 0x694   :  { %2662 = vmatprep.subr.bf16.mxu0 %v2524_v60  ;;  %2962 = vmatprep.subr.bf16.mxu1 %v2824_v26  ;;  %v2842_v60 = vld [vmem:[#allocation3 + $0xd98] sm:$0xff]  ;;  %v2541_v26 = vld [vmem:[#allocation3 + $0xd80] sm:$0xff] }
 0x697   :  { %2663 = vmatpush1.bf16.msra.mxu0 %v2523_v49  ;;  %2963 = vmatpush1.bf16.msra.mxu1 %v2823_v61  ;;  %v2841_v49 = vld [vmem:[#allocation3 + $0xd90] sm:$0xff]  ;;  %v2544_v61 = vld [vmem:[#allocation3 + $0xe08] sm:$0xff] }
 0x698   :  { %2664 = vmatprep.subr.bf16.mxu0 %v2526_v1  ;;  %2964 = vmatprep.subr.bf16.mxu1 %v2826_v30  ;;  %v2844_v1 = vld [vmem:[#allocation3 + $0xe18] sm:$0xff]  ;;  %v2543_v30 = vld [vmem:[#allocation3 + $0xe00] sm:$0xff] }
 0x69b   :  { %2665 = vmatpush1.bf16.msra.mxu0 %v2525_v15  ;;  %2965 = vmatpush1.bf16.msra.mxu1 %v2825_v16  ;;  %v2843_v15 = vld [vmem:[#allocation3 + $0xe10] sm:$0xff]  ;;  %v2546_v16 = vld [vmem:[#allocation3 + $0xe88] sm:$0xff] }
 0x69c   :  { %2666 = vmatprep.subr.bf16.mxu0 %v2528_v18  ;;  %2966 = vmatprep.subr.bf16.mxu1 %v2828_v19  ;;  %v2846_v18 = vld [vmem:[#allocation3 + $0xe98] sm:$0xff]  ;;  %v2545_v19 = vld [vmem:[#allocation3 + $0xe80] sm:$0xff] }
 0x69f   :  { %2667 = vmatpush1.bf16.msra.mxu0 %v2527_v20  ;;  %2967 = vmatpush1.bf16.msra.mxu1 %v2827_v22  ;;  %v2845_v20 = vld [vmem:[#allocation3 + $0xe90] sm:$0xff]  ;;  %v2548_v22 = vld [vmem:[#allocation3 + $0xf08] sm:$0xff] }
 0x6a0   :  { %2668 = vmatprep.subr.bf16.mxu0 %v2530_v21  ;;  %2968 = vmatprep.subr.bf16.mxu1 %v2830_v36  ;;  %v2848_v21 = vld [vmem:[#allocation3 + $0xf18] sm:$0xff]  ;;  %v2547_v36 = vld [vmem:[#allocation3 + $0xf00] sm:$0xff] }
 0x6a3   :  { %2669 = vmatpush1.bf16.msra.mxu0 %v2529_v52  ;;  %2969 = vmatpush1.bf16.msra.mxu1 %v2829_v55  ;;  %v2847_v52 = vld [vmem:[#allocation3 + $0xf10] sm:$0xff]  ;;  %v2550_v55 = vld [vmem:[#allocation3 + $0xf88] sm:$0xff] }
 0x6a4   :  { %2670 = vmatprep.subr.bf16.mxu0 %v2532_v59  ;;  %2970 = vmatprep.subr.bf16.mxu1 %v2832_v2  ;;  %v2850_v59 = vld [vmem:[#allocation3 + $0xf98] sm:$0xff]  ;;  %v2549_v2 = vld [vmem:[#allocation3 + $0xf80] sm:$0xff] }
 0x6a7   :  { %2671 = vmatpush1.bf16.msra.mxu0 %v2531_v3  ;;  %2971 = vmatpush1.bf16.msra.mxu1 %v2831_v4  ;;  %v2849_v3 = vld [vmem:[#allocation3 + $0xf90] sm:$0xff]  ;;  %v2552_v4 = vld [vmem:[#allocation3 + $0x1008] sm:$0xff] }
 0x6a8   :  { %2672 = vmatprep.subr.bf16.mxu0 %v2534_v5  ;;  %2972 = vmatprep.subr.bf16.mxu1 %v2834_v6  ;;  %v2852_v5 = vld [vmem:[#allocation3 + $0x1018] sm:$0xff]  ;;  %v7621_v6 = vpack.c.bf16 %v2469_v29, %v2461_v63  ;;  %v2556_v63 = vld [vmem:[#allocation3 + $0x1108] sm:$0xff] }
 0x6a9   :  { %v2856_v29 = vld [vmem:[#allocation3 + $0x1118] sm:$0xff] }
 0x6ab   :  { %2673 = vmatpush1.bf16.msra.mxu0 %v2533_v7  ;;  %2973 = vmatpush1.bf16.msra.mxu1 %v2833_v32  ;;  %v2551_v7 = vld [vmem:[#allocation3 + $0x1000] sm:$0xff]  ;;  %v2851_v32 = vld [vmem:[#allocation3 + $0x1010] sm:$0xff] }
 0x6ac   :  { %2674 = vmatprep.subr.bf16.mxu0 %v2536_v43  ;;  %2974 = vmatprep.subr.bf16.mxu1 %v2836_v10  ;;  %v2554_v43 = vld [vmem:[#allocation3 + $0x1088] sm:$0xff]  ;;  %v2854_v10 = vld [vmem:[#allocation3 + $0x1098] sm:$0xff] }
 0x6af   :  { %2675 = vmatpush1.bf16.msra.mxu0 %v2535_v42  ;;  %2975 = vmatpush1.bf16.msra.mxu1 %v2835_v39  ;;  %v7627_v42 = vpack.c.bf16 %v2472_v33, %v2464_v24  ;;  %v2558_v24 = vld [vmem:[#allocation3 + $0x1188] sm:$0xff]  ;;  %v2858_v33 = vld [vmem:[#allocation3 + $0x1198] sm:$0xff]  ;;  %v2557_v39 = vld [vmem:[#allocation3 + $0x1180] sm:$0xff] }
 0x6b0   :  { %2676 = vmatprep.subr.bf16.mxu0 %v2538_v8  ;;  %2976 = vmatprep.subr.bf16.mxu1 %v2838_v9  ;;  %v2857_v8 = vld [vmem:[#allocation3 + $0x1190] sm:$0xff]  ;;  %v2560_v9 = vld [vmem:[#allocation3 + $0x1208] sm:$0xff] }
 0x6b3   :  { %2677 = vmatpush1.bf16.msra.mxu0 %v2537_v11  ;;  %2977 = vmatpush1.bf16.msra.mxu1 %v2837_v14  ;;  %v2860_v11 = vld [vmem:[#allocation3 + $0x1218] sm:$0xff]  ;;  %v2559_v14 = vld [vmem:[#allocation3 + $0x1200] sm:$0xff] }
 0x6b4   :  { %2678 = vmatprep.subr.bf16.mxu0 %v2540_v47  ;;  %2978 = vmatprep.subr.bf16.mxu1 %v2840_v54  ;;  %v2859_v47 = vld [vmem:[#allocation3 + $0x1210] sm:$0xff]  ;;  %v2562_v54 = vld [vmem:[#allocation3 + $0x1288] sm:$0xff] }
 0x6b7   :  { %2679 = vmatpush1.bf16.msra.mxu0 %v2539_v62  ;;  %2979 = vmatpush1.bf16.msra.mxu1 %v2839_v46  ;;  %v2862_v62 = vld [vmem:[#allocation3 + $0x1298] sm:$0xff]  ;;  %v2561_v46 = vld [vmem:[#allocation3 + $0x1280] sm:$0xff] }
 0x6b8   :  { %2680 = vmatprep.subr.bf16.mxu0 %v2542_v53  ;;  %2980 = vmatprep.subr.bf16.mxu1 %v2842_v60  ;;  %v2861_v53 = vld [vmem:[#allocation3 + $0x1290] sm:$0xff]  ;;  %v2564_v60 = vld [vmem:[#allocation3 + $0x1308] sm:$0xff] }
 0x6bb   :  { %2681 = vmatpush1.bf16.msra.mxu0 %v2541_v26  ;;  %2981 = vmatpush1.bf16.msra.mxu1 %v2841_v49  ;;  %v2864_v26 = vld [vmem:[#allocation3 + $0x1318] sm:$0xff]  ;;  %v2563_v49 = vld [vmem:[#allocation3 + $0x1300] sm:$0xff] }
 0x6bc   :  { %2682 = vmatprep.subr.bf16.mxu0 %v2544_v61  ;;  %2982 = vmatprep.subr.bf16.mxu1 %v2844_v1  ;;  %v2863_v61 = vld [vmem:[#allocation3 + $0x1310] sm:$0xff]  ;;  %v2566_v1 = vld [vmem:[#allocation3 + $0x1388] sm:$0xff] }
 0x6bf   :  { %2683 = vmatpush1.bf16.msra.mxu0 %v2543_v30  ;;  %2983 = vmatpush1.bf16.msra.mxu1 %v2843_v15  ;;  %v2866_v30 = vld [vmem:[#allocation3 + $0x1398] sm:$0xff]  ;;  %v2565_v15 = vld [vmem:[#allocation3 + $0x1380] sm:$0xff] }
 0x6c0   :  { %2684 = vmatprep.subr.bf16.mxu0 %v2546_v16  ;;  %2984 = vmatprep.subr.bf16.mxu1 %v2846_v18  ;;  %v2865_v16 = vld [vmem:[#allocation3 + $0x1390] sm:$0xff]  ;;  %v2568_v18 = vld [vmem:[#allocation3 + $0x1408] sm:$0xff] }
 0x6c3   :  { %2685 = vmatpush1.bf16.msra.mxu0 %v2545_v19  ;;  %2985 = vmatpush1.bf16.msra.mxu1 %v2845_v20  ;;  %v2868_v19 = vld [vmem:[#allocation3 + $0x1418] sm:$0xff]  ;;  %v2567_v20 = vld [vmem:[#allocation3 + $0x1400] sm:$0xff] }
 0x6c4   :  { %2686 = vmatprep.subr.bf16.mxu0 %v2548_v22  ;;  %2986 = vmatprep.subr.bf16.mxu1 %v2848_v21  ;;  %v2867_v22 = vld [vmem:[#allocation3 + $0x1410] sm:$0xff]  ;;  %v2570_v21 = vld [vmem:[#allocation3 + $0x1488] sm:$0xff] }
 0x6c7   :  { %2687 = vmatpush1.bf16.msra.mxu0 %v2547_v36  ;;  %2987 = vmatpush1.bf16.msra.mxu1 %v2847_v52  ;;  %v2870_v36 = vld [vmem:[#allocation3 + $0x1498] sm:$0xff]  ;;  %v2569_v52 = vld [vmem:[#allocation3 + $0x1480] sm:$0xff] }
 0x6c8   :  { %2688 = vmatprep.subr.bf16.mxu0 %v2550_v55  ;;  %2988 = vmatprep.subr.bf16.mxu1 %v2850_v59  ;;  %v2869_v55 = vld [vmem:[#allocation3 + $0x1490] sm:$0xff]  ;;  %v2572_v59 = vld [vmem:[#allocation3 + $0x1508] sm:$0xff] }
 0x6cb   :  { %2689 = vmatpush1.bf16.msra.mxu0 %v2549_v2  ;;  %2989 = vmatpush1.bf16.msra.mxu1 %v2849_v3  ;;  %v2872_v2 = vld [vmem:[#allocation3 + $0x1518] sm:$0xff]  ;;  %v2571_v3 = vld [vmem:[#allocation3 + $0x1500] sm:$0xff] }
 0x6cc   :  { %2701 = vmatprep.subr.bf16.mxu0 %v2552_v4  ;;  %3001 = vmatprep.subr.bf16.mxu1 %v2852_v5  ;;  %v2871_v4 = vld [vmem:[#allocation3 + $0x1510] sm:$0xff]  ;;  %v2574_v5 = vld [vmem:[#allocation3 + $0x1588] sm:$0xff] }
 0x6ce   :  { %2691 = vmatmul.mubr.bf16.vlgmr.msra.gmra.mrb[64].mxu0 %v7621_v6  ;;  %2991 = vmatmul.mubr.bf16.vlgmr.msra.gmra.mrb[64].mxu1 %v7621_v6 }
 0x6cf   :  { %2702 = vmatpush1.bf16.msra.mxu0 %v2551_v7  ;;  %3002 = vmatpush1.bf16.msra.mxu1 %v2851_v32  ;;  %v2874_v7 = vld [vmem:[#allocation3 + $0x1598] sm:$0xff]  ;;  %v2573_v32 = vld [vmem:[#allocation3 + $0x1580] sm:$0xff] }
 0x6d0   :  { %2703 = vmatprep.subr.bf16.mxu0 %v2554_v43  ;;  %3003 = vmatprep.subr.bf16.mxu1 %v2854_v10  ;;  %v2873_v43 = vld [vmem:[#allocation3 + $0x1590] sm:$0xff]  ;;  %v2576_v10 = vld [vmem:[#allocation3 + $0x1608] sm:$0xff] }
 0x6d1   :  { %2733 = vmatprep.mubr.bf16.mxu0 %v7627_v42  ;;  %3033 = vmatprep.mubr.bf16.mxu1 %v7627_v42 }
 0x6d3   :  { %2704 = vmatpush1.bf16.msra.mxu0 %v2553_v48  ;;  %3004 = vmatpush1.bf16.msra.mxu1 %v2853_v57  ;;  %v2876_v48 = vld [vmem:[#allocation3 + $0x1618] sm:$0xff]  ;;  %v2575_v57 = vld [vmem:[#allocation3 + $0x1600] sm:$0xff] }
 0x6d4   :  { %2705 = vmatprep.subr.bf16.mxu0 %v2556_v63  ;;  %3005 = vmatprep.subr.bf16.mxu1 %v2856_v29  ;;  %v2875_v63 = vld [vmem:[#allocation3 + $0x1610] sm:$0xff]  ;;  %v2578_v29 = vld [vmem:[#allocation3 + $0x1688] sm:$0xff] }
 0x6d7   :  { %2706 = vmatpush1.bf16.msra.mxu0 %v2555_v51  ;;  %3006 = vmatpush1.bf16.msra.mxu1 %v2855_v58  ;;  %v2878_v51 = vld [vmem:[#allocation3 + $0x1698] sm:$0xff]  ;;  %v2577_v58 = vld [vmem:[#allocation3 + $0x1680] sm:$0xff] }
 0x6d8   :  { %2707 = vmatprep.subr.bf16.mxu0 %v2558_v24  ;;  %3007 = vmatprep.subr.bf16.mxu1 %v2858_v33  ;;  %v2877_v24 = vld [vmem:[#allocation3 + $0x1690] sm:$0xff]  ;;  %v2580_v33 = vld [vmem:[#allocation3 + $0x1708] sm:$0xff] }
 0x6db   :  { %2708 = vmatpush1.bf16.msra.mxu0 %v2557_v39  ;;  %3008 = vmatpush1.bf16.msra.mxu1 %v2857_v8  ;;  %v2880_v39 = vld [vmem:[#allocation3 + $0x1718] sm:$0xff]  ;;  %v2579_v8 = vld [vmem:[#allocation3 + $0x1700] sm:$0xff] }
 0x6dc   :  { %2709 = vmatprep.subr.bf16.mxu0 %v2560_v9  ;;  %3009 = vmatprep.subr.bf16.mxu1 %v2860_v11  ;;  %v2879_v9 = vld [vmem:[#allocation3 + $0x1710] sm:$0xff]  ;;  %v2582_v11 = vld [vmem:[#allocation3 + $0x1788] sm:$0xff] }
 0x6df   :  { %2710 = vmatpush1.bf16.msra.mxu0 %v2559_v14  ;;  %3010 = vmatpush1.bf16.msra.mxu1 %v2859_v47  ;;  %v2882_v14 = vld [vmem:[#allocation3 + $0x1798] sm:$0xff]  ;;  %v2581_v47 = vld [vmem:[#allocation3 + $0x1780] sm:$0xff] }
 0x6e0   :  { %2711 = vmatprep.subr.bf16.mxu0 %v2562_v54  ;;  %3011 = vmatprep.subr.bf16.mxu1 %v2862_v62  ;;  %v2881_v54 = vld [vmem:[#allocation3 + $0x1790] sm:$0xff]  ;;  %v2584_v62 = vld [vmem:[#allocation3 + $0x1808] sm:$0xff] }
 0x6e3   :  { %2712 = vmatpush1.bf16.msra.mxu0 %v2561_v46  ;;  %3012 = vmatpush1.bf16.msra.mxu1 %v2861_v53  ;;  %v2884_v46 = vld [vmem:[#allocation3 + $0x1818] sm:$0xff]  ;;  %v7637_v53 = vpack.c.bf16 %v2471_v31, %v2463_v35  ;;  %v2588_v35 = vld [vmem:[#allocation3 + $0x1908] sm:$0xff] }
 0x6e4   :  { %2713 = vmatprep.subr.bf16.mxu0 %v2564_v60  ;;  %3013 = vmatprep.subr.bf16.mxu1 %v2864_v26  ;;  %v2583_v60 = vld [vmem:[#allocation3 + $0x1800] sm:$0xff]  ;;  %v2883_v26 = vld [vmem:[#allocation3 + $0x1810] sm:$0xff]  ;;  %v2888_v31 = vld [vmem:[#allocation3 + $0x1918] sm:$0xff] }
 0x6e7   :  { %2714 = vmatpush1.bf16.msra.mxu0 %v2563_v49  ;;  %3014 = vmatpush1.bf16.msra.mxu1 %v2863_v61  ;;  %v2586_v49 = vld [vmem:[#allocation3 + $0x1888] sm:$0xff]  ;;  %v2886_v61 = vld [vmem:[#allocation3 + $0x1898] sm:$0xff] }
 0x6e8   :  { %2715 = vmatprep.subr.bf16.mxu0 %v2566_v1  ;;  %3015 = vmatprep.subr.bf16.mxu1 %v2866_v30  ;;  %v7643_v1 = vpack.c.bf16 %v2474_v37, %v2466_v28  ;;  %v2887_v28 = vld [vmem:[#allocation3 + $0x1910] sm:$0xff]  ;;  %v2890_v37 = vld [vmem:[#allocation3 + $0x1998] sm:$0xff]  ;;  %v2589_v30 = vld [vmem:[#allocation3 + $0x1980] sm:$0xff] }
 0x6eb   :  { %2716 = vmatpush1.bf16.msra.mxu0 %v2565_v15  ;;  %3016 = vmatpush1.bf16.msra.mxu1 %v2865_v16  ;;  %v2889_v15 = vld [vmem:[#allocation3 + $0x1990] sm:$0xff]  ;;  %v2592_v16 = vld [vmem:[#allocation3 + $0x1a08] sm:$0xff] }
 0x6ec   :  { %2717 = vmatprep.subr.bf16.mxu0 %v2568_v18  ;;  %3017 = vmatprep.subr.bf16.mxu1 %v2868_v19  ;;  %v2892_v18 = vld [vmem:[#allocation3 + $0x1a18] sm:$0xff]  ;;  %v2591_v19 = vld [vmem:[#allocation3 + $0x1a00] sm:$0xff] }
 0x6ef   :  { %2718 = vmatpush1.bf16.msra.mxu0 %v2567_v20  ;;  %3018 = vmatpush1.bf16.msra.mxu1 %v2867_v22  ;;  %v2891_v20 = vld [vmem:[#allocation3 + $0x1a10] sm:$0xff]  ;;  %v2594_v22 = vld [vmem:[#allocation3 + $0x1a88] sm:$0xff] }
 0x6f0   :  { %2719 = vmatprep.subr.bf16.mxu0 %v2570_v21  ;;  %3019 = vmatprep.subr.bf16.mxu1 %v2870_v36  ;;  %v2894_v21 = vld [vmem:[#allocation3 + $0x1a98] sm:$0xff]  ;;  %v2593_v36 = vld [vmem:[#allocation3 + $0x1a80] sm:$0xff] }
 0x6f3   :  { %2720 = vmatpush1.bf16.msra.mxu0 %v2569_v52  ;;  %3020 = vmatpush1.bf16.msra.mxu1 %v2869_v55  ;;  %v2893_v52 = vld [vmem:[#allocation3 + $0x1a90] sm:$0xff]  ;;  %v2596_v55 = vld [vmem:[#allocation3 + $0x1b08] sm:$0xff] }
 0x6f4   :  { %2721 = vmatprep.subr.bf16.mxu0 %v2572_v59  ;;  %3021 = vmatprep.subr.bf16.mxu1 %v2872_v2  ;;  %v2896_v59 = vld [vmem:[#allocation3 + $0x1b18] sm:$0xff]  ;;  %v2595_v2 = vld [vmem:[#allocation3 + $0x1b00] sm:$0xff] }
 0x6f7   :  { %2722 = vmatpush1.bf16.msra.mxu0 %v2571_v3  ;;  %3022 = vmatpush1.bf16.msra.mxu1 %v2871_v4  ;;  %v2895_v3 = vld [vmem:[#allocation3 + $0x1b10] sm:$0xff]  ;;  %v2598_v4 = vld [vmem:[#allocation3 + $0x1b88] sm:$0xff] }
 0x6f8   :  { %2723 = vmatprep.subr.bf16.mxu0 %v2574_v5  ;;  %3023 = vmatprep.subr.bf16.mxu1 %v2874_v7  ;;  %v2898_v5 = vld [vmem:[#allocation3 + $0x1b98] sm:$0xff]  ;;  %v2597_v7 = vld [vmem:[#allocation3 + $0x1b80] sm:$0xff] }
 0x6fb   :  { %2724 = vmatpush1.bf16.msra.mxu0 %v2573_v32  ;;  %3024 = vmatpush1.bf16.msra.mxu1 %v2873_v43  ;;  %v2897_v32 = vld [vmem:[#allocation3 + $0x1b90] sm:$0xff]  ;;  %v2600_v43 = vld [vmem:[#allocation3 + $0x1c08] sm:$0xff] }
 0x6fc   :  { %2725 = vmatprep.subr.bf16.mxu0 %v2576_v10  ;;  %3025 = vmatprep.subr.bf16.mxu1 %v2876_v48  ;;  %v2900_v10 = vld [vmem:[#allocation3 + $0x1c18] sm:$0xff]  ;;  %v2599_v48 = vld [vmem:[#allocation3 + $0x1c00] sm:$0xff] }
 0x6ff   :  { %2726 = vmatpush1.bf16.msra.mxu0 %v2575_v57  ;;  %3026 = vmatpush1.bf16.msra.mxu1 %v2875_v63  ;;  %v2899_v57 = vld [vmem:[#allocation3 + $0x1c10] sm:$0xff]  ;;  %v2602_v63 = vld [vmem:[#allocation3 + $0x1c88] sm:$0xff] }
 0x700   :  { %2727 = vmatprep.subr.bf16.mxu0 %v2578_v29  ;;  %3027 = vmatprep.subr.bf16.mxu1 %v2878_v51  ;;  %v2902_v29 = vld [vmem:[#allocation3 + $0x1c98] sm:$0xff]  ;;  %v2601_v51 = vld [vmem:[#allocation3 + $0x1c80] sm:$0xff] }
 0x703   :  { %2728 = vmatpush1.bf16.msra.mxu0 %v2577_v58  ;;  %3028 = vmatpush1.bf16.msra.mxu1 %v2877_v24  ;;  %v2901_v58 = vld [vmem:[#allocation3 + $0x1c90] sm:$0xff]  ;;  %v2604_v24 = vld [vmem:[#allocation3 + $0x1d08] sm:$0xff] }
 0x704   :  { %2729 = vmatprep.subr.bf16.mxu0 %v2580_v33  ;;  %3029 = vmatprep.subr.bf16.mxu1 %v2880_v39  ;;  %v2904_v33 = vld [vmem:[#allocation3 + $0x1d18] sm:$0xff]  ;;  %v2603_v39 = vld [vmem:[#allocation3 + $0x1d00] sm:$0xff] }
 0x707   :  { %2730 = vmatpush1.bf16.msra.mxu0 %v2579_v8  ;;  %3030 = vmatpush1.bf16.msra.mxu1 %v2879_v9  ;;  %v2903_v8 = vld [vmem:[#allocation3 + $0x1d10] sm:$0xff]  ;;  %v2606_v9 = vld [vmem:[#allocation3 + $0x1d88] sm:$0xff] }
 0x708   :  { %2731 = vmatprep.subr.bf16.mxu0 %v2582_v11  ;;  %3031 = vmatprep.subr.bf16.mxu1 %v2882_v14  ;;  %v2906_v11 = vld [vmem:[#allocation3 + $0x1d98] sm:$0xff]  ;;  %v2605_v14 = vld [vmem:[#allocation3 + $0x1d80] sm:$0xff] }
 0x70b   :  { %2732 = vmatpush1.bf16.msra.mxu0 %v2581_v47  ;;  %3032 = vmatpush1.bf16.msra.mxu1 %v2881_v54  ;;  %v2905_v47 = vld [vmem:[#allocation3 + $0x1d90] sm:$0xff]  ;;  %v2608_v54 = vld [vmem:[#allocation3 + $0x1e08] sm:$0xff] }
 0x70c   :  { %2744 = vmatprep.subr.bf16.mxu0 %v2584_v62  ;;  %3044 = vmatprep.subr.bf16.mxu1 %v2884_v46  ;;  %v2908_v62 = vld [vmem:[#allocation3 + $0x1e18] sm:$0xff]  ;;  %v2607_v46 = vld [vmem:[#allocation3 + $0x1e00] sm:$0xff] }
 0x70e   :  { %2734 = vmatmul.mubr.bf16.vlgmr.msra.gmra.mrb[64].mxu0 %v7637_v53  ;;  %3034 = vmatmul.mubr.bf16.vlgmr.msra.gmra.mrb[64].mxu1 %v7637_v53 }
 0x70f   :  { %2745 = vmatpush1.bf16.msra.mxu0 %v2583_v60  ;;  %3045 = vmatpush1.bf16.msra.mxu1 %v2883_v26  ;;  %v2907_v60 = vld [vmem:[#allocation3 + $0x1e10] sm:$0xff]  ;;  %v2610_v26 = vld [vmem:[#allocation3 + $0x1e88] sm:$0xff] }
 0x710   :  { %2746 = vmatprep.subr.bf16.mxu0 %v2586_v49  ;;  %3046 = vmatprep.subr.bf16.mxu1 %v2886_v61  ;;  %v2910_v49 = vld [vmem:[#allocation3 + $0x1e98] sm:$0xff]  ;;  %v2609_v61 = vld [vmem:[#allocation3 + $0x1e80] sm:$0xff] }
 0x711   :  { %2776 = vmatprep.mubr.bf16.mxu0 %v7643_v1  ;;  %3076 = vmatprep.mubr.bf16.mxu1 %v7643_v1 }
 0x713   :  { %2747 = vmatpush1.bf16.msra.mxu0 %v2585_v50  ;;  %3047 = vmatpush1.bf16.msra.mxu1 %v2885_v56  ;;  %v2909_v50 = vld [vmem:[#allocation3 + $0x1e90] sm:$0xff]  ;;  %v2612_v56 = vld [vmem:[#allocation3 + $0x1f08] sm:$0xff] }
 0x714   :  { %2748 = vmatprep.subr.bf16.mxu0 %v2588_v35  ;;  %3048 = vmatprep.subr.bf16.mxu1 %v2888_v31  ;;  %v2912_v35 = vld [vmem:[#allocation3 + $0x1f18] sm:$0xff]  ;;  %v2611_v31 = vld [vmem:[#allocation3 + $0x1f00] sm:$0xff] }
 0x717   :  { %2749 = vmatpush1.bf16.msra.mxu0 %v2587_v41  ;;  %3049 = vmatpush1.bf16.msra.mxu1 %v2887_v28  ;;  %v2911_v41 = vld [vmem:[#allocation3 + $0x1f10] sm:$0xff]  ;;  %v2614_v28 = vld [vmem:[#allocation3 + $0x1f88] sm:$0xff] }
 0x718   :  { %2750 = vmatprep.subr.bf16.mxu0 %v2590_v0  ;;  %3050 = vmatprep.subr.bf16.mxu1 %v2890_v37  ;;  %v2914_v0 = vld [vmem:[#allocation3 + $0x1f98] sm:$0xff]  ;;  %v2613_v37 = vld [vmem:[#allocation3 + $0x1f80] sm:$0xff] }
 0x71b   :  { %2751 = vmatpush1.bf16.msra.mxu0 %v2589_v30  ;;  %3051 = vmatpush1.bf16.msra.mxu1 %v2889_v15  ;;  %v2913_v30 = vld [vmem:[#allocation3 + $0x1f90] sm:$0xff]  ;;  %v3092_v15 = vld [vmem:[#allocation3 + $0x28] sm:$0xff] }
 0x71c   :  { %2752 = vmatprep.subr.bf16.mxu0 %v2592_v16  ;;  %3052 = vmatprep.subr.bf16.mxu1 %v2892_v18  ;;  %v3396_v16 = vld [vmem:[#allocation3 + $0x38] sm:$0xff]  ;;  %v7653_v18 = vpack.c.bf16 %v2473_v34, %v2465_v44  ;;  %v3096_v44 = vld [vmem:[#allocation3 + $0x128] sm:$0xff] }
 0x71d   :  { %v3400_v34 = vld [vmem:[#allocation3 + $0x138] sm:$0xff] }
 0x71f   :  { %2753 = vmatpush1.bf16.msra.mxu0 %v2591_v19  ;;  %3053 = vmatpush1.bf16.msra.mxu1 %v2891_v20  ;;  %v3091_v19 = vld [vmem:[#allocation3 + $0x20] sm:$0xff]  ;;  %v3395_v20 = vld [vmem:[#allocation3 + $0x30] sm:$0xff] }
 0x720   :  { %2754 = vmatprep.subr.bf16.mxu0 %v2594_v22  ;;  %3054 = vmatprep.subr.bf16.mxu1 %v2894_v21  ;;  %v3094_v22 = vld [vmem:[#allocation3 + $0xa8] sm:$0xff]  ;;  %v3398_v21 = vld [vmem:[#allocation3 + $0xb8] sm:$0xff] }
 0x723   :  { %2755 = vmatpush1.bf16.msra.mxu0 %v2593_v36  ;;  %3055 = vmatpush1.bf16.msra.mxu1 %v2893_v52  ;;  %v3095_v36 = vld [vmem:[#allocation3 + $0x120] sm:$0xff]  ;;  %v3399_v52 = vld [vmem:[#allocation3 + $0x130] sm:$0xff] }
 0x724   :  { %2756 = vmatprep.subr.bf16.mxu0 %v2596_v55  ;;  %3056 = vmatprep.subr.bf16.mxu1 %v2896_v59  ;;  %v3098_v55 = vld [vmem:[#allocation3 + $0x1a8] sm:$0xff]  ;;  %v3402_v59 = vld [vmem:[#allocation3 + $0x1b8] sm:$0xff] }
 0x727   :  { %2757 = vmatpush1.bf16.msra.mxu0 %v2595_v2  ;;  %3057 = vmatpush1.bf16.msra.mxu1 %v2895_v3  ;;  %v3097_v2 = vld [vmem:[#allocation3 + $0x1a0] sm:$0xff]  ;;  %v3401_v3 = vld [vmem:[#allocation3 + $0x1b0] sm:$0xff] }
 0x728   :  { %2758 = vmatprep.subr.bf16.mxu0 %v2598_v4  ;;  %3058 = vmatprep.subr.bf16.mxu1 %v2898_v5  ;;  %v3100_v4 = vld [vmem:[#allocation3 + $0x228] sm:$0xff]  ;;  %v3404_v5 = vld [vmem:[#allocation3 + $0x238] sm:$0xff] }
 0x72b   :  { %2759 = vmatpush1.bf16.msra.mxu0 %v2597_v7  ;;  %3059 = vmatpush1.bf16.msra.mxu1 %v2897_v32  ;;  %v3099_v7 = vld [vmem:[#allocation3 + $0x220] sm:$0xff]  ;;  %v3403_v32 = vld [vmem:[#allocation3 + $0x230] sm:$0xff] }
 0x72c   :  { %2760 = vmatprep.subr.bf16.mxu0 %v2600_v43  ;;  %3060 = vmatprep.subr.bf16.mxu1 %v2900_v10  ;;  %v3102_v43 = vld [vmem:[#allocation3 + $0x2a8] sm:$0xff]  ;;  %v3406_v10 = vld [vmem:[#allocation3 + $0x2b8] sm:$0xff] }
 0x72f   :  { %2761 = vmatpush1.bf16.msra.mxu0 %v2599_v48  ;;  %3061 = vmatpush1.bf16.msra.mxu1 %v2899_v57  ;;  %v3101_v48 = vld [vmem:[#allocation3 + $0x2a0] sm:$0xff]  ;;  %v3405_v57 = vld [vmem:[#allocation3 + $0x2b0] sm:$0xff] }
 0x730   :  { %2762 = vmatprep.subr.bf16.mxu0 %v2602_v63  ;;  %3062 = vmatprep.subr.bf16.mxu1 %v2902_v29  ;;  %v3104_v63 = vld [vmem:[#allocation3 + $0x328] sm:$0xff]  ;;  %v3408_v29 = vld [vmem:[#allocation3 + $0x338] sm:$0xff] }
 0x733   :  { %2763 = vmatpush1.bf16.msra.mxu0 %v2601_v51  ;;  %3063 = vmatpush1.bf16.msra.mxu1 %v2901_v58  ;;  %v3103_v51 = vld [vmem:[#allocation3 + $0x320] sm:$0xff]  ;;  %v3407_v58 = vld [vmem:[#allocation3 + $0x330] sm:$0xff] }
 0x734   :  { %2764 = vmatprep.subr.bf16.mxu0 %v2604_v24  ;;  %3064 = vmatprep.subr.bf16.mxu1 %v2904_v33  ;;  %v3106_v24 = vld [vmem:[#allocation3 + $0x3a8] sm:$0xff]  ;;  %v3410_v33 = vld [vmem:[#allocation3 + $0x3b8] sm:$0xff] }
 0x737   :  { %2765 = vmatpush1.bf16.msra.mxu0 %v2603_v39  ;;  %3065 = vmatpush1.bf16.msra.mxu1 %v2903_v8  ;;  %v3105_v39 = vld [vmem:[#allocation3 + $0x3a0] sm:$0xff]  ;;  %v3409_v8 = vld [vmem:[#allocation3 + $0x3b0] sm:$0xff] }
 0x738   :  { %2766 = vmatprep.subr.bf16.mxu0 %v2606_v9  ;;  %3066 = vmatprep.subr.bf16.mxu1 %v2906_v11  ;;  %v3108_v9 = vld [vmem:[#allocation3 + $0x428] sm:$0xff]  ;;  %v3412_v11 = vld [vmem:[#allocation3 + $0x438] sm:$0xff] }
 0x73b   :  { %2767 = vmatpush1.bf16.msra.mxu0 %v2605_v14  ;;  %3067 = vmatpush1.bf16.msra.mxu1 %v2905_v47  ;;  %v3107_v14 = vld [vmem:[#allocation3 + $0x420] sm:$0xff]  ;;  %v3411_v47 = vld [vmem:[#allocation3 + $0x430] sm:$0xff] }
 0x73c   :  { %2768 = vmatprep.subr.bf16.mxu0 %v2608_v54  ;;  %3068 = vmatprep.subr.bf16.mxu1 %v2908_v62  ;;  %v3110_v54 = vld [vmem:[#allocation3 + $0x4a8] sm:$0xff]  ;;  %v3414_v62 = vld [vmem:[#allocation3 + $0x4b8] sm:$0xff] }
 0x73f   :  { %2769 = vmatpush1.bf16.msra.mxu0 %v2607_v46  ;;  %3069 = vmatpush1.bf16.msra.mxu1 %v2907_v60  ;;  %v3109_v46 = vld [vmem:[#allocation3 + $0x4a0] sm:$0xff]  ;;  %v3413_v60 = vld [vmem:[#allocation3 + $0x4b0] sm:$0xff] }
 0x740   :  { %2770 = vmatprep.subr.bf16.mxu0 %v2610_v26  ;;  %3070 = vmatprep.subr.bf16.mxu1 %v2910_v49  ;;  %v3112_v26 = vld [vmem:[#allocation3 + $0x528] sm:$0xff]  ;;  %v3416_v49 = vld [vmem:[#allocation3 + $0x538] sm:$0xff] }
 0x743   :  { %2771 = vmatpush1.bf16.msra.mxu0 %v2609_v61  ;;  %3071 = vmatpush1.bf16.msra.mxu1 %v2909_v50  ;;  %v3111_v61 = vld [vmem:[#allocation3 + $0x520] sm:$0xff]  ;;  %v3415_v50 = vld [vmem:[#allocation3 + $0x530] sm:$0xff] }
 0x744   :  { %2772 = vmatprep.subr.bf16.mxu0 %v2612_v56  ;;  %3072 = vmatprep.subr.bf16.mxu1 %v2912_v35  ;;  %v3114_v56 = vld [vmem:[#allocation3 + $0x5a8] sm:$0xff]  ;;  %v3418_v35 = vld [vmem:[#allocation3 + $0x5b8] sm:$0xff] }
 0x747   :  { %2773 = vmatpush1.bf16.msra.mxu0 %v2611_v31  ;;  %3073 = vmatpush1.bf16.msra.mxu1 %v2911_v41  ;;  %v3113_v31 = vld [vmem:[#allocation3 + $0x5a0] sm:$0xff]  ;;  %v3417_v41 = vld [vmem:[#allocation3 + $0x5b0] sm:$0xff] }
 0x748   :  { %2774 = vmatprep.subr.bf16.mxu0 %v2614_v28  ;;  %3074 = vmatprep.subr.bf16.mxu1 %v2914_v0  ;;  %v3116_v28 = vld [vmem:[#allocation3 + $0x628] sm:$0xff]  ;;  %v3420_v0 = vld [vmem:[#allocation3 + $0x638] sm:$0xff] }
 0x74b   :  { %2775 = vmatpush1.bf16.msra.mxu0 %v2613_v37  ;;  %3075 = vmatpush1.bf16.msra.mxu1 %v2913_v30  ;;  %v3115_v37 = vld [vmem:[#allocation3 + $0x620] sm:$0xff]  ;;  %v3419_v30 = vld [vmem:[#allocation3 + $0x630] sm:$0xff] }
 0x74c   :  { %3219 = vmatprep.subr.bf16.mxu0 %v3092_v15  ;;  %3523 = vmatprep.subr.bf16.mxu1 %v3396_v16  ;;  %v3118_v15 = vld [vmem:[#allocation3 + $0x6a8] sm:$0xff]  ;;  %v3422_v16 = vld [vmem:[#allocation3 + $0x6b8] sm:$0xff] }
 0x74e   :  { %2777 = vmatmul.mubr.bf16.vlgmr.msra.gmra.mrb[64].mxu0 %v7653_v18  ;;  %3077 = vmatmul.mubr.bf16.vlgmr.msra.gmra.mrb[64].mxu1 %v7653_v18 }
 0x74f   :  { %3220 = vmatpush1.bf16.msra.mxu0 %v3091_v19  ;;  %3524 = vmatpush1.bf16.msra.mxu1 %v3395_v20  ;;  %v3117_v19 = vld [vmem:[#allocation3 + $0x6a0] sm:$0xff]  ;;  %v3421_v20 = vld [vmem:[#allocation3 + $0x6b0] sm:$0xff] }
 0x750   :  { %3221 = vmatprep.subr.bf16.mxu0 %v3094_v22  ;;  %3525 = vmatprep.subr.bf16.mxu1 %v3398_v21  ;;  %v3120_v22 = vld [vmem:[#allocation3 + $0x728] sm:$0xff]  ;;  %v3424_v21 = vld [vmem:[#allocation3 + $0x738] sm:$0xff] }
 0x751   :  { %3251 = vmatprep.mubr.bf16.mxu0 %v7597_v38  ;;  %3555 = vmatprep.mubr.bf16.mxu1 %v7597_v38 }
 0x753   :  { %3222 = vmatpush1.bf16.msra.mxu0 %v3093_v40  ;;  %3526 = vmatpush1.bf16.msra.mxu1 %v3397_v45  ;;  %v3119_v40 = vld [vmem:[#allocation3 + $0x720] sm:$0xff]  ;;  %v3423_v45 = vld [vmem:[#allocation3 + $0x730] sm:$0xff] }
 0x754   :  { %3223 = vmatprep.subr.bf16.mxu0 %v3096_v44  ;;  %3527 = vmatprep.subr.bf16.mxu1 %v3400_v34  ;;  %v3122_v44 = vld [vmem:[#allocation3 + $0x7a8] sm:$0xff]  ;;  %v3426_v34 = vld [vmem:[#allocation3 + $0x7b8] sm:$0xff] }
 0x757   :  { %3224 = vmatpush1.bf16.msra.mxu0 %v3095_v36  ;;  %3528 = vmatpush1.bf16.msra.mxu1 %v3399_v52  ;;  %v3121_v36 = vld [vmem:[#allocation3 + $0x7a0] sm:$0xff]  ;;  %v3425_v52 = vld [vmem:[#allocation3 + $0x7b0] sm:$0xff] }
 0x758   :  { %3225 = vmatprep.subr.bf16.mxu0 %v3098_v55  ;;  %3529 = vmatprep.subr.bf16.mxu1 %v3402_v59  ;;  %v3124_v55 = vld [vmem:[#allocation3 + $0x828] sm:$0xff]  ;;  %v3428_v59 = vld [vmem:[#allocation3 + $0x838] sm:$0xff] }
 0x75b   :  { %3226 = vmatpush1.bf16.msra.mxu0 %v3097_v2  ;;  %3530 = vmatpush1.bf16.msra.mxu1 %v3401_v3  ;;  %v3123_v2 = vld [vmem:[#allocation3 + $0x820] sm:$0xff]  ;;  %v3427_v3 = vld [vmem:[#allocation3 + $0x830] sm:$0xff] }
 0x75c   :  { %3227 = vmatprep.subr.bf16.mxu0 %v3100_v4  ;;  %3531 = vmatprep.subr.bf16.mxu1 %v3404_v5  ;;  %v3126_v4 = vld [vmem:[#allocation3 + $0x8a8] sm:$0xff]  ;;  %v3430_v5 = vld [vmem:[#allocation3 + $0x8b8] sm:$0xff] }
 0x75f   :  { %3228 = vmatpush1.bf16.msra.mxu0 %v3099_v7  ;;  %3532 = vmatpush1.bf16.msra.mxu1 %v3403_v32  ;;  %v3125_v7 = vld [vmem:[#allocation3 + $0x8a0] sm:$0xff]  ;;  %v3429_v32 = vld [vmem:[#allocation3 + $0x8b0] sm:$0xff] }
 0x760   :  { %3229 = vmatprep.subr.bf16.mxu0 %v3102_v43  ;;  %3533 = vmatprep.subr.bf16.mxu1 %v3406_v10  ;;  %v3128_v43 = vld [vmem:[#allocation3 + $0x928] sm:$0xff]  ;;  %v3432_v10 = vld [vmem:[#allocation3 + $0x938] sm:$0xff] }
 0x763   :  { %3230 = vmatpush1.bf16.msra.mxu0 %v3101_v48  ;;  %3534 = vmatpush1.bf16.msra.mxu1 %v3405_v57  ;;  %v3127_v48 = vld [vmem:[#allocation3 + $0x920] sm:$0xff]  ;;  %v3431_v57 = vld [vmem:[#allocation3 + $0x930] sm:$0xff] }
 0x764   :  { %3231 = vmatprep.subr.bf16.mxu0 %v3104_v63  ;;  %3535 = vmatprep.subr.bf16.mxu1 %v3408_v29  ;;  %v3130_v63 = vld [vmem:[#allocation3 + $0x9a8] sm:$0xff]  ;;  %v3434_v29 = vld [vmem:[#allocation3 + $0x9b8] sm:$0xff] }
 0x767   :  { %3232 = vmatpush1.bf16.msra.mxu0 %v3103_v51  ;;  %3536 = vmatpush1.bf16.msra.mxu1 %v3407_v58  ;;  %v3129_v51 = vld [vmem:[#allocation3 + $0x9a0] sm:$0xff]  ;;  %v3433_v58 = vld [vmem:[#allocation3 + $0x9b0] sm:$0xff] }
 0x768   :  { %3233 = vmatprep.subr.bf16.mxu0 %v3106_v24  ;;  %3537 = vmatprep.subr.bf16.mxu1 %v3410_v33  ;;  %v3132_v24 = vld [vmem:[#allocation3 + $0xa28] sm:$0xff]  ;;  %v3436_v33 = vld [vmem:[#allocation3 + $0xa38] sm:$0xff] }
 0x76b   :  { %3234 = vmatpush1.bf16.msra.mxu0 %v3105_v39  ;;  %3538 = vmatpush1.bf16.msra.mxu1 %v3409_v8  ;;  %v3131_v39 = vld [vmem:[#allocation3 + $0xa20] sm:$0xff]  ;;  %v3435_v8 = vld [vmem:[#allocation3 + $0xa30] sm:$0xff] }
 0x76c   :  { %3235 = vmatprep.subr.bf16.mxu0 %v3108_v9  ;;  %3539 = vmatprep.subr.bf16.mxu1 %v3412_v11  ;;  %v3134_v9 = vld [vmem:[#allocation3 + $0xaa8] sm:$0xff]  ;;  %v3438_v11 = vld [vmem:[#allocation3 + $0xab8] sm:$0xff] }
 0x76f   :  { %3236 = vmatpush1.bf16.msra.mxu0 %v3107_v14  ;;  %3540 = vmatpush1.bf16.msra.mxu1 %v3411_v47  ;;  %v3133_v14 = vld [vmem:[#allocation3 + $0xaa0] sm:$0xff]  ;;  %v3437_v47 = vld [vmem:[#allocation3 + $0xab0] sm:$0xff] }
 0x770   :  { %3237 = vmatprep.subr.bf16.mxu0 %v3110_v54  ;;  %3541 = vmatprep.subr.bf16.mxu1 %v3414_v62  ;;  %v3136_v54 = vld [vmem:[#allocation3 + $0xb28] sm:$0xff]  ;;  %v3440_v62 = vld [vmem:[#allocation3 + $0xb38] sm:$0xff] }
 0x773   :  { %3238 = vmatpush1.bf16.msra.mxu0 %v3109_v46  ;;  %3542 = vmatpush1.bf16.msra.mxu1 %v3413_v60  ;;  %v3135_v46 = vld [vmem:[#allocation3 + $0xb20] sm:$0xff]  ;;  %v3439_v60 = vld [vmem:[#allocation3 + $0xb30] sm:$0xff] }
 0x774   :  { %3239 = vmatprep.subr.bf16.mxu0 %v3112_v26  ;;  %3543 = vmatprep.subr.bf16.mxu1 %v3416_v49  ;;  %v3138_v26 = vld [vmem:[#allocation3 + $0xba8] sm:$0xff]  ;;  %v3442_v49 = vld [vmem:[#allocation3 + $0xbb8] sm:$0xff] }
 0x777   :  { %3240 = vmatpush1.bf16.msra.mxu0 %v3111_v61  ;;  %3544 = vmatpush1.bf16.msra.mxu1 %v3415_v50  ;;  %v3137_v61 = vld [vmem:[#allocation3 + $0xba0] sm:$0xff]  ;;  %v3441_v50 = vld [vmem:[#allocation3 + $0xbb0] sm:$0xff] }
 0x778   :  { %3241 = vmatprep.subr.bf16.mxu0 %v3114_v56  ;;  %3545 = vmatprep.subr.bf16.mxu1 %v3418_v35  ;;  %v3140_v56 = vld [vmem:[#allocation3 + $0xc28] sm:$0xff]  ;;  %v3444_v35 = vld [vmem:[#allocation3 + $0xc38] sm:$0xff] }
 0x77b   :  { %3242 = vmatpush1.bf16.msra.mxu0 %v3113_v31  ;;  %3546 = vmatpush1.bf16.msra.mxu1 %v3417_v41  ;;  %v3139_v31 = vld [vmem:[#allocation3 + $0xc20] sm:$0xff]  ;;  %v3443_v41 = vld [vmem:[#allocation3 + $0xc30] sm:$0xff] }
 0x77c   :  { %3243 = vmatprep.subr.bf16.mxu0 %v3116_v28  ;;  %3547 = vmatprep.subr.bf16.mxu1 %v3420_v0  ;;  %v3142_v28 = vld [vmem:[#allocation3 + $0xca8] sm:$0xff]  ;;  %v3446_v0 = vld [vmem:[#allocation3 + $0xcb8] sm:$0xff] }
 0x77f   :  { %3244 = vmatpush1.bf16.msra.mxu0 %v3115_v37  ;;  %3548 = vmatpush1.bf16.msra.mxu1 %v3419_v30  ;;  %v3141_v37 = vld [vmem:[#allocation3 + $0xca0] sm:$0xff]  ;;  %v3445_v30 = vld [vmem:[#allocation3 + $0xcb0] sm:$0xff] }
 0x780   :  { %3245 = vmatprep.subr.bf16.mxu0 %v3118_v15  ;;  %3549 = vmatprep.subr.bf16.mxu1 %v3422_v16  ;;  %v3144_v15 = vld [vmem:[#allocation3 + $0xd28] sm:$0xff]  ;;  %v3448_v16 = vld [vmem:[#allocation3 + $0xd38] sm:$0xff] }
 0x783   :  { %3246 = vmatpush1.bf16.msra.mxu0 %v3117_v19  ;;  %3550 = vmatpush1.bf16.msra.mxu1 %v3421_v20  ;;  %v3143_v19 = vld [vmem:[#allocation3 + $0xd20] sm:$0xff]  ;;  %v3447_v20 = vld [vmem:[#allocation3 + $0xd30] sm:$0xff] }
 0x784   :  { %3247 = vmatprep.subr.bf16.mxu0 %v3120_v22  ;;  %3551 = vmatprep.subr.bf16.mxu1 %v3424_v21  ;;  %v3146_v22 = vld [vmem:[#allocation3 + $0xda8] sm:$0xff]  ;;  %v3450_v21 = vld [vmem:[#allocation3 + $0xdb8] sm:$0xff] }
 0x787   :  { %3248 = vmatpush1.bf16.msra.mxu0 %v3119_v40  ;;  %3552 = vmatpush1.bf16.msra.mxu1 %v3423_v45  ;;  %v3145_v40 = vld [vmem:[#allocation3 + $0xda0] sm:$0xff]  ;;  %v3449_v45 = vld [vmem:[#allocation3 + $0xdb0] sm:$0xff] }
 0x788   :  { %3249 = vmatprep.subr.bf16.mxu0 %v3122_v44  ;;  %3553 = vmatprep.subr.bf16.mxu1 %v3426_v34  ;;  %v3148_v44 = vld [vmem:[#allocation3 + $0xe28] sm:$0xff]  ;;  %v3452_v34 = vld [vmem:[#allocation3 + $0xe38] sm:$0xff] }
 0x78b   :  { %3250 = vmatpush1.bf16.msra.mxu0 %v3121_v36  ;;  %3554 = vmatpush1.bf16.msra.mxu1 %v3425_v52  ;;  %v3147_v36 = vld [vmem:[#allocation3 + $0xe20] sm:$0xff]  ;;  %v3451_v52 = vld [vmem:[#allocation3 + $0xe30] sm:$0xff] }
 0x78c   :  { %3262 = vmatprep.subr.bf16.mxu0 %v3124_v55  ;;  %3566 = vmatprep.subr.bf16.mxu1 %v3428_v59  ;;  %v3150_v55 = vld [vmem:[#allocation3 + $0xea8] sm:$0xff]  ;;  %v3454_v59 = vld [vmem:[#allocation3 + $0xeb8] sm:$0xff] }
 0x78e   :  { %3252 = vmatmul.mubr.bf16.vlgmr.msra.gmra.mrb[68].mxu0 %v7605_v12  ;;  %3556 = vmatmul.mubr.bf16.vlgmr.msra.gmra.mrb[68].mxu1 %v7605_v12 }
 0x78f   :  { %3263 = vmatpush1.bf16.msra.mxu0 %v3123_v2  ;;  %3567 = vmatpush1.bf16.msra.mxu1 %v3427_v3  ;;  %v3149_v2 = vld [vmem:[#allocation3 + $0xea0] sm:$0xff]  ;;  %v3453_v3 = vld [vmem:[#allocation3 + $0xeb0] sm:$0xff] }
 0x790   :  { %3264 = vmatprep.subr.bf16.mxu0 %v3126_v4  ;;  %3568 = vmatprep.subr.bf16.mxu1 %v3430_v5  ;;  %v3152_v4 = vld [vmem:[#allocation3 + $0xf28] sm:$0xff]  ;;  %v3456_v5 = vld [vmem:[#allocation3 + $0xf38] sm:$0xff] }
 0x791   :  { %3294 = vmatprep.mubr.bf16.mxu0 %v7611_v27  ;;  %3598 = vmatprep.mubr.bf16.mxu1 %v7611_v27 }
 0x793   :  { %3265 = vmatpush1.bf16.msra.mxu0 %v3125_v7  ;;  %3569 = vmatpush1.bf16.msra.mxu1 %v3429_v32  ;;  %v3151_v7 = vld [vmem:[#allocation3 + $0xf20] sm:$0xff]  ;;  %v3455_v32 = vld [vmem:[#allocation3 + $0xf30] sm:$0xff] }
 0x794   :  { %3266 = vmatprep.subr.bf16.mxu0 %v3128_v43  ;;  %3570 = vmatprep.subr.bf16.mxu1 %v3432_v10  ;;  %v3154_v43 = vld [vmem:[#allocation3 + $0xfa8] sm:$0xff]  ;;  %v3458_v10 = vld [vmem:[#allocation3 + $0xfb8] sm:$0xff] }
 0x797   :  { %3267 = vmatpush1.bf16.msra.mxu0 %v3127_v48  ;;  %3571 = vmatpush1.bf16.msra.mxu1 %v3431_v57  ;;  %v3153_v48 = vld [vmem:[#allocation3 + $0xfa0] sm:$0xff]  ;;  %v3457_v57 = vld [vmem:[#allocation3 + $0xfb0] sm:$0xff] }
 0x798   :  { %3268 = vmatprep.subr.bf16.mxu0 %v3130_v63  ;;  %3572 = vmatprep.subr.bf16.mxu1 %v3434_v29  ;;  %v3156_v63 = vld [vmem:[#allocation3 + $0x1028] sm:$0xff]  ;;  %v3460_v29 = vld [vmem:[#allocation3 + $0x1038] sm:$0xff] }
 0x79b   :  { %3269 = vmatpush1.bf16.msra.mxu0 %v3129_v51  ;;  %3573 = vmatpush1.bf16.msra.mxu1 %v3433_v58  ;;  %v3155_v51 = vld [vmem:[#allocation3 + $0x1020] sm:$0xff]  ;;  %v3459_v58 = vld [vmem:[#allocation3 + $0x1030] sm:$0xff] }
 0x79c   :  { %3270 = vmatprep.subr.bf16.mxu0 %v3132_v24  ;;  %3574 = vmatprep.subr.bf16.mxu1 %v3436_v33  ;;  %v3158_v24 = vld [vmem:[#allocation3 + $0x10a8] sm:$0xff]  ;;  %v3462_v33 = vld [vmem:[#allocation3 + $0x10b8] sm:$0xff] }
 0x79f   :  { %3271 = vmatpush1.bf16.msra.mxu0 %v3131_v39  ;;  %3575 = vmatpush1.bf16.msra.mxu1 %v3435_v8  ;;  %v3157_v39 = vld [vmem:[#allocation3 + $0x10a0] sm:$0xff]  ;;  %v3461_v8 = vld [vmem:[#allocation3 + $0x10b0] sm:$0xff] }
 0x7a0   :  { %3272 = vmatprep.subr.bf16.mxu0 %v3134_v9  ;;  %3576 = vmatprep.subr.bf16.mxu1 %v3438_v11  ;;  %v3160_v9 = vld [vmem:[#allocation3 + $0x1128] sm:$0xff]  ;;  %v3464_v11 = vld [vmem:[#allocation3 + $0x1138] sm:$0xff] }
 0x7a3   :  { %3273 = vmatpush1.bf16.msra.mxu0 %v3133_v14  ;;  %3577 = vmatpush1.bf16.msra.mxu1 %v3437_v47  ;;  %v3159_v14 = vld [vmem:[#allocation3 + $0x1120] sm:$0xff]  ;;  %v3463_v47 = vld [vmem:[#allocation3 + $0x1130] sm:$0xff] }
 0x7a4   :  { %3274 = vmatprep.subr.bf16.mxu0 %v3136_v54  ;;  %3578 = vmatprep.subr.bf16.mxu1 %v3440_v62  ;;  %v3162_v54 = vld [vmem:[#allocation3 + $0x11a8] sm:$0xff]  ;;  %v3466_v62 = vld [vmem:[#allocation3 + $0x11b8] sm:$0xff] }
 0x7a7   :  { %3275 = vmatpush1.bf16.msra.mxu0 %v3135_v46  ;;  %3579 = vmatpush1.bf16.msra.mxu1 %v3439_v60  ;;  %v3161_v46 = vld [vmem:[#allocation3 + $0x11a0] sm:$0xff]  ;;  %v3465_v60 = vld [vmem:[#allocation3 + $0x11b0] sm:$0xff] }
 0x7a8   :  { %3276 = vmatprep.subr.bf16.mxu0 %v3138_v26  ;;  %3580 = vmatprep.subr.bf16.mxu1 %v3442_v49  ;;  %v3164_v26 = vld [vmem:[#allocation3 + $0x1228] sm:$0xff]  ;;  %v3468_v49 = vld [vmem:[#allocation3 + $0x1238] sm:$0xff] }
 0x7ab   :  { %3277 = vmatpush1.bf16.msra.mxu0 %v3137_v61  ;;  %3581 = vmatpush1.bf16.msra.mxu1 %v3441_v50  ;;  %v3163_v61 = vld [vmem:[#allocation3 + $0x1220] sm:$0xff]  ;;  %v3467_v50 = vld [vmem:[#allocation3 + $0x1230] sm:$0xff] }
 0x7ac   :  { %3278 = vmatprep.subr.bf16.mxu0 %v3140_v56  ;;  %3582 = vmatprep.subr.bf16.mxu1 %v3444_v35  ;;  %v3166_v56 = vld [vmem:[#allocation3 + $0x12a8] sm:$0xff]  ;;  %v3470_v35 = vld [vmem:[#allocation3 + $0x12b8] sm:$0xff] }
 0x7af   :  { %3279 = vmatpush1.bf16.msra.mxu0 %v3139_v31  ;;  %3583 = vmatpush1.bf16.msra.mxu1 %v3443_v41  ;;  %v3165_v31 = vld [vmem:[#allocation3 + $0x12a0] sm:$0xff]  ;;  %v3469_v41 = vld [vmem:[#allocation3 + $0x12b0] sm:$0xff] }
 0x7b0   :  { %3280 = vmatprep.subr.bf16.mxu0 %v3142_v28  ;;  %3584 = vmatprep.subr.bf16.mxu1 %v3446_v0  ;;  %v3168_v28 = vld [vmem:[#allocation3 + $0x1328] sm:$0xff]  ;;  %v3472_v0 = vld [vmem:[#allocation3 + $0x1338] sm:$0xff] }
 0x7b3   :  { %3281 = vmatpush1.bf16.msra.mxu0 %v3141_v37  ;;  %3585 = vmatpush1.bf16.msra.mxu1 %v3445_v30  ;;  %v3167_v37 = vld [vmem:[#allocation3 + $0x1320] sm:$0xff]  ;;  %v3471_v30 = vld [vmem:[#allocation3 + $0x1330] sm:$0xff] }
 0x7b4   :  { %3282 = vmatprep.subr.bf16.mxu0 %v3144_v15  ;;  %3586 = vmatprep.subr.bf16.mxu1 %v3448_v16  ;;  %v3170_v15 = vld [vmem:[#allocation3 + $0x13a8] sm:$0xff]  ;;  %v3474_v16 = vld [vmem:[#allocation3 + $0x13b8] sm:$0xff] }
 0x7b7   :  { %3283 = vmatpush1.bf16.msra.mxu0 %v3143_v19  ;;  %3587 = vmatpush1.bf16.msra.mxu1 %v3447_v20  ;;  %v3169_v19 = vld [vmem:[#allocation3 + $0x13a0] sm:$0xff]  ;;  %v3473_v20 = vld [vmem:[#allocation3 + $0x13b0] sm:$0xff] }
 0x7b8   :  { %3284 = vmatprep.subr.bf16.mxu0 %v3146_v22  ;;  %3588 = vmatprep.subr.bf16.mxu1 %v3450_v21  ;;  %v3172_v22 = vld [vmem:[#allocation3 + $0x1428] sm:$0xff]  ;;  %v3476_v21 = vld [vmem:[#allocation3 + $0x1438] sm:$0xff] }
 0x7bb   :  { %3285 = vmatpush1.bf16.msra.mxu0 %v3145_v40  ;;  %3589 = vmatpush1.bf16.msra.mxu1 %v3449_v45  ;;  %v3171_v40 = vld [vmem:[#allocation3 + $0x1420] sm:$0xff]  ;;  %v3475_v45 = vld [vmem:[#allocation3 + $0x1430] sm:$0xff] }
 0x7bc   :  { %3286 = vmatprep.subr.bf16.mxu0 %v3148_v44  ;;  %3590 = vmatprep.subr.bf16.mxu1 %v3452_v34  ;;  %v3174_v44 = vld [vmem:[#allocation3 + $0x14a8] sm:$0xff]  ;;  %v3478_v34 = vld [vmem:[#allocation3 + $0x14b8] sm:$0xff] }
 0x7bf   :  { %3287 = vmatpush1.bf16.msra.mxu0 %v3147_v36  ;;  %3591 = vmatpush1.bf16.msra.mxu1 %v3451_v52  ;;  %v3173_v36 = vld [vmem:[#allocation3 + $0x14a0] sm:$0xff]  ;;  %v3477_v52 = vld [vmem:[#allocation3 + $0x14b0] sm:$0xff] }
 0x7c0   :  { %3288 = vmatprep.subr.bf16.mxu0 %v3150_v55  ;;  %3592 = vmatprep.subr.bf16.mxu1 %v3454_v59  ;;  %v3176_v55 = vld [vmem:[#allocation3 + $0x1528] sm:$0xff]  ;;  %v3480_v59 = vld [vmem:[#allocation3 + $0x1538] sm:$0xff] }
 0x7c3   :  { %3289 = vmatpush1.bf16.msra.mxu0 %v3149_v2  ;;  %3593 = vmatpush1.bf16.msra.mxu1 %v3453_v3  ;;  %v3175_v2 = vld [vmem:[#allocation3 + $0x1520] sm:$0xff]  ;;  %v3479_v3 = vld [vmem:[#allocation3 + $0x1530] sm:$0xff] }
 0x7c4   :  { %3290 = vmatprep.subr.bf16.mxu0 %v3152_v4  ;;  %3594 = vmatprep.subr.bf16.mxu1 %v3456_v5  ;;  %v3178_v4 = vld [vmem:[#allocation3 + $0x15a8] sm:$0xff]  ;;  %v3482_v5 = vld [vmem:[#allocation3 + $0x15b8] sm:$0xff] }
 0x7c7   :  { %3291 = vmatpush1.bf16.msra.mxu0 %v3151_v7  ;;  %3595 = vmatpush1.bf16.msra.mxu1 %v3455_v32  ;;  %v3177_v7 = vld [vmem:[#allocation3 + $0x15a0] sm:$0xff]  ;;  %v3481_v32 = vld [vmem:[#allocation3 + $0x15b0] sm:$0xff] }
 0x7c8   :  { %3292 = vmatprep.subr.bf16.mxu0 %v3154_v43  ;;  %3596 = vmatprep.subr.bf16.mxu1 %v3458_v10  ;;  %v3180_v43 = vld [vmem:[#allocation3 + $0x1628] sm:$0xff]  ;;  %v3484_v10 = vld [vmem:[#allocation3 + $0x1638] sm:$0xff] }
 0x7cb   :  { %3293 = vmatpush1.bf16.msra.mxu0 %v3153_v48  ;;  %3597 = vmatpush1.bf16.msra.mxu1 %v3457_v57  ;;  %v3179_v48 = vld [vmem:[#allocation3 + $0x1620] sm:$0xff]  ;;  %v3483_v57 = vld [vmem:[#allocation3 + $0x1630] sm:$0xff] }
 0x7cc   :  { %3305 = vmatprep.subr.bf16.mxu0 %v3156_v63  ;;  %3609 = vmatprep.subr.bf16.mxu1 %v3460_v29  ;;  %v3182_v63 = vld [vmem:[#allocation3 + $0x16a8] sm:$0xff]  ;;  %v3486_v29 = vld [vmem:[#allocation3 + $0x16b8] sm:$0xff] }
 0x7ce   :  { %3295 = vmatmul.mubr.bf16.vlgmr.msra.gmra.mrb[68].mxu0 %v7621_v6  ;;  %3599 = vmatmul.mubr.bf16.vlgmr.msra.gmra.mrb[68].mxu1 %v7621_v6 }
 0x7cf   :  { %3306 = vmatpush1.bf16.msra.mxu0 %v3155_v51  ;;  %3610 = vmatpush1.bf16.msra.mxu1 %v3459_v58  ;;  %v3181_v51 = vld [vmem:[#allocation3 + $0x16a0] sm:$0xff]  ;;  %v3485_v58 = vld [vmem:[#allocation3 + $0x16b0] sm:$0xff] }
 0x7d0   :  { %3307 = vmatprep.subr.bf16.mxu0 %v3158_v24  ;;  %3611 = vmatprep.subr.bf16.mxu1 %v3462_v33  ;;  %v3184_v24 = vld [vmem:[#allocation3 + $0x1728] sm:$0xff]  ;;  %v3488_v33 = vld [vmem:[#allocation3 + $0x1738] sm:$0xff] }
 0x7d1   :  { %3337 = vmatprep.mubr.bf16.mxu0 %v7627_v42  ;;  %3641 = vmatprep.mubr.bf16.mxu1 %v7627_v42 }
 0x7d3   :  { %3308 = vmatpush1.bf16.msra.mxu0 %v3157_v39  ;;  %3612 = vmatpush1.bf16.msra.mxu1 %v3461_v8  ;;  %v3183_v39 = vld [vmem:[#allocation3 + $0x1720] sm:$0xff]  ;;  %v3487_v8 = vld [vmem:[#allocation3 + $0x1730] sm:$0xff] }
 0x7d4   :  { %3309 = vmatprep.subr.bf16.mxu0 %v3160_v9  ;;  %3613 = vmatprep.subr.bf16.mxu1 %v3464_v11  ;;  %v3186_v9 = vld [vmem:[#allocation3 + $0x17a8] sm:$0xff]  ;;  %v3490_v11 = vld [vmem:[#allocation3 + $0x17b8] sm:$0xff] }
 0x7d7   :  { %3310 = vmatpush1.bf16.msra.mxu0 %v3159_v14  ;;  %3614 = vmatpush1.bf16.msra.mxu1 %v3463_v47  ;;  %v3185_v14 = vld [vmem:[#allocation3 + $0x17a0] sm:$0xff]  ;;  %v3489_v47 = vld [vmem:[#allocation3 + $0x17b0] sm:$0xff] }
 0x7d8   :  { %3311 = vmatprep.subr.bf16.mxu0 %v3162_v54  ;;  %3615 = vmatprep.subr.bf16.mxu1 %v3466_v62  ;;  %v3188_v54 = vld [vmem:[#allocation3 + $0x1828] sm:$0xff]  ;;  %v3492_v62 = vld [vmem:[#allocation3 + $0x1838] sm:$0xff] }
 0x7db   :  { %3312 = vmatpush1.bf16.msra.mxu0 %v3161_v46  ;;  %3616 = vmatpush1.bf16.msra.mxu1 %v3465_v60  ;;  %v3187_v46 = vld [vmem:[#allocation3 + $0x1820] sm:$0xff]  ;;  %v3491_v60 = vld [vmem:[#allocation3 + $0x1830] sm:$0xff] }
 0x7dc   :  { %3313 = vmatprep.subr.bf16.mxu0 %v3164_v26  ;;  %3617 = vmatprep.subr.bf16.mxu1 %v3468_v49  ;;  %v3190_v26 = vld [vmem:[#allocation3 + $0x18a8] sm:$0xff]  ;;  %v3494_v49 = vld [vmem:[#allocation3 + $0x18b8] sm:$0xff] }
 0x7df   :  { %3314 = vmatpush1.bf16.msra.mxu0 %v3163_v61  ;;  %3618 = vmatpush1.bf16.msra.mxu1 %v3467_v50  ;;  %v3189_v61 = vld [vmem:[#allocation3 + $0x18a0] sm:$0xff]  ;;  %v3493_v50 = vld [vmem:[#allocation3 + $0x18b0] sm:$0xff] }
 0x7e0   :  { %3315 = vmatprep.subr.bf16.mxu0 %v3166_v56  ;;  %3619 = vmatprep.subr.bf16.mxu1 %v3470_v35  ;;  %v3192_v56 = vld [vmem:[#allocation3 + $0x1928] sm:$0xff]  ;;  %v3496_v35 = vld [vmem:[#allocation3 + $0x1938] sm:$0xff] }
 0x7e3   :  { %3316 = vmatpush1.bf16.msra.mxu0 %v3165_v31  ;;  %3620 = vmatpush1.bf16.msra.mxu1 %v3469_v41  ;;  %v3191_v31 = vld [vmem:[#allocation3 + $0x1920] sm:$0xff]  ;;  %v3495_v41 = vld [vmem:[#allocation3 + $0x1930] sm:$0xff] }
 0x7e4   :  { %3317 = vmatprep.subr.bf16.mxu0 %v3168_v28  ;;  %3621 = vmatprep.subr.bf16.mxu1 %v3472_v0  ;;  %v3194_v28 = vld [vmem:[#allocation3 + $0x19a8] sm:$0xff]  ;;  %v3498_v0 = vld [vmem:[#allocation3 + $0x19b8] sm:$0xff] }
 0x7e7   :  { %3318 = vmatpush1.bf16.msra.mxu0 %v3167_v37  ;;  %3622 = vmatpush1.bf16.msra.mxu1 %v3471_v30  ;;  %v3193_v37 = vld [vmem:[#allocation3 + $0x19a0] sm:$0xff]  ;;  %v3497_v30 = vld [vmem:[#allocation3 + $0x19b0] sm:$0xff] }
 0x7e8   :  { %3319 = vmatprep.subr.bf16.mxu0 %v3170_v15  ;;  %3623 = vmatprep.subr.bf16.mxu1 %v3474_v16  ;;  %v3196_v15 = vld [vmem:[#allocation3 + $0x1a28] sm:$0xff]  ;;  %v3500_v16 = vld [vmem:[#allocation3 + $0x1a38] sm:$0xff] }
 0x7eb   :  { %3320 = vmatpush1.bf16.msra.mxu0 %v3169_v19  ;;  %3624 = vmatpush1.bf16.msra.mxu1 %v3473_v20  ;;  %v3195_v19 = vld [vmem:[#allocation3 + $0x1a20] sm:$0xff]  ;;  %v3499_v20 = vld [vmem:[#allocation3 + $0x1a30] sm:$0xff] }
 0x7ec   :  { %3321 = vmatprep.subr.bf16.mxu0 %v3172_v22  ;;  %3625 = vmatprep.subr.bf16.mxu1 %v3476_v21  ;;  %v3198_v22 = vld [vmem:[#allocation3 + $0x1aa8] sm:$0xff]  ;;  %v3502_v21 = vld [vmem:[#allocation3 + $0x1ab8] sm:$0xff] }
 0x7ef   :  { %3322 = vmatpush1.bf16.msra.mxu0 %v3171_v40  ;;  %3626 = vmatpush1.bf16.msra.mxu1 %v3475_v45  ;;  %v3197_v40 = vld [vmem:[#allocation3 + $0x1aa0] sm:$0xff]  ;;  %v3501_v45 = vld [vmem:[#allocation3 + $0x1ab0] sm:$0xff] }
 0x7f0   :  { %3323 = vmatprep.subr.bf16.mxu0 %v3174_v44  ;;  %3627 = vmatprep.subr.bf16.mxu1 %v3478_v34 }
 0x7f3   :  { %3324 = vmatpush1.bf16.msra.mxu0 %v3173_v36  ;;  %3628 = vmatpush1.bf16.msra.mxu1 %v3477_v52  ;;  %v3200_v36 = vld [vmem:[#allocation3 + $0x1b28] sm:$0xff]  ;;  %v3504_v52 = vld [vmem:[#allocation3 + $0x1b38] sm:$0xff] }
 0x7f4   :  { %3325 = vmatprep.subr.bf16.mxu0 %v3176_v55  ;;  %3629 = vmatprep.subr.bf16.mxu1 %v3480_v59 }
 0x7f7   :  { %3326 = vmatpush1.bf16.msra.mxu0 %v3175_v2  ;;  %3630 = vmatpush1.bf16.msra.mxu1 %v3479_v3 }
 0x7f8   :  { %3327 = vmatprep.subr.bf16.mxu0 %v3178_v4  ;;  %3631 = vmatprep.subr.bf16.mxu1 %v3482_v5 }
 0x7fb   :  { %3328 = vmatpush1.bf16.msra.mxu0 %v3177_v7  ;;  %3632 = vmatpush1.bf16.msra.mxu1 %v3481_v32 }
 0x7fc   :  { %3329 = vmatprep.subr.bf16.mxu0 %v3180_v43  ;;  %3633 = vmatprep.subr.bf16.mxu1 %v3484_v10  ;;  %v3199_v10 = vld [vmem:[#allocation3 + $0x1b20] sm:$0xff] }
 0x7ff   :  { %3330 = vmatpush1.bf16.msra.mxu0 %v3179_v48  ;;  %3634 = vmatpush1.bf16.msra.mxu1 %v3483_v57  ;;  %v3503_v48 = vld [vmem:[#allocation3 + $0x1b30] sm:$0xff] }
 0x800   :  { %3331 = vmatprep.subr.bf16.mxu0 %v3182_v63  ;;  %3635 = vmatprep.subr.bf16.mxu1 %v3486_v29  ;;  %v3202_v63 = vld [vmem:[#allocation3 + $0x1ba8] sm:$0xff]  ;;  %v3506_v29 = vld [vmem:[#allocation3 + $0x1bb8] sm:$0xff] }
 0x803   :  { %3332 = vmatpush1.bf16.msra.mxu0 %v3181_v51  ;;  %3636 = vmatpush1.bf16.msra.mxu1 %v3485_v58  ;;  %v3201_v51 = vld [vmem:[#allocation3 + $0x1ba0] sm:$0xff]  ;;  %v3505_v58 = vld [vmem:[#allocation3 + $0x1bb0] sm:$0xff] }
 0x804   :  { %3333 = vmatprep.subr.bf16.mxu0 %v3184_v24  ;;  %3637 = vmatprep.subr.bf16.mxu1 %v3488_v33  ;;  %v3204_v24 = vld [vmem:[#allocation3 + $0x1c28] sm:$0xff]  ;;  %v3508_v33 = vld [vmem:[#allocation3 + $0x1c38] sm:$0xff] }
 0x807   :  { %3334 = vmatpush1.bf16.msra.mxu0 %v3183_v39  ;;  %3638 = vmatpush1.bf16.msra.mxu1 %v3487_v8  ;;  %v3203_v39 = vld [vmem:[#allocation3 + $0x1c20] sm:$0xff]  ;;  %v3507_v8 = vld [vmem:[#allocation3 + $0x1c30] sm:$0xff] }
 0x808   :  { %3335 = vmatprep.subr.bf16.mxu0 %v3186_v9  ;;  %3639 = vmatprep.subr.bf16.mxu1 %v3490_v11  ;;  %v3206_v9 = vld [vmem:[#allocation3 + $0x1ca8] sm:$0xff]  ;;  %v3510_v11 = vld [vmem:[#allocation3 + $0x1cb8] sm:$0xff] }
 0x80b   :  { %3336 = vmatpush1.bf16.msra.mxu0 %v3185_v14  ;;  %3640 = vmatpush1.bf16.msra.mxu1 %v3489_v47  ;;  %v3205_v14 = vld [vmem:[#allocation3 + $0x1ca0] sm:$0xff]  ;;  %v3509_v47 = vld [vmem:[#allocation3 + $0x1cb0] sm:$0xff] }
 0x80c   :  { %3348 = vmatprep.subr.bf16.mxu0 %v3188_v54  ;;  %3652 = vmatprep.subr.bf16.mxu1 %v3492_v62  ;;  %v3208_v54 = vld [vmem:[#allocation3 + $0x1d28] sm:$0xff]  ;;  %v3512_v62 = vld [vmem:[#allocation3 + $0x1d38] sm:$0xff] }
 0x80e   :  { %3338 = vmatmul.mubr.bf16.vlgmr.msra.gmra.mrb[68].mxu0 %v7637_v53  ;;  %3642 = vmatmul.mubr.bf16.vlgmr.msra.gmra.mrb[68].mxu1 %v7637_v53 }
 0x80f   :  { %3349 = vmatpush1.bf16.msra.mxu0 %v3187_v46  ;;  %3653 = vmatpush1.bf16.msra.mxu1 %v3491_v60  ;;  %v3207_v46 = vld [vmem:[#allocation3 + $0x1d20] sm:$0xff]  ;;  %v3511_v60 = vld [vmem:[#allocation3 + $0x1d30] sm:$0xff] }
 0x810   :  { %3350 = vmatprep.subr.bf16.mxu0 %v3190_v26  ;;  %3654 = vmatprep.subr.bf16.mxu1 %v3494_v49  ;;  %v3210_v26 = vld [vmem:[#allocation3 + $0x1da8] sm:$0xff]  ;;  %v3514_v49 = vld [vmem:[#allocation3 + $0x1db8] sm:$0xff] }
 0x811   :  { %3380 = vmatprep.mubr.bf16.mxu0 %v7643_v1  ;;  %3684 = vmatprep.mubr.bf16.mxu1 %v7643_v1 }
 0x813   :  { %3351 = vmatpush1.bf16.msra.mxu0 %v3189_v61  ;;  %3655 = vmatpush1.bf16.msra.mxu1 %v3493_v50  ;;  %v3209_v61 = vld [vmem:[#allocation3 + $0x1da0] sm:$0xff]  ;;  %v3513_v50 = vld [vmem:[#allocation3 + $0x1db0] sm:$0xff] }
 0x814   :  { %3352 = vmatprep.subr.bf16.mxu0 %v3192_v56  ;;  %3656 = vmatprep.subr.bf16.mxu1 %v3496_v35  ;;  %v3212_v56 = vld [vmem:[#allocation3 + $0x1e28] sm:$0xff]  ;;  %v3516_v35 = vld [vmem:[#allocation3 + $0x1e38] sm:$0xff] }
 0x817   :  { %3353 = vmatpush1.bf16.msra.mxu0 %v3191_v31  ;;  %3657 = vmatpush1.bf16.msra.mxu1 %v3495_v41  ;;  %v3211_v31 = vld [vmem:[#allocation3 + $0x1e20] sm:$0xff]  ;;  %v3515_v41 = vld [vmem:[#allocation3 + $0x1e30] sm:$0xff] }
 0x818   :  { %3354 = vmatprep.subr.bf16.mxu0 %v3194_v28  ;;  %3658 = vmatprep.subr.bf16.mxu1 %v3498_v0  ;;  %v3214_v28 = vld [vmem:[#allocation3 + $0x1ea8] sm:$0xff]  ;;  %v3518_v0 = vld [vmem:[#allocation3 + $0x1eb8] sm:$0xff] }
 0x81b   :  { %3355 = vmatpush1.bf16.msra.mxu0 %v3193_v37  ;;  %3659 = vmatpush1.bf16.msra.mxu1 %v3497_v30  ;;  %v3213_v37 = vld [vmem:[#allocation3 + $0x1ea0] sm:$0xff]  ;;  %v3517_v30 = vld [vmem:[#allocation3 + $0x1eb0] sm:$0xff] }
 0x81c   :  { %3356 = vmatprep.subr.bf16.mxu0 %v3196_v15  ;;  %3660 = vmatprep.subr.bf16.mxu1 %v3500_v16  ;;  %v3216_v15 = vld [vmem:[#allocation3 + $0x1f28] sm:$0xff]  ;;  %v3520_v16 = vld [vmem:[#allocation3 + $0x1f38] sm:$0xff] }
 0x81f   :  { %3357 = vmatpush1.bf16.msra.mxu0 %v3195_v19  ;;  %3661 = vmatpush1.bf16.msra.mxu1 %v3499_v20  ;;  %v3215_v19 = vld [vmem:[#allocation3 + $0x1f20] sm:$0xff]  ;;  %v3519_v20 = vld [vmem:[#allocation3 + $0x1f30] sm:$0xff] }
 0x820   :  { %3358 = vmatprep.subr.bf16.mxu0 %v3198_v22  ;;  %3662 = vmatprep.subr.bf16.mxu1 %v3502_v21  ;;  %v3218_v22 = vld [vmem:[#allocation3 + $0x1fa8] sm:$0xff]  ;;  %v3522_v21 = vld [vmem:[#allocation3 + $0x1fb8] sm:$0xff] }
 0x821   :  { %v7671_v44 = vpop.f32.mrb[64].mxu0  ;;  %v7673_v34 = vpop.f32.mrb[64].mxu1 }
 0x822   :  { %v3087_v55 = vmax.f32 %v7671_v44, %v7673_v34  ;;  %v7677_v59 = vpop.f32.mrb[65].mxu0  ;;  %v7679_v2 = vpop.f32.mrb[65].mxu1 }
 0x823   :  { %v3088_v3 = vmax.f32 %v7677_v59, %v7679_v2  ;;  %v7683_v4 = vpop.f32.mrb[66].mxu0  ;;  %v7685_v5 = vpop.f32.mrb[66].mxu1  ;;  %3359 = vmatpush1.bf16.msra.mxu0 %v3197_v40  ;;  %3663 = vmatpush1.bf16.msra.mxu1 %v3501_v45  ;;  %v3217_v40 = vld [vmem:[#allocation3 + $0x1fa0] sm:$0xff]  ;;  %v3521_v45 = vld [vmem:[#allocation3 + $0x1fb0] sm:$0xff] }
 0x824   :  { %v3089_v7 = vmax.f32 %v7683_v4, %v7685_v5  ;;  %v7689_v32 = vpop.f32.mrb[67].mxu0  ;;  %v7691_v43 = vpop.f32.mrb[67].mxu1  ;;  %3360 = vmatprep.subr.bf16.mxu0 %v3200_v36  ;;  %3664 = vmatprep.subr.bf16.mxu1 %v3504_v52  ;;  %v3700_v36 = vld [vmem:[#allocation3 + $0x48] sm:$0xff]  ;;  %v4004_v52 = vld [vmem:[#allocation3 + $0x58] sm:$0xff]  ;;  %v3807_v59 = vld [vmem:[#allocation3 + $0x1b40] sm:$0xff] }
 0x825   :  { %v3090_v57 = vmax.f32 %v7689_v32, %v7691_v43  ;;  %v4111_v2 = vld [vmem:[#allocation3 + $0x1b50] sm:$0xff]  ;;  %v3811_v32 = vld [vmem:[#allocation3 + $0x1c40] sm:$0xff] }
 0x826   :  { %v4115_v43 = vld [vmem:[#allocation3 + $0x1c50] sm:$0xff] }
 0x827   :  { %3361 = vmatpush1.bf16.msra.mxu0 %v3199_v10  ;;  %3665 = vmatpush1.bf16.msra.mxu1 %v3503_v48  ;;  %v3699_v10 = vld [vmem:[#allocation3 + $0x40] sm:$0xff]  ;;  %v4003_v48 = vld [vmem:[#allocation3 + $0x50] sm:$0xff] }
 0x828   :  { %3362 = vmatprep.subr.bf16.mxu0 %v3202_v63  ;;  %3666 = vmatprep.subr.bf16.mxu1 %v3506_v29  ;;  %v3702_v63 = vld [vmem:[#allocation3 + $0xc8] sm:$0xff]  ;;  %v4006_v29 = vld [vmem:[#allocation3 + $0xd8] sm:$0xff] }
 0x82b   :  { %3363 = vmatpush1.bf16.msra.mxu0 %v3201_v51  ;;  %3667 = vmatpush1.bf16.msra.mxu1 %v3505_v58  ;;  %v3701_v51 = vld [vmem:[#allocation3 + $0xc0] sm:$0xff]  ;;  %v4005_v58 = vld [vmem:[#allocation3 + $0xd0] sm:$0xff] }
 0x82c   :  { %3364 = vmatprep.subr.bf16.mxu0 %v3204_v24  ;;  %3668 = vmatprep.subr.bf16.mxu1 %v3508_v33  ;;  %v3704_v24 = vld [vmem:[#allocation3 + $0x148] sm:$0xff]  ;;  %v4008_v33 = vld [vmem:[#allocation3 + $0x158] sm:$0xff] }
 0x82f   :  { %3365 = vmatpush1.bf16.msra.mxu0 %v3203_v39  ;;  %3669 = vmatpush1.bf16.msra.mxu1 %v3507_v8  ;;  %v3703_v39 = vld [vmem:[#allocation3 + $0x140] sm:$0xff]  ;;  %v4007_v8 = vld [vmem:[#allocation3 + $0x150] sm:$0xff] }
 0x830   :  { %3366 = vmatprep.subr.bf16.mxu0 %v3206_v9  ;;  %3670 = vmatprep.subr.bf16.mxu1 %v3510_v11  ;;  %v3706_v9 = vld [vmem:[#allocation3 + $0x1c8] sm:$0xff]  ;;  %v4010_v11 = vld [vmem:[#allocation3 + $0x1d8] sm:$0xff] }
 0x833   :  { %3367 = vmatpush1.bf16.msra.mxu0 %v3205_v14  ;;  %3671 = vmatpush1.bf16.msra.mxu1 %v3509_v47  ;;  %v3705_v14 = vld [vmem:[#allocation3 + $0x1c0] sm:$0xff]  ;;  %v4009_v47 = vld [vmem:[#allocation3 + $0x1d0] sm:$0xff] }
 0x834   :  { %3368 = vmatprep.subr.bf16.mxu0 %v3208_v54  ;;  %3672 = vmatprep.subr.bf16.mxu1 %v3512_v62  ;;  %v3708_v54 = vld [vmem:[#allocation3 + $0x248] sm:$0xff]  ;;  %v4012_v62 = vld [vmem:[#allocation3 + $0x258] sm:$0xff] }
 0x837   :  { %3369 = vmatpush1.bf16.msra.mxu0 %v3207_v46  ;;  %3673 = vmatpush1.bf16.msra.mxu1 %v3511_v60  ;;  %v3707_v46 = vld [vmem:[#allocation3 + $0x240] sm:$0xff]  ;;  %v4011_v60 = vld [vmem:[#allocation3 + $0x250] sm:$0xff] }
 0x838   :  { %3370 = vmatprep.subr.bf16.mxu0 %v3210_v26  ;;  %3674 = vmatprep.subr.bf16.mxu1 %v3514_v49  ;;  %v3710_v26 = vld [vmem:[#allocation3 + $0x2c8] sm:$0xff]  ;;  %v4014_v49 = vld [vmem:[#allocation3 + $0x2d8] sm:$0xff] }
 0x83b   :  { %3371 = vmatpush1.bf16.msra.mxu0 %v3209_v61  ;;  %3675 = vmatpush1.bf16.msra.mxu1 %v3513_v50  ;;  %v3709_v61 = vld [vmem:[#allocation3 + $0x2c0] sm:$0xff]  ;;  %v4013_v50 = vld [vmem:[#allocation3 + $0x2d0] sm:$0xff] }
 0x83c   :  { %3372 = vmatprep.subr.bf16.mxu0 %v3212_v56  ;;  %3676 = vmatprep.subr.bf16.mxu1 %v3516_v35  ;;  %v3712_v56 = vld [vmem:[#allocation3 + $0x348] sm:$0xff]  ;;  %v4016_v35 = vld [vmem:[#allocation3 + $0x358] sm:$0xff] }
 0x83f   :  { %3373 = vmatpush1.bf16.msra.mxu0 %v3211_v31  ;;  %3677 = vmatpush1.bf16.msra.mxu1 %v3515_v41  ;;  %v3711_v31 = vld [vmem:[#allocation3 + $0x340] sm:$0xff]  ;;  %v4015_v41 = vld [vmem:[#allocation3 + $0x350] sm:$0xff] }
 0x840   :  { %3374 = vmatprep.subr.bf16.mxu0 %v3214_v28  ;;  %3678 = vmatprep.subr.bf16.mxu1 %v3518_v0  ;;  %v3714_v28 = vld [vmem:[#allocation3 + $0x3c8] sm:$0xff]  ;;  %v4018_v0 = vld [vmem:[#allocation3 + $0x3d8] sm:$0xff] }
 0x843   :  { %3375 = vmatpush1.bf16.msra.mxu0 %v3213_v37  ;;  %3679 = vmatpush1.bf16.msra.mxu1 %v3517_v30  ;;  %v3713_v37 = vld [vmem:[#allocation3 + $0x3c0] sm:$0xff]  ;;  %v4017_v30 = vld [vmem:[#allocation3 + $0x3d0] sm:$0xff] }
 0x844   :  { %3376 = vmatprep.subr.bf16.mxu0 %v3216_v15  ;;  %3680 = vmatprep.subr.bf16.mxu1 %v3520_v16  ;;  %v3716_v15 = vld [vmem:[#allocation3 + $0x448] sm:$0xff]  ;;  %v4020_v16 = vld [vmem:[#allocation3 + $0x458] sm:$0xff] }
 0x847   :  { %3377 = vmatpush1.bf16.msra.mxu0 %v3215_v19  ;;  %3681 = vmatpush1.bf16.msra.mxu1 %v3519_v20  ;;  %v3715_v19 = vld [vmem:[#allocation3 + $0x440] sm:$0xff]  ;;  %v4019_v20 = vld [vmem:[#allocation3 + $0x450] sm:$0xff] }
 0x848   :  { %3378 = vmatprep.subr.bf16.mxu0 %v3218_v22  ;;  %3682 = vmatprep.subr.bf16.mxu1 %v3522_v21  ;;  %v3718_v22 = vld [vmem:[#allocation3 + $0x4c8] sm:$0xff]  ;;  %v4022_v21 = vld [vmem:[#allocation3 + $0x4d8] sm:$0xff] }
 0x84b   :  { %3379 = vmatpush1.bf16.msra.mxu0 %v3217_v40  ;;  %3683 = vmatpush1.bf16.msra.mxu1 %v3521_v45  ;;  %v3717_v40 = vld [vmem:[#allocation3 + $0x4c0] sm:$0xff]  ;;  %v4021_v45 = vld [vmem:[#allocation3 + $0x4d0] sm:$0xff] }
 0x84c   :  { %3827 = vmatprep.subr.bf16.mxu0 %v3700_v36  ;;  %4131 = vmatprep.subr.bf16.mxu1 %v4004_v52  ;;  %v3720_v36 = vld [vmem:[#allocation3 + $0x548] sm:$0xff]  ;;  %v4024_v52 = vld [vmem:[#allocation3 + $0x558] sm:$0xff] }
 0x84e   :  { %3381 = vmatmul.mubr.bf16.vlgmr.msra.gmra.mrb[68].mxu0 %v7653_v18  ;;  %3685 = vmatmul.mubr.bf16.vlgmr.msra.gmra.mrb[68].mxu1 %v7653_v18 }
 0x84f   :  { %3828 = vmatpush1.bf16.msra.mxu0 %v3699_v10  ;;  %4132 = vmatpush1.bf16.msra.mxu1 %v4003_v48  ;;  %v3719_v10 = vld [vmem:[#allocation3 + $0x540] sm:$0xff]  ;;  %v4023_v48 = vld [vmem:[#allocation3 + $0x550] sm:$0xff] }
 0x850   :  { %3829 = vmatprep.subr.bf16.mxu0 %v3702_v63  ;;  %4133 = vmatprep.subr.bf16.mxu1 %v4006_v29  ;;  %v3722_v63 = vld [vmem:[#allocation3 + $0x5c8] sm:$0xff]  ;;  %v4026_v29 = vld [vmem:[#allocation3 + $0x5d8] sm:$0xff] }
 0x851   :  { %3859 = vmatprep.mubr.bf16.mxu0 %v7597_v38  ;;  %4163 = vmatprep.mubr.bf16.mxu1 %v7597_v38 }
 0x853   :  { %3830 = vmatpush1.bf16.msra.mxu0 %v3701_v51  ;;  %4134 = vmatpush1.bf16.msra.mxu1 %v4005_v58  ;;  %v3721_v51 = vld [vmem:[#allocation3 + $0x5c0] sm:$0xff]  ;;  %v4025_v58 = vld [vmem:[#allocation3 + $0x5d0] sm:$0xff] }
 0x854   :  { %3831 = vmatprep.subr.bf16.mxu0 %v3704_v24  ;;  %4135 = vmatprep.subr.bf16.mxu1 %v4008_v33  ;;  %v3724_v24 = vld [vmem:[#allocation3 + $0x648] sm:$0xff]  ;;  %v4028_v33 = vld [vmem:[#allocation3 + $0x658] sm:$0xff] }
 0x857   :  { %3832 = vmatpush1.bf16.msra.mxu0 %v3703_v39  ;;  %4136 = vmatpush1.bf16.msra.mxu1 %v4007_v8  ;;  %v3723_v39 = vld [vmem:[#allocation3 + $0x640] sm:$0xff]  ;;  %v4027_v8 = vld [vmem:[#allocation3 + $0x650] sm:$0xff] }
 0x858   :  { %3833 = vmatprep.subr.bf16.mxu0 %v3706_v9  ;;  %4137 = vmatprep.subr.bf16.mxu1 %v4010_v11  ;;  %v3726_v9 = vld [vmem:[#allocation3 + $0x6c8] sm:$0xff]  ;;  %v4030_v11 = vld [vmem:[#allocation3 + $0x6d8] sm:$0xff] }
 0x85b   :  { %3834 = vmatpush1.bf16.msra.mxu0 %v3705_v14  ;;  %4138 = vmatpush1.bf16.msra.mxu1 %v4009_v47  ;;  %v3725_v14 = vld [vmem:[#allocation3 + $0x6c0] sm:$0xff]  ;;  %v4029_v47 = vld [vmem:[#allocation3 + $0x6d0] sm:$0xff] }
 0x85c   :  { %3835 = vmatprep.subr.bf16.mxu0 %v3708_v54  ;;  %4139 = vmatprep.subr.bf16.mxu1 %v4012_v62  ;;  %v3728_v54 = vld [vmem:[#allocation3 + $0x748] sm:$0xff]  ;;  %v4032_v62 = vld [vmem:[#allocation3 + $0x758] sm:$0xff] }
 0x85f   :  { %3836 = vmatpush1.bf16.msra.mxu0 %v3707_v46  ;;  %4140 = vmatpush1.bf16.msra.mxu1 %v4011_v60  ;;  %v3727_v46 = vld [vmem:[#allocation3 + $0x740] sm:$0xff]  ;;  %v4031_v60 = vld [vmem:[#allocation3 + $0x750] sm:$0xff] }
 0x860   :  { %3837 = vmatprep.subr.bf16.mxu0 %v3710_v26  ;;  %4141 = vmatprep.subr.bf16.mxu1 %v4014_v49  ;;  %v3730_v26 = vld [vmem:[#allocation3 + $0x7c8] sm:$0xff]  ;;  %v4034_v49 = vld [vmem:[#allocation3 + $0x7d8] sm:$0xff] }
 0x863   :  { %3838 = vmatpush1.bf16.msra.mxu0 %v3709_v61  ;;  %4142 = vmatpush1.bf16.msra.mxu1 %v4013_v50  ;;  %v3729_v61 = vld [vmem:[#allocation3 + $0x7c0] sm:$0xff]  ;;  %v4033_v50 = vld [vmem:[#allocation3 + $0x7d0] sm:$0xff] }
 0x864   :  { %3839 = vmatprep.subr.bf16.mxu0 %v3712_v56  ;;  %4143 = vmatprep.subr.bf16.mxu1 %v4016_v35  ;;  %v3732_v56 = vld [vmem:[#allocation3 + $0x848] sm:$0xff]  ;;  %v4036_v35 = vld [vmem:[#allocation3 + $0x858] sm:$0xff] }
 0x867   :  { %3840 = vmatpush1.bf16.msra.mxu0 %v3711_v31  ;;  %4144 = vmatpush1.bf16.msra.mxu1 %v4015_v41  ;;  %v3731_v31 = vld [vmem:[#allocation3 + $0x840] sm:$0xff]  ;;  %v4035_v41 = vld [vmem:[#allocation3 + $0x850] sm:$0xff] }
 0x868   :  { %3841 = vmatprep.subr.bf16.mxu0 %v3714_v28  ;;  %4145 = vmatprep.subr.bf16.mxu1 %v4018_v0  ;;  %v3734_v28 = vld [vmem:[#allocation3 + $0x8c8] sm:$0xff]  ;;  %v4038_v0 = vld [vmem:[#allocation3 + $0x8d8] sm:$0xff] }
 0x86b   :  { %3842 = vmatpush1.bf16.msra.mxu0 %v3713_v37  ;;  %4146 = vmatpush1.bf16.msra.mxu1 %v4017_v30  ;;  %v3733_v37 = vld [vmem:[#allocation3 + $0x8c0] sm:$0xff]  ;;  %v4037_v30 = vld [vmem:[#allocation3 + $0x8d0] sm:$0xff] }
 0x86c   :  { %3843 = vmatprep.subr.bf16.mxu0 %v3716_v15  ;;  %4147 = vmatprep.subr.bf16.mxu1 %v4020_v16  ;;  %v3736_v15 = vld [vmem:[#allocation3 + $0x948] sm:$0xff]  ;;  %v4040_v16 = vld [vmem:[#allocation3 + $0x958] sm:$0xff] }
 0x86f   :  { %3844 = vmatpush1.bf16.msra.mxu0 %v3715_v19  ;;  %4148 = vmatpush1.bf16.msra.mxu1 %v4019_v20  ;;  %v3735_v19 = vld [vmem:[#allocation3 + $0x940] sm:$0xff]  ;;  %v4039_v20 = vld [vmem:[#allocation3 + $0x950] sm:$0xff] }
 0x870   :  { %3845 = vmatprep.subr.bf16.mxu0 %v3718_v22  ;;  %4149 = vmatprep.subr.bf16.mxu1 %v4022_v21  ;;  %v3738_v22 = vld [vmem:[#allocation3 + $0x9c8] sm:$0xff]  ;;  %v4042_v21 = vld [vmem:[#allocation3 + $0x9d8] sm:$0xff] }
 0x873   :  { %3846 = vmatpush1.bf16.msra.mxu0 %v3717_v40  ;;  %4150 = vmatpush1.bf16.msra.mxu1 %v4021_v45  ;;  %v3737_v40 = vld [vmem:[#allocation3 + $0x9c0] sm:$0xff]  ;;  %v4041_v45 = vld [vmem:[#allocation3 + $0x9d0] sm:$0xff] }
 0x874   :  { %3847 = vmatprep.subr.bf16.mxu0 %v3720_v36  ;;  %4151 = vmatprep.subr.bf16.mxu1 %v4024_v52  ;;  %v3740_v36 = vld [vmem:[#allocation3 + $0xa48] sm:$0xff]  ;;  %v4044_v52 = vld [vmem:[#allocation3 + $0xa58] sm:$0xff] }
 0x877   :  { %3848 = vmatpush1.bf16.msra.mxu0 %v3719_v10  ;;  %4152 = vmatpush1.bf16.msra.mxu1 %v4023_v48  ;;  %v3739_v10 = vld [vmem:[#allocation3 + $0xa40] sm:$0xff]  ;;  %v4043_v48 = vld [vmem:[#allocation3 + $0xa50] sm:$0xff] }
 0x878   :  { %3849 = vmatprep.subr.bf16.mxu0 %v3722_v63  ;;  %4153 = vmatprep.subr.bf16.mxu1 %v4026_v29  ;;  %v3742_v63 = vld [vmem:[#allocation3 + $0xac8] sm:$0xff]  ;;  %v4046_v29 = vld [vmem:[#allocation3 + $0xad8] sm:$0xff] }
 0x87b   :  { %3850 = vmatpush1.bf16.msra.mxu0 %v3721_v51  ;;  %4154 = vmatpush1.bf16.msra.mxu1 %v4025_v58  ;;  %v3741_v51 = vld [vmem:[#allocation3 + $0xac0] sm:$0xff]  ;;  %v4045_v58 = vld [vmem:[#allocation3 + $0xad0] sm:$0xff] }
 0x87c   :  { %3851 = vmatprep.subr.bf16.mxu0 %v3724_v24  ;;  %4155 = vmatprep.subr.bf16.mxu1 %v4028_v33  ;;  %v3744_v24 = vld [vmem:[#allocation3 + $0xb48] sm:$0xff]  ;;  %v4048_v33 = vld [vmem:[#allocation3 + $0xb58] sm:$0xff] }
 0x87f   :  { %3852 = vmatpush1.bf16.msra.mxu0 %v3723_v39  ;;  %4156 = vmatpush1.bf16.msra.mxu1 %v4027_v8  ;;  %v3743_v39 = vld [vmem:[#allocation3 + $0xb40] sm:$0xff]  ;;  %v4047_v8 = vld [vmem:[#allocation3 + $0xb50] sm:$0xff] }
 0x880   :  { %3853 = vmatprep.subr.bf16.mxu0 %v3726_v9  ;;  %4157 = vmatprep.subr.bf16.mxu1 %v4030_v11  ;;  %v3746_v9 = vld [vmem:[#allocation3 + $0xbc8] sm:$0xff]  ;;  %v4050_v11 = vld [vmem:[#allocation3 + $0xbd8] sm:$0xff] }
 0x883   :  { %3854 = vmatpush1.bf16.msra.mxu0 %v3725_v14  ;;  %4158 = vmatpush1.bf16.msra.mxu1 %v4029_v47  ;;  %v3745_v14 = vld [vmem:[#allocation3 + $0xbc0] sm:$0xff]  ;;  %v4049_v47 = vld [vmem:[#allocation3 + $0xbd0] sm:$0xff] }
 0x884   :  { %3855 = vmatprep.subr.bf16.mxu0 %v3728_v54  ;;  %4159 = vmatprep.subr.bf16.mxu1 %v4032_v62  ;;  %v3748_v54 = vld [vmem:[#allocation3 + $0xc48] sm:$0xff]  ;;  %v4052_v62 = vld [vmem:[#allocation3 + $0xc58] sm:$0xff] }
 0x887   :  { %3856 = vmatpush1.bf16.msra.mxu0 %v3727_v46  ;;  %4160 = vmatpush1.bf16.msra.mxu1 %v4031_v60  ;;  %v3747_v46 = vld [vmem:[#allocation3 + $0xc40] sm:$0xff]  ;;  %v4051_v60 = vld [vmem:[#allocation3 + $0xc50] sm:$0xff] }
 0x888   :  { %3857 = vmatprep.subr.bf16.mxu0 %v3730_v26  ;;  %4161 = vmatprep.subr.bf16.mxu1 %v4034_v49  ;;  %v3750_v26 = vld [vmem:[#allocation3 + $0xcc8] sm:$0xff]  ;;  %v4054_v49 = vld [vmem:[#allocation3 + $0xcd8] sm:$0xff] }
 0x88b   :  { %3858 = vmatpush1.bf16.msra.mxu0 %v3729_v61  ;;  %4162 = vmatpush1.bf16.msra.mxu1 %v4033_v50  ;;  %v3749_v61 = vld [vmem:[#allocation3 + $0xcc0] sm:$0xff]  ;;  %v4053_v50 = vld [vmem:[#allocation3 + $0xcd0] sm:$0xff] }
 0x88c   :  { %3870 = vmatprep.subr.bf16.mxu0 %v3732_v56  ;;  %4174 = vmatprep.subr.bf16.mxu1 %v4036_v35  ;;  %v3752_v56 = vld [vmem:[#allocation3 + $0xd48] sm:$0xff]  ;;  %v4056_v35 = vld [vmem:[#allocation3 + $0xd58] sm:$0xff] }
 0x88e   :  { %3860 = vmatmul.mubr.bf16.vlgmr.msra.gmra.mrb[72].mxu0 %v7605_v12  ;;  %4164 = vmatmul.mubr.bf16.vlgmr.msra.gmra.mrb[72].mxu1 %v7605_v12 }
 0x88f   :  { %3871 = vmatpush1.bf16.msra.mxu0 %v3731_v31  ;;  %4175 = vmatpush1.bf16.msra.mxu1 %v4035_v41  ;;  %v3751_v31 = vld [vmem:[#allocation3 + $0xd40] sm:$0xff]  ;;  %v4055_v41 = vld [vmem:[#allocation3 + $0xd50] sm:$0xff] }
 0x890   :  { %3872 = vmatprep.subr.bf16.mxu0 %v3734_v28  ;;  %4176 = vmatprep.subr.bf16.mxu1 %v4038_v0  ;;  %v3754_v28 = vld [vmem:[#allocation3 + $0xdc8] sm:$0xff]  ;;  %v4058_v0 = vld [vmem:[#allocation3 + $0xdd8] sm:$0xff] }
 0x891   :  { %3902 = vmatprep.mubr.bf16.mxu0 %v7611_v27  ;;  %4206 = vmatprep.mubr.bf16.mxu1 %v7611_v27 }
 0x893   :  { %3873 = vmatpush1.bf16.msra.mxu0 %v3733_v37  ;;  %4177 = vmatpush1.bf16.msra.mxu1 %v4037_v30  ;;  %v3753_v37 = vld [vmem:[#allocation3 + $0xdc0] sm:$0xff]  ;;  %v4057_v30 = vld [vmem:[#allocation3 + $0xdd0] sm:$0xff] }
 0x894   :  { %3874 = vmatprep.subr.bf16.mxu0 %v3736_v15  ;;  %4178 = vmatprep.subr.bf16.mxu1 %v4040_v16  ;;  %v3756_v15 = vld [vmem:[#allocation3 + $0xe48] sm:$0xff]  ;;  %v4060_v16 = vld [vmem:[#allocation3 + $0xe58] sm:$0xff] }
 0x897   :  { %3875 = vmatpush1.bf16.msra.mxu0 %v3735_v19  ;;  %4179 = vmatpush1.bf16.msra.mxu1 %v4039_v20  ;;  %v3755_v19 = vld [vmem:[#allocation3 + $0xe40] sm:$0xff]  ;;  %v4059_v20 = vld [vmem:[#allocation3 + $0xe50] sm:$0xff] }
 0x898   :  { %3876 = vmatprep.subr.bf16.mxu0 %v3738_v22  ;;  %4180 = vmatprep.subr.bf16.mxu1 %v4042_v21  ;;  %v3758_v22 = vld [vmem:[#allocation3 + $0xec8] sm:$0xff]  ;;  %v4062_v21 = vld [vmem:[#allocation3 + $0xed8] sm:$0xff] }
 0x89b   :  { %3877 = vmatpush1.bf16.msra.mxu0 %v3737_v40  ;;  %4181 = vmatpush1.bf16.msra.mxu1 %v4041_v45  ;;  %v3757_v40 = vld [vmem:[#allocation3 + $0xec0] sm:$0xff]  ;;  %v4061_v45 = vld [vmem:[#allocation3 + $0xed0] sm:$0xff] }
 0x89c   :  { %3878 = vmatprep.subr.bf16.mxu0 %v3740_v36  ;;  %4182 = vmatprep.subr.bf16.mxu1 %v4044_v52  ;;  %v3760_v36 = vld [vmem:[#allocation3 + $0xf48] sm:$0xff]  ;;  %v4064_v52 = vld [vmem:[#allocation3 + $0xf58] sm:$0xff] }
 0x89f   :  { %3879 = vmatpush1.bf16.msra.mxu0 %v3739_v10  ;;  %4183 = vmatpush1.bf16.msra.mxu1 %v4043_v48  ;;  %v3759_v10 = vld [vmem:[#allocation3 + $0xf40] sm:$0xff]  ;;  %v4063_v48 = vld [vmem:[#allocation3 + $0xf50] sm:$0xff] }
 0x8a0   :  { %3880 = vmatprep.subr.bf16.mxu0 %v3742_v63  ;;  %4184 = vmatprep.subr.bf16.mxu1 %v4046_v29  ;;  %v3762_v63 = vld [vmem:[#allocation3 + $0xfc8] sm:$0xff]  ;;  %v4066_v29 = vld [vmem:[#allocation3 + $0xfd8] sm:$0xff] }
 0x8a3   :  { %3881 = vmatpush1.bf16.msra.mxu0 %v3741_v51  ;;  %4185 = vmatpush1.bf16.msra.mxu1 %v4045_v58  ;;  %v3761_v51 = vld [vmem:[#allocation3 + $0xfc0] sm:$0xff]  ;;  %v4065_v58 = vld [vmem:[#allocation3 + $0xfd0] sm:$0xff] }
 0x8a4   :  { %3882 = vmatprep.subr.bf16.mxu0 %v3744_v24  ;;  %4186 = vmatprep.subr.bf16.mxu1 %v4048_v33  ;;  %v3764_v24 = vld [vmem:[#allocation3 + $0x1048] sm:$0xff]  ;;  %v4068_v33 = vld [vmem:[#allocation3 + $0x1058] sm:$0xff] }
 0x8a7   :  { %3883 = vmatpush1.bf16.msra.mxu0 %v3743_v39  ;;  %4187 = vmatpush1.bf16.msra.mxu1 %v4047_v8  ;;  %v3763_v39 = vld [vmem:[#allocation3 + $0x1040] sm:$0xff]  ;;  %v4067_v8 = vld [vmem:[#allocation3 + $0x1050] sm:$0xff] }
 0x8a8   :  { %3884 = vmatprep.subr.bf16.mxu0 %v3746_v9  ;;  %4188 = vmatprep.subr.bf16.mxu1 %v4050_v11  ;;  %v3766_v9 = vld [vmem:[#allocation3 + $0x10c8] sm:$0xff]  ;;  %v4070_v11 = vld [vmem:[#allocation3 + $0x10d8] sm:$0xff] }
 0x8ab   :  { %3885 = vmatpush1.bf16.msra.mxu0 %v3745_v14  ;;  %4189 = vmatpush1.bf16.msra.mxu1 %v4049_v47  ;;  %v3765_v14 = vld [vmem:[#allocation3 + $0x10c0] sm:$0xff]  ;;  %v4069_v47 = vld [vmem:[#allocation3 + $0x10d0] sm:$0xff] }
 0x8ac   :  { %3886 = vmatprep.subr.bf16.mxu0 %v3748_v54  ;;  %4190 = vmatprep.subr.bf16.mxu1 %v4052_v62  ;;  %v3768_v54 = vld [vmem:[#allocation3 + $0x1148] sm:$0xff]  ;;  %v4072_v62 = vld [vmem:[#allocation3 + $0x1158] sm:$0xff] }
 0x8af   :  { %3887 = vmatpush1.bf16.msra.mxu0 %v3747_v46  ;;  %4191 = vmatpush1.bf16.msra.mxu1 %v4051_v60  ;;  %v3767_v46 = vld [vmem:[#allocation3 + $0x1140] sm:$0xff]  ;;  %v4071_v60 = vld [vmem:[#allocation3 + $0x1150] sm:$0xff] }
 0x8b0   :  { %3888 = vmatprep.subr.bf16.mxu0 %v3750_v26  ;;  %4192 = vmatprep.subr.bf16.mxu1 %v4054_v49  ;;  %v3770_v26 = vld [vmem:[#allocation3 + $0x11c8] sm:$0xff]  ;;  %v4074_v49 = vld [vmem:[#allocation3 + $0x11d8] sm:$0xff] }
 0x8b3   :  { %3889 = vmatpush1.bf16.msra.mxu0 %v3749_v61  ;;  %4193 = vmatpush1.bf16.msra.mxu1 %v4053_v50  ;;  %v3769_v61 = vld [vmem:[#allocation3 + $0x11c0] sm:$0xff]  ;;  %v4073_v50 = vld [vmem:[#allocation3 + $0x11d0] sm:$0xff] }
 0x8b4   :  { %3890 = vmatprep.subr.bf16.mxu0 %v3752_v56  ;;  %4194 = vmatprep.subr.bf16.mxu1 %v4056_v35  ;;  %v3772_v56 = vld [vmem:[#allocation3 + $0x1248] sm:$0xff]  ;;  %v4076_v35 = vld [vmem:[#allocation3 + $0x1258] sm:$0xff] }
 0x8b7   :  { %3891 = vmatpush1.bf16.msra.mxu0 %v3751_v31  ;;  %4195 = vmatpush1.bf16.msra.mxu1 %v4055_v41  ;;  %v3771_v31 = vld [vmem:[#allocation3 + $0x1240] sm:$0xff]  ;;  %v4075_v41 = vld [vmem:[#allocation3 + $0x1250] sm:$0xff] }
 0x8b8   :  { %3892 = vmatprep.subr.bf16.mxu0 %v3754_v28  ;;  %4196 = vmatprep.subr.bf16.mxu1 %v4058_v0  ;;  %v3774_v28 = vld [vmem:[#allocation3 + $0x12c8] sm:$0xff]  ;;  %v4078_v0 = vld [vmem:[#allocation3 + $0x12d8] sm:$0xff] }
 0x8bb   :  { %3893 = vmatpush1.bf16.msra.mxu0 %v3753_v37  ;;  %4197 = vmatpush1.bf16.msra.mxu1 %v4057_v30  ;;  %v3773_v37 = vld [vmem:[#allocation3 + $0x12c0] sm:$0xff]  ;;  %v4077_v30 = vld [vmem:[#allocation3 + $0x12d0] sm:$0xff] }
 0x8bc   :  { %3894 = vmatprep.subr.bf16.mxu0 %v3756_v15  ;;  %4198 = vmatprep.subr.bf16.mxu1 %v4060_v16  ;;  %v3776_v15 = vld [vmem:[#allocation3 + $0x1348] sm:$0xff]  ;;  %v4080_v16 = vld [vmem:[#allocation3 + $0x1358] sm:$0xff] }
 0x8bf   :  { %3895 = vmatpush1.bf16.msra.mxu0 %v3755_v19  ;;  %4199 = vmatpush1.bf16.msra.mxu1 %v4059_v20  ;;  %v3775_v19 = vld [vmem:[#allocation3 + $0x1340] sm:$0xff]  ;;  %v4079_v20 = vld [vmem:[#allocation3 + $0x1350] sm:$0xff] }
 0x8c0   :  { %3896 = vmatprep.subr.bf16.mxu0 %v3758_v22  ;;  %4200 = vmatprep.subr.bf16.mxu1 %v4062_v21  ;;  %v3778_v22 = vld [vmem:[#allocation3 + $0x13c8] sm:$0xff]  ;;  %v4082_v21 = vld [vmem:[#allocation3 + $0x13d8] sm:$0xff] }
 0x8c3   :  { %3897 = vmatpush1.bf16.msra.mxu0 %v3757_v40  ;;  %4201 = vmatpush1.bf16.msra.mxu1 %v4061_v45  ;;  %v3777_v40 = vld [vmem:[#allocation3 + $0x13c0] sm:$0xff]  ;;  %v4081_v45 = vld [vmem:[#allocation3 + $0x13d0] sm:$0xff] }
 0x8c4   :  { %3898 = vmatprep.subr.bf16.mxu0 %v3760_v36  ;;  %4202 = vmatprep.subr.bf16.mxu1 %v4064_v52  ;;  %v3780_v36 = vld [vmem:[#allocation3 + $0x1448] sm:$0xff]  ;;  %v4084_v52 = vld [vmem:[#allocation3 + $0x1458] sm:$0xff] }
 0x8c7   :  { %3899 = vmatpush1.bf16.msra.mxu0 %v3759_v10  ;;  %4203 = vmatpush1.bf16.msra.mxu1 %v4063_v48  ;;  %v3779_v10 = vld [vmem:[#allocation3 + $0x1440] sm:$0xff]  ;;  %v4083_v48 = vld [vmem:[#allocation3 + $0x1450] sm:$0xff] }
 0x8c8   :  { %3900 = vmatprep.subr.bf16.mxu0 %v3762_v63  ;;  %4204 = vmatprep.subr.bf16.mxu1 %v4066_v29  ;;  %v3782_v63 = vld [vmem:[#allocation3 + $0x14c8] sm:$0xff]  ;;  %v4086_v29 = vld [vmem:[#allocation3 + $0x14d8] sm:$0xff] }
 0x8cb   :  { %3901 = vmatpush1.bf16.msra.mxu0 %v3761_v51  ;;  %4205 = vmatpush1.bf16.msra.mxu1 %v4065_v58  ;;  %v3781_v51 = vld [vmem:[#allocation3 + $0x14c0] sm:$0xff]  ;;  %v4085_v58 = vld [vmem:[#allocation3 + $0x14d0] sm:$0xff] }
 0x8cc   :  { %3913 = vmatprep.subr.bf16.mxu0 %v3764_v24  ;;  %4217 = vmatprep.subr.bf16.mxu1 %v4068_v33  ;;  %v3784_v24 = vld [vmem:[#allocation3 + $0x1548] sm:$0xff]  ;;  %v4088_v33 = vld [vmem:[#allocation3 + $0x1558] sm:$0xff] }
 0x8ce   :  { %3903 = vmatmul.mubr.bf16.vlgmr.msra.gmra.mrb[72].mxu0 %v7621_v6  ;;  %4207 = vmatmul.mubr.bf16.vlgmr.msra.gmra.mrb[72].mxu1 %v7621_v6 }
 0x8cf   :  { %3914 = vmatpush1.bf16.msra.mxu0 %v3763_v39  ;;  %4218 = vmatpush1.bf16.msra.mxu1 %v4067_v8  ;;  %v3783_v39 = vld [vmem:[#allocation3 + $0x1540] sm:$0xff]  ;;  %v4087_v8 = vld [vmem:[#allocation3 + $0x1550] sm:$0xff] }
 0x8d0   :  { %3915 = vmatprep.subr.bf16.mxu0 %v3766_v9  ;;  %4219 = vmatprep.subr.bf16.mxu1 %v4070_v11  ;;  %v3786_v9 = vld [vmem:[#allocation3 + $0x15c8] sm:$0xff]  ;;  %v4090_v11 = vld [vmem:[#allocation3 + $0x15d8] sm:$0xff] }
 0x8d1   :  { %3945 = vmatprep.mubr.bf16.mxu0 %v7627_v42  ;;  %4249 = vmatprep.mubr.bf16.mxu1 %v7627_v42 }
 0x8d3   :  { %3916 = vmatpush1.bf16.msra.mxu0 %v3765_v14  ;;  %4220 = vmatpush1.bf16.msra.mxu1 %v4069_v47  ;;  %v3785_v14 = vld [vmem:[#allocation3 + $0x15c0] sm:$0xff]  ;;  %v4089_v47 = vld [vmem:[#allocation3 + $0x15d0] sm:$0xff] }
 0x8d4   :  { %3917 = vmatprep.subr.bf16.mxu0 %v3768_v54  ;;  %4221 = vmatprep.subr.bf16.mxu1 %v4072_v62  ;;  %v3788_v54 = vld [vmem:[#allocation3 + $0x1648] sm:$0xff]  ;;  %v4092_v62 = vld [vmem:[#allocation3 + $0x1658] sm:$0xff] }
 0x8d7   :  { %3918 = vmatpush1.bf16.msra.mxu0 %v3767_v46  ;;  %4222 = vmatpush1.bf16.msra.mxu1 %v4071_v60  ;;  %v3787_v46 = vld [vmem:[#allocation3 + $0x1640] sm:$0xff]  ;;  %v4091_v60 = vld [vmem:[#allocation3 + $0x1650] sm:$0xff] }
 0x8d8   :  { %3919 = vmatprep.subr.bf16.mxu0 %v3770_v26  ;;  %4223 = vmatprep.subr.bf16.mxu1 %v4074_v49  ;;  %v3790_v26 = vld [vmem:[#allocation3 + $0x16c8] sm:$0xff]  ;;  %v4094_v49 = vld [vmem:[#allocation3 + $0x16d8] sm:$0xff] }
 0x8db   :  { %3920 = vmatpush1.bf16.msra.mxu0 %v3769_v61  ;;  %4224 = vmatpush1.bf16.msra.mxu1 %v4073_v50  ;;  %v3789_v61 = vld [vmem:[#allocation3 + $0x16c0] sm:$0xff]  ;;  %v4093_v50 = vld [vmem:[#allocation3 + $0x16d0] sm:$0xff] }
 0x8dc   :  { %3921 = vmatprep.subr.bf16.mxu0 %v3772_v56  ;;  %4225 = vmatprep.subr.bf16.mxu1 %v4076_v35  ;;  %v3792_v56 = vld [vmem:[#allocation3 + $0x1748] sm:$0xff]  ;;  %v4096_v35 = vld [vmem:[#allocation3 + $0x1758] sm:$0xff] }
 0x8df   :  { %3922 = vmatpush1.bf16.msra.mxu0 %v3771_v31  ;;  %4226 = vmatpush1.bf16.msra.mxu1 %v4075_v41  ;;  %v3791_v31 = vld [vmem:[#allocation3 + $0x1740] sm:$0xff]  ;;  %v4095_v41 = vld [vmem:[#allocation3 + $0x1750] sm:$0xff] }
 0x8e0   :  { %3923 = vmatprep.subr.bf16.mxu0 %v3774_v28  ;;  %4227 = vmatprep.subr.bf16.mxu1 %v4078_v0  ;;  %v3794_v28 = vld [vmem:[#allocation3 + $0x17c8] sm:$0xff]  ;;  %v4098_v0 = vld [vmem:[#allocation3 + $0x17d8] sm:$0xff] }
 0x8e3   :  { %3924 = vmatpush1.bf16.msra.mxu0 %v3773_v37  ;;  %4228 = vmatpush1.bf16.msra.mxu1 %v4077_v30  ;;  %v3793_v37 = vld [vmem:[#allocation3 + $0x17c0] sm:$0xff]  ;;  %v4097_v30 = vld [vmem:[#allocation3 + $0x17d0] sm:$0xff] }
 0x8e4   :  { %3925 = vmatprep.subr.bf16.mxu0 %v3776_v15  ;;  %4229 = vmatprep.subr.bf16.mxu1 %v4080_v16  ;;  %v3796_v15 = vld [vmem:[#allocation3 + $0x1848] sm:$0xff]  ;;  %v4100_v16 = vld [vmem:[#allocation3 + $0x1858] sm:$0xff] }
 0x8e7   :  { %3926 = vmatpush1.bf16.msra.mxu0 %v3775_v19  ;;  %4230 = vmatpush1.bf16.msra.mxu1 %v4079_v20  ;;  %v3795_v19 = vld [vmem:[#allocation3 + $0x1840] sm:$0xff]  ;;  %v4099_v20 = vld [vmem:[#allocation3 + $0x1850] sm:$0xff] }
 0x8e8   :  { %3927 = vmatprep.subr.bf16.mxu0 %v3778_v22  ;;  %4231 = vmatprep.subr.bf16.mxu1 %v4082_v21  ;;  %v3798_v22 = vld [vmem:[#allocation3 + $0x18c8] sm:$0xff]  ;;  %v4102_v21 = vld [vmem:[#allocation3 + $0x18d8] sm:$0xff] }
 0x8eb   :  { %3928 = vmatpush1.bf16.msra.mxu0 %v3777_v40  ;;  %4232 = vmatpush1.bf16.msra.mxu1 %v4081_v45  ;;  %v3797_v40 = vld [vmem:[#allocation3 + $0x18c0] sm:$0xff]  ;;  %v4101_v45 = vld [vmem:[#allocation3 + $0x18d0] sm:$0xff] }
 0x8ec   :  { %3929 = vmatprep.subr.bf16.mxu0 %v3780_v36  ;;  %4233 = vmatprep.subr.bf16.mxu1 %v4084_v52  ;;  %v3800_v36 = vld [vmem:[#allocation3 + $0x1948] sm:$0xff]  ;;  %v4104_v52 = vld [vmem:[#allocation3 + $0x1958] sm:$0xff] }
 0x8ef   :  { %3930 = vmatpush1.bf16.msra.mxu0 %v3779_v10  ;;  %4234 = vmatpush1.bf16.msra.mxu1 %v4083_v48  ;;  %v3799_v10 = vld [vmem:[#allocation3 + $0x1940] sm:$0xff]  ;;  %v4103_v48 = vld [vmem:[#allocation3 + $0x1950] sm:$0xff] }
 0x8f0   :  { %3931 = vmatprep.subr.bf16.mxu0 %v3782_v63  ;;  %4235 = vmatprep.subr.bf16.mxu1 %v4086_v29  ;;  %v3802_v63 = vld [vmem:[#allocation3 + $0x19c8] sm:$0xff]  ;;  %v4106_v29 = vld [vmem:[#allocation3 + $0x19d8] sm:$0xff] }
 0x8f3   :  { %3932 = vmatpush1.bf16.msra.mxu0 %v3781_v51  ;;  %4236 = vmatpush1.bf16.msra.mxu1 %v4085_v58  ;;  %v3801_v51 = vld [vmem:[#allocation3 + $0x19c0] sm:$0xff]  ;;  %v4105_v58 = vld [vmem:[#allocation3 + $0x19d0] sm:$0xff] }
 0x8f4   :  { %3933 = vmatprep.subr.bf16.mxu0 %v3784_v24  ;;  %4237 = vmatprep.subr.bf16.mxu1 %v4088_v33  ;;  %v3804_v24 = vld [vmem:[#allocation3 + $0x1a48] sm:$0xff]  ;;  %v4108_v33 = vld [vmem:[#allocation3 + $0x1a58] sm:$0xff] }
 0x8f7   :  { %3934 = vmatpush1.bf16.msra.mxu0 %v3783_v39  ;;  %4238 = vmatpush1.bf16.msra.mxu1 %v4087_v8  ;;  %v3803_v39 = vld [vmem:[#allocation3 + $0x1a40] sm:$0xff]  ;;  %v4107_v8 = vld [vmem:[#allocation3 + $0x1a50] sm:$0xff] }
 0x8f8   :  { %3935 = vmatprep.subr.bf16.mxu0 %v3786_v9  ;;  %4239 = vmatprep.subr.bf16.mxu1 %v4090_v11  ;;  %v3806_v9 = vld [vmem:[#allocation3 + $0x1ac8] sm:$0xff]  ;;  %v4110_v11 = vld [vmem:[#allocation3 + $0x1ad8] sm:$0xff] }
 0x8fb   :  { %3936 = vmatpush1.bf16.msra.mxu0 %v3785_v14  ;;  %4240 = vmatpush1.bf16.msra.mxu1 %v4089_v47  ;;  %v3805_v14 = vld [vmem:[#allocation3 + $0x1ac0] sm:$0xff]  ;;  %v4109_v47 = vld [vmem:[#allocation3 + $0x1ad0] sm:$0xff] }
 0x8fc   :  { %3937 = vmatprep.subr.bf16.mxu0 %v3788_v54  ;;  %4241 = vmatprep.subr.bf16.mxu1 %v4092_v62 }
 0x8ff   :  { %3938 = vmatpush1.bf16.msra.mxu0 %v3787_v46  ;;  %4242 = vmatpush1.bf16.msra.mxu1 %v4091_v60  ;;  %v3808_v46 = vld [vmem:[#allocation3 + $0x1b48] sm:$0xff]  ;;  %v4112_v60 = vld [vmem:[#allocation3 + $0x1b58] sm:$0xff] }
 0x900   :  { %3939 = vmatprep.subr.bf16.mxu0 %v3790_v26  ;;  %4243 = vmatprep.subr.bf16.mxu1 %v4094_v49 }
 0x903   :  { %3940 = vmatpush1.bf16.msra.mxu0 %v3789_v61  ;;  %4244 = vmatpush1.bf16.msra.mxu1 %v4093_v50 }
 0x904   :  { %3941 = vmatprep.subr.bf16.mxu0 %v3792_v56  ;;  %4245 = vmatprep.subr.bf16.mxu1 %v4096_v35 }
 0x907   :  { %3942 = vmatpush1.bf16.msra.mxu0 %v3791_v31  ;;  %4246 = vmatpush1.bf16.msra.mxu1 %v4095_v41 }
 0x908   :  { %3943 = vmatprep.subr.bf16.mxu0 %v3794_v28  ;;  %4247 = vmatprep.subr.bf16.mxu1 %v4098_v0  ;;  %v3810_v28 = vld [vmem:[#allocation3 + $0x1bc8] sm:$0xff]  ;;  %v4114_v0 = vld [vmem:[#allocation3 + $0x1bd8] sm:$0xff] }
 0x90b   :  { %3944 = vmatpush1.bf16.msra.mxu0 %v3793_v37  ;;  %4248 = vmatpush1.bf16.msra.mxu1 %v4097_v30  ;;  %v4113_v37 = vld [vmem:[#allocation3 + $0x1bd0] sm:$0xff]  ;;  %v3812_v30 = vld [vmem:[#allocation3 + $0x1c48] sm:$0xff] }
 0x90c   :  { %3956 = vmatprep.subr.bf16.mxu0 %v3796_v15  ;;  %4260 = vmatprep.subr.bf16.mxu1 %v4100_v16  ;;  %v4116_v15 = vld [vmem:[#allocation3 + $0x1c58] sm:$0xff] }
 0x90d   :  { %v4118_v16 = vld [vmem:[#allocation3 + $0x1cd8] sm:$0xff] }
 0x90e   :  { %3946 = vmatmul.mubr.bf16.vlgmr.msra.gmra.mrb[72].mxu0 %v7637_v53  ;;  %4250 = vmatmul.mubr.bf16.vlgmr.msra.gmra.mrb[72].mxu1 %v7637_v53 }
 0x90f   :  { %3957 = vmatpush1.bf16.msra.mxu0 %v3795_v19  ;;  %4261 = vmatpush1.bf16.msra.mxu1 %v4099_v20  ;;  %v3813_v19 = vld [vmem:[#allocation3 + $0x1cc0] sm:$0xff]  ;;  %v4117_v20 = vld [vmem:[#allocation3 + $0x1cd0] sm:$0xff] }
 0x910   :  { %3958 = vmatprep.subr.bf16.mxu0 %v3798_v22  ;;  %4262 = vmatprep.subr.bf16.mxu1 %v4102_v21  ;;  %v3816_v22 = vld [vmem:[#allocation3 + $0x1d48] sm:$0xff]  ;;  %v4120_v21 = vld [vmem:[#allocation3 + $0x1d58] sm:$0xff] }
 0x911   :  { %3988 = vmatprep.mubr.bf16.mxu0 %v7643_v1  ;;  %4292 = vmatprep.mubr.bf16.mxu1 %v7643_v1 }
 0x913   :  { %3959 = vmatpush1.bf16.msra.mxu0 %v3797_v40  ;;  %4263 = vmatpush1.bf16.msra.mxu1 %v4101_v45  ;;  %v3815_v40 = vld [vmem:[#allocation3 + $0x1d40] sm:$0xff]  ;;  %v4119_v45 = vld [vmem:[#allocation3 + $0x1d50] sm:$0xff] }
 0x914   :  { %3960 = vmatprep.subr.bf16.mxu0 %v3800_v36  ;;  %4264 = vmatprep.subr.bf16.mxu1 %v4104_v52  ;;  %v3818_v36 = vld [vmem:[#allocation3 + $0x1dc8] sm:$0xff]  ;;  %v4122_v52 = vld [vmem:[#allocation3 + $0x1dd8] sm:$0xff] }
 0x917   :  { %3961 = vmatpush1.bf16.msra.mxu0 %v3799_v10  ;;  %4265 = vmatpush1.bf16.msra.mxu1 %v4103_v48  ;;  %v3817_v10 = vld [vmem:[#allocation3 + $0x1dc0] sm:$0xff]  ;;  %v4121_v48 = vld [vmem:[#allocation3 + $0x1dd0] sm:$0xff] }
 0x918   :  { %3962 = vmatprep.subr.bf16.mxu0 %v3802_v63  ;;  %4266 = vmatprep.subr.bf16.mxu1 %v4106_v29  ;;  %v3820_v63 = vld [vmem:[#allocation3 + $0x1e48] sm:$0xff]  ;;  %v4124_v29 = vld [vmem:[#allocation3 + $0x1e58] sm:$0xff] }
 0x91b   :  { %3963 = vmatpush1.bf16.msra.mxu0 %v3801_v51  ;;  %4267 = vmatpush1.bf16.msra.mxu1 %v4105_v58  ;;  %v3819_v51 = vld [vmem:[#allocation3 + $0x1e40] sm:$0xff]  ;;  %v4123_v58 = vld [vmem:[#allocation3 + $0x1e50] sm:$0xff] }
 0x91c   :  { %3964 = vmatprep.subr.bf16.mxu0 %v3804_v24  ;;  %4268 = vmatprep.subr.bf16.mxu1 %v4108_v33  ;;  %v3822_v24 = vld [vmem:[#allocation3 + $0x1ec8] sm:$0xff]  ;;  %v4126_v33 = vld [vmem:[#allocation3 + $0x1ed8] sm:$0xff] }
 0x91f   :  { %3965 = vmatpush1.bf16.msra.mxu0 %v3803_v39  ;;  %4269 = vmatpush1.bf16.msra.mxu1 %v4107_v8  ;;  %v3821_v39 = vld [vmem:[#allocation3 + $0x1ec0] sm:$0xff]  ;;  %v4125_v8 = vld [vmem:[#allocation3 + $0x1ed0] sm:$0xff] }
 0x920   :  { %3966 = vmatprep.subr.bf16.mxu0 %v3806_v9  ;;  %4270 = vmatprep.subr.bf16.mxu1 %v4110_v11  ;;  %v3824_v9 = vld [vmem:[#allocation3 + $0x1f48] sm:$0xff]  ;;  %v4128_v11 = vld [vmem:[#allocation3 + $0x1f58] sm:$0xff] }
 0x921   :  { %v3382_v54 = vpop.f32.mrb[68].mxu0  ;;  %v7711_v62 = vpop.f32.mrb[68].mxu1 }
 0x922   :  { %v7716_v26 = vmax.f32 %v3087_v55, %v3382_v54  ;;  %v3384_v49 = vpop.f32.mrb[69].mxu0  ;;  %v7718_v61 = vpop.f32.mrb[69].mxu1  ;;  %v3826_v54 = vld [vmem:[#allocation3 + $0x1fc8] sm:$0xff] }
 0x923   :  { %v7723_v50 = vmax.f32 %v3088_v3, %v3384_v49  ;;  %v3386_v56 = vpop.f32.mrb[70].mxu0  ;;  %v7725_v35 = vpop.f32.mrb[70].mxu1  ;;  %3967 = vmatpush1.bf16.msra.mxu0 %v3805_v14  ;;  %4271 = vmatpush1.bf16.msra.mxu1 %v4109_v47  ;;  %v3823_v14 = vld [vmem:[#allocation3 + $0x1f40] sm:$0xff]  ;;  %v4127_v47 = vld [vmem:[#allocation3 + $0x1f50] sm:$0xff] }
 0x924   :  { %v3695_v31 = vmax.f32 %v7716_v26, %v7711_v62  ;;  %v7732_v44 = vmax.f32 %v3089_v7, %v3386_v56  ;;  %v3388_v34 = vpop.f32.mrb[71].mxu0  ;;  %v7734_v55 = vpop.f32.mrb[71].mxu1  ;;  %3968 = vmatprep.subr.bf16.mxu0 %v3808_v46  ;;  %4272 = vmatprep.subr.bf16.mxu1 %v4112_v60  ;;  %v3809_v7 = vld [vmem:[#allocation3 + $0x1bc0] sm:$0xff]  ;;  %v4130_v46 = vld [vmem:[#allocation3 + $0x1fd8] sm:$0xff]  ;;  %v4129_v49 = vld [vmem:[#allocation3 + $0x1fd0] sm:$0xff] }
 0x925   :  { %v3696_v3 = vmax.f32 %v7723_v50, %v7718_v61  ;;  %v7741_v41 = vmax.f32 %v3090_v57, %v3388_v34  ;;  %v3814_v57 = vld [vmem:[#allocation3 + $0x1cc8] sm:$0xff]  ;;  %v3825_v60 = vld [vmem:[#allocation3 + $0x1fc0] sm:$0xff]  ;;  %v4612_v34 = vld [vmem:[#allocation3 + $0x78] sm:$0xff] }
 0x926   :  { %v3697_v4 = vmax.f32 %v7732_v44, %v7725_v35  ;;  %v4308_v56 = vld [vmem:[#allocation3 + $0x68] sm:$0xff]  ;;  %v4415_v61 = vld [vmem:[#allocation3 + $0x1b60] sm:$0xff]  ;;  %v4719_v50 = vld [vmem:[#allocation3 + $0x1b70] sm:$0xff] }
 0x927   :  { %v3698_v5 = vmax.f32 %v7741_v41, %v7734_v55  ;;  %3969 = vmatpush1.bf16.msra.mxu0 %v3807_v59  ;;  %4273 = vmatpush1.bf16.msra.mxu1 %v4111_v2  ;;  %v4307_v59 = vld [vmem:[#allocation3 + $0x60] sm:$0xff]  ;;  %v4611_v2 = vld [vmem:[#allocation3 + $0x70] sm:$0xff] }
 0x928   :  { %3970 = vmatprep.subr.bf16.mxu0 %v3810_v28  ;;  %4274 = vmatprep.subr.bf16.mxu1 %v4114_v0  ;;  %v4310_v28 = vld [vmem:[#allocation3 + $0xe8] sm:$0xff]  ;;  %v4614_v0 = vld [vmem:[#allocation3 + $0xf8] sm:$0xff]  ;;  %v4419_v55 = vld [vmem:[#allocation3 + $0x1c60] sm:$0xff] }
 0x929   :  { %v4723_v41 = vld [vmem:[#allocation3 + $0x1c70] sm:$0xff] }
 0x92b   :  { %3971 = vmatpush1.bf16.msra.mxu0 %v3809_v7  ;;  %4275 = vmatpush1.bf16.msra.mxu1 %v4113_v37  ;;  %v4309_v7 = vld [vmem:[#allocation3 + $0xe0] sm:$0xff]  ;;  %v4613_v37 = vld [vmem:[#allocation3 + $0xf0] sm:$0xff] }
 0x92c   :  { %3972 = vmatprep.subr.bf16.mxu0 %v3812_v30  ;;  %4276 = vmatprep.subr.bf16.mxu1 %v4116_v15  ;;  %v4312_v30 = vld [vmem:[#allocation3 + $0x168] sm:$0xff]  ;;  %v4616_v15 = vld [vmem:[#allocation3 + $0x178] sm:$0xff] }
 0x92f   :  { %3973 = vmatpush1.bf16.msra.mxu0 %v3811_v32  ;;  %4277 = vmatpush1.bf16.msra.mxu1 %v4115_v43  ;;  %v4311_v32 = vld [vmem:[#allocation3 + $0x160] sm:$0xff]  ;;  %v4615_v43 = vld [vmem:[#allocation3 + $0x170] sm:$0xff] }
 0x930   :  { %3974 = vmatprep.subr.bf16.mxu0 %v3814_v57  ;;  %4278 = vmatprep.subr.bf16.mxu1 %v4118_v16  ;;  %v4314_v57 = vld [vmem:[#allocation3 + $0x1e8] sm:$0xff]  ;;  %v4618_v16 = vld [vmem:[#allocation3 + $0x1f8] sm:$0xff] }
 0x933   :  { %3975 = vmatpush1.bf16.msra.mxu0 %v3813_v19  ;;  %4279 = vmatpush1.bf16.msra.mxu1 %v4117_v20  ;;  %v4313_v19 = vld [vmem:[#allocation3 + $0x1e0] sm:$0xff]  ;;  %v4617_v20 = vld [vmem:[#allocation3 + $0x1f0] sm:$0xff] }
 0x934   :  { %3976 = vmatprep.subr.bf16.mxu0 %v3816_v22  ;;  %4280 = vmatprep.subr.bf16.mxu1 %v4120_v21  ;;  %v4316_v22 = vld [vmem:[#allocation3 + $0x268] sm:$0xff]  ;;  %v4620_v21 = vld [vmem:[#allocation3 + $0x278] sm:$0xff] }
 0x937   :  { %3977 = vmatpush1.bf16.msra.mxu0 %v3815_v40  ;;  %4281 = vmatpush1.bf16.msra.mxu1 %v4119_v45  ;;  %v4619_v40 = vld [vmem:[#allocation3 + $0x270] sm:$0xff]  ;;  %v4318_v45 = vld [vmem:[#allocation3 + $0x2e8] sm:$0xff] }
 0x938   :  { %3978 = vmatprep.subr.bf16.mxu0 %v3818_v36  ;;  %4282 = vmatprep.subr.bf16.mxu1 %v4122_v52  ;;  %v4622_v36 = vld [vmem:[#allocation3 + $0x2f8] sm:$0xff]  ;;  %v4317_v52 = vld [vmem:[#allocation3 + $0x2e0] sm:$0xff] }
 0x93b   :  { %3979 = vmatpush1.bf16.msra.mxu0 %v3817_v10  ;;  %4283 = vmatpush1.bf16.msra.mxu1 %v4121_v48  ;;  %v4621_v10 = vld [vmem:[#allocation3 + $0x2f0] sm:$0xff]  ;;  %v4320_v48 = vld [vmem:[#allocation3 + $0x368] sm:$0xff] }
 0x93c   :  { %3980 = vmatprep.subr.bf16.mxu0 %v3820_v63  ;;  %4284 = vmatprep.subr.bf16.mxu1 %v4124_v29  ;;  %v4624_v63 = vld [vmem:[#allocation3 + $0x378] sm:$0xff]  ;;  %v4319_v29 = vld [vmem:[#allocation3 + $0x360] sm:$0xff] }
 0x93f   :  { %3981 = vmatpush1.bf16.msra.mxu0 %v3819_v51  ;;  %4285 = vmatpush1.bf16.msra.mxu1 %v4123_v58  ;;  %v4623_v51 = vld [vmem:[#allocation3 + $0x370] sm:$0xff]  ;;  %v4322_v58 = vld [vmem:[#allocation3 + $0x3e8] sm:$0xff] }
 0x940   :  { %3982 = vmatprep.subr.bf16.mxu0 %v3822_v24  ;;  %4286 = vmatprep.subr.bf16.mxu1 %v4126_v33  ;;  %v4626_v24 = vld [vmem:[#allocation3 + $0x3f8] sm:$0xff]  ;;  %v4321_v33 = vld [vmem:[#allocation3 + $0x3e0] sm:$0xff] }
 0x943   :  { %3983 = vmatpush1.bf16.msra.mxu0 %v3821_v39  ;;  %4287 = vmatpush1.bf16.msra.mxu1 %v4125_v8  ;;  %v4625_v39 = vld [vmem:[#allocation3 + $0x3f0] sm:$0xff]  ;;  %v4324_v8 = vld [vmem:[#allocation3 + $0x468] sm:$0xff] }
 0x944   :  { %3984 = vmatprep.subr.bf16.mxu0 %v3824_v9  ;;  %4288 = vmatprep.subr.bf16.mxu1 %v4128_v11  ;;  %v4628_v9 = vld [vmem:[#allocation3 + $0x478] sm:$0xff]  ;;  %v4323_v11 = vld [vmem:[#allocation3 + $0x460] sm:$0xff] }
 0x947   :  { %3985 = vmatpush1.bf16.msra.mxu0 %v3823_v14  ;;  %4289 = vmatpush1.bf16.msra.mxu1 %v4127_v47  ;;  %v4627_v14 = vld [vmem:[#allocation3 + $0x470] sm:$0xff]  ;;  %v4326_v47 = vld [vmem:[#allocation3 + $0x4e8] sm:$0xff] }
 0x948   :  { %3986 = vmatprep.subr.bf16.mxu0 %v3826_v54  ;;  %4290 = vmatprep.subr.bf16.mxu1 %v4130_v46  ;;  %v4630_v54 = vld [vmem:[#allocation3 + $0x4f8] sm:$0xff]  ;;  %v4325_v46 = vld [vmem:[#allocation3 + $0x4e0] sm:$0xff] }
 0x94b   :  { %3987 = vmatpush1.bf16.msra.mxu0 %v3825_v60  ;;  %4291 = vmatpush1.bf16.msra.mxu1 %v4129_v49  ;;  %v4629_v60 = vld [vmem:[#allocation3 + $0x4f0] sm:$0xff]  ;;  %v4328_v49 = vld [vmem:[#allocation3 + $0x568] sm:$0xff] }
 0x94c   :  { %4435 = vmatprep.subr.bf16.mxu0 %v4308_v56  ;;  %4739 = vmatprep.subr.bf16.mxu1 %v4612_v34  ;;  %v4632_v56 = vld [vmem:[#allocation3 + $0x578] sm:$0xff]  ;;  %v4327_v34 = vld [vmem:[#allocation3 + $0x560] sm:$0xff] }
 0x94e   :  { %3989 = vmatmul.mubr.bf16.vlgmr.msra.gmra.mrb[72].mxu0 %v7653_v18  ;;  %4293 = vmatmul.mubr.bf16.vlgmr.msra.gmra.mrb[72].mxu1 %v7653_v18 }
 0x94f   :  { %4436 = vmatpush1.bf16.msra.mxu0 %v4307_v59  ;;  %4740 = vmatpush1.bf16.msra.mxu1 %v4611_v2  ;;  %v4631_v59 = vld [vmem:[#allocation3 + $0x570] sm:$0xff]  ;;  %v4330_v2 = vld [vmem:[#allocation3 + $0x5e8] sm:$0xff] }
 0x950   :  { %4437 = vmatprep.subr.bf16.mxu0 %v4310_v28  ;;  %4741 = vmatprep.subr.bf16.mxu1 %v4614_v0  ;;  %v4634_v28 = vld [vmem:[#allocation3 + $0x5f8] sm:$0xff]  ;;  %v4329_v0 = vld [vmem:[#allocation3 + $0x5e0] sm:$0xff] }
 0x951   :  { %4467 = vmatprep.mubr.bf16.mxu0 %v7597_v38  ;;  %4771 = vmatprep.mubr.bf16.mxu1 %v7597_v38  ;;  %v4315_v38 = vld [vmem:[#allocation3 + $0x260] sm:$0xff] }
 0x953   :  { %4438 = vmatpush1.bf16.msra.mxu0 %v4309_v7  ;;  %4742 = vmatpush1.bf16.msra.mxu1 %v4613_v37  ;;  %v4633_v7 = vld [vmem:[#allocation3 + $0x5f0] sm:$0xff]  ;;  %v4332_v37 = vld [vmem:[#allocation3 + $0x668] sm:$0xff] }
 0x954   :  { %4439 = vmatprep.subr.bf16.mxu0 %v4312_v30  ;;  %4743 = vmatprep.subr.bf16.mxu1 %v4616_v15  ;;  %v4636_v30 = vld [vmem:[#allocation3 + $0x678] sm:$0xff]  ;;  %v4331_v15 = vld [vmem:[#allocation3 + $0x660] sm:$0xff] }
 0x957   :  { %4440 = vmatpush1.bf16.msra.mxu0 %v4311_v32  ;;  %4744 = vmatpush1.bf16.msra.mxu1 %v4615_v43  ;;  %v4635_v32 = vld [vmem:[#allocation3 + $0x670] sm:$0xff]  ;;  %v4334_v43 = vld [vmem:[#allocation3 + $0x6e8] sm:$0xff] }
 0x958   :  { %4441 = vmatprep.subr.bf16.mxu0 %v4314_v57  ;;  %4745 = vmatprep.subr.bf16.mxu1 %v4618_v16  ;;  %v4638_v57 = vld [vmem:[#allocation3 + $0x6f8] sm:$0xff]  ;;  %v4333_v16 = vld [vmem:[#allocation3 + $0x6e0] sm:$0xff] }
 0x95b   :  { %4442 = vmatpush1.bf16.msra.mxu0 %v4313_v19  ;;  %4746 = vmatpush1.bf16.msra.mxu1 %v4617_v20  ;;  %v4637_v19 = vld [vmem:[#allocation3 + $0x6f0] sm:$0xff]  ;;  %v4336_v20 = vld [vmem:[#allocation3 + $0x768] sm:$0xff] }
 0x95c   :  { %4443 = vmatprep.subr.bf16.mxu0 %v4316_v22  ;;  %4747 = vmatprep.subr.bf16.mxu1 %v4620_v21  ;;  %v4640_v22 = vld [vmem:[#allocation3 + $0x778] sm:$0xff]  ;;  %v4335_v21 = vld [vmem:[#allocation3 + $0x760] sm:$0xff] }
 0x95f   :  { %4444 = vmatpush1.bf16.msra.mxu0 %v4315_v38  ;;  %4748 = vmatpush1.bf16.msra.mxu1 %v4619_v40  ;;  %v4639_v38 = vld [vmem:[#allocation3 + $0x770] sm:$0xff]  ;;  %v4338_v40 = vld [vmem:[#allocation3 + $0x7e8] sm:$0xff] }
 0x960   :  { %4445 = vmatprep.subr.bf16.mxu0 %v4318_v45  ;;  %4749 = vmatprep.subr.bf16.mxu1 %v4622_v36  ;;  %v4642_v45 = vld [vmem:[#allocation3 + $0x7f8] sm:$0xff]  ;;  %v4337_v36 = vld [vmem:[#allocation3 + $0x7e0] sm:$0xff] }
 0x963   :  { %4446 = vmatpush1.bf16.msra.mxu0 %v4317_v52  ;;  %4750 = vmatpush1.bf16.msra.mxu1 %v4621_v10  ;;  %v4641_v52 = vld [vmem:[#allocation3 + $0x7f0] sm:$0xff]  ;;  %v4340_v10 = vld [vmem:[#allocation3 + $0x868] sm:$0xff] }
 0x964   :  { %4447 = vmatprep.subr.bf16.mxu0 %v4320_v48  ;;  %4751 = vmatprep.subr.bf16.mxu1 %v4624_v63  ;;  %v4644_v48 = vld [vmem:[#allocation3 + $0x878] sm:$0xff]  ;;  %v4339_v63 = vld [vmem:[#allocation3 + $0x860] sm:$0xff] }
 0x967   :  { %4448 = vmatpush1.bf16.msra.mxu0 %v4319_v29  ;;  %4752 = vmatpush1.bf16.msra.mxu1 %v4623_v51  ;;  %v4643_v29 = vld [vmem:[#allocation3 + $0x870] sm:$0xff]  ;;  %v4342_v51 = vld [vmem:[#allocation3 + $0x8e8] sm:$0xff] }
 0x968   :  { %4449 = vmatprep.subr.bf16.mxu0 %v4322_v58  ;;  %4753 = vmatprep.subr.bf16.mxu1 %v4626_v24  ;;  %v4646_v58 = vld [vmem:[#allocation3 + $0x8f8] sm:$0xff]  ;;  %v4341_v24 = vld [vmem:[#allocation3 + $0x8e0] sm:$0xff] }
 0x96b   :  { %4450 = vmatpush1.bf16.msra.mxu0 %v4321_v33  ;;  %4754 = vmatpush1.bf16.msra.mxu1 %v4625_v39  ;;  %v4645_v33 = vld [vmem:[#allocation3 + $0x8f0] sm:$0xff]  ;;  %v4344_v39 = vld [vmem:[#allocation3 + $0x968] sm:$0xff] }
 0x96c   :  { %4451 = vmatprep.subr.bf16.mxu0 %v4324_v8  ;;  %4755 = vmatprep.subr.bf16.mxu1 %v4628_v9  ;;  %v4648_v8 = vld [vmem:[#allocation3 + $0x978] sm:$0xff]  ;;  %v4343_v9 = vld [vmem:[#allocation3 + $0x960] sm:$0xff] }
 0x96f   :  { %4452 = vmatpush1.bf16.msra.mxu0 %v4323_v11  ;;  %4756 = vmatpush1.bf16.msra.mxu1 %v4627_v14  ;;  %v4647_v11 = vld [vmem:[#allocation3 + $0x970] sm:$0xff]  ;;  %v4346_v14 = vld [vmem:[#allocation3 + $0x9e8] sm:$0xff] }
 0x970   :  { %4453 = vmatprep.subr.bf16.mxu0 %v4326_v47  ;;  %4757 = vmatprep.subr.bf16.mxu1 %v4630_v54  ;;  %v4345_v47 = vld [vmem:[#allocation3 + $0x9e0] sm:$0xff]  ;;  %v4649_v54 = vld [vmem:[#allocation3 + $0x9f0] sm:$0xff] }
 0x973   :  { %4454 = vmatpush1.bf16.msra.mxu0 %v4325_v46  ;;  %4758 = vmatpush1.bf16.msra.mxu1 %v4629_v60  ;;  %v4348_v46 = vld [vmem:[#allocation3 + $0xa68] sm:$0xff]  ;;  %v4652_v60 = vld [vmem:[#allocation3 + $0xa78] sm:$0xff] }
 0x974   :  { %4455 = vmatprep.subr.bf16.mxu0 %v4328_v49  ;;  %4759 = vmatprep.subr.bf16.mxu1 %v4632_v56  ;;  %v4651_v49 = vld [vmem:[#allocation3 + $0xa70] sm:$0xff]  ;;  %v4350_v56 = vld [vmem:[#allocation3 + $0xae8] sm:$0xff] }
 0x977   :  { %4456 = vmatpush1.bf16.msra.mxu0 %v4327_v34  ;;  %4760 = vmatpush1.bf16.msra.mxu1 %v4631_v59  ;;  %v4654_v34 = vld [vmem:[#allocation3 + $0xaf8] sm:$0xff]  ;;  %v4349_v59 = vld [vmem:[#allocation3 + $0xae0] sm:$0xff] }
 0x978   :  { %4457 = vmatprep.subr.bf16.mxu0 %v4330_v2  ;;  %4761 = vmatprep.subr.bf16.mxu1 %v4634_v28  ;;  %v4653_v2 = vld [vmem:[#allocation3 + $0xaf0] sm:$0xff]  ;;  %v4352_v28 = vld [vmem:[#allocation3 + $0xb68] sm:$0xff] }
 0x97b   :  { %4458 = vmatpush1.bf16.msra.mxu0 %v4329_v0  ;;  %4762 = vmatpush1.bf16.msra.mxu1 %v4633_v7  ;;  %v4656_v0 = vld [vmem:[#allocation3 + $0xb78] sm:$0xff]  ;;  %v4351_v7 = vld [vmem:[#allocation3 + $0xb60] sm:$0xff] }
 0x97c   :  { %4459 = vmatprep.subr.bf16.mxu0 %v4332_v37  ;;  %4763 = vmatprep.subr.bf16.mxu1 %v4636_v30  ;;  %v4655_v37 = vld [vmem:[#allocation3 + $0xb70] sm:$0xff]  ;;  %v4354_v30 = vld [vmem:[#allocation3 + $0xbe8] sm:$0xff] }
 0x97f   :  { %4460 = vmatpush1.bf16.msra.mxu0 %v4331_v15  ;;  %4764 = vmatpush1.bf16.msra.mxu1 %v4635_v32  ;;  %v4658_v15 = vld [vmem:[#allocation3 + $0xbf8] sm:$0xff]  ;;  %v4353_v32 = vld [vmem:[#allocation3 + $0xbe0] sm:$0xff] }
 0x980   :  { %4461 = vmatprep.subr.bf16.mxu0 %v4334_v43  ;;  %4765 = vmatprep.subr.bf16.mxu1 %v4638_v57  ;;  %v4657_v43 = vld [vmem:[#allocation3 + $0xbf0] sm:$0xff]  ;;  %v4356_v57 = vld [vmem:[#allocation3 + $0xc68] sm:$0xff] }
 0x983   :  { %4462 = vmatpush1.bf16.msra.mxu0 %v4333_v16  ;;  %4766 = vmatpush1.bf16.msra.mxu1 %v4637_v19  ;;  %v4660_v16 = vld [vmem:[#allocation3 + $0xc78] sm:$0xff]  ;;  %v4355_v19 = vld [vmem:[#allocation3 + $0xc60] sm:$0xff] }
 0x984   :  { %4463 = vmatprep.subr.bf16.mxu0 %v4336_v20  ;;  %4767 = vmatprep.subr.bf16.mxu1 %v4640_v22  ;;  %v4659_v20 = vld [vmem:[#allocation3 + $0xc70] sm:$0xff]  ;;  %v4358_v22 = vld [vmem:[#allocation3 + $0xce8] sm:$0xff] }
 0x987   :  { %4464 = vmatpush1.bf16.msra.mxu0 %v4335_v21  ;;  %4768 = vmatpush1.bf16.msra.mxu1 %v4639_v38  ;;  %v4662_v21 = vld [vmem:[#allocation3 + $0xcf8] sm:$0xff]  ;;  %v4357_v38 = vld [vmem:[#allocation3 + $0xce0] sm:$0xff] }
 0x988   :  { %4465 = vmatprep.subr.bf16.mxu0 %v4338_v40  ;;  %4769 = vmatprep.subr.bf16.mxu1 %v4642_v45  ;;  %v4661_v40 = vld [vmem:[#allocation3 + $0xcf0] sm:$0xff]  ;;  %v4360_v45 = vld [vmem:[#allocation3 + $0xd68] sm:$0xff] }
 0x98b   :  { %4466 = vmatpush1.bf16.msra.mxu0 %v4337_v36  ;;  %4770 = vmatpush1.bf16.msra.mxu1 %v4641_v52  ;;  %v4664_v36 = vld [vmem:[#allocation3 + $0xd78] sm:$0xff]  ;;  %v4359_v52 = vld [vmem:[#allocation3 + $0xd60] sm:$0xff] }
 0x98c   :  { %4478 = vmatprep.subr.bf16.mxu0 %v4340_v10  ;;  %4782 = vmatprep.subr.bf16.mxu1 %v4644_v48  ;;  %v4663_v10 = vld [vmem:[#allocation3 + $0xd70] sm:$0xff]  ;;  %v4362_v48 = vld [vmem:[#allocation3 + $0xde8] sm:$0xff] }
 0x98e   :  { %4468 = vmatmul.mubr.bf16.vlgmr.msra.gmra.mrb[76].mxu0 %v7605_v12  ;;  %4772 = vmatmul.mubr.bf16.vlgmr.msra.gmra.mrb[76].mxu1 %v7605_v12  ;;  %v4650_v12 = vld [vmem:[#allocation3 + $0x9f8] sm:$0xff] }
 0x98f   :  { %4479 = vmatpush1.bf16.msra.mxu0 %v4339_v63  ;;  %4783 = vmatpush1.bf16.msra.mxu1 %v4643_v29  ;;  %v4666_v63 = vld [vmem:[#allocation3 + $0xdf8] sm:$0xff]  ;;  %v4361_v29 = vld [vmem:[#allocation3 + $0xde0] sm:$0xff] }
 0x990   :  { %4480 = vmatprep.subr.bf16.mxu0 %v4342_v51  ;;  %4784 = vmatprep.subr.bf16.mxu1 %v4646_v58  ;;  %v4665_v51 = vld [vmem:[#allocation3 + $0xdf0] sm:$0xff]  ;;  %v4364_v58 = vld [vmem:[#allocation3 + $0xe68] sm:$0xff] }
 0x991   :  { %4510 = vmatprep.mubr.bf16.mxu0 %v7611_v27  ;;  %4814 = vmatprep.mubr.bf16.mxu1 %v7611_v27  ;;  %v4347_v27 = vld [vmem:[#allocation3 + $0xa60] sm:$0xff] }
 0x993   :  { %4481 = vmatpush1.bf16.msra.mxu0 %v4341_v24  ;;  %4785 = vmatpush1.bf16.msra.mxu1 %v4645_v33  ;;  %v4668_v24 = vld [vmem:[#allocation3 + $0xe78] sm:$0xff]  ;;  %v4363_v33 = vld [vmem:[#allocation3 + $0xe60] sm:$0xff] }
 0x994   :  { %4482 = vmatprep.subr.bf16.mxu0 %v4344_v39  ;;  %4786 = vmatprep.subr.bf16.mxu1 %v4648_v8  ;;  %v4667_v39 = vld [vmem:[#allocation3 + $0xe70] sm:$0xff]  ;;  %v4366_v8 = vld [vmem:[#allocation3 + $0xee8] sm:$0xff] }
 0x997   :  { %4483 = vmatpush1.bf16.msra.mxu0 %v4343_v9  ;;  %4787 = vmatpush1.bf16.msra.mxu1 %v4647_v11  ;;  %v4670_v9 = vld [vmem:[#allocation3 + $0xef8] sm:$0xff]  ;;  %v4365_v11 = vld [vmem:[#allocation3 + $0xee0] sm:$0xff] }
 0x998   :  { %4484 = vmatprep.subr.bf16.mxu0 %v4346_v14  ;;  %4788 = vmatprep.subr.bf16.mxu1 %v4650_v12  ;;  %v4669_v14 = vld [vmem:[#allocation3 + $0xef0] sm:$0xff]  ;;  %v4368_v12 = vld [vmem:[#allocation3 + $0xf68] sm:$0xff] }
 0x99b   :  { %4485 = vmatpush1.bf16.msra.mxu0 %v4345_v47  ;;  %4789 = vmatpush1.bf16.msra.mxu1 %v4649_v54  ;;  %v4672_v47 = vld [vmem:[#allocation3 + $0xf78] sm:$0xff]  ;;  %v4367_v54 = vld [vmem:[#allocation3 + $0xf60] sm:$0xff] }
 0x99c   :  { %4486 = vmatprep.subr.bf16.mxu0 %v4348_v46  ;;  %4790 = vmatprep.subr.bf16.mxu1 %v4652_v60  ;;  %v4671_v46 = vld [vmem:[#allocation3 + $0xf70] sm:$0xff]  ;;  %v4370_v60 = vld [vmem:[#allocation3 + $0xfe8] sm:$0xff] }
 0x99f   :  { %4487 = vmatpush1.bf16.msra.mxu0 %v4347_v27  ;;  %4791 = vmatpush1.bf16.msra.mxu1 %v4651_v49  ;;  %v4674_v27 = vld [vmem:[#allocation3 + $0xff8] sm:$0xff]  ;;  %v4369_v49 = vld [vmem:[#allocation3 + $0xfe0] sm:$0xff] }
 0x9a0   :  { %4488 = vmatprep.subr.bf16.mxu0 %v4350_v56  ;;  %4792 = vmatprep.subr.bf16.mxu1 %v4654_v34  ;;  %v4673_v56 = vld [vmem:[#allocation3 + $0xff0] sm:$0xff]  ;;  %v4372_v34 = vld [vmem:[#allocation3 + $0x1068] sm:$0xff] }
 0x9a3   :  { %4489 = vmatpush1.bf16.msra.mxu0 %v4349_v59  ;;  %4793 = vmatpush1.bf16.msra.mxu1 %v4653_v2  ;;  %v4676_v59 = vld [vmem:[#allocation3 + $0x1078] sm:$0xff]  ;;  %v4371_v2 = vld [vmem:[#allocation3 + $0x1060] sm:$0xff] }
 0x9a4   :  { %4490 = vmatprep.subr.bf16.mxu0 %v4352_v28  ;;  %4794 = vmatprep.subr.bf16.mxu1 %v4656_v0  ;;  %v4675_v28 = vld [vmem:[#allocation3 + $0x1070] sm:$0xff]  ;;  %v4374_v0 = vld [vmem:[#allocation3 + $0x10e8] sm:$0xff] }
 0x9a7   :  { %4491 = vmatpush1.bf16.msra.mxu0 %v4351_v7  ;;  %4795 = vmatpush1.bf16.msra.mxu1 %v4655_v37  ;;  %v4678_v7 = vld [vmem:[#allocation3 + $0x10f8] sm:$0xff]  ;;  %v4373_v37 = vld [vmem:[#allocation3 + $0x10e0] sm:$0xff] }
 0x9a8   :  { %4492 = vmatprep.subr.bf16.mxu0 %v4354_v30  ;;  %4796 = vmatprep.subr.bf16.mxu1 %v4658_v15  ;;  %v4677_v30 = vld [vmem:[#allocation3 + $0x10f0] sm:$0xff]  ;;  %v4376_v15 = vld [vmem:[#allocation3 + $0x1168] sm:$0xff] }
 0x9ab   :  { %4493 = vmatpush1.bf16.msra.mxu0 %v4353_v32  ;;  %4797 = vmatpush1.bf16.msra.mxu1 %v4657_v43  ;;  %v4680_v32 = vld [vmem:[#allocation3 + $0x1178] sm:$0xff]  ;;  %v4375_v43 = vld [vmem:[#allocation3 + $0x1160] sm:$0xff] }
 0x9ac   :  { %4494 = vmatprep.subr.bf16.mxu0 %v4356_v57  ;;  %4798 = vmatprep.subr.bf16.mxu1 %v4660_v16  ;;  %v4679_v57 = vld [vmem:[#allocation3 + $0x1170] sm:$0xff]  ;;  %v4378_v16 = vld [vmem:[#allocation3 + $0x11e8] sm:$0xff] }
 0x9af   :  { %4495 = vmatpush1.bf16.msra.mxu0 %v4355_v19  ;;  %4799 = vmatpush1.bf16.msra.mxu1 %v4659_v20  ;;  %v4377_v19 = vld [vmem:[#allocation3 + $0x11e0] sm:$0xff]  ;;  %v4681_v20 = vld [vmem:[#allocation3 + $0x11f0] sm:$0xff] }
 0x9b0   :  { %4496 = vmatprep.subr.bf16.mxu0 %v4358_v22  ;;  %4800 = vmatprep.subr.bf16.mxu1 %v4662_v21  ;;  %v4380_v22 = vld [vmem:[#allocation3 + $0x1268] sm:$0xff]  ;;  %v4684_v21 = vld [vmem:[#allocation3 + $0x1278] sm:$0xff] }
 0x9b3   :  { %4497 = vmatpush1.bf16.msra.mxu0 %v4357_v38  ;;  %4801 = vmatpush1.bf16.msra.mxu1 %v4661_v40  ;;  %v4683_v38 = vld [vmem:[#allocation3 + $0x1270] sm:$0xff]  ;;  %v4382_v40 = vld [vmem:[#allocation3 + $0x12e8] sm:$0xff] }
 0x9b4   :  { %4498 = vmatprep.subr.bf16.mxu0 %v4360_v45  ;;  %4802 = vmatprep.subr.bf16.mxu1 %v4664_v36  ;;  %v4686_v45 = vld [vmem:[#allocation3 + $0x12f8] sm:$0xff]  ;;  %v4381_v36 = vld [vmem:[#allocation3 + $0x12e0] sm:$0xff] }
 0x9b7   :  { %4499 = vmatpush1.bf16.msra.mxu0 %v4359_v52  ;;  %4803 = vmatpush1.bf16.msra.mxu1 %v4663_v10  ;;  %v4685_v52 = vld [vmem:[#allocation3 + $0x12f0] sm:$0xff]  ;;  %v4384_v10 = vld [vmem:[#allocation3 + $0x1368] sm:$0xff] }
 0x9b8   :  { %4500 = vmatprep.subr.bf16.mxu0 %v4362_v48  ;;  %4804 = vmatprep.subr.bf16.mxu1 %v4666_v63  ;;  %v4688_v48 = vld [vmem:[#allocation3 + $0x1378] sm:$0xff]  ;;  %v4383_v63 = vld [vmem:[#allocation3 + $0x1360] sm:$0xff] }
 0x9bb   :  { %4501 = vmatpush1.bf16.msra.mxu0 %v4361_v29  ;;  %4805 = vmatpush1.bf16.msra.mxu1 %v4665_v51  ;;  %v4687_v29 = vld [vmem:[#allocation3 + $0x1370] sm:$0xff]  ;;  %v4386_v51 = vld [vmem:[#allocation3 + $0x13e8] sm:$0xff] }
 0x9bc   :  { %4502 = vmatprep.subr.bf16.mxu0 %v4364_v58  ;;  %4806 = vmatprep.subr.bf16.mxu1 %v4668_v24  ;;  %v4690_v58 = vld [vmem:[#allocation3 + $0x13f8] sm:$0xff]  ;;  %v4385_v24 = vld [vmem:[#allocation3 + $0x13e0] sm:$0xff] }
 0x9bf   :  { %4503 = vmatpush1.bf16.msra.mxu0 %v4363_v33  ;;  %4807 = vmatpush1.bf16.msra.mxu1 %v4667_v39  ;;  %v4689_v33 = vld [vmem:[#allocation3 + $0x13f0] sm:$0xff]  ;;  %v4388_v39 = vld [vmem:[#allocation3 + $0x1468] sm:$0xff] }
 0x9c0   :  { %4504 = vmatprep.subr.bf16.mxu0 %v4366_v8  ;;  %4808 = vmatprep.subr.bf16.mxu1 %v4670_v9  ;;  %v4692_v8 = vld [vmem:[#allocation3 + $0x1478] sm:$0xff]  ;;  %v4387_v9 = vld [vmem:[#allocation3 + $0x1460] sm:$0xff] }
 0x9c3   :  { %4505 = vmatpush1.bf16.msra.mxu0 %v4365_v11  ;;  %4809 = vmatpush1.bf16.msra.mxu1 %v4669_v14  ;;  %v4691_v11 = vld [vmem:[#allocation3 + $0x1470] sm:$0xff]  ;;  %v4390_v14 = vld [vmem:[#allocation3 + $0x14e8] sm:$0xff] }
 0x9c4   :  { %4506 = vmatprep.subr.bf16.mxu0 %v4368_v12  ;;  %4810 = vmatprep.subr.bf16.mxu1 %v4672_v47  ;;  %v4694_v12 = vld [vmem:[#allocation3 + $0x14f8] sm:$0xff]  ;;  %v4389_v47 = vld [vmem:[#allocation3 + $0x14e0] sm:$0xff] }
 0x9c7   :  { %4507 = vmatpush1.bf16.msra.mxu0 %v4367_v54  ;;  %4811 = vmatpush1.bf16.msra.mxu1 %v4671_v46  ;;  %v4693_v54 = vld [vmem:[#allocation3 + $0x14f0] sm:$0xff]  ;;  %v4392_v46 = vld [vmem:[#allocation3 + $0x1568] sm:$0xff] }
 0x9c8   :  { %4508 = vmatprep.subr.bf16.mxu0 %v4370_v60  ;;  %4812 = vmatprep.subr.bf16.mxu1 %v4674_v27  ;;  %v4696_v60 = vld [vmem:[#allocation3 + $0x1578] sm:$0xff]  ;;  %v4391_v27 = vld [vmem:[#allocation3 + $0x1560] sm:$0xff] }
 0x9cb   :  { %4509 = vmatpush1.bf16.msra.mxu0 %v4369_v49  ;;  %4813 = vmatpush1.bf16.msra.mxu1 %v4673_v56  ;;  %v4695_v49 = vld [vmem:[#allocation3 + $0x1570] sm:$0xff]  ;;  %v4394_v56 = vld [vmem:[#allocation3 + $0x15e8] sm:$0xff] }
 0x9cc   :  { %4521 = vmatprep.subr.bf16.mxu0 %v4372_v34  ;;  %4825 = vmatprep.subr.bf16.mxu1 %v4676_v59  ;;  %v4698_v34 = vld [vmem:[#allocation3 + $0x15f8] sm:$0xff]  ;;  %v4393_v59 = vld [vmem:[#allocation3 + $0x15e0] sm:$0xff] }
 0x9ce   :  { %4511 = vmatmul.mubr.bf16.vlgmr.msra.gmra.mrb[76].mxu0 %v7621_v6  ;;  %4815 = vmatmul.mubr.bf16.vlgmr.msra.gmra.mrb[76].mxu1 %v7621_v6  ;;  %v4682_v6 = vld [vmem:[#allocation3 + $0x11f8] sm:$0xff] }
 0x9cf   :  { %4522 = vmatpush1.bf16.msra.mxu0 %v4371_v2  ;;  %4826 = vmatpush1.bf16.msra.mxu1 %v4675_v28  ;;  %v4697_v2 = vld [vmem:[#allocation3 + $0x15f0] sm:$0xff]  ;;  %v4396_v28 = vld [vmem:[#allocation3 + $0x1668] sm:$0xff] }
 0x9d0   :  { %4523 = vmatprep.subr.bf16.mxu0 %v4374_v0  ;;  %4827 = vmatprep.subr.bf16.mxu1 %v4678_v7  ;;  %v4700_v0 = vld [vmem:[#allocation3 + $0x1678] sm:$0xff]  ;;  %v4395_v7 = vld [vmem:[#allocation3 + $0x1660] sm:$0xff] }
 0x9d1   :  { %4553 = vmatprep.mubr.bf16.mxu0 %v7627_v42  ;;  %4857 = vmatprep.mubr.bf16.mxu1 %v7627_v42  ;;  %v4379_v42 = vld [vmem:[#allocation3 + $0x1260] sm:$0xff] }
 0x9d3   :  { %4524 = vmatpush1.bf16.msra.mxu0 %v4373_v37  ;;  %4828 = vmatpush1.bf16.msra.mxu1 %v4677_v30  ;;  %v4699_v37 = vld [vmem:[#allocation3 + $0x1670] sm:$0xff]  ;;  %v4398_v30 = vld [vmem:[#allocation3 + $0x16e8] sm:$0xff] }
 0x9d4   :  { %4525 = vmatprep.subr.bf16.mxu0 %v4376_v15  ;;  %4829 = vmatprep.subr.bf16.mxu1 %v4680_v32  ;;  %v4702_v15 = vld [vmem:[#allocation3 + $0x16f8] sm:$0xff]  ;;  %v4397_v32 = vld [vmem:[#allocation3 + $0x16e0] sm:$0xff] }
 0x9d7   :  { %4526 = vmatpush1.bf16.msra.mxu0 %v4375_v43  ;;  %4830 = vmatpush1.bf16.msra.mxu1 %v4679_v57  ;;  %v4701_v43 = vld [vmem:[#allocation3 + $0x16f0] sm:$0xff]  ;;  %v4400_v57 = vld [vmem:[#allocation3 + $0x1768] sm:$0xff] }
 0x9d8   :  { %4527 = vmatprep.subr.bf16.mxu0 %v4378_v16  ;;  %4831 = vmatprep.subr.bf16.mxu1 %v4682_v6  ;;  %v4704_v16 = vld [vmem:[#allocation3 + $0x1778] sm:$0xff]  ;;  %v4399_v6 = vld [vmem:[#allocation3 + $0x1760] sm:$0xff] }
 0x9db   :  { %4528 = vmatpush1.bf16.msra.mxu0 %v4377_v19  ;;  %4832 = vmatpush1.bf16.msra.mxu1 %v4681_v20  ;;  %v4703_v19 = vld [vmem:[#allocation3 + $0x1770] sm:$0xff]  ;;  %v4402_v20 = vld [vmem:[#allocation3 + $0x17e8] sm:$0xff] }
 0x9dc   :  { %4529 = vmatprep.subr.bf16.mxu0 %v4380_v22  ;;  %4833 = vmatprep.subr.bf16.mxu1 %v4684_v21  ;;  %v4706_v22 = vld [vmem:[#allocation3 + $0x17f8] sm:$0xff]  ;;  %v4401_v21 = vld [vmem:[#allocation3 + $0x17e0] sm:$0xff] }
 0x9df   :  { %4530 = vmatpush1.bf16.msra.mxu0 %v4379_v42  ;;  %4834 = vmatpush1.bf16.msra.mxu1 %v4683_v38  ;;  %v4705_v42 = vld [vmem:[#allocation3 + $0x17f0] sm:$0xff]  ;;  %v4404_v38 = vld [vmem:[#allocation3 + $0x1868] sm:$0xff] }
 0x9e0   :  { %4531 = vmatprep.subr.bf16.mxu0 %v4382_v40  ;;  %4835 = vmatprep.subr.bf16.mxu1 %v4686_v45  ;;  %v4708_v40 = vld [vmem:[#allocation3 + $0x1878] sm:$0xff]  ;;  %v4403_v45 = vld [vmem:[#allocation3 + $0x1860] sm:$0xff] }
 0x9e3   :  { %4532 = vmatpush1.bf16.msra.mxu0 %v4381_v36  ;;  %4836 = vmatpush1.bf16.msra.mxu1 %v4685_v52  ;;  %v4707_v36 = vld [vmem:[#allocation3 + $0x1870] sm:$0xff]  ;;  %v4406_v52 = vld [vmem:[#allocation3 + $0x18e8] sm:$0xff] }
 0x9e4   :  { %4533 = vmatprep.subr.bf16.mxu0 %v4384_v10  ;;  %4837 = vmatprep.subr.bf16.mxu1 %v4688_v48  ;;  %v4710_v10 = vld [vmem:[#allocation3 + $0x18f8] sm:$0xff]  ;;  %v4405_v48 = vld [vmem:[#allocation3 + $0x18e0] sm:$0xff] }
 0x9e7   :  { %4534 = vmatpush1.bf16.msra.mxu0 %v4383_v63  ;;  %4838 = vmatpush1.bf16.msra.mxu1 %v4687_v29  ;;  %v4709_v63 = vld [vmem:[#allocation3 + $0x18f0] sm:$0xff]  ;;  %v4408_v29 = vld [vmem:[#allocation3 + $0x1968] sm:$0xff] }
 0x9e8   :  { %4535 = vmatprep.subr.bf16.mxu0 %v4386_v51  ;;  %4839 = vmatprep.subr.bf16.mxu1 %v4690_v58  ;;  %v4712_v51 = vld [vmem:[#allocation3 + $0x1978] sm:$0xff]  ;;  %v4407_v58 = vld [vmem:[#allocation3 + $0x1960] sm:$0xff] }
 0x9eb   :  { %4536 = vmatpush1.bf16.msra.mxu0 %v4385_v24  ;;  %4840 = vmatpush1.bf16.msra.mxu1 %v4689_v33  ;;  %v4711_v24 = vld [vmem:[#allocation3 + $0x1970] sm:$0xff]  ;;  %v4410_v33 = vld [vmem:[#allocation3 + $0x19e8] sm:$0xff] }
 0x9ec   :  { %4537 = vmatprep.subr.bf16.mxu0 %v4388_v39  ;;  %4841 = vmatprep.subr.bf16.mxu1 %v4692_v8  ;;  %v4409_v39 = vld [vmem:[#allocation3 + $0x19e0] sm:$0xff]  ;;  %v4713_v8 = vld [vmem:[#allocation3 + $0x19f0] sm:$0xff] }
 0x9ef   :  { %4538 = vmatpush1.bf16.msra.mxu0 %v4387_v9  ;;  %4842 = vmatpush1.bf16.msra.mxu1 %v4691_v11  ;;  %v4412_v9 = vld [vmem:[#allocation3 + $0x1a68] sm:$0xff]  ;;  %v4716_v11 = vld [vmem:[#allocation3 + $0x1a78] sm:$0xff] }
 0x9f0   :  { %4539 = vmatprep.subr.bf16.mxu0 %v4390_v14  ;;  %4843 = vmatprep.subr.bf16.mxu1 %v4694_v12  ;;  %v4715_v14 = vld [vmem:[#allocation3 + $0x1a70] sm:$0xff]  ;;  %v4414_v12 = vld [vmem:[#allocation3 + $0x1ae8] sm:$0xff] }
 0x9f3   :  { %4540 = vmatpush1.bf16.msra.mxu0 %v4389_v47  ;;  %4844 = vmatpush1.bf16.msra.mxu1 %v4693_v54  ;;  %v4718_v47 = vld [vmem:[#allocation3 + $0x1af8] sm:$0xff]  ;;  %v4413_v54 = vld [vmem:[#allocation3 + $0x1ae0] sm:$0xff] }
 0x9f4   :  { %4541 = vmatprep.subr.bf16.mxu0 %v4392_v46  ;;  %4845 = vmatprep.subr.bf16.mxu1 %v4696_v60  ;;  %v4717_v46 = vld [vmem:[#allocation3 + $0x1af0] sm:$0xff] }
 0x9f7   :  { %4542 = vmatpush1.bf16.msra.mxu0 %v4391_v27  ;;  %4846 = vmatpush1.bf16.msra.mxu1 %v4695_v49  ;;  %v4416_v49 = vld [vmem:[#allocation3 + $0x1b68] sm:$0xff] }
 0x9f8   :  { %4543 = vmatprep.subr.bf16.mxu0 %v4394_v56  ;;  %4847 = vmatprep.subr.bf16.mxu1 %v4698_v34  ;;  %v4720_v56 = vld [vmem:[#allocation3 + $0x1b78] sm:$0xff] }
 0x9fb   :  { %4544 = vmatpush1.bf16.msra.mxu0 %v4393_v59  ;;  %4848 = vmatpush1.bf16.msra.mxu1 %v4697_v2 }
 0x9fc   :  { %4545 = vmatprep.subr.bf16.mxu0 %v4396_v28  ;;  %4849 = vmatprep.subr.bf16.mxu1 %v4700_v0 }
 0x9ff   :  { %4546 = vmatpush1.bf16.msra.mxu0 %v4395_v7  ;;  %4850 = vmatpush1.bf16.msra.mxu1 %v4699_v37 }
 0xa00   :  { %4547 = vmatprep.subr.bf16.mxu0 %v4398_v30  ;;  %4851 = vmatprep.subr.bf16.mxu1 %v4702_v15  ;;  %v4418_v15 = vld [vmem:[#allocation3 + $0x1be8] sm:$0xff] }
 0xa03   :  { %4548 = vmatpush1.bf16.msra.mxu0 %v4397_v32  ;;  %4852 = vmatpush1.bf16.msra.mxu1 %v4701_v43  ;;  %v4722_v32 = vld [vmem:[#allocation3 + $0x1bf8] sm:$0xff]  ;;  %v4721_v43 = vld [vmem:[#allocation3 + $0x1bf0] sm:$0xff] }
 0xa04   :  { %4549 = vmatprep.subr.bf16.mxu0 %v4400_v57  ;;  %4853 = vmatprep.subr.bf16.mxu1 %v4704_v16  ;;  %v4420_v57 = vld [vmem:[#allocation3 + $0x1c68] sm:$0xff]  ;;  %v4724_v16 = vld [vmem:[#allocation3 + $0x1c78] sm:$0xff] }
 0xa07   :  { %4550 = vmatpush1.bf16.msra.mxu0 %v4399_v6  ;;  %4854 = vmatpush1.bf16.msra.mxu1 %v4703_v19  ;;  %v4726_v6 = vld [vmem:[#allocation3 + $0x1cf8] sm:$0xff]  ;;  %v4421_v19 = vld [vmem:[#allocation3 + $0x1ce0] sm:$0xff] }
 0xa08   :  { %4551 = vmatprep.subr.bf16.mxu0 %v4402_v20  ;;  %4855 = vmatprep.subr.bf16.mxu1 %v4706_v22  ;;  %v4725_v20 = vld [vmem:[#allocation3 + $0x1cf0] sm:$0xff]  ;;  %v4424_v22 = vld [vmem:[#allocation3 + $0x1d68] sm:$0xff] }
 0xa0b   :  { %4552 = vmatpush1.bf16.msra.mxu0 %v4401_v21  ;;  %4856 = vmatpush1.bf16.msra.mxu1 %v4705_v42  ;;  %v4728_v21 = vld [vmem:[#allocation3 + $0x1d78] sm:$0xff]  ;;  %v4423_v42 = vld [vmem:[#allocation3 + $0x1d60] sm:$0xff] }
 0xa0c   :  { %4564 = vmatprep.subr.bf16.mxu0 %v4404_v38  ;;  %4868 = vmatprep.subr.bf16.mxu1 %v4708_v40  ;;  %v4727_v38 = vld [vmem:[#allocation3 + $0x1d70] sm:$0xff]  ;;  %v4426_v40 = vld [vmem:[#allocation3 + $0x1de8] sm:$0xff] }
 0xa0e   :  { %4554 = vmatmul.mubr.bf16.vlgmr.msra.gmra.mrb[76].mxu0 %v7637_v53  ;;  %4858 = vmatmul.mubr.bf16.vlgmr.msra.gmra.mrb[76].mxu1 %v7637_v53  ;;  %v4714_v53 = vld [vmem:[#allocation3 + $0x19f8] sm:$0xff] }
 0xa0f   :  { %4565 = vmatpush1.bf16.msra.mxu0 %v4403_v45  ;;  %4869 = vmatpush1.bf16.msra.mxu1 %v4707_v36  ;;  %v4730_v45 = vld [vmem:[#allocation3 + $0x1df8] sm:$0xff]  ;;  %v4425_v36 = vld [vmem:[#allocation3 + $0x1de0] sm:$0xff] }
 0xa10   :  { %4566 = vmatprep.subr.bf16.mxu0 %v4406_v52  ;;  %4870 = vmatprep.subr.bf16.mxu1 %v4710_v10  ;;  %v4729_v52 = vld [vmem:[#allocation3 + $0x1df0] sm:$0xff]  ;;  %v4428_v10 = vld [vmem:[#allocation3 + $0x1e68] sm:$0xff] }
 0xa11   :  { %4596 = vmatprep.mubr.bf16.mxu0 %v7643_v1  ;;  %4900 = vmatprep.mubr.bf16.mxu1 %v7643_v1  ;;  %v4411_v1 = vld [vmem:[#allocation3 + $0x1a60] sm:$0xff] }
 0xa13   :  { %4567 = vmatpush1.bf16.msra.mxu0 %v4405_v48  ;;  %4871 = vmatpush1.bf16.msra.mxu1 %v4709_v63  ;;  %v4732_v48 = vld [vmem:[#allocation3 + $0x1e78] sm:$0xff]  ;;  %v4427_v63 = vld [vmem:[#allocation3 + $0x1e60] sm:$0xff] }
 0xa14   :  { %4568 = vmatprep.subr.bf16.mxu0 %v4408_v29  ;;  %4872 = vmatprep.subr.bf16.mxu1 %v4712_v51  ;;  %v4731_v29 = vld [vmem:[#allocation3 + $0x1e70] sm:$0xff]  ;;  %v4430_v51 = vld [vmem:[#allocation3 + $0x1ee8] sm:$0xff] }
 0xa17   :  { %4569 = vmatpush1.bf16.msra.mxu0 %v4407_v58  ;;  %4873 = vmatpush1.bf16.msra.mxu1 %v4711_v24  ;;  %v4734_v58 = vld [vmem:[#allocation3 + $0x1ef8] sm:$0xff]  ;;  %v4429_v24 = vld [vmem:[#allocation3 + $0x1ee0] sm:$0xff] }
 0xa18   :  { %4570 = vmatprep.subr.bf16.mxu0 %v4410_v33  ;;  %4874 = vmatprep.subr.bf16.mxu1 %v4714_v53  ;;  %v4733_v33 = vld [vmem:[#allocation3 + $0x1ef0] sm:$0xff]  ;;  %v4432_v53 = vld [vmem:[#allocation3 + $0x1f68] sm:$0xff] }
 0xa1b   :  { %4571 = vmatpush1.bf16.msra.mxu0 %v4409_v39  ;;  %4875 = vmatpush1.bf16.msra.mxu1 %v4713_v8  ;;  %v4736_v39 = vld [vmem:[#allocation3 + $0x1f78] sm:$0xff]  ;;  %v4431_v8 = vld [vmem:[#allocation3 + $0x1f60] sm:$0xff] }
 0xa1c   :  { %4572 = vmatprep.subr.bf16.mxu0 %v4412_v9  ;;  %4876 = vmatprep.subr.bf16.mxu1 %v4716_v11  ;;  %v4735_v9 = vld [vmem:[#allocation3 + $0x1f70] sm:$0xff]  ;;  %v4434_v11 = vld [vmem:[#allocation3 + $0x1fe8] sm:$0xff] }
 0xa1f   :  { %4573 = vmatpush1.bf16.msra.mxu0 %v4411_v1  ;;  %4877 = vmatpush1.bf16.msra.mxu1 %v4715_v14  ;;  %v4738_v1 = vld [vmem:[#allocation3 + $0x1ff8] sm:$0xff]  ;;  %v4433_v14 = vld [vmem:[#allocation3 + $0x1fe0] sm:$0xff] }
 0xa20   :  { %4574 = vmatprep.subr.bf16.mxu0 %v4414_v12  ;;  %4878 = vmatprep.subr.bf16.mxu1 %v4718_v47  ;;  %v4737_v12 = vld [vmem:[#allocation3 + $0x1ff0] sm:$0xff]  ;;  %v4915_v47 = vld [vmem:[#allocation10] sm:$0x3] }
 0xa21   :  { %v3990_v60 = vpop.f32.mrb[72].mxu0  ;;  %v7763_v27 = vpop.f32.mrb[72].mxu1 }
 0xa22   :  { %v7768_v34 = vmax.f32 %v3695_v31, %v3990_v60  ;;  %v3992_v59 = vpop.f32.mrb[73].mxu0  ;;  %v7770_v2 = vpop.f32.mrb[73].mxu1 }
 0xa23   :  { %v7775_v28 = vmax.f32 %v3696_v3, %v3992_v59  ;;  %v3994_v0 = vpop.f32.mrb[74].mxu0  ;;  %v7777_v7 = vpop.f32.mrb[74].mxu1  ;;  %4575 = vmatpush1.bf16.msra.mxu0 %v4413_v54  ;;  %4879 = vmatpush1.bf16.msra.mxu1 %v4717_v46 }
 0xa24   :  { %v4303_v37 = vmax.f32 %v7768_v34, %v7763_v27  ;;  %v7784_v62 = vmax.f32 %v3697_v4, %v3994_v0  ;;  %v3996_v26 = vpop.f32.mrb[75].mxu0  ;;  %v7786_v31 = vpop.f32.mrb[75].mxu1  ;;  %4576 = vmatprep.subr.bf16.mxu0 %v4416_v49  ;;  %4880 = vmatprep.subr.bf16.mxu1 %v4720_v56  ;;  %v4417_v4 = vld [vmem:[#allocation3 + $0x1be0] sm:$0xff]  ;;  %v4920_v49 = vrot.slane %v4915_v47, %v7480_v13 }
 0xa25   :  { %v4304_v3 = vmax.f32 %v7775_v28, %v7770_v2  ;;  %v7793_v30 = vmax.f32 %v3698_v5, %v3996_v26  ;;  %v4422_v5 = vld [vmem:[#allocation3 + $0x1ce8] sm:$0xff]  ;;  %v4924_v26 = vrot.slane %v4915_v47, %v7483_v17 }
 0xa26   :  { %v4305_v35 = vmax.f32 %v7784_v62, %v7777_v7 }
 0xa27   :  { %v4306_v44 = vmax.f32 %v7793_v30, %v7786_v31  ;;  %4577 = vmatpush1.bf16.msra.mxu0 %v4415_v61  ;;  %4881 = vmatpush1.bf16.msra.mxu1 %v4719_v50 }
 0xa28   :  { %4578 = vmatprep.subr.bf16.mxu0 %v4418_v15  ;;  %4882 = vmatprep.subr.bf16.mxu1 %v4722_v32 }
 0xa2b   :  { %4579 = vmatpush1.bf16.msra.mxu0 %v4417_v4  ;;  %4883 = vmatpush1.bf16.msra.mxu1 %v4721_v43 }
 0xa2c   :  { %4580 = vmatprep.subr.bf16.mxu0 %v4420_v57  ;;  %4884 = vmatprep.subr.bf16.mxu1 %v4724_v16 }
 0xa2f   :  { %4581 = vmatpush1.bf16.msra.mxu0 %v4419_v55  ;;  %4885 = vmatpush1.bf16.msra.mxu1 %v4723_v41 }
 0xa30   :  { %4582 = vmatprep.subr.bf16.mxu0 %v4422_v5  ;;  %4886 = vmatprep.subr.bf16.mxu1 %v4726_v6 }
 0xa33   :  { %4583 = vmatpush1.bf16.msra.mxu0 %v4421_v19  ;;  %4887 = vmatpush1.bf16.msra.mxu1 %v4725_v20 }
 0xa34   :  { %4584 = vmatprep.subr.bf16.mxu0 %v4424_v22  ;;  %4888 = vmatprep.subr.bf16.mxu1 %v4728_v21 }
 0xa37   :  { %4585 = vmatpush1.bf16.msra.mxu0 %v4423_v42  ;;  %4889 = vmatpush1.bf16.msra.mxu1 %v4727_v38 }
 0xa38   :  { %4586 = vmatprep.subr.bf16.mxu0 %v4426_v40  ;;  %4890 = vmatprep.subr.bf16.mxu1 %v4730_v45 }
 0xa3b   :  { %4587 = vmatpush1.bf16.msra.mxu0 %v4425_v36  ;;  %4891 = vmatpush1.bf16.msra.mxu1 %v4729_v52 }
 0xa3c   :  { %4588 = vmatprep.subr.bf16.mxu0 %v4428_v10  ;;  %4892 = vmatprep.subr.bf16.mxu1 %v4732_v48 }
 0xa3f   :  { %4589 = vmatpush1.bf16.msra.mxu0 %v4427_v63  ;;  %4893 = vmatpush1.bf16.msra.mxu1 %v4731_v29 }
 0xa40   :  { %4590 = vmatprep.subr.bf16.mxu0 %v4430_v51  ;;  %4894 = vmatprep.subr.bf16.mxu1 %v4734_v58 }
 0xa43   :  { %4591 = vmatpush1.bf16.msra.mxu0 %v4429_v24  ;;  %4895 = vmatpush1.bf16.msra.mxu1 %v4733_v33 }
 0xa44   :  { %4592 = vmatprep.subr.bf16.mxu0 %v4432_v53  ;;  %4896 = vmatprep.subr.bf16.mxu1 %v4736_v39 }
 0xa47   :  { %4593 = vmatpush1.bf16.msra.mxu0 %v4431_v8  ;;  %4897 = vmatpush1.bf16.msra.mxu1 %v4735_v9 }
 0xa48   :  { %4594 = vmatprep.subr.bf16.mxu0 %v4434_v11  ;;  %4898 = vmatprep.subr.bf16.mxu1 %v4738_v1 }
 0xa4b   :  { %4595 = vmatpush1.bf16.msra.mxu0 %v4433_v14  ;;  %4899 = vmatpush1.bf16.msra.mxu1 %v4737_v12 }
 0xa4e   :  { %4597 = vmatmul.mubr.bf16.vlgmr.msra.gmra.mrb[76].mxu0 %v7653_v18  ;;  %4901 = vmatmul.mubr.bf16.vlgmr.msra.gmra.mrb[76].mxu1 %v7653_v18 }
 0xb21   :  { %v4598_v54 = vpop.f32.mrb[76].mxu0  ;;  %v4902_v46 = vpop.f32.mrb[76].mxu1 }
 0xb22   :  { %v4607_v60 = vmax.f32 %v4303_v37, %v4598_v54  ;;  %v4600_v56 = vpop.f32.mrb[77].mxu0  ;;  %v4904_v59 = vpop.f32.mrb[77].mxu1 }
 0xb23   :  { %v4608_v0 = vmax.f32 %v4304_v3, %v4600_v56  ;;  %v4602_v61 = vpop.f32.mrb[78].mxu0  ;;  %v4906_v50 = vpop.f32.mrb[78].mxu1 }
 0xb24   :  { %v4911_v18 = vmax.f32 %v4607_v60, %v4902_v46  ;;  %v4609_v15 = vmax.f32 %v4305_v35, %v4602_v61  ;;  %v4604_v32 = vpop.f32.mrb[79].mxu0  ;;  %v4908_v27 = vpop.f32.mrb[79].mxu1 }
 0xb25   :  { %v4912_v34 = vmax.f32 %v4608_v0, %v4904_v59  ;;  %v4610_v37 = vmax.f32 %v4306_v44, %v4604_v32 }
 0xb26   :  { %v7815_v4 = vadd.f32 %v4920_v49, %v4911_v18  ;;  %v4913_v2 = vmax.f32 %v4609_v15, %v4906_v50 }
 0xb27   :  { %v4928_v28 = vadd.f32 %v4924_v26, %v4912_v34  ;;  %v4914_v3 = vmax.f32 %v4610_v37, %v4908_v27 }
 0xb28   :  { %v4931_v43 = vmax.f32 %v7815_v4, 0.0  ;;  %v7818_v57 = vadd.f32 %v4920_v49, %v4913_v2 }
 0xb29   :  { %v4932_v16 = vmax.f32 %v4928_v28, 0.0  ;;  %v4930_v55 = vadd.f32 %v4924_v26, %v4914_v3 }
 0xb2a   :  { %v4933_v7 = vmax.f32 %v7818_v57, 0.0 }
 0xb2b   :  { %v4934_v62 = vmax.f32 %v4930_v55, 0.0 }
 0xb2c   :  { %7011 = dma.done.wait [#allocation7 + $0x5], 65536 }
 0xb2d   :  { %7012 = vsyncadd [#allocation7 + $0x5], 4294901760  ;;  %v7821_v35 = vpack.c.bf16 %v4934_v62, %v4932_v16  ;;  %v4942_v31 = vld [vmem:[#allocation4 + $0x8] sm:$0xff]  ;;  %v4944_v30 = vld [vmem:[#allocation4 + $0x18] sm:$0xff] }
 0xb2e   :  { %v4941_v44 = vld [vmem:[#allocation4] sm:$0xff]  ;;  %5005 = vmatprep.subr.bf16.mxu0 %v4942_v31  ;;  %5048 = vmatprep.subr.bf16.mxu1 %v4944_v30  ;;  %v4943_v41 = vld [vmem:[#allocation4 + $0x10] sm:$0xff]  ;;  %v4946_v5 = vld [vmem:[#allocation4 + $0x108] sm:$0xff] }
 0xb2f   :  { %5037 = vmatprep.mubr.bf16.mxu0 %v7821_v35  ;;  %5080 = vmatprep.mubr.bf16.mxu1 %v7821_v35  ;;  %v4948_v6 = vld [vmem:[#allocation4 + $0x118] sm:$0xff]  ;;  %v4945_v19 = vld [vmem:[#allocation4 + $0x100] sm:$0xff]  ;;  %v4947_v20 = vld [vmem:[#allocation4 + $0x110] sm:$0xff] }
 0xb30   :  { %5006 = vmatpush1.bf16.msra.mxu0 %v4941_v44  ;;  %5049 = vmatpush1.bf16.msra.mxu1 %v4943_v41  ;;  %v4950_v22 = vld [vmem:[#allocation4 + $0x208] sm:$0xff]  ;;  %v4952_v21 = vld [vmem:[#allocation4 + $0x218] sm:$0xff]  ;;  %v4949_v42 = vld [vmem:[#allocation4 + $0x200] sm:$0xff] }
 0xb31   :  { %5007 = vmatprep.subr.bf16.mxu0 %v4946_v5  ;;  %5050 = vmatprep.subr.bf16.mxu1 %v4948_v6  ;;  %v4951_v38 = vld [vmem:[#allocation4 + $0x210] sm:$0xff]  ;;  %v4954_v40 = vld [vmem:[#allocation4 + $0x308] sm:$0xff]  ;;  %v4956_v45 = vld [vmem:[#allocation4 + $0x318] sm:$0xff] }
 0xb32   :  { %v4953_v36 = vld [vmem:[#allocation4 + $0x300] sm:$0xff]  ;;  %v4955_v52 = vld [vmem:[#allocation4 + $0x310] sm:$0xff]  ;;  %v4958_v10 = vld [vmem:[#allocation4 + $0x408] sm:$0xff] }
 0xb33   :  { %v4960_v48 = vld [vmem:[#allocation4 + $0x418] sm:$0xff]  ;;  %v4957_v63 = vld [vmem:[#allocation4 + $0x400] sm:$0xff]  ;;  %v4959_v29 = vld [vmem:[#allocation4 + $0x410] sm:$0xff] }
 0xb34   :  { %5008 = vmatpush1.bf16.msra.mxu0 %v4945_v19  ;;  %5051 = vmatpush1.bf16.msra.mxu1 %v4947_v20  ;;  %v4962_v51 = vld [vmem:[#allocation4 + $0x508] sm:$0xff]  ;;  %v4964_v58 = vld [vmem:[#allocation4 + $0x518] sm:$0xff]  ;;  %v4961_v24 = vld [vmem:[#allocation4 + $0x500] sm:$0xff] }
 0xb35   :  { %5009 = vmatprep.subr.bf16.mxu0 %v4950_v22  ;;  %5052 = vmatprep.subr.bf16.mxu1 %v4952_v21  ;;  %v4963_v33 = vld [vmem:[#allocation4 + $0x510] sm:$0xff]  ;;  %v4966_v53 = vld [vmem:[#allocation4 + $0x608] sm:$0xff]  ;;  %v4968_v39 = vld [vmem:[#allocation4 + $0x618] sm:$0xff] }
 0xb36   :  { %v4965_v8 = vld [vmem:[#allocation4 + $0x600] sm:$0xff]  ;;  %v4967_v9 = vld [vmem:[#allocation4 + $0x610] sm:$0xff]  ;;  %v4970_v11 = vld [vmem:[#allocation4 + $0x708] sm:$0xff] }
 0xb37   :  { %v4972_v1 = vld [vmem:[#allocation4 + $0x718] sm:$0xff]  ;;  %v4969_v14 = vld [vmem:[#allocation4 + $0x700] sm:$0xff]  ;;  %v4971_v12 = vld [vmem:[#allocation4 + $0x710] sm:$0xff] }
 0xb38   :  { %5010 = vmatpush1.bf16.msra.mxu0 %v4949_v42  ;;  %5053 = vmatpush1.bf16.msra.mxu1 %v4951_v38  ;;  %v4974_v47 = vld [vmem:[#allocation4 + $0x808] sm:$0xff]  ;;  %v4976_v54 = vld [vmem:[#allocation4 + $0x818] sm:$0xff]  ;;  %v4973_v46 = vld [vmem:[#allocation4 + $0x800] sm:$0xff]  ;;  %v7829_v38 = vpack.c.bf16 %v4933_v7, %v4931_v43 }
 0xb39   :  { %5011 = vmatprep.subr.bf16.mxu0 %v4954_v40  ;;  %5054 = vmatprep.subr.bf16.mxu1 %v4956_v45  ;;  %v4975_v60 = vld [vmem:[#allocation4 + $0x810] sm:$0xff]  ;;  %v4978_v49 = vld [vmem:[#allocation4 + $0x908] sm:$0xff]  ;;  %v4980_v56 = vld [vmem:[#allocation4 + $0x918] sm:$0xff] }
 0xb3a   :  { %v4977_v59 = vld [vmem:[#allocation4 + $0x900] sm:$0xff]  ;;  %v4979_v0 = vld [vmem:[#allocation4 + $0x910] sm:$0xff]  ;;  %v4982_v26 = vld [vmem:[#allocation4 + $0xa08] sm:$0xff] }
 0xb3b   :  { %v4984_v61 = vld [vmem:[#allocation4 + $0xa18] sm:$0xff]  ;;  %v4981_v50 = vld [vmem:[#allocation4 + $0xa00] sm:$0xff]  ;;  %v4983_v18 = vld [vmem:[#allocation4 + $0xa10] sm:$0xff] }
 0xb3c   :  { %5012 = vmatpush1.bf16.msra.mxu0 %v4953_v36  ;;  %5055 = vmatpush1.bf16.msra.mxu1 %v4955_v52  ;;  %v4986_v15 = vld [vmem:[#allocation4 + $0xb08] sm:$0xff]  ;;  %v4988_v32 = vld [vmem:[#allocation4 + $0xb18] sm:$0xff]  ;;  %v4985_v27 = vld [vmem:[#allocation4 + $0xb00] sm:$0xff] }
 0xb3d   :  { %5013 = vmatprep.subr.bf16.mxu0 %v4958_v10  ;;  %5056 = vmatprep.subr.bf16.mxu1 %v4960_v48  ;;  %v4987_v34 = vld [vmem:[#allocation4 + $0xb10] sm:$0xff]  ;;  %v4990_v37 = vld [vmem:[#allocation4 + $0xc08] sm:$0xff]  ;;  %v4992_v2 = vld [vmem:[#allocation4 + $0xc18] sm:$0xff] }
 0xb3e   :  { %v4989_v28 = vld [vmem:[#allocation4 + $0xc00] sm:$0xff]  ;;  %v4991_v3 = vld [vmem:[#allocation4 + $0xc10] sm:$0xff]  ;;  %v4994_v16 = vld [vmem:[#allocation4 + $0xd08] sm:$0xff] }
 0xb3f   :  { %v4996_v55 = vld [vmem:[#allocation4 + $0xd18] sm:$0xff]  ;;  %v4993_v62 = vld [vmem:[#allocation4 + $0xd00] sm:$0xff]  ;;  %v4995_v31 = vld [vmem:[#allocation4 + $0xd10] sm:$0xff] }
 0xb40   :  { %5014 = vmatpush1.bf16.msra.mxu0 %v4957_v63  ;;  %5057 = vmatpush1.bf16.msra.mxu1 %v4959_v29  ;;  %v4998_v30 = vld [vmem:[#allocation4 + $0xe08] sm:$0xff]  ;;  %v5000_v44 = vld [vmem:[#allocation4 + $0xe18] sm:$0xff]  ;;  %v4997_v41 = vld [vmem:[#allocation4 + $0xe00] sm:$0xff] }
 0xb41   :  { %5015 = vmatprep.subr.bf16.mxu0 %v4962_v51  ;;  %5058 = vmatprep.subr.bf16.mxu1 %v4964_v58  ;;  %v4999_v5 = vld [vmem:[#allocation4 + $0xe10] sm:$0xff]  ;;  %v5002_v6 = vld [vmem:[#allocation4 + $0xf08] sm:$0xff]  ;;  %v5004_v19 = vld [vmem:[#allocation4 + $0xf18] sm:$0xff] }
 0xb42   :  { %v5001_v20 = vld [vmem:[#allocation4 + $0xf00] sm:$0xff]  ;;  %v5003_v22 = vld [vmem:[#allocation4 + $0xf10] sm:$0xff]  ;;  %v5092_v21 = vld [vmem:[#allocation4 + $0x28] sm:$0xff] }
 0xb43   :  { %v5094_v42 = vld [vmem:[#allocation4 + $0x38] sm:$0xff]  ;;  %v5091_v40 = vld [vmem:[#allocation4 + $0x20] sm:$0xff]  ;;  %v5093_v45 = vld [vmem:[#allocation4 + $0x30] sm:$0xff] }
 0xb44   :  { %5016 = vmatpush1.bf16.msra.mxu0 %v4961_v24  ;;  %5059 = vmatpush1.bf16.msra.mxu1 %v4963_v33  ;;  %v5096_v36 = vld [vmem:[#allocation4 + $0x128] sm:$0xff]  ;;  %v5098_v52 = vld [vmem:[#allocation4 + $0x138] sm:$0xff]  ;;  %v5095_v4 = vld [vmem:[#allocation4 + $0x120] sm:$0xff] }
 0xb45   :  { %5017 = vmatprep.subr.bf16.mxu0 %v4966_v53  ;;  %5060 = vmatprep.subr.bf16.mxu1 %v4968_v39  ;;  %v5097_v57 = vld [vmem:[#allocation4 + $0x130] sm:$0xff]  ;;  %v5100_v43 = vld [vmem:[#allocation4 + $0x228] sm:$0xff]  ;;  %v5102_v7 = vld [vmem:[#allocation4 + $0x238] sm:$0xff] }
 0xb46   :  { %v5099_v10 = vld [vmem:[#allocation4 + $0x220] sm:$0xff]  ;;  %v5101_v48 = vld [vmem:[#allocation4 + $0x230] sm:$0xff]  ;;  %v5104_v63 = vld [vmem:[#allocation4 + $0x328] sm:$0xff] }
 0xb47   :  { %v5106_v29 = vld [vmem:[#allocation4 + $0x338] sm:$0xff]  ;;  %v5103_v51 = vld [vmem:[#allocation4 + $0x320] sm:$0xff]  ;;  %v5105_v58 = vld [vmem:[#allocation4 + $0x330] sm:$0xff] }
 0xb48   :  { %5018 = vmatpush1.bf16.msra.mxu0 %v4965_v8  ;;  %5061 = vmatpush1.bf16.msra.mxu1 %v4967_v9  ;;  %v5108_v24 = vld [vmem:[#allocation4 + $0x428] sm:$0xff]  ;;  %v5110_v33 = vld [vmem:[#allocation4 + $0x438] sm:$0xff]  ;;  %v5107_v53 = vld [vmem:[#allocation4 + $0x420] sm:$0xff] }
 0xb49   :  { %5019 = vmatprep.subr.bf16.mxu0 %v4970_v11  ;;  %5062 = vmatprep.subr.bf16.mxu1 %v4972_v1  ;;  %v5109_v39 = vld [vmem:[#allocation4 + $0x430] sm:$0xff]  ;;  %v5112_v8 = vld [vmem:[#allocation4 + $0x528] sm:$0xff]  ;;  %v5114_v9 = vld [vmem:[#allocation4 + $0x538] sm:$0xff] }
 0xb4a   :  { %v5111_v11 = vld [vmem:[#allocation4 + $0x520] sm:$0xff]  ;;  %v5113_v1 = vld [vmem:[#allocation4 + $0x530] sm:$0xff] }
 0xb4c   :  { %5020 = vmatpush1.bf16.msra.mxu0 %v4969_v14  ;;  %5063 = vmatpush1.bf16.msra.mxu1 %v4971_v12  ;;  %v5116_v14 = vld [vmem:[#allocation4 + $0x628] sm:$0xff]  ;;  %v5118_v12 = vld [vmem:[#allocation4 + $0x638] sm:$0xff] }
 0xb4d   :  { %5021 = vmatprep.subr.bf16.mxu0 %v4974_v47  ;;  %5064 = vmatprep.subr.bf16.mxu1 %v4976_v54  ;;  %v5115_v47 = vld [vmem:[#allocation4 + $0x620] sm:$0xff]  ;;  %v5117_v54 = vld [vmem:[#allocation4 + $0x630] sm:$0xff] }
 0xb50   :  { %5022 = vmatpush1.bf16.msra.mxu0 %v4973_v46  ;;  %5065 = vmatpush1.bf16.msra.mxu1 %v4975_v60  ;;  %v5120_v46 = vld [vmem:[#allocation4 + $0x728] sm:$0xff]  ;;  %v5122_v60 = vld [vmem:[#allocation4 + $0x738] sm:$0xff] }
 0xb51   :  { %5023 = vmatprep.subr.bf16.mxu0 %v4978_v49  ;;  %5066 = vmatprep.subr.bf16.mxu1 %v4980_v56  ;;  %v5119_v49 = vld [vmem:[#allocation4 + $0x720] sm:$0xff]  ;;  %v5121_v56 = vld [vmem:[#allocation4 + $0x730] sm:$0xff] }
 0xb54   :  { %5024 = vmatpush1.bf16.msra.mxu0 %v4977_v59  ;;  %5067 = vmatpush1.bf16.msra.mxu1 %v4979_v0  ;;  %v5124_v59 = vld [vmem:[#allocation4 + $0x828] sm:$0xff]  ;;  %v5126_v0 = vld [vmem:[#allocation4 + $0x838] sm:$0xff] }
 0xb55   :  { %5025 = vmatprep.subr.bf16.mxu0 %v4982_v26  ;;  %5068 = vmatprep.subr.bf16.mxu1 %v4984_v61  ;;  %v5123_v26 = vld [vmem:[#allocation4 + $0x820] sm:$0xff]  ;;  %v5125_v61 = vld [vmem:[#allocation4 + $0x830] sm:$0xff] }
 0xb58   :  { %5026 = vmatpush1.bf16.msra.mxu0 %v4981_v50  ;;  %5069 = vmatpush1.bf16.msra.mxu1 %v4983_v18  ;;  %v5128_v50 = vld [vmem:[#allocation4 + $0x928] sm:$0xff]  ;;  %v5130_v18 = vld [vmem:[#allocation4 + $0x938] sm:$0xff] }
 0xb59   :  { %5027 = vmatprep.subr.bf16.mxu0 %v4986_v15  ;;  %5070 = vmatprep.subr.bf16.mxu1 %v4988_v32  ;;  %v5127_v15 = vld [vmem:[#allocation4 + $0x920] sm:$0xff]  ;;  %v5129_v32 = vld [vmem:[#allocation4 + $0x930] sm:$0xff] }
 0xb5c   :  { %5028 = vmatpush1.bf16.msra.mxu0 %v4985_v27  ;;  %5071 = vmatpush1.bf16.msra.mxu1 %v4987_v34  ;;  %v5132_v27 = vld [vmem:[#allocation4 + $0xa28] sm:$0xff]  ;;  %v5134_v34 = vld [vmem:[#allocation4 + $0xa38] sm:$0xff] }
 0xb5d   :  { %5029 = vmatprep.subr.bf16.mxu0 %v4990_v37  ;;  %5072 = vmatprep.subr.bf16.mxu1 %v4992_v2  ;;  %v5131_v37 = vld [vmem:[#allocation4 + $0xa20] sm:$0xff]  ;;  %v5133_v2 = vld [vmem:[#allocation4 + $0xa30] sm:$0xff] }
 0xb60   :  { %5030 = vmatpush1.bf16.msra.mxu0 %v4989_v28  ;;  %5073 = vmatpush1.bf16.msra.mxu1 %v4991_v3  ;;  %v5136_v28 = vld [vmem:[#allocation4 + $0xb28] sm:$0xff]  ;;  %v5138_v3 = vld [vmem:[#allocation4 + $0xb38] sm:$0xff] }
 0xb61   :  { %5031 = vmatprep.subr.bf16.mxu0 %v4994_v16  ;;  %5074 = vmatprep.subr.bf16.mxu1 %v4996_v55  ;;  %v5135_v16 = vld [vmem:[#allocation4 + $0xb20] sm:$0xff]  ;;  %v5137_v55 = vld [vmem:[#allocation4 + $0xb30] sm:$0xff] }
 0xb64   :  { %5032 = vmatpush1.bf16.msra.mxu0 %v4993_v62  ;;  %5075 = vmatpush1.bf16.msra.mxu1 %v4995_v31  ;;  %v5140_v62 = vld [vmem:[#allocation4 + $0xc28] sm:$0xff]  ;;  %v5142_v31 = vld [vmem:[#allocation4 + $0xc38] sm:$0xff] }
 0xb65   :  { %5033 = vmatprep.subr.bf16.mxu0 %v4998_v30  ;;  %5076 = vmatprep.subr.bf16.mxu1 %v5000_v44  ;;  %v5139_v30 = vld [vmem:[#allocation4 + $0xc20] sm:$0xff]  ;;  %v5141_v44 = vld [vmem:[#allocation4 + $0xc30] sm:$0xff] }
 0xb68   :  { %5034 = vmatpush1.bf16.msra.mxu0 %v4997_v41  ;;  %5077 = vmatpush1.bf16.msra.mxu1 %v4999_v5  ;;  %v5144_v41 = vld [vmem:[#allocation4 + $0xd28] sm:$0xff]  ;;  %v5146_v5 = vld [vmem:[#allocation4 + $0xd38] sm:$0xff] }
 0xb69   :  { %5035 = vmatprep.subr.bf16.mxu0 %v5002_v6  ;;  %5078 = vmatprep.subr.bf16.mxu1 %v5004_v19  ;;  %v5143_v6 = vld [vmem:[#allocation4 + $0xd20] sm:$0xff]  ;;  %v5145_v19 = vld [vmem:[#allocation4 + $0xd30] sm:$0xff] }
 0xb6c   :  { %5036 = vmatpush1.bf16.msra.mxu0 %v5001_v20  ;;  %5079 = vmatpush1.bf16.msra.mxu1 %v5003_v22  ;;  %v5148_v20 = vld [vmem:[#allocation4 + $0xe28] sm:$0xff]  ;;  %v5150_v22 = vld [vmem:[#allocation4 + $0xe38] sm:$0xff] }
 0xb6d   :  { %5155 = vmatprep.subr.bf16.mxu0 %v5092_v21  ;;  %5198 = vmatprep.subr.bf16.mxu1 %v5094_v42  ;;  %v5147_v21 = vld [vmem:[#allocation4 + $0xe20] sm:$0xff]  ;;  %v5149_v42 = vld [vmem:[#allocation4 + $0xe30] sm:$0xff] }
 0xb6f   :  { %5038 = vmatmul.mubr.bf16.vlgmr.msra.gmra.mrb[80].mxu0 %v7829_v38  ;;  %5081 = vmatmul.mubr.bf16.vlgmr.msra.gmra.mrb[80].mxu1 %v7829_v38 }
 0xb70   :  { %5156 = vmatpush1.bf16.msra.mxu0 %v5091_v40  ;;  %5199 = vmatpush1.bf16.msra.mxu1 %v5093_v45  ;;  %v5152_v40 = vld [vmem:[#allocation4 + $0xf28] sm:$0xff]  ;;  %v5154_v45 = vld [vmem:[#allocation4 + $0xf38] sm:$0xff] }
 0xb71   :  { %5157 = vmatprep.subr.bf16.mxu0 %v5096_v36  ;;  %5200 = vmatprep.subr.bf16.mxu1 %v5098_v52  ;;  %v5151_v36 = vld [vmem:[#allocation4 + $0xf20] sm:$0xff]  ;;  %v5153_v52 = vld [vmem:[#allocation4 + $0xf30] sm:$0xff] }
 0xb72   :  { %5187 = vmatprep.mubr.bf16.mxu0 %v7821_v35  ;;  %5230 = vmatprep.mubr.bf16.mxu1 %v7821_v35 }
 0xb74   :  { %5158 = vmatpush1.bf16.msra.mxu0 %v5095_v4  ;;  %5201 = vmatpush1.bf16.msra.mxu1 %v5097_v57  ;;  %v5250_v4 = vld [vmem:[#allocation4 + $0x48] sm:$0xff]  ;;  %v5252_v57 = vld [vmem:[#allocation4 + $0x58] sm:$0xff] }
 0xb75   :  { %5159 = vmatprep.subr.bf16.mxu0 %v5100_v43  ;;  %5202 = vmatprep.subr.bf16.mxu1 %v5102_v7  ;;  %v5249_v43 = vld [vmem:[#allocation4 + $0x40] sm:$0xff]  ;;  %v5251_v7 = vld [vmem:[#allocation4 + $0x50] sm:$0xff] }
 0xb78   :  { %5160 = vmatpush1.bf16.msra.mxu0 %v5099_v10  ;;  %5203 = vmatpush1.bf16.msra.mxu1 %v5101_v48  ;;  %v5254_v10 = vld [vmem:[#allocation4 + $0x148] sm:$0xff]  ;;  %v5256_v48 = vld [vmem:[#allocation4 + $0x158] sm:$0xff] }
 0xb79   :  { %5161 = vmatprep.subr.bf16.mxu0 %v5104_v63  ;;  %5204 = vmatprep.subr.bf16.mxu1 %v5106_v29  ;;  %v5253_v63 = vld [vmem:[#allocation4 + $0x140] sm:$0xff]  ;;  %v5255_v29 = vld [vmem:[#allocation4 + $0x150] sm:$0xff] }
 0xb7c   :  { %5162 = vmatpush1.bf16.msra.mxu0 %v5103_v51  ;;  %5205 = vmatpush1.bf16.msra.mxu1 %v5105_v58  ;;  %v5258_v51 = vld [vmem:[#allocation4 + $0x248] sm:$0xff]  ;;  %v5260_v58 = vld [vmem:[#allocation4 + $0x258] sm:$0xff] }
 0xb7d   :  { %5163 = vmatprep.subr.bf16.mxu0 %v5108_v24  ;;  %5206 = vmatprep.subr.bf16.mxu1 %v5110_v33  ;;  %v5257_v24 = vld [vmem:[#allocation4 + $0x240] sm:$0xff]  ;;  %v5259_v33 = vld [vmem:[#allocation4 + $0x250] sm:$0xff] }
 0xb80   :  { %5164 = vmatpush1.bf16.msra.mxu0 %v5107_v53  ;;  %5207 = vmatpush1.bf16.msra.mxu1 %v5109_v39  ;;  %v5262_v53 = vld [vmem:[#allocation4 + $0x348] sm:$0xff]  ;;  %v5264_v39 = vld [vmem:[#allocation4 + $0x358] sm:$0xff] }
 0xb81   :  { %5165 = vmatprep.subr.bf16.mxu0 %v5112_v8  ;;  %5208 = vmatprep.subr.bf16.mxu1 %v5114_v9  ;;  %v5261_v8 = vld [vmem:[#allocation4 + $0x340] sm:$0xff]  ;;  %v5263_v9 = vld [vmem:[#allocation4 + $0x350] sm:$0xff] }
 0xb84   :  { %5166 = vmatpush1.bf16.msra.mxu0 %v5111_v11  ;;  %5209 = vmatpush1.bf16.msra.mxu1 %v5113_v1  ;;  %v5266_v11 = vld [vmem:[#allocation4 + $0x448] sm:$0xff]  ;;  %v5268_v1 = vld [vmem:[#allocation4 + $0x458] sm:$0xff] }
 0xb85   :  { %5167 = vmatprep.subr.bf16.mxu0 %v5116_v14  ;;  %5210 = vmatprep.subr.bf16.mxu1 %v5118_v12  ;;  %v5265_v14 = vld [vmem:[#allocation4 + $0x440] sm:$0xff]  ;;  %v5267_v12 = vld [vmem:[#allocation4 + $0x450] sm:$0xff] }
 0xb88   :  { %5168 = vmatpush1.bf16.msra.mxu0 %v5115_v47  ;;  %5211 = vmatpush1.bf16.msra.mxu1 %v5117_v54  ;;  %v5270_v47 = vld [vmem:[#allocation4 + $0x548] sm:$0xff]  ;;  %v5272_v54 = vld [vmem:[#allocation4 + $0x558] sm:$0xff] }
 0xb89   :  { %5169 = vmatprep.subr.bf16.mxu0 %v5120_v46  ;;  %5212 = vmatprep.subr.bf16.mxu1 %v5122_v60  ;;  %v5269_v46 = vld [vmem:[#allocation4 + $0x540] sm:$0xff]  ;;  %v5271_v60 = vld [vmem:[#allocation4 + $0x550] sm:$0xff] }
 0xb8c   :  { %5170 = vmatpush1.bf16.msra.mxu0 %v5119_v49  ;;  %5213 = vmatpush1.bf16.msra.mxu1 %v5121_v56  ;;  %v5274_v49 = vld [vmem:[#allocation4 + $0x648] sm:$0xff]  ;;  %v5276_v56 = vld [vmem:[#allocation4 + $0x658] sm:$0xff] }
 0xb8d   :  { %5171 = vmatprep.subr.bf16.mxu0 %v5124_v59  ;;  %5214 = vmatprep.subr.bf16.mxu1 %v5126_v0  ;;  %v5273_v59 = vld [vmem:[#allocation4 + $0x640] sm:$0xff]  ;;  %v5275_v0 = vld [vmem:[#allocation4 + $0x650] sm:$0xff] }
 0xb90   :  { %5172 = vmatpush1.bf16.msra.mxu0 %v5123_v26  ;;  %5215 = vmatpush1.bf16.msra.mxu1 %v5125_v61  ;;  %v5278_v26 = vld [vmem:[#allocation4 + $0x748] sm:$0xff]  ;;  %v5280_v61 = vld [vmem:[#allocation4 + $0x758] sm:$0xff] }
 0xb91   :  { %5173 = vmatprep.subr.bf16.mxu0 %v5128_v50  ;;  %5216 = vmatprep.subr.bf16.mxu1 %v5130_v18  ;;  %v5277_v50 = vld [vmem:[#allocation4 + $0x740] sm:$0xff]  ;;  %v5279_v18 = vld [vmem:[#allocation4 + $0x750] sm:$0xff] }
 0xb94   :  { %5174 = vmatpush1.bf16.msra.mxu0 %v5127_v15  ;;  %5217 = vmatpush1.bf16.msra.mxu1 %v5129_v32  ;;  %v5282_v15 = vld [vmem:[#allocation4 + $0x848] sm:$0xff]  ;;  %v5284_v32 = vld [vmem:[#allocation4 + $0x858] sm:$0xff] }
 0xb95   :  { %5175 = vmatprep.subr.bf16.mxu0 %v5132_v27  ;;  %5218 = vmatprep.subr.bf16.mxu1 %v5134_v34  ;;  %v5281_v27 = vld [vmem:[#allocation4 + $0x840] sm:$0xff]  ;;  %v5283_v34 = vld [vmem:[#allocation4 + $0x850] sm:$0xff] }
 0xb98   :  { %5176 = vmatpush1.bf16.msra.mxu0 %v5131_v37  ;;  %5219 = vmatpush1.bf16.msra.mxu1 %v5133_v2  ;;  %v5286_v37 = vld [vmem:[#allocation4 + $0x948] sm:$0xff]  ;;  %v5288_v2 = vld [vmem:[#allocation4 + $0x958] sm:$0xff] }
 0xb99   :  { %5177 = vmatprep.subr.bf16.mxu0 %v5136_v28  ;;  %5220 = vmatprep.subr.bf16.mxu1 %v5138_v3  ;;  %v5285_v28 = vld [vmem:[#allocation4 + $0x940] sm:$0xff]  ;;  %v5287_v3 = vld [vmem:[#allocation4 + $0x950] sm:$0xff] }
 0xb9c   :  { %5178 = vmatpush1.bf16.msra.mxu0 %v5135_v16  ;;  %5221 = vmatpush1.bf16.msra.mxu1 %v5137_v55  ;;  %v5290_v16 = vld [vmem:[#allocation4 + $0xa48] sm:$0xff]  ;;  %v5292_v55 = vld [vmem:[#allocation4 + $0xa58] sm:$0xff] }
 0xb9d   :  { %5179 = vmatprep.subr.bf16.mxu0 %v5140_v62  ;;  %5222 = vmatprep.subr.bf16.mxu1 %v5142_v31  ;;  %v5289_v62 = vld [vmem:[#allocation4 + $0xa40] sm:$0xff]  ;;  %v5291_v31 = vld [vmem:[#allocation4 + $0xa50] sm:$0xff] }
 0xba0   :  { %5180 = vmatpush1.bf16.msra.mxu0 %v5139_v30  ;;  %5223 = vmatpush1.bf16.msra.mxu1 %v5141_v44  ;;  %v5294_v30 = vld [vmem:[#allocation4 + $0xb48] sm:$0xff]  ;;  %v5296_v44 = vld [vmem:[#allocation4 + $0xb58] sm:$0xff] }
 0xba1   :  { %5181 = vmatprep.subr.bf16.mxu0 %v5144_v41  ;;  %5224 = vmatprep.subr.bf16.mxu1 %v5146_v5  ;;  %v5293_v41 = vld [vmem:[#allocation4 + $0xb40] sm:$0xff]  ;;  %v5295_v5 = vld [vmem:[#allocation4 + $0xb50] sm:$0xff] }
 0xba4   :  { %5182 = vmatpush1.bf16.msra.mxu0 %v5143_v6  ;;  %5225 = vmatpush1.bf16.msra.mxu1 %v5145_v19  ;;  %v5298_v6 = vld [vmem:[#allocation4 + $0xc48] sm:$0xff]  ;;  %v5300_v19 = vld [vmem:[#allocation4 + $0xc58] sm:$0xff] }
 0xba5   :  { %5183 = vmatprep.subr.bf16.mxu0 %v5148_v20  ;;  %5226 = vmatprep.subr.bf16.mxu1 %v5150_v22  ;;  %v5297_v20 = vld [vmem:[#allocation4 + $0xc40] sm:$0xff]  ;;  %v5299_v22 = vld [vmem:[#allocation4 + $0xc50] sm:$0xff] }
 0xba8   :  { %5184 = vmatpush1.bf16.msra.mxu0 %v5147_v21  ;;  %5227 = vmatpush1.bf16.msra.mxu1 %v5149_v42  ;;  %v5302_v21 = vld [vmem:[#allocation4 + $0xd48] sm:$0xff]  ;;  %v5304_v42 = vld [vmem:[#allocation4 + $0xd58] sm:$0xff] }
 0xba9   :  { %5185 = vmatprep.subr.bf16.mxu0 %v5152_v40  ;;  %5228 = vmatprep.subr.bf16.mxu1 %v5154_v45  ;;  %v5301_v40 = vld [vmem:[#allocation4 + $0xd40] sm:$0xff]  ;;  %v5303_v45 = vld [vmem:[#allocation4 + $0xd50] sm:$0xff] }
 0xbac   :  { %5186 = vmatpush1.bf16.msra.mxu0 %v5151_v36  ;;  %5229 = vmatpush1.bf16.msra.mxu1 %v5153_v52  ;;  %v5306_v36 = vld [vmem:[#allocation4 + $0xe48] sm:$0xff]  ;;  %v5308_v52 = vld [vmem:[#allocation4 + $0xe58] sm:$0xff] }
 0xbad   :  { %5313 = vmatprep.subr.bf16.mxu0 %v5250_v4  ;;  %5356 = vmatprep.subr.bf16.mxu1 %v5252_v57  ;;  %v5305_v4 = vld [vmem:[#allocation4 + $0xe40] sm:$0xff]  ;;  %v5307_v57 = vld [vmem:[#allocation4 + $0xe50] sm:$0xff] }
 0xbaf   :  { %5188 = vmatmul.mubr.bf16.vlgmr.msra.gmra.mrb[84].mxu0 %v7829_v38  ;;  %5231 = vmatmul.mubr.bf16.vlgmr.msra.gmra.mrb[84].mxu1 %v7829_v38 }
 0xbb0   :  { %5314 = vmatpush1.bf16.msra.mxu0 %v5249_v43  ;;  %5357 = vmatpush1.bf16.msra.mxu1 %v5251_v7  ;;  %v5310_v43 = vld [vmem:[#allocation4 + $0xf48] sm:$0xff]  ;;  %v5312_v7 = vld [vmem:[#allocation4 + $0xf58] sm:$0xff] }
 0xbb1   :  { %5315 = vmatprep.subr.bf16.mxu0 %v5254_v10  ;;  %5358 = vmatprep.subr.bf16.mxu1 %v5256_v48  ;;  %v5309_v10 = vld [vmem:[#allocation4 + $0xf40] sm:$0xff]  ;;  %v5311_v48 = vld [vmem:[#allocation4 + $0xf50] sm:$0xff] }
 0xbb2   :  { %5345 = vmatprep.mubr.bf16.mxu0 %v7821_v35  ;;  %5388 = vmatprep.mubr.bf16.mxu1 %v7821_v35 }
 0xbb4   :  { %5316 = vmatpush1.bf16.msra.mxu0 %v5253_v63  ;;  %5359 = vmatpush1.bf16.msra.mxu1 %v5255_v29  ;;  %v5408_v63 = vld [vmem:[#allocation4 + $0x68] sm:$0xff]  ;;  %v5410_v29 = vld [vmem:[#allocation4 + $0x78] sm:$0xff] }
 0xbb5   :  { %5317 = vmatprep.subr.bf16.mxu0 %v5258_v51  ;;  %5360 = vmatprep.subr.bf16.mxu1 %v5260_v58  ;;  %v5407_v51 = vld [vmem:[#allocation4 + $0x60] sm:$0xff]  ;;  %v5409_v58 = vld [vmem:[#allocation4 + $0x70] sm:$0xff] }
 0xbb8   :  { %5318 = vmatpush1.bf16.msra.mxu0 %v5257_v24  ;;  %5361 = vmatpush1.bf16.msra.mxu1 %v5259_v33  ;;  %v5412_v24 = vld [vmem:[#allocation4 + $0x168] sm:$0xff]  ;;  %v5414_v33 = vld [vmem:[#allocation4 + $0x178] sm:$0xff] }
 0xbb9   :  { %5319 = vmatprep.subr.bf16.mxu0 %v5262_v53  ;;  %5362 = vmatprep.subr.bf16.mxu1 %v5264_v39  ;;  %v5411_v53 = vld [vmem:[#allocation4 + $0x160] sm:$0xff]  ;;  %v5413_v39 = vld [vmem:[#allocation4 + $0x170] sm:$0xff] }
 0xbbc   :  { %5320 = vmatpush1.bf16.msra.mxu0 %v5261_v8  ;;  %5363 = vmatpush1.bf16.msra.mxu1 %v5263_v9  ;;  %v5416_v8 = vld [vmem:[#allocation4 + $0x268] sm:$0xff]  ;;  %v5418_v9 = vld [vmem:[#allocation4 + $0x278] sm:$0xff] }
 0xbbd   :  { %5321 = vmatprep.subr.bf16.mxu0 %v5266_v11  ;;  %5364 = vmatprep.subr.bf16.mxu1 %v5268_v1  ;;  %v5415_v11 = vld [vmem:[#allocation4 + $0x260] sm:$0xff]  ;;  %v5417_v1 = vld [vmem:[#allocation4 + $0x270] sm:$0xff] }
 0xbc0   :  { %5322 = vmatpush1.bf16.msra.mxu0 %v5265_v14  ;;  %5365 = vmatpush1.bf16.msra.mxu1 %v5267_v12  ;;  %v5420_v14 = vld [vmem:[#allocation4 + $0x368] sm:$0xff]  ;;  %v5422_v12 = vld [vmem:[#allocation4 + $0x378] sm:$0xff] }
 0xbc1   :  { %5323 = vmatprep.subr.bf16.mxu0 %v5270_v47  ;;  %5366 = vmatprep.subr.bf16.mxu1 %v5272_v54  ;;  %v5419_v47 = vld [vmem:[#allocation4 + $0x360] sm:$0xff]  ;;  %v5421_v54 = vld [vmem:[#allocation4 + $0x370] sm:$0xff] }
 0xbc4   :  { %5324 = vmatpush1.bf16.msra.mxu0 %v5269_v46  ;;  %5367 = vmatpush1.bf16.msra.mxu1 %v5271_v60  ;;  %v5424_v46 = vld [vmem:[#allocation4 + $0x468] sm:$0xff]  ;;  %v5426_v60 = vld [vmem:[#allocation4 + $0x478] sm:$0xff] }
 0xbc5   :  { %5325 = vmatprep.subr.bf16.mxu0 %v5274_v49  ;;  %5368 = vmatprep.subr.bf16.mxu1 %v5276_v56  ;;  %v5423_v49 = vld [vmem:[#allocation4 + $0x460] sm:$0xff]  ;;  %v5425_v56 = vld [vmem:[#allocation4 + $0x470] sm:$0xff] }
 0xbc8   :  { %5326 = vmatpush1.bf16.msra.mxu0 %v5273_v59  ;;  %5369 = vmatpush1.bf16.msra.mxu1 %v5275_v0  ;;  %v5428_v59 = vld [vmem:[#allocation4 + $0x568] sm:$0xff]  ;;  %v5430_v0 = vld [vmem:[#allocation4 + $0x578] sm:$0xff] }
 0xbc9   :  { %5327 = vmatprep.subr.bf16.mxu0 %v5278_v26  ;;  %5370 = vmatprep.subr.bf16.mxu1 %v5280_v61  ;;  %v5427_v26 = vld [vmem:[#allocation4 + $0x560] sm:$0xff]  ;;  %v5429_v61 = vld [vmem:[#allocation4 + $0x570] sm:$0xff] }
 0xbcc   :  { %5328 = vmatpush1.bf16.msra.mxu0 %v5277_v50  ;;  %5371 = vmatpush1.bf16.msra.mxu1 %v5279_v18  ;;  %v5432_v50 = vld [vmem:[#allocation4 + $0x668] sm:$0xff]  ;;  %v5434_v18 = vld [vmem:[#allocation4 + $0x678] sm:$0xff] }
 0xbcd   :  { %5329 = vmatprep.subr.bf16.mxu0 %v5282_v15  ;;  %5372 = vmatprep.subr.bf16.mxu1 %v5284_v32  ;;  %v5431_v15 = vld [vmem:[#allocation4 + $0x660] sm:$0xff]  ;;  %v5433_v32 = vld [vmem:[#allocation4 + $0x670] sm:$0xff] }
 0xbd0   :  { %5330 = vmatpush1.bf16.msra.mxu0 %v5281_v27  ;;  %5373 = vmatpush1.bf16.msra.mxu1 %v5283_v34  ;;  %v5436_v27 = vld [vmem:[#allocation4 + $0x768] sm:$0xff]  ;;  %v5438_v34 = vld [vmem:[#allocation4 + $0x778] sm:$0xff] }
 0xbd1   :  { %5331 = vmatprep.subr.bf16.mxu0 %v5286_v37  ;;  %5374 = vmatprep.subr.bf16.mxu1 %v5288_v2  ;;  %v5435_v37 = vld [vmem:[#allocation4 + $0x760] sm:$0xff]  ;;  %v5437_v2 = vld [vmem:[#allocation4 + $0x770] sm:$0xff] }
 0xbd4   :  { %5332 = vmatpush1.bf16.msra.mxu0 %v5285_v28  ;;  %5375 = vmatpush1.bf16.msra.mxu1 %v5287_v3  ;;  %v5440_v28 = vld [vmem:[#allocation4 + $0x868] sm:$0xff]  ;;  %v5442_v3 = vld [vmem:[#allocation4 + $0x878] sm:$0xff] }
 0xbd5   :  { %5333 = vmatprep.subr.bf16.mxu0 %v5290_v16  ;;  %5376 = vmatprep.subr.bf16.mxu1 %v5292_v55  ;;  %v5439_v16 = vld [vmem:[#allocation4 + $0x860] sm:$0xff]  ;;  %v5441_v55 = vld [vmem:[#allocation4 + $0x870] sm:$0xff] }
 0xbd8   :  { %5334 = vmatpush1.bf16.msra.mxu0 %v5289_v62  ;;  %5377 = vmatpush1.bf16.msra.mxu1 %v5291_v31  ;;  %v5444_v62 = vld [vmem:[#allocation4 + $0x968] sm:$0xff]  ;;  %v5446_v31 = vld [vmem:[#allocation4 + $0x978] sm:$0xff] }
 0xbd9   :  { %5335 = vmatprep.subr.bf16.mxu0 %v5294_v30  ;;  %5378 = vmatprep.subr.bf16.mxu1 %v5296_v44  ;;  %v5443_v30 = vld [vmem:[#allocation4 + $0x960] sm:$0xff]  ;;  %v5445_v44 = vld [vmem:[#allocation4 + $0x970] sm:$0xff] }
 0xbdc   :  { %5336 = vmatpush1.bf16.msra.mxu0 %v5293_v41  ;;  %5379 = vmatpush1.bf16.msra.mxu1 %v5295_v5  ;;  %v5448_v41 = vld [vmem:[#allocation4 + $0xa68] sm:$0xff]  ;;  %v5450_v5 = vld [vmem:[#allocation4 + $0xa78] sm:$0xff] }
 0xbdd   :  { %5337 = vmatprep.subr.bf16.mxu0 %v5298_v6  ;;  %5380 = vmatprep.subr.bf16.mxu1 %v5300_v19  ;;  %v5447_v6 = vld [vmem:[#allocation4 + $0xa60] sm:$0xff]  ;;  %v5449_v19 = vld [vmem:[#allocation4 + $0xa70] sm:$0xff] }
 0xbe0   :  { %5338 = vmatpush1.bf16.msra.mxu0 %v5297_v20  ;;  %5381 = vmatpush1.bf16.msra.mxu1 %v5299_v22  ;;  %v5452_v20 = vld [vmem:[#allocation4 + $0xb68] sm:$0xff]  ;;  %v5454_v22 = vld [vmem:[#allocation4 + $0xb78] sm:$0xff] }
 0xbe1   :  { %5339 = vmatprep.subr.bf16.mxu0 %v5302_v21  ;;  %5382 = vmatprep.subr.bf16.mxu1 %v5304_v42  ;;  %v5451_v21 = vld [vmem:[#allocation4 + $0xb60] sm:$0xff]  ;;  %v5453_v42 = vld [vmem:[#allocation4 + $0xb70] sm:$0xff] }
 0xbe4   :  { %5340 = vmatpush1.bf16.msra.mxu0 %v5301_v40  ;;  %5383 = vmatpush1.bf16.msra.mxu1 %v5303_v45  ;;  %v5456_v40 = vld [vmem:[#allocation4 + $0xc68] sm:$0xff]  ;;  %v5458_v45 = vld [vmem:[#allocation4 + $0xc78] sm:$0xff] }
 0xbe5   :  { %5341 = vmatprep.subr.bf16.mxu0 %v5306_v36  ;;  %5384 = vmatprep.subr.bf16.mxu1 %v5308_v52  ;;  %v5455_v36 = vld [vmem:[#allocation4 + $0xc60] sm:$0xff]  ;;  %v5457_v52 = vld [vmem:[#allocation4 + $0xc70] sm:$0xff] }
 0xbe8   :  { %5342 = vmatpush1.bf16.msra.mxu0 %v5305_v4  ;;  %5385 = vmatpush1.bf16.msra.mxu1 %v5307_v57  ;;  %v5460_v4 = vld [vmem:[#allocation4 + $0xd68] sm:$0xff]  ;;  %v5462_v57 = vld [vmem:[#allocation4 + $0xd78] sm:$0xff] }
 0xbe9   :  { %5343 = vmatprep.subr.bf16.mxu0 %v5310_v43  ;;  %5386 = vmatprep.subr.bf16.mxu1 %v5312_v7  ;;  %v5459_v43 = vld [vmem:[#allocation4 + $0xd60] sm:$0xff]  ;;  %v5461_v7 = vld [vmem:[#allocation4 + $0xd70] sm:$0xff] }
 0xbec   :  { %5344 = vmatpush1.bf16.msra.mxu0 %v5309_v10  ;;  %5387 = vmatpush1.bf16.msra.mxu1 %v5311_v48  ;;  %v5464_v10 = vld [vmem:[#allocation4 + $0xe68] sm:$0xff]  ;;  %v5466_v48 = vld [vmem:[#allocation4 + $0xe78] sm:$0xff] }
 0xbed   :  { %5471 = vmatprep.subr.bf16.mxu0 %v5408_v63  ;;  %5514 = vmatprep.subr.bf16.mxu1 %v5410_v29  ;;  %v5463_v63 = vld [vmem:[#allocation4 + $0xe60] sm:$0xff]  ;;  %v5465_v29 = vld [vmem:[#allocation4 + $0xe70] sm:$0xff] }
 0xbef   :  { %5346 = vmatmul.mubr.bf16.vlgmr.msra.gmra.mrb[88].mxu0 %v7829_v38  ;;  %5389 = vmatmul.mubr.bf16.vlgmr.msra.gmra.mrb[88].mxu1 %v7829_v38 }
 0xbf0   :  { %5472 = vmatpush1.bf16.msra.mxu0 %v5407_v51  ;;  %5515 = vmatpush1.bf16.msra.mxu1 %v5409_v58  ;;  %v5468_v51 = vld [vmem:[#allocation4 + $0xf68] sm:$0xff]  ;;  %v5470_v58 = vld [vmem:[#allocation4 + $0xf78] sm:$0xff] }
 0xbf1   :  { %5473 = vmatprep.subr.bf16.mxu0 %v5412_v24  ;;  %5516 = vmatprep.subr.bf16.mxu1 %v5414_v33  ;;  %v5467_v24 = vld [vmem:[#allocation4 + $0xf60] sm:$0xff]  ;;  %v5469_v33 = vld [vmem:[#allocation4 + $0xf70] sm:$0xff] }
 0xbf2   :  { %5503 = vmatprep.mubr.bf16.mxu0 %v7821_v35  ;;  %5546 = vmatprep.mubr.bf16.mxu1 %v7821_v35 }
 0xbf4   :  { %5474 = vmatpush1.bf16.msra.mxu0 %v5411_v53  ;;  %5517 = vmatpush1.bf16.msra.mxu1 %v5413_v39  ;;  %v5566_v53 = vld [vmem:[#allocation4 + $0x88] sm:$0xff]  ;;  %v5568_v39 = vld [vmem:[#allocation4 + $0x98] sm:$0xff] }
 0xbf5   :  { %5475 = vmatprep.subr.bf16.mxu0 %v5416_v8  ;;  %5518 = vmatprep.subr.bf16.mxu1 %v5418_v9  ;;  %v5565_v8 = vld [vmem:[#allocation4 + $0x80] sm:$0xff]  ;;  %v5567_v9 = vld [vmem:[#allocation4 + $0x90] sm:$0xff] }
 0xbf8   :  { %5476 = vmatpush1.bf16.msra.mxu0 %v5415_v11  ;;  %5519 = vmatpush1.bf16.msra.mxu1 %v5417_v1  ;;  %v5570_v11 = vld [vmem:[#allocation4 + $0x188] sm:$0xff]  ;;  %v5572_v1 = vld [vmem:[#allocation4 + $0x198] sm:$0xff] }
 0xbf9   :  { %5477 = vmatprep.subr.bf16.mxu0 %v5420_v14  ;;  %5520 = vmatprep.subr.bf16.mxu1 %v5422_v12  ;;  %v5569_v14 = vld [vmem:[#allocation4 + $0x180] sm:$0xff]  ;;  %v5571_v12 = vld [vmem:[#allocation4 + $0x190] sm:$0xff] }
 0xbfc   :  { %5478 = vmatpush1.bf16.msra.mxu0 %v5419_v47  ;;  %5521 = vmatpush1.bf16.msra.mxu1 %v5421_v54  ;;  %v5574_v47 = vld [vmem:[#allocation4 + $0x288] sm:$0xff]  ;;  %v5576_v54 = vld [vmem:[#allocation4 + $0x298] sm:$0xff] }
 0xbfd   :  { %5479 = vmatprep.subr.bf16.mxu0 %v5424_v46  ;;  %5522 = vmatprep.subr.bf16.mxu1 %v5426_v60  ;;  %v5573_v46 = vld [vmem:[#allocation4 + $0x280] sm:$0xff]  ;;  %v5575_v60 = vld [vmem:[#allocation4 + $0x290] sm:$0xff] }
 0xc00   :  { %5480 = vmatpush1.bf16.msra.mxu0 %v5423_v49  ;;  %5523 = vmatpush1.bf16.msra.mxu1 %v5425_v56  ;;  %v5578_v49 = vld [vmem:[#allocation4 + $0x388] sm:$0xff]  ;;  %v5580_v56 = vld [vmem:[#allocation4 + $0x398] sm:$0xff] }
 0xc01   :  { %5481 = vmatprep.subr.bf16.mxu0 %v5428_v59  ;;  %5524 = vmatprep.subr.bf16.mxu1 %v5430_v0  ;;  %v5577_v59 = vld [vmem:[#allocation4 + $0x380] sm:$0xff]  ;;  %v5579_v0 = vld [vmem:[#allocation4 + $0x390] sm:$0xff] }
 0xc04   :  { %5482 = vmatpush1.bf16.msra.mxu0 %v5427_v26  ;;  %5525 = vmatpush1.bf16.msra.mxu1 %v5429_v61  ;;  %v5582_v26 = vld [vmem:[#allocation4 + $0x488] sm:$0xff]  ;;  %v5584_v61 = vld [vmem:[#allocation4 + $0x498] sm:$0xff] }
 0xc05   :  { %5483 = vmatprep.subr.bf16.mxu0 %v5432_v50  ;;  %5526 = vmatprep.subr.bf16.mxu1 %v5434_v18  ;;  %v5581_v50 = vld [vmem:[#allocation4 + $0x480] sm:$0xff]  ;;  %v5583_v18 = vld [vmem:[#allocation4 + $0x490] sm:$0xff] }
 0xc08   :  { %5484 = vmatpush1.bf16.msra.mxu0 %v5431_v15  ;;  %5527 = vmatpush1.bf16.msra.mxu1 %v5433_v32  ;;  %v5586_v15 = vld [vmem:[#allocation4 + $0x588] sm:$0xff]  ;;  %v5588_v32 = vld [vmem:[#allocation4 + $0x598] sm:$0xff] }
 0xc09   :  { %5485 = vmatprep.subr.bf16.mxu0 %v5436_v27  ;;  %5528 = vmatprep.subr.bf16.mxu1 %v5438_v34  ;;  %v5585_v27 = vld [vmem:[#allocation4 + $0x580] sm:$0xff]  ;;  %v5587_v34 = vld [vmem:[#allocation4 + $0x590] sm:$0xff] }
 0xc0c   :  { %5486 = vmatpush1.bf16.msra.mxu0 %v5435_v37  ;;  %5529 = vmatpush1.bf16.msra.mxu1 %v5437_v2 }
 0xc0d   :  { %5487 = vmatprep.subr.bf16.mxu0 %v5440_v28  ;;  %5530 = vmatprep.subr.bf16.mxu1 %v5442_v3  ;;  %v5590_v28 = vld [vmem:[#allocation4 + $0x688] sm:$0xff]  ;;  %v5592_v3 = vld [vmem:[#allocation4 + $0x698] sm:$0xff] }
 0xc10   :  { %5488 = vmatpush1.bf16.msra.mxu0 %v5439_v16  ;;  %5531 = vmatpush1.bf16.msra.mxu1 %v5441_v55 }
 0xc11   :  { %5489 = vmatprep.subr.bf16.mxu0 %v5444_v62  ;;  %5532 = vmatprep.subr.bf16.mxu1 %v5446_v31 }
 0xc14   :  { %5490 = vmatpush1.bf16.msra.mxu0 %v5443_v30  ;;  %5533 = vmatpush1.bf16.msra.mxu1 %v5445_v44 }
 0xc15   :  { %5491 = vmatprep.subr.bf16.mxu0 %v5448_v41  ;;  %5534 = vmatprep.subr.bf16.mxu1 %v5450_v5  ;;  %v5589_v41 = vld [vmem:[#allocation4 + $0x680] sm:$0xff]  ;;  %v5591_v5 = vld [vmem:[#allocation4 + $0x690] sm:$0xff] }
 0xc18   :  { %5492 = vmatpush1.bf16.msra.mxu0 %v5447_v6  ;;  %5535 = vmatpush1.bf16.msra.mxu1 %v5449_v19  ;;  %v5594_v6 = vld [vmem:[#allocation4 + $0x788] sm:$0xff]  ;;  %v5596_v19 = vld [vmem:[#allocation4 + $0x798] sm:$0xff] }
 0xc19   :  { %5493 = vmatprep.subr.bf16.mxu0 %v5452_v20  ;;  %5536 = vmatprep.subr.bf16.mxu1 %v5454_v22  ;;  %v5593_v20 = vld [vmem:[#allocation4 + $0x780] sm:$0xff]  ;;  %v5595_v22 = vld [vmem:[#allocation4 + $0x790] sm:$0xff] }
 0xc1c   :  { %5494 = vmatpush1.bf16.msra.mxu0 %v5451_v21  ;;  %5537 = vmatpush1.bf16.msra.mxu1 %v5453_v42  ;;  %v5598_v21 = vld [vmem:[#allocation4 + $0x888] sm:$0xff]  ;;  %v5600_v42 = vld [vmem:[#allocation4 + $0x898] sm:$0xff] }
 0xc1d   :  { %5495 = vmatprep.subr.bf16.mxu0 %v5456_v40  ;;  %5538 = vmatprep.subr.bf16.mxu1 %v5458_v45  ;;  %v5597_v40 = vld [vmem:[#allocation4 + $0x880] sm:$0xff]  ;;  %v5599_v45 = vld [vmem:[#allocation4 + $0x890] sm:$0xff] }
 0xc20   :  { %5496 = vmatpush1.bf16.msra.mxu0 %v5455_v36  ;;  %5539 = vmatpush1.bf16.msra.mxu1 %v5457_v52  ;;  %v5602_v36 = vld [vmem:[#allocation4 + $0x988] sm:$0xff]  ;;  %v5604_v52 = vld [vmem:[#allocation4 + $0x998] sm:$0xff] }
 0xc21   :  { %5497 = vmatprep.subr.bf16.mxu0 %v5460_v4  ;;  %5540 = vmatprep.subr.bf16.mxu1 %v5462_v57  ;;  %v5601_v4 = vld [vmem:[#allocation4 + $0x980] sm:$0xff]  ;;  %v5603_v57 = vld [vmem:[#allocation4 + $0x990] sm:$0xff] }
 0xc24   :  { %5498 = vmatpush1.bf16.msra.mxu0 %v5459_v43  ;;  %5541 = vmatpush1.bf16.msra.mxu1 %v5461_v7  ;;  %v5606_v43 = vld [vmem:[#allocation4 + $0xa88] sm:$0xff]  ;;  %v5608_v7 = vld [vmem:[#allocation4 + $0xa98] sm:$0xff] }
 0xc25   :  { %5499 = vmatprep.subr.bf16.mxu0 %v5464_v10  ;;  %5542 = vmatprep.subr.bf16.mxu1 %v5466_v48  ;;  %v5605_v10 = vld [vmem:[#allocation4 + $0xa80] sm:$0xff]  ;;  %v5607_v48 = vld [vmem:[#allocation4 + $0xa90] sm:$0xff] }
 0xc28   :  { %5500 = vmatpush1.bf16.msra.mxu0 %v5463_v63  ;;  %5543 = vmatpush1.bf16.msra.mxu1 %v5465_v29  ;;  %v5610_v63 = vld [vmem:[#allocation4 + $0xb88] sm:$0xff]  ;;  %v5612_v29 = vld [vmem:[#allocation4 + $0xb98] sm:$0xff] }
 0xc29   :  { %5501 = vmatprep.subr.bf16.mxu0 %v5468_v51  ;;  %5544 = vmatprep.subr.bf16.mxu1 %v5470_v58  ;;  %v5609_v51 = vld [vmem:[#allocation4 + $0xb80] sm:$0xff]  ;;  %v5611_v58 = vld [vmem:[#allocation4 + $0xb90] sm:$0xff] }
 0xc2c   :  { %5502 = vmatpush1.bf16.msra.mxu0 %v5467_v24  ;;  %5545 = vmatpush1.bf16.msra.mxu1 %v5469_v33  ;;  %v5614_v24 = vld [vmem:[#allocation4 + $0xc88] sm:$0xff]  ;;  %v5616_v33 = vld [vmem:[#allocation4 + $0xc98] sm:$0xff] }
 0xc2d   :  { %5629 = vmatprep.subr.bf16.mxu0 %v5566_v53  ;;  %5672 = vmatprep.subr.bf16.mxu1 %v5568_v39  ;;  %v5613_v53 = vld [vmem:[#allocation4 + $0xc80] sm:$0xff]  ;;  %v5615_v39 = vld [vmem:[#allocation4 + $0xc90] sm:$0xff] }
 0xc2f   :  { %5504 = vmatmul.mubr.bf16.vlgmr.msra.gmra.mrb[92].mxu0 %v7829_v38  ;;  %5547 = vmatmul.mubr.bf16.vlgmr.msra.gmra.mrb[92].mxu1 %v7829_v38 }
 0xc30   :  { %5630 = vmatpush1.bf16.msra.mxu0 %v5565_v8  ;;  %5673 = vmatpush1.bf16.msra.mxu1 %v5567_v9  ;;  %v5618_v8 = vld [vmem:[#allocation4 + $0xd88] sm:$0xff]  ;;  %v5620_v9 = vld [vmem:[#allocation4 + $0xd98] sm:$0xff] }
 0xc31   :  { %5631 = vmatprep.subr.bf16.mxu0 %v5570_v11  ;;  %5674 = vmatprep.subr.bf16.mxu1 %v5572_v1  ;;  %v5617_v11 = vld [vmem:[#allocation4 + $0xd80] sm:$0xff]  ;;  %v5619_v1 = vld [vmem:[#allocation4 + $0xd90] sm:$0xff] }
 0xc32   :  { %5661 = vmatprep.mubr.bf16.mxu0 %v7821_v35  ;;  %5704 = vmatprep.mubr.bf16.mxu1 %v7821_v35 }
 0xc34   :  { %5632 = vmatpush1.bf16.msra.mxu0 %v5569_v14  ;;  %5675 = vmatpush1.bf16.msra.mxu1 %v5571_v12  ;;  %v5622_v14 = vld [vmem:[#allocation4 + $0xe88] sm:$0xff]  ;;  %v5624_v12 = vld [vmem:[#allocation4 + $0xe98] sm:$0xff] }
 0xc35   :  { %5633 = vmatprep.subr.bf16.mxu0 %v5574_v47  ;;  %5676 = vmatprep.subr.bf16.mxu1 %v5576_v54  ;;  %v5621_v47 = vld [vmem:[#allocation4 + $0xe80] sm:$0xff]  ;;  %v5623_v54 = vld [vmem:[#allocation4 + $0xe90] sm:$0xff] }
 0xc38   :  { %5634 = vmatpush1.bf16.msra.mxu0 %v5573_v46  ;;  %5677 = vmatpush1.bf16.msra.mxu1 %v5575_v60  ;;  %v5626_v46 = vld [vmem:[#allocation4 + $0xf88] sm:$0xff]  ;;  %v5628_v60 = vld [vmem:[#allocation4 + $0xf98] sm:$0xff] }
 0xc39   :  { %5635 = vmatprep.subr.bf16.mxu0 %v5578_v49  ;;  %5678 = vmatprep.subr.bf16.mxu1 %v5580_v56  ;;  %v5625_v49 = vld [vmem:[#allocation4 + $0xf80] sm:$0xff]  ;;  %v5627_v56 = vld [vmem:[#allocation4 + $0xf90] sm:$0xff] }
 0xc3c   :  { %5636 = vmatpush1.bf16.msra.mxu0 %v5577_v59  ;;  %5679 = vmatpush1.bf16.msra.mxu1 %v5579_v0  ;;  %v5724_v59 = vld [vmem:[#allocation4 + $0xa8] sm:$0xff]  ;;  %v5726_v0 = vld [vmem:[#allocation4 + $0xb8] sm:$0xff] }
 0xc3d   :  { %5637 = vmatprep.subr.bf16.mxu0 %v5582_v26  ;;  %5680 = vmatprep.subr.bf16.mxu1 %v5584_v61  ;;  %v5723_v26 = vld [vmem:[#allocation4 + $0xa0] sm:$0xff]  ;;  %v5725_v61 = vld [vmem:[#allocation4 + $0xb0] sm:$0xff] }
 0xc40   :  { %5638 = vmatpush1.bf16.msra.mxu0 %v5581_v50  ;;  %5681 = vmatpush1.bf16.msra.mxu1 %v5583_v18  ;;  %v5728_v50 = vld [vmem:[#allocation4 + $0x1a8] sm:$0xff]  ;;  %v5730_v18 = vld [vmem:[#allocation4 + $0x1b8] sm:$0xff] }
 0xc41   :  { %5639 = vmatprep.subr.bf16.mxu0 %v5586_v15  ;;  %5682 = vmatprep.subr.bf16.mxu1 %v5588_v32  ;;  %v5727_v15 = vld [vmem:[#allocation4 + $0x1a0] sm:$0xff]  ;;  %v5729_v32 = vld [vmem:[#allocation4 + $0x1b0] sm:$0xff] }
 0xc42   :  { %v7847_v37 = vpop.f32.mrb[80].mxu0  ;;  %v7849_v2 = vpop.f32.mrb[80].mxu1 }
 0xc43   :  { %v7851_v16 = vpop.f32.mrb[81].mxu0  ;;  %v7853_v55 = vpop.f32.mrb[81].mxu1 }
 0xc44   :  { %v7855_v62 = vpop.f32.mrb[82].mxu0  ;;  %v7857_v31 = vpop.f32.mrb[82].mxu1  ;;  %5640 = vmatpush1.bf16.msra.mxu0 %v5585_v27  ;;  %5683 = vmatpush1.bf16.msra.mxu1 %v5587_v34  ;;  %v5732_v27 = vld [vmem:[#allocation4 + $0x2a8] sm:$0xff]  ;;  %v5734_v34 = vld [vmem:[#allocation4 + $0x2b8] sm:$0xff] }
 0xc45   :  { %v7859_v30 = vpop.f32.mrb[83].mxu0  ;;  %v7861_v44 = vpop.f32.mrb[83].mxu1  ;;  %5641 = vmatprep.subr.bf16.mxu0 %v5590_v28  ;;  %5684 = vmatprep.subr.bf16.mxu1 %v5592_v3  ;;  %v5731_v28 = vld [vmem:[#allocation4 + $0x2a0] sm:$0xff]  ;;  %v5733_v3 = vld [vmem:[#allocation4 + $0x2b0] sm:$0xff] }
 0xc48   :  { %5642 = vmatpush1.bf16.msra.mxu0 %v5589_v41  ;;  %5685 = vmatpush1.bf16.msra.mxu1 %v5591_v5  ;;  %v5736_v41 = vld [vmem:[#allocation4 + $0x3a8] sm:$0xff]  ;;  %v5738_v5 = vld [vmem:[#allocation4 + $0x3b8] sm:$0xff] }
 0xc49   :  { %5643 = vmatprep.subr.bf16.mxu0 %v5594_v6  ;;  %5686 = vmatprep.subr.bf16.mxu1 %v5596_v19  ;;  %v5735_v6 = vld [vmem:[#allocation4 + $0x3a0] sm:$0xff]  ;;  %v5737_v19 = vld [vmem:[#allocation4 + $0x3b0] sm:$0xff] }
 0xc4c   :  { %5644 = vmatpush1.bf16.msra.mxu0 %v5593_v20  ;;  %5687 = vmatpush1.bf16.msra.mxu1 %v5595_v22  ;;  %v5740_v20 = vld [vmem:[#allocation4 + $0x4a8] sm:$0xff]  ;;  %v5742_v22 = vld [vmem:[#allocation4 + $0x4b8] sm:$0xff] }
 0xc4d   :  { %5645 = vmatprep.subr.bf16.mxu0 %v5598_v21  ;;  %5688 = vmatprep.subr.bf16.mxu1 %v5600_v42  ;;  %v5739_v21 = vld [vmem:[#allocation4 + $0x4a0] sm:$0xff]  ;;  %v5741_v42 = vld [vmem:[#allocation4 + $0x4b0] sm:$0xff] }
 0xc50   :  { %5646 = vmatpush1.bf16.msra.mxu0 %v5597_v40  ;;  %5689 = vmatpush1.bf16.msra.mxu1 %v5599_v45  ;;  %v5744_v40 = vld [vmem:[#allocation4 + $0x5a8] sm:$0xff]  ;;  %v5746_v45 = vld [vmem:[#allocation4 + $0x5b8] sm:$0xff] }
 0xc51   :  { %5647 = vmatprep.subr.bf16.mxu0 %v5602_v36  ;;  %5690 = vmatprep.subr.bf16.mxu1 %v5604_v52  ;;  %v5743_v36 = vld [vmem:[#allocation4 + $0x5a0] sm:$0xff]  ;;  %v5745_v52 = vld [vmem:[#allocation4 + $0x5b0] sm:$0xff] }
 0xc54   :  { %5648 = vmatpush1.bf16.msra.mxu0 %v5601_v4  ;;  %5691 = vmatpush1.bf16.msra.mxu1 %v5603_v57 }
 0xc55   :  { %5649 = vmatprep.subr.bf16.mxu0 %v5606_v43  ;;  %5692 = vmatprep.subr.bf16.mxu1 %v5608_v7  ;;  %v5748_v43 = vld [vmem:[#allocation4 + $0x6a8] sm:$0xff]  ;;  %v5750_v7 = vld [vmem:[#allocation4 + $0x6b8] sm:$0xff] }
 0xc58   :  { %5650 = vmatpush1.bf16.msra.mxu0 %v5605_v10  ;;  %5693 = vmatpush1.bf16.msra.mxu1 %v5607_v48 }
 0xc59   :  { %5651 = vmatprep.subr.bf16.mxu0 %v5610_v63  ;;  %5694 = vmatprep.subr.bf16.mxu1 %v5612_v29 }
 0xc5c   :  { %5652 = vmatpush1.bf16.msra.mxu0 %v5609_v51  ;;  %5695 = vmatpush1.bf16.msra.mxu1 %v5611_v58 }
 0xc5d   :  { %5653 = vmatprep.subr.bf16.mxu0 %v5614_v24  ;;  %5696 = vmatprep.subr.bf16.mxu1 %v5616_v33 }
 0xc60   :  { %5654 = vmatpush1.bf16.msra.mxu0 %v5613_v53  ;;  %5697 = vmatpush1.bf16.msra.mxu1 %v5615_v39 }
 0xc61   :  { %5655 = vmatprep.subr.bf16.mxu0 %v5618_v8  ;;  %5698 = vmatprep.subr.bf16.mxu1 %v5620_v9 }
 0xc64   :  { %5656 = vmatpush1.bf16.msra.mxu0 %v5617_v11  ;;  %5699 = vmatpush1.bf16.msra.mxu1 %v5619_v1  ;;  %v5747_v11 = vld [vmem:[#allocation4 + $0x6a0] sm:$0xff]  ;;  %v5749_v1 = vld [vmem:[#allocation4 + $0x6b0] sm:$0xff] }
 0xc65   :  { %5657 = vmatprep.subr.bf16.mxu0 %v5622_v14  ;;  %5700 = vmatprep.subr.bf16.mxu1 %v5624_v12 }
 0xc68   :  { %5658 = vmatpush1.bf16.msra.mxu0 %v5621_v47  ;;  %5701 = vmatpush1.bf16.msra.mxu1 %v5623_v54  ;;  %v5752_v47 = vld [vmem:[#allocation4 + $0x7a8] sm:$0xff]  ;;  %v5754_v54 = vld [vmem:[#allocation4 + $0x7b8] sm:$0xff] }
 0xc69   :  { %5659 = vmatprep.subr.bf16.mxu0 %v5626_v46  ;;  %5702 = vmatprep.subr.bf16.mxu1 %v5628_v60  ;;  %v5751_v46 = vld [vmem:[#allocation4 + $0x7a0] sm:$0xff]  ;;  %v5753_v60 = vld [vmem:[#allocation4 + $0x7b0] sm:$0xff] }
 0xc6c   :  { %5660 = vmatpush1.bf16.msra.mxu0 %v5625_v49  ;;  %5703 = vmatpush1.bf16.msra.mxu1 %v5627_v56  ;;  %v5756_v49 = vld [vmem:[#allocation4 + $0x8a8] sm:$0xff]  ;;  %v5758_v56 = vld [vmem:[#allocation4 + $0x8b8] sm:$0xff] }
 0xc6d   :  { %5787 = vmatprep.subr.bf16.mxu0 %v5724_v59  ;;  %5830 = vmatprep.subr.bf16.mxu1 %v5726_v0  ;;  %v5755_v59 = vld [vmem:[#allocation4 + $0x8a0] sm:$0xff]  ;;  %v5757_v0 = vld [vmem:[#allocation4 + $0x8b0] sm:$0xff] }
 0xc6f   :  { %5662 = vmatmul.mubr.bf16.vlgmr.msra.gmra.mrb[96].mxu0 %v7829_v38  ;;  %5705 = vmatmul.mubr.bf16.vlgmr.msra.gmra.mrb[96].mxu1 %v7829_v38 }
 0xc70   :  { %5788 = vmatpush1.bf16.msra.mxu0 %v5723_v26  ;;  %5831 = vmatpush1.bf16.msra.mxu1 %v5725_v61  ;;  %v5760_v26 = vld [vmem:[#allocation4 + $0x9a8] sm:$0xff]  ;;  %v5762_v61 = vld [vmem:[#allocation4 + $0x9b8] sm:$0xff] }
 0xc71   :  { %5789 = vmatprep.subr.bf16.mxu0 %v5728_v50  ;;  %5832 = vmatprep.subr.bf16.mxu1 %v5730_v18  ;;  %v5759_v50 = vld [vmem:[#allocation4 + $0x9a0] sm:$0xff]  ;;  %v5761_v18 = vld [vmem:[#allocation4 + $0x9b0] sm:$0xff] }
 0xc72   :  { %5819 = vmatprep.mubr.bf16.mxu0 %v7821_v35  ;;  %5862 = vmatprep.mubr.bf16.mxu1 %v7821_v35 }
 0xc74   :  { %5790 = vmatpush1.bf16.msra.mxu0 %v5727_v15  ;;  %5833 = vmatpush1.bf16.msra.mxu1 %v5729_v32  ;;  %v5764_v15 = vld [vmem:[#allocation4 + $0xaa8] sm:$0xff]  ;;  %v5766_v32 = vld [vmem:[#allocation4 + $0xab8] sm:$0xff] }
 0xc75   :  { %5791 = vmatprep.subr.bf16.mxu0 %v5732_v27  ;;  %5834 = vmatprep.subr.bf16.mxu1 %v5734_v34  ;;  %v5763_v27 = vld [vmem:[#allocation4 + $0xaa0] sm:$0xff]  ;;  %v5765_v34 = vld [vmem:[#allocation4 + $0xab0] sm:$0xff] }
 0xc78   :  { %5792 = vmatpush1.bf16.msra.mxu0 %v5731_v28  ;;  %5835 = vmatpush1.bf16.msra.mxu1 %v5733_v3  ;;  %v5768_v28 = vld [vmem:[#allocation4 + $0xba8] sm:$0xff]  ;;  %v5770_v3 = vld [vmem:[#allocation4 + $0xbb8] sm:$0xff] }
 0xc79   :  { %5793 = vmatprep.subr.bf16.mxu0 %v5736_v41  ;;  %5836 = vmatprep.subr.bf16.mxu1 %v5738_v5  ;;  %v5767_v41 = vld [vmem:[#allocation4 + $0xba0] sm:$0xff]  ;;  %v5769_v5 = vld [vmem:[#allocation4 + $0xbb0] sm:$0xff] }
 0xc7c   :  { %5794 = vmatpush1.bf16.msra.mxu0 %v5735_v6  ;;  %5837 = vmatpush1.bf16.msra.mxu1 %v5737_v19  ;;  %v5772_v6 = vld [vmem:[#allocation4 + $0xca8] sm:$0xff]  ;;  %v5774_v19 = vld [vmem:[#allocation4 + $0xcb8] sm:$0xff] }
 0xc7d   :  { %5795 = vmatprep.subr.bf16.mxu0 %v5740_v20  ;;  %5838 = vmatprep.subr.bf16.mxu1 %v5742_v22  ;;  %v5771_v20 = vld [vmem:[#allocation4 + $0xca0] sm:$0xff]  ;;  %v5773_v22 = vld [vmem:[#allocation4 + $0xcb0] sm:$0xff] }
 0xc80   :  { %5796 = vmatpush1.bf16.msra.mxu0 %v5739_v21  ;;  %5839 = vmatpush1.bf16.msra.mxu1 %v5741_v42  ;;  %v5776_v21 = vld [vmem:[#allocation4 + $0xda8] sm:$0xff]  ;;  %v5778_v42 = vld [vmem:[#allocation4 + $0xdb8] sm:$0xff] }
 0xc81   :  { %5797 = vmatprep.subr.bf16.mxu0 %v5744_v40  ;;  %5840 = vmatprep.subr.bf16.mxu1 %v5746_v45  ;;  %v5775_v40 = vld [vmem:[#allocation4 + $0xda0] sm:$0xff]  ;;  %v5777_v45 = vld [vmem:[#allocation4 + $0xdb0] sm:$0xff] }
 0xc82   :  { %v7867_v4 = vpop.f32.mrb[84].mxu0  ;;  %v7869_v57 = vpop.f32.mrb[84].mxu1 }
 0xc83   :  { %v5241_v10 = vmax.f32 %v7847_v37, %v7867_v4  ;;  %v5243_v48 = vmax.f32 %v7849_v2, %v7869_v57  ;;  %v7875_v63 = vpop.f32.mrb[85].mxu0  ;;  %v7877_v29 = vpop.f32.mrb[85].mxu1 }
 0xc84   :  { %v5242_v51 = vmax.f32 %v7851_v16, %v7875_v63  ;;  %v5244_v58 = vmax.f32 %v7853_v55, %v7877_v29  ;;  %v7883_v24 = vpop.f32.mrb[86].mxu0  ;;  %v7885_v33 = vpop.f32.mrb[86].mxu1  ;;  %5798 = vmatpush1.bf16.msra.mxu0 %v5743_v36  ;;  %5841 = vmatpush1.bf16.msra.mxu1 %v5745_v52  ;;  %v5780_v36 = vld [vmem:[#allocation4 + $0xea8] sm:$0xff]  ;;  %v5782_v52 = vld [vmem:[#allocation4 + $0xeb8] sm:$0xff]  ;;  %v5905_v55 = vld [vmem:[#allocation4 + $0x6c0] sm:$0xff] }
 0xc85   :  { %v5245_v53 = vmax.f32 %v7855_v62, %v7883_v24  ;;  %v5247_v39 = vmax.f32 %v7857_v31, %v7885_v33  ;;  %v7891_v8 = vpop.f32.mrb[87].mxu0  ;;  %v7893_v9 = vpop.f32.mrb[87].mxu1  ;;  %5799 = vmatprep.subr.bf16.mxu0 %v5748_v43  ;;  %5842 = vmatprep.subr.bf16.mxu1 %v5750_v7  ;;  %v5779_v43 = vld [vmem:[#allocation4 + $0xea0] sm:$0xff]  ;;  %v5781_v7 = vld [vmem:[#allocation4 + $0xeb0] sm:$0xff]  ;;  %v5910_v29 = vld [vmem:[#allocation4 + $0x7c8] sm:$0xff] }
 0xc86   :  { %v5246_v14 = vmax.f32 %v7859_v30, %v7891_v8  ;;  %v5248_v12 = vmax.f32 %v7861_v44, %v7893_v9  ;;  %v5912_v31 = vld [vmem:[#allocation4 + $0x7d8] sm:$0xff]  ;;  %v5914_v24 = vld [vmem:[#allocation4 + $0x8c8] sm:$0xff]  ;;  %v5913_v30 = vld [vmem:[#allocation4 + $0x8c0] sm:$0xff] }
 0xc87   :  { %v5916_v33 = vld [vmem:[#allocation4 + $0x8d8] sm:$0xff]  ;;  %v5917_v8 = vld [vmem:[#allocation4 + $0x9c0] sm:$0xff]  ;;  %v5919_v9 = vld [vmem:[#allocation4 + $0x9d0] sm:$0xff] }
 0xc88   :  { %5800 = vmatpush1.bf16.msra.mxu0 %v5747_v11  ;;  %5843 = vmatpush1.bf16.msra.mxu1 %v5749_v1  ;;  %v5784_v11 = vld [vmem:[#allocation4 + $0xfa8] sm:$0xff]  ;;  %v5786_v1 = vld [vmem:[#allocation4 + $0xfb8] sm:$0xff] }
 0xc89   :  { %5801 = vmatprep.subr.bf16.mxu0 %v5752_v47  ;;  %5844 = vmatprep.subr.bf16.mxu1 %v5754_v54  ;;  %v5783_v47 = vld [vmem:[#allocation4 + $0xfa0] sm:$0xff]  ;;  %v5785_v54 = vld [vmem:[#allocation4 + $0xfb0] sm:$0xff]  ;;  %v5920_v44 = vld [vmem:[#allocation4 + $0x9d8] sm:$0xff] }
 0xc8c   :  { %5802 = vmatpush1.bf16.msra.mxu0 %v5751_v46  ;;  %5845 = vmatpush1.bf16.msra.mxu1 %v5753_v60  ;;  %v5882_v46 = vld [vmem:[#allocation4 + $0xc8] sm:$0xff]  ;;  %v5884_v60 = vld [vmem:[#allocation4 + $0xd8] sm:$0xff] }
 0xc8d   :  { %5803 = vmatprep.subr.bf16.mxu0 %v5756_v49  ;;  %5846 = vmatprep.subr.bf16.mxu1 %v5758_v56  ;;  %v5881_v49 = vld [vmem:[#allocation4 + $0xc0] sm:$0xff]  ;;  %v5883_v56 = vld [vmem:[#allocation4 + $0xd0] sm:$0xff] }
 0xc90   :  { %5804 = vmatpush1.bf16.msra.mxu0 %v5755_v59  ;;  %5847 = vmatpush1.bf16.msra.mxu1 %v5757_v0  ;;  %v5886_v59 = vld [vmem:[#allocation4 + $0x1c8] sm:$0xff]  ;;  %v5888_v0 = vld [vmem:[#allocation4 + $0x1d8] sm:$0xff] }
 0xc91   :  { %5805 = vmatprep.subr.bf16.mxu0 %v5760_v26  ;;  %5848 = vmatprep.subr.bf16.mxu1 %v5762_v61  ;;  %v5885_v26 = vld [vmem:[#allocation4 + $0x1c0] sm:$0xff]  ;;  %v5887_v61 = vld [vmem:[#allocation4 + $0x1d0] sm:$0xff] }
 0xc94   :  { %5806 = vmatpush1.bf16.msra.mxu0 %v5759_v50  ;;  %5849 = vmatpush1.bf16.msra.mxu1 %v5761_v18  ;;  %v5890_v50 = vld [vmem:[#allocation4 + $0x2c8] sm:$0xff]  ;;  %v5892_v18 = vld [vmem:[#allocation4 + $0x2d8] sm:$0xff] }
 0xc95   :  { %5807 = vmatprep.subr.bf16.mxu0 %v5764_v15  ;;  %5850 = vmatprep.subr.bf16.mxu1 %v5766_v32  ;;  %v5889_v15 = vld [vmem:[#allocation4 + $0x2c0] sm:$0xff]  ;;  %v5891_v32 = vld [vmem:[#allocation4 + $0x2d0] sm:$0xff] }
 0xc98   :  { %5808 = vmatpush1.bf16.msra.mxu0 %v5763_v27  ;;  %5851 = vmatpush1.bf16.msra.mxu1 %v5765_v34  ;;  %v5894_v27 = vld [vmem:[#allocation4 + $0x3c8] sm:$0xff]  ;;  %v5896_v34 = vld [vmem:[#allocation4 + $0x3d8] sm:$0xff] }
 0xc99   :  { %5809 = vmatprep.subr.bf16.mxu0 %v5768_v28  ;;  %5852 = vmatprep.subr.bf16.mxu1 %v5770_v3  ;;  %v5893_v28 = vld [vmem:[#allocation4 + $0x3c0] sm:$0xff]  ;;  %v5895_v3 = vld [vmem:[#allocation4 + $0x3d0] sm:$0xff] }
 0xc9c   :  { %5810 = vmatpush1.bf16.msra.mxu0 %v5767_v41  ;;  %5853 = vmatpush1.bf16.msra.mxu1 %v5769_v5  ;;  %v5898_v41 = vld [vmem:[#allocation4 + $0x4c8] sm:$0xff]  ;;  %v5900_v5 = vld [vmem:[#allocation4 + $0x4d8] sm:$0xff] }
 0xc9d   :  { %5811 = vmatprep.subr.bf16.mxu0 %v5772_v6  ;;  %5854 = vmatprep.subr.bf16.mxu1 %v5774_v19  ;;  %v5897_v6 = vld [vmem:[#allocation4 + $0x4c0] sm:$0xff]  ;;  %v5899_v19 = vld [vmem:[#allocation4 + $0x4d0] sm:$0xff] }
 0xca0   :  { %5812 = vmatpush1.bf16.msra.mxu0 %v5771_v20  ;;  %5855 = vmatpush1.bf16.msra.mxu1 %v5773_v22  ;;  %v5902_v20 = vld [vmem:[#allocation4 + $0x5c8] sm:$0xff]  ;;  %v5904_v22 = vld [vmem:[#allocation4 + $0x5d8] sm:$0xff] }
 0xca1   :  { %5813 = vmatprep.subr.bf16.mxu0 %v5776_v21  ;;  %5856 = vmatprep.subr.bf16.mxu1 %v5778_v42  ;;  %v5901_v21 = vld [vmem:[#allocation4 + $0x5c0] sm:$0xff]  ;;  %v5903_v42 = vld [vmem:[#allocation4 + $0x5d0] sm:$0xff] }
 0xca4   :  { %5814 = vmatpush1.bf16.msra.mxu0 %v5775_v40  ;;  %5857 = vmatpush1.bf16.msra.mxu1 %v5777_v45 }
 0xca5   :  { %5815 = vmatprep.subr.bf16.mxu0 %v5780_v36  ;;  %5858 = vmatprep.subr.bf16.mxu1 %v5782_v52  ;;  %v5906_v36 = vld [vmem:[#allocation4 + $0x6c8] sm:$0xff]  ;;  %v5908_v52 = vld [vmem:[#allocation4 + $0x6d8] sm:$0xff] }
 0xca8   :  { %5816 = vmatpush1.bf16.msra.mxu0 %v5779_v43  ;;  %5859 = vmatpush1.bf16.msra.mxu1 %v5781_v7 }
 0xca9   :  { %5817 = vmatprep.subr.bf16.mxu0 %v5784_v11  ;;  %5860 = vmatprep.subr.bf16.mxu1 %v5786_v1 }
 0xcac   :  { %5818 = vmatpush1.bf16.msra.mxu0 %v5783_v47  ;;  %5861 = vmatpush1.bf16.msra.mxu1 %v5785_v54 }
 0xcad   :  { %5945 = vmatprep.subr.bf16.mxu0 %v5882_v46  ;;  %5988 = vmatprep.subr.bf16.mxu1 %v5884_v60  ;;  %v5921_v46 = vld [vmem:[#allocation4 + $0xac0] sm:$0xff]  ;;  %v5923_v60 = vld [vmem:[#allocation4 + $0xad0] sm:$0xff] }
 0xcaf   :  { %5820 = vmatmul.mubr.bf16.vlgmr.msra.gmra.mrb[100].mxu0 %v7829_v38  ;;  %5863 = vmatmul.mubr.bf16.vlgmr.msra.gmra.mrb[100].mxu1 %v7829_v38 }
 0xcb0   :  { %5946 = vmatpush1.bf16.msra.mxu0 %v5881_v49  ;;  %5989 = vmatpush1.bf16.msra.mxu1 %v5883_v56  ;;  %v5926_v49 = vld [vmem:[#allocation4 + $0xbc8] sm:$0xff]  ;;  %v5928_v56 = vld [vmem:[#allocation4 + $0xbd8] sm:$0xff] }
 0xcb1   :  { %5947 = vmatprep.subr.bf16.mxu0 %v5886_v59  ;;  %5990 = vmatprep.subr.bf16.mxu1 %v5888_v0  ;;  %v5925_v59 = vld [vmem:[#allocation4 + $0xbc0] sm:$0xff]  ;;  %v5927_v0 = vld [vmem:[#allocation4 + $0xbd0] sm:$0xff] }
 0xcb2   :  { %5977 = vmatprep.mubr.bf16.mxu0 %v7821_v35  ;;  %6020 = vmatprep.mubr.bf16.mxu1 %v7821_v35 }
 0xcb4   :  { %5948 = vmatpush1.bf16.msra.mxu0 %v5885_v26  ;;  %5991 = vmatpush1.bf16.msra.mxu1 %v5887_v61  ;;  %v5930_v26 = vld [vmem:[#allocation4 + $0xcc8] sm:$0xff]  ;;  %v5932_v61 = vld [vmem:[#allocation4 + $0xcd8] sm:$0xff] }
 0xcb5   :  { %5949 = vmatprep.subr.bf16.mxu0 %v5890_v50  ;;  %5992 = vmatprep.subr.bf16.mxu1 %v5892_v18  ;;  %v5929_v50 = vld [vmem:[#allocation4 + $0xcc0] sm:$0xff]  ;;  %v5931_v18 = vld [vmem:[#allocation4 + $0xcd0] sm:$0xff] }
 0xcb8   :  { %5950 = vmatpush1.bf16.msra.mxu0 %v5889_v15  ;;  %5993 = vmatpush1.bf16.msra.mxu1 %v5891_v32  ;;  %v5934_v15 = vld [vmem:[#allocation4 + $0xdc8] sm:$0xff]  ;;  %v5936_v32 = vld [vmem:[#allocation4 + $0xdd8] sm:$0xff] }
 0xcb9   :  { %5951 = vmatprep.subr.bf16.mxu0 %v5894_v27  ;;  %5994 = vmatprep.subr.bf16.mxu1 %v5896_v34  ;;  %v5933_v27 = vld [vmem:[#allocation4 + $0xdc0] sm:$0xff]  ;;  %v5935_v34 = vld [vmem:[#allocation4 + $0xdd0] sm:$0xff] }
 0xcbc   :  { %5952 = vmatpush1.bf16.msra.mxu0 %v5893_v28  ;;  %5995 = vmatpush1.bf16.msra.mxu1 %v5895_v3  ;;  %v5938_v28 = vld [vmem:[#allocation4 + $0xec8] sm:$0xff]  ;;  %v5940_v3 = vld [vmem:[#allocation4 + $0xed8] sm:$0xff] }
 0xcbd   :  { %5953 = vmatprep.subr.bf16.mxu0 %v5898_v41  ;;  %5996 = vmatprep.subr.bf16.mxu1 %v5900_v5  ;;  %v5937_v41 = vld [vmem:[#allocation4 + $0xec0] sm:$0xff]  ;;  %v5939_v5 = vld [vmem:[#allocation4 + $0xed0] sm:$0xff] }
 0xcc0   :  { %5954 = vmatpush1.bf16.msra.mxu0 %v5897_v6  ;;  %5997 = vmatpush1.bf16.msra.mxu1 %v5899_v19  ;;  %v5942_v6 = vld [vmem:[#allocation4 + $0xfc8] sm:$0xff]  ;;  %v5944_v19 = vld [vmem:[#allocation4 + $0xfd8] sm:$0xff] }
 0xcc1   :  { %5955 = vmatprep.subr.bf16.mxu0 %v5902_v20  ;;  %5998 = vmatprep.subr.bf16.mxu1 %v5904_v22  ;;  %v5941_v20 = vld [vmem:[#allocation4 + $0xfc0] sm:$0xff]  ;;  %v5943_v22 = vld [vmem:[#allocation4 + $0xfd0] sm:$0xff] }
 0xcc2   :  { %v5347_v40 = vpop.f32.mrb[88].mxu0  ;;  %v5390_v45 = vpop.f32.mrb[88].mxu1 }
 0xcc3   :  { %v7906_v43 = vmax.f32 %v5241_v10, %v5347_v40  ;;  %v7911_v7 = vmax.f32 %v5243_v48, %v5390_v45  ;;  %v5349_v11 = vpop.f32.mrb[89].mxu0  ;;  %v5392_v1 = vpop.f32.mrb[89].mxu1  ;;  %v5907_v48 = vld [vmem:[#allocation4 + $0x6d0] sm:$0xff]  ;;  %v6039_v40 = vld [vmem:[#allocation4 + $0xe0] sm:$0xff] }
 0xcc4   :  { %v7916_v47 = vmax.f32 %v5242_v51, %v5349_v11  ;;  %v7921_v54 = vmax.f32 %v5244_v58, %v5392_v1  ;;  %v5351_v37 = vpop.f32.mrb[90].mxu0  ;;  %v5394_v4 = vpop.f32.mrb[90].mxu1  ;;  %5956 = vmatpush1.bf16.msra.mxu0 %v5901_v21  ;;  %5999 = vmatpush1.bf16.msra.mxu1 %v5903_v42  ;;  %v5909_v51 = vld [vmem:[#allocation4 + $0x7c0] sm:$0xff]  ;;  %v5911_v58 = vld [vmem:[#allocation4 + $0x7d0] sm:$0xff]  ;;  %v6040_v21 = vld [vmem:[#allocation4 + $0xe8] sm:$0xff] }
 0xcc5   :  { %v7926_v2 = vmax.f32 %v5245_v53, %v5351_v37  ;;  %v7931_v16 = vmax.f32 %v5247_v39, %v5394_v4  ;;  %v5353_v57 = vpop.f32.mrb[91].mxu0  ;;  %v5396_v10 = vpop.f32.mrb[91].mxu1  ;;  %5957 = vmatprep.subr.bf16.mxu0 %v5906_v36  ;;  %6000 = vmatprep.subr.bf16.mxu1 %v5908_v52  ;;  %v5915_v53 = vld [vmem:[#allocation4 + $0x8d0] sm:$0xff]  ;;  %v5918_v39 = vld [vmem:[#allocation4 + $0x9c8] sm:$0xff]  ;;  %v6042_v42 = vld [vmem:[#allocation4 + $0xf8] sm:$0xff] }
 0xcc6   :  { %v7936_v63 = vmax.f32 %v5246_v14, %v5353_v57  ;;  %v7941_v62 = vmax.f32 %v5248_v12, %v5396_v10  ;;  %v5922_v14 = vld [vmem:[#allocation4 + $0xac8] sm:$0xff]  ;;  %v5924_v12 = vld [vmem:[#allocation4 + $0xad8] sm:$0xff]  ;;  %v6041_v45 = vld [vmem:[#allocation4 + $0xf0] sm:$0xff] }
 0xcc7   :  { %v6044_v36 = vld [vmem:[#allocation4 + $0x1e8] sm:$0xff]  ;;  %v6046_v52 = vld [vmem:[#allocation4 + $0x1f8] sm:$0xff]  ;;  %v6043_v11 = vld [vmem:[#allocation4 + $0x1e0] sm:$0xff] }
 0xcc8   :  { %5958 = vmatpush1.bf16.msra.mxu0 %v5905_v55  ;;  %6001 = vmatpush1.bf16.msra.mxu1 %v5907_v48  ;;  %v6045_v1 = vld [vmem:[#allocation4 + $0x1f0] sm:$0xff]  ;;  %v6048_v37 = vld [vmem:[#allocation4 + $0x2e8] sm:$0xff]  ;;  %v6050_v4 = vld [vmem:[#allocation4 + $0x2f8] sm:$0xff] }
 0xcc9   :  { %5959 = vmatprep.subr.bf16.mxu0 %v5910_v29  ;;  %6002 = vmatprep.subr.bf16.mxu1 %v5912_v31  ;;  %v6047_v57 = vld [vmem:[#allocation4 + $0x2e0] sm:$0xff]  ;;  %v6049_v10 = vld [vmem:[#allocation4 + $0x2f0] sm:$0xff]  ;;  %v6052_v55 = vld [vmem:[#allocation4 + $0x3e8] sm:$0xff] }
 0xcca   :  { %v6054_v48 = vld [vmem:[#allocation4 + $0x3f8] sm:$0xff]  ;;  %v6051_v29 = vld [vmem:[#allocation4 + $0x3e0] sm:$0xff]  ;;  %v6053_v31 = vld [vmem:[#allocation4 + $0x3f0] sm:$0xff] }
 0xccc   :  { %5960 = vmatpush1.bf16.msra.mxu0 %v5909_v51  ;;  %6003 = vmatpush1.bf16.msra.mxu1 %v5911_v58  ;;  %v6056_v51 = vld [vmem:[#allocation4 + $0x4e8] sm:$0xff]  ;;  %v6058_v58 = vld [vmem:[#allocation4 + $0x4f8] sm:$0xff] }
 0xccd   :  { %5961 = vmatprep.subr.bf16.mxu0 %v5914_v24  ;;  %6004 = vmatprep.subr.bf16.mxu1 %v5916_v33  ;;  %v6057_v24 = vld [vmem:[#allocation4 + $0x4f0] sm:$0xff]  ;;  %v6060_v33 = vld [vmem:[#allocation4 + $0x5e8] sm:$0xff] }
 0xcd0   :  { %5962 = vmatpush1.bf16.msra.mxu0 %v5913_v30  ;;  %6005 = vmatpush1.bf16.msra.mxu1 %v5915_v53  ;;  %v6062_v30 = vld [vmem:[#allocation4 + $0x5f8] sm:$0xff]  ;;  %v6059_v53 = vld [vmem:[#allocation4 + $0x5e0] sm:$0xff] }
 0xcd1   :  { %5963 = vmatprep.subr.bf16.mxu0 %v5918_v39  ;;  %6006 = vmatprep.subr.bf16.mxu1 %v5920_v44  ;;  %v6061_v39 = vld [vmem:[#allocation4 + $0x5f0] sm:$0xff] }
 0xcd4   :  { %5964 = vmatpush1.bf16.msra.mxu0 %v5917_v8  ;;  %6007 = vmatpush1.bf16.msra.mxu1 %v5919_v9  ;;  %v6064_v9 = vld [vmem:[#allocation4 + $0x6e8] sm:$0xff] }
 0xcd5   :  { %5965 = vmatprep.subr.bf16.mxu0 %v5922_v14  ;;  %6008 = vmatprep.subr.bf16.mxu1 %v5924_v12  ;;  %v6066_v14 = vld [vmem:[#allocation4 + $0x6f8] sm:$0xff] }
 0xcd8   :  { %5966 = vmatpush1.bf16.msra.mxu0 %v5921_v46  ;;  %6009 = vmatpush1.bf16.msra.mxu1 %v5923_v60 }
 0xcd9   :  { %5967 = vmatprep.subr.bf16.mxu0 %v5926_v49  ;;  %6010 = vmatprep.subr.bf16.mxu1 %v5928_v56 }
 0xcdc   :  { %5968 = vmatpush1.bf16.msra.mxu0 %v5925_v59  ;;  %6011 = vmatpush1.bf16.msra.mxu1 %v5927_v0 }
 0xcdd   :  { %5969 = vmatprep.subr.bf16.mxu0 %v5930_v26  ;;  %6012 = vmatprep.subr.bf16.mxu1 %v5932_v61 }
 0xce0   :  { %5970 = vmatpush1.bf16.msra.mxu0 %v5929_v50  ;;  %6013 = vmatpush1.bf16.msra.mxu1 %v5931_v18 }
 0xce1   :  { %5971 = vmatprep.subr.bf16.mxu0 %v5934_v15  ;;  %6014 = vmatprep.subr.bf16.mxu1 %v5936_v32  ;;  %v6063_v32 = vld [vmem:[#allocation4 + $0x6e0] sm:$0xff] }
 0xce4   :  { %5972 = vmatpush1.bf16.msra.mxu0 %v5933_v27  ;;  %6015 = vmatpush1.bf16.msra.mxu1 %v5935_v34  ;;  %v6065_v27 = vld [vmem:[#allocation4 + $0x6f0] sm:$0xff] }
 0xce5   :  { %5973 = vmatprep.subr.bf16.mxu0 %v5938_v28  ;;  %6016 = vmatprep.subr.bf16.mxu1 %v5940_v3  ;;  %v6068_v3 = vld [vmem:[#allocation4 + $0x7e8] sm:$0xff] }
 0xce8   :  { %5974 = vmatpush1.bf16.msra.mxu0 %v5937_v41  ;;  %6017 = vmatpush1.bf16.msra.mxu1 %v5939_v5  ;;  %v6070_v41 = vld [vmem:[#allocation4 + $0x7f8] sm:$0xff]  ;;  %v6067_v5 = vld [vmem:[#allocation4 + $0x7e0] sm:$0xff] }
 0xce9   :  { %5975 = vmatprep.subr.bf16.mxu0 %v5942_v6  ;;  %6018 = vmatprep.subr.bf16.mxu1 %v5944_v19  ;;  %v6069_v6 = vld [vmem:[#allocation4 + $0x7f0] sm:$0xff]  ;;  %v6072_v19 = vld [vmem:[#allocation4 + $0x8e8] sm:$0xff] }
 0xcec   :  { %5976 = vmatpush1.bf16.msra.mxu0 %v5941_v20  ;;  %6019 = vmatpush1.bf16.msra.mxu1 %v5943_v22  ;;  %v6074_v20 = vld [vmem:[#allocation4 + $0x8f8] sm:$0xff]  ;;  %v6071_v22 = vld [vmem:[#allocation4 + $0x8e0] sm:$0xff] }
 0xced   :  { %6103 = vmatprep.subr.bf16.mxu0 %v6040_v21  ;;  %6146 = vmatprep.subr.bf16.mxu1 %v6042_v42  ;;  %v6073_v21 = vld [vmem:[#allocation4 + $0x8f0] sm:$0xff]  ;;  %v6076_v42 = vld [vmem:[#allocation4 + $0x9e8] sm:$0xff] }
 0xcef   :  { %5978 = vmatmul.mubr.bf16.vlgmr.msra.gmra.mrb[104].mxu0 %v7829_v38  ;;  %6021 = vmatmul.mubr.bf16.vlgmr.msra.gmra.mrb[104].mxu1 %v7829_v38 }
 0xcf0   :  { %6104 = vmatpush1.bf16.msra.mxu0 %v6039_v40  ;;  %6147 = vmatpush1.bf16.msra.mxu1 %v6041_v45  ;;  %v6078_v40 = vld [vmem:[#allocation4 + $0x9f8] sm:$0xff]  ;;  %v6075_v45 = vld [vmem:[#allocation4 + $0x9e0] sm:$0xff] }
 0xcf1   :  { %6105 = vmatprep.subr.bf16.mxu0 %v6044_v36  ;;  %6148 = vmatprep.subr.bf16.mxu1 %v6046_v52  ;;  %v6077_v36 = vld [vmem:[#allocation4 + $0x9f0] sm:$0xff]  ;;  %v6080_v52 = vld [vmem:[#allocation4 + $0xae8] sm:$0xff] }
 0xcf2   :  { %6135 = vmatprep.mubr.bf16.mxu0 %v7821_v35  ;;  %6178 = vmatprep.mubr.bf16.mxu1 %v7821_v35  ;;  %v6055_v35 = vld [vmem:[#allocation4 + $0x4e0] sm:$0xff] }
 0xcf4   :  { %6106 = vmatpush1.bf16.msra.mxu0 %v6043_v11  ;;  %6149 = vmatpush1.bf16.msra.mxu1 %v6045_v1  ;;  %v6082_v11 = vld [vmem:[#allocation4 + $0xaf8] sm:$0xff]  ;;  %v6079_v1 = vld [vmem:[#allocation4 + $0xae0] sm:$0xff] }
 0xcf5   :  { %6107 = vmatprep.subr.bf16.mxu0 %v6048_v37  ;;  %6150 = vmatprep.subr.bf16.mxu1 %v6050_v4  ;;  %v6081_v37 = vld [vmem:[#allocation4 + $0xaf0] sm:$0xff]  ;;  %v6084_v4 = vld [vmem:[#allocation4 + $0xbe8] sm:$0xff] }
 0xcf8   :  { %6108 = vmatpush1.bf16.msra.mxu0 %v6047_v57  ;;  %6151 = vmatpush1.bf16.msra.mxu1 %v6049_v10  ;;  %v6086_v57 = vld [vmem:[#allocation4 + $0xbf8] sm:$0xff]  ;;  %v6083_v10 = vld [vmem:[#allocation4 + $0xbe0] sm:$0xff] }
 0xcf9   :  { %6109 = vmatprep.subr.bf16.mxu0 %v6052_v55  ;;  %6152 = vmatprep.subr.bf16.mxu1 %v6054_v48  ;;  %v6085_v55 = vld [vmem:[#allocation4 + $0xbf0] sm:$0xff]  ;;  %v6088_v48 = vld [vmem:[#allocation4 + $0xce8] sm:$0xff] }
 0xcfc   :  { %6110 = vmatpush1.bf16.msra.mxu0 %v6051_v29  ;;  %6153 = vmatpush1.bf16.msra.mxu1 %v6053_v31  ;;  %v6090_v29 = vld [vmem:[#allocation4 + $0xcf8] sm:$0xff]  ;;  %v6087_v31 = vld [vmem:[#allocation4 + $0xce0] sm:$0xff] }
 0xcfd   :  { %6111 = vmatprep.subr.bf16.mxu0 %v6056_v51  ;;  %6154 = vmatprep.subr.bf16.mxu1 %v6058_v58  ;;  %v6089_v51 = vld [vmem:[#allocation4 + $0xcf0] sm:$0xff]  ;;  %v6092_v58 = vld [vmem:[#allocation4 + $0xde8] sm:$0xff] }
 0xd00   :  { %6112 = vmatpush1.bf16.msra.mxu0 %v6055_v35  ;;  %6155 = vmatpush1.bf16.msra.mxu1 %v6057_v24  ;;  %v6094_v35 = vld [vmem:[#allocation4 + $0xdf8] sm:$0xff]  ;;  %v6091_v24 = vld [vmem:[#allocation4 + $0xde0] sm:$0xff] }
 0xd01   :  { %6113 = vmatprep.subr.bf16.mxu0 %v6060_v33  ;;  %6156 = vmatprep.subr.bf16.mxu1 %v6062_v30  ;;  %v6093_v33 = vld [vmem:[#allocation4 + $0xdf0] sm:$0xff]  ;;  %v6096_v30 = vld [vmem:[#allocation4 + $0xee8] sm:$0xff] }
 0xd02   :  { %v7947_v44 = vpop.f32.mrb[92].mxu0  ;;  %v7949_v8 = vpop.f32.mrb[92].mxu1 }
 0xd03   :  { %v5557_v12 = vmax.f32 %v7906_v43, %v7947_v44  ;;  %v5559_v46 = vmax.f32 %v7911_v7, %v7949_v8  ;;  %v7955_v60 = vpop.f32.mrb[93].mxu0  ;;  %v7957_v49 = vpop.f32.mrb[93].mxu1 }
 0xd04   :  { %v5558_v56 = vmax.f32 %v7916_v47, %v7955_v60  ;;  %v5560_v59 = vmax.f32 %v7921_v54, %v7957_v49  ;;  %v7963_v0 = vpop.f32.mrb[94].mxu0  ;;  %v7965_v26 = vpop.f32.mrb[94].mxu1  ;;  %6114 = vmatpush1.bf16.msra.mxu0 %v6059_v53  ;;  %6157 = vmatpush1.bf16.msra.mxu1 %v6061_v39  ;;  %v6098_v53 = vld [vmem:[#allocation4 + $0xef8] sm:$0xff]  ;;  %v6095_v39 = vld [vmem:[#allocation4 + $0xee0] sm:$0xff] }
 0xd05   :  { %v5561_v61 = vmax.f32 %v7926_v2, %v7963_v0  ;;  %v5563_v50 = vmax.f32 %v7931_v16, %v7965_v26  ;;  %v7971_v18 = vpop.f32.mrb[95].mxu0  ;;  %v7973_v15 = vpop.f32.mrb[95].mxu1  ;;  %6115 = vmatprep.subr.bf16.mxu0 %v6064_v9  ;;  %6158 = vmatprep.subr.bf16.mxu1 %v6066_v14  ;;  %v6097_v9 = vld [vmem:[#allocation4 + $0xef0] sm:$0xff]  ;;  %v6100_v14 = vld [vmem:[#allocation4 + $0xfe8] sm:$0xff] }
 0xd06   :  { %v5562_v34 = vmax.f32 %v7936_v63, %v7971_v18  ;;  %v5564_v28 = vmax.f32 %v7941_v62, %v7973_v15 }
 0xd08   :  { %6116 = vmatpush1.bf16.msra.mxu0 %v6063_v32  ;;  %6159 = vmatpush1.bf16.msra.mxu1 %v6065_v27  ;;  %v6102_v32 = vld [vmem:[#allocation4 + $0xff8] sm:$0xff]  ;;  %v6099_v27 = vld [vmem:[#allocation4 + $0xfe0] sm:$0xff] }
 0xd09   :  { %6117 = vmatprep.subr.bf16.mxu0 %v6068_v3  ;;  %6160 = vmatprep.subr.bf16.mxu1 %v6070_v41  ;;  %v6101_v3 = vld [vmem:[#allocation4 + $0xff0] sm:$0xff] }
 0xd0c   :  { %6118 = vmatpush1.bf16.msra.mxu0 %v6067_v5  ;;  %6161 = vmatpush1.bf16.msra.mxu1 %v6069_v6 }
 0xd0d   :  { %6119 = vmatprep.subr.bf16.mxu0 %v6072_v19  ;;  %6162 = vmatprep.subr.bf16.mxu1 %v6074_v20 }
 0xd10   :  { %6120 = vmatpush1.bf16.msra.mxu0 %v6071_v22  ;;  %6163 = vmatpush1.bf16.msra.mxu1 %v6073_v21 }
 0xd11   :  { %6121 = vmatprep.subr.bf16.mxu0 %v6076_v42  ;;  %6164 = vmatprep.subr.bf16.mxu1 %v6078_v40 }
 0xd14   :  { %6122 = vmatpush1.bf16.msra.mxu0 %v6075_v45  ;;  %6165 = vmatpush1.bf16.msra.mxu1 %v6077_v36 }
 0xd15   :  { %6123 = vmatprep.subr.bf16.mxu0 %v6080_v52  ;;  %6166 = vmatprep.subr.bf16.mxu1 %v6082_v11 }
 0xd18   :  { %6124 = vmatpush1.bf16.msra.mxu0 %v6079_v1  ;;  %6167 = vmatpush1.bf16.msra.mxu1 %v6081_v37 }
 0xd19   :  { %6125 = vmatprep.subr.bf16.mxu0 %v6084_v4  ;;  %6168 = vmatprep.subr.bf16.mxu1 %v6086_v57 }
 0xd1c   :  { %6126 = vmatpush1.bf16.msra.mxu0 %v6083_v10  ;;  %6169 = vmatpush1.bf16.msra.mxu1 %v6085_v55 }
 0xd1d   :  { %6127 = vmatprep.subr.bf16.mxu0 %v6088_v48  ;;  %6170 = vmatprep.subr.bf16.mxu1 %v6090_v29 }
 0xd20   :  { %6128 = vmatpush1.bf16.msra.mxu0 %v6087_v31  ;;  %6171 = vmatpush1.bf16.msra.mxu1 %v6089_v51 }
 0xd21   :  { %6129 = vmatprep.subr.bf16.mxu0 %v6092_v58  ;;  %6172 = vmatprep.subr.bf16.mxu1 %v6094_v35  ;;  %v6197_v58 = vld [vmem:[#allocation12] sm:$0xf]  ;;  %v6235_v35 = vld [vmem:[#allocation13] sm:$0xf] }
 0xd24   :  { %6130 = vmatpush1.bf16.msra.mxu0 %v6091_v24  ;;  %6173 = vmatpush1.bf16.msra.mxu1 %v6093_v33  ;;  %v6265_v24 = vld [vmem:[#allocation15] sm:$0xf]  ;;  %v6202_v33 = vrot.slane %v6197_v58, %v7480_v13 }
 0xd25   :  { %6131 = vmatprep.subr.bf16.mxu0 %v6096_v30  ;;  %6174 = vmatprep.subr.bf16.mxu1 %v6098_v53  ;;  %v6210_v30 = vrot.slane %v6197_v58, %v7486_v23  ;;  %v6206_v53 = vrot.slane %v6197_v58, %v7483_v17 }
 0xd28   :  { %6132 = vmatpush1.bf16.msra.mxu0 %v6095_v39  ;;  %6175 = vmatpush1.bf16.msra.mxu1 %v6097_v9  ;;  %v6214_v39 = vrot.slane %v6197_v58, %v7489_v25 }
 0xd29   :  { %6133 = vmatprep.subr.bf16.mxu0 %v6100_v14  ;;  %6176 = vmatprep.subr.bf16.mxu1 %v6102_v32  ;;  %v6240_v14 = vrot.slane %v6235_v35, %v7480_v13 }
 0xd2c   :  { %6134 = vmatpush1.bf16.msra.mxu0 %v6099_v27  ;;  %6177 = vmatpush1.bf16.msra.mxu1 %v6101_v3  ;;  %v6248_v27 = vrot.slane %v6235_v35, %v7486_v23  ;;  %v6244_v3 = vrot.slane %v6235_v35, %v7483_v17 }
 0xd2f   :  { %6136 = vmatmul.mubr.bf16.vlgmr.msra.gmra.mrb[108].mxu0 %v7829_v38  ;;  %6179 = vmatmul.mubr.bf16.vlgmr.msra.gmra.mrb[108].mxu1 %v7829_v38 }
 0xd42   :  { %v5663_v41 = vpop.f32.mrb[96].mxu0  ;;  %v5706_v5 = vpop.f32.mrb[96].mxu1 }
 0xd43   :  { %v5715_v6 = vmax.f32 %v5557_v12, %v5663_v41  ;;  %v5717_v19 = vmax.f32 %v5559_v46, %v5706_v5  ;;  %v5665_v20 = vpop.f32.mrb[97].mxu0  ;;  %v5708_v22 = vpop.f32.mrb[97].mxu1  ;;  %v6252_v41 = vrot.slane %v6235_v35, %v7489_v25 }
 0xd44   :  { %v5716_v21 = vmax.f32 %v5558_v56, %v5665_v20  ;;  %v5718_v38 = vmax.f32 %v5560_v59, %v5708_v22  ;;  %v5667_v42 = vpop.f32.mrb[98].mxu0  ;;  %v5710_v40 = vpop.f32.mrb[98].mxu1  ;;  %v6278_v20 = vrot.slane %v6265_v24, %v7486_v23 }
 0xd45   :  { %v5719_v43 = vmax.f32 %v5561_v61, %v5667_v42  ;;  %v5721_v7 = vmax.f32 %v5563_v50, %v5710_v40  ;;  %v5669_v44 = vpop.f32.mrb[99].mxu0  ;;  %v5712_v8 = vpop.f32.mrb[99].mxu1  ;;  %v6274_v42 = vrot.slane %v6265_v24, %v7483_v17 }
 0xd46   :  { %v5720_v47 = vmax.f32 %v5562_v34, %v5669_v44  ;;  %v5722_v54 = vmax.f32 %v5564_v28, %v5712_v8 }
 0xd82   :  { %v5821_v12 = vpop.f32.mrb[100].mxu0  ;;  %v5864_v46 = vpop.f32.mrb[100].mxu1 }
 0xd83   :  { %v5873_v60 = vmax.f32 %v5715_v6, %v5821_v12  ;;  %v5875_v49 = vmax.f32 %v5717_v19, %v5864_v46  ;;  %v5823_v2 = vpop.f32.mrb[101].mxu0  ;;  %v5866_v56 = vpop.f32.mrb[101].mxu1  ;;  %v6270_v6 = vrot.slane %v6265_v24, %v7480_v13 }
 0xd84   :  { %v5874_v59 = vmax.f32 %v5716_v21, %v5823_v2  ;;  %v5876_v0 = vmax.f32 %v5718_v38, %v5866_v56  ;;  %v5825_v16 = vpop.f32.mrb[102].mxu0  ;;  %v5868_v26 = vpop.f32.mrb[102].mxu1 }
 0xd85   :  { %v5877_v61 = vmax.f32 %v5719_v43, %v5825_v16  ;;  %v5879_v50 = vmax.f32 %v5721_v7, %v5868_v26  ;;  %v5827_v45 = vpop.f32.mrb[103].mxu0  ;;  %v5870_v36 = vpop.f32.mrb[103].mxu1  ;;  %v6282_v43 = vrot.slane %v6265_v24, %v7489_v25 }
 0xd86   :  { %v5878_v63 = vmax.f32 %v5720_v47, %v5827_v45  ;;  %v5880_v18 = vmax.f32 %v5722_v54, %v5870_v36 }
 0xdc2   :  { %v5979_v34 = vpop.f32.mrb[104].mxu0  ;;  %v6022_v52 = vpop.f32.mrb[104].mxu1 }
 0xdc3   :  { %v6031_v62 = vmax.f32 %v5873_v60, %v5979_v34  ;;  %v6033_v15 = vmax.f32 %v5875_v49, %v6022_v52  ;;  %v5981_v28 = vpop.f32.mrb[105].mxu0  ;;  %v6024_v11 = vpop.f32.mrb[105].mxu1 }
 0xdc4   :  { %v6032_v1 = vmax.f32 %v5874_v59, %v5981_v28  ;;  %v6034_v37 = vmax.f32 %v5876_v0, %v6024_v11  ;;  %v5983_v4 = vpop.f32.mrb[106].mxu0  ;;  %v6026_v57 = vpop.f32.mrb[106].mxu1 }
 0xdc5   :  { %v6035_v10 = vmax.f32 %v5877_v61, %v5983_v4  ;;  %v6037_v55 = vmax.f32 %v5879_v50, %v6026_v57  ;;  %v5985_v48 = vpop.f32.mrb[107].mxu0  ;;  %v6028_v29 = vpop.f32.mrb[107].mxu1 }
 0xdc6   :  { %v6036_v31 = vmax.f32 %v5878_v63, %v5985_v48  ;;  %v6038_v51 = vmax.f32 %v5880_v18, %v6028_v29 }
 0xe02   :  { %v6137_v9 = vpop.f32.mrb[108].mxu0  ;;  %v6180_v32 = vpop.f32.mrb[108].mxu1 }
 0xe03   :  { %v6189_v5 = vmax.f32 %v6031_v62, %v6137_v9  ;;  %v6191_v19 = vmax.f32 %v6033_v15, %v6180_v32  ;;  %v6139_v22 = vpop.f32.mrb[109].mxu0  ;;  %v6182_v21 = vpop.f32.mrb[109].mxu1 }
 0xe04   :  { %v6190_v38 = vmax.f32 %v6032_v1, %v6139_v22  ;;  %v6192_v40 = vmax.f32 %v6034_v37, %v6182_v21  ;;  %v6141_v7 = vpop.f32.mrb[110].mxu0  ;;  %v6184_v44 = vpop.f32.mrb[110].mxu1 }
 0xe05   :  { %v6219_v8 = vadd.f32 %v6202_v33, %v6189_v5  ;;  %v6221_v47 = vadd.f32 %v6210_v30, %v6191_v19  ;;  %v6193_v54 = vmax.f32 %v6035_v10, %v6141_v7  ;;  %v6195_v12 = vmax.f32 %v6037_v55, %v6184_v44  ;;  %v6143_v46 = vpop.f32.mrb[111].mxu0  ;;  %v6186_v60 = vpop.f32.mrb[111].mxu1 }
 0xe06   :  { %v6220_v13 = vadd.f32 %v6206_v53, %v6190_v38  ;;  %v6222_v49 = vadd.f32 %v6214_v39, %v6192_v40  ;;  %v6194_v2 = vmax.f32 %v6036_v31, %v6143_v46  ;;  %v6196_v23 = vmax.f32 %v6038_v51, %v6186_v60 }
 0xe07   :  { %v6227_v56 = vmax.f32 %v6219_v8, 0.0  ;;  %v6229_v59 = vmax.f32 %v6221_v47, 0.0  ;;  %v6223_v0 = vadd.f32 %v6202_v33, %v6193_v54  ;;  %v6225_v16 = vadd.f32 %v6210_v30, %v6195_v12 }
 0xe08   :  { %v6228_v17 = vmax.f32 %v6220_v13, 0.0  ;;  %v6230_v26 = vmax.f32 %v6222_v49, 0.0  ;;  %v6224_v61 = vadd.f32 %v6206_v53, %v6194_v2  ;;  %v6226_v25 = vadd.f32 %v6214_v39, %v6196_v23 }
 0xe09   :  { %v6257_v50 = vmul.f32 %v6240_v14, %v6227_v56  ;;  %v6259_v45 = vmul.f32 %v6248_v27, %v6229_v59  ;;  %v6231_v36 = vmax.f32 %v6223_v0, 0.0  ;;  %v6233_v63 = vmax.f32 %v6225_v16, 0.0 }
 0xe0a   :  { %v6258_v18 = vmul.f32 %v6244_v3, %v6228_v17  ;;  %v6260_v34 = vmul.f32 %v6252_v41, %v6230_v26  ;;  %v6232_v52 = vmax.f32 %v6224_v61, 0.0  ;;  %v6234_v62 = vmax.f32 %v6226_v25, 0.0 }
 0xe0b   :  { %v8017_v15 = vadd.f32 %v6270_v6, %v6257_v50  ;;  %v8019_v28 = vadd.f32 %v6278_v20, %v6259_v45  ;;  %v6261_v11 = vmul.f32 %v6240_v14, %v6231_v36  ;;  %v6263_v1 = vmul.f32 %v6248_v27, %v6233_v63 }
 0xe0c   :  { %v6288_v37 = vadd.f32 %v6274_v42, %v6258_v18  ;;  %v6290_v4 = vadd.f32 %v6282_v43, %v6260_v34  ;;  %v6262_v57 = vmul.f32 %v6244_v3, %v6232_v52  ;;  %v6264_v10 = vmul.f32 %v6252_v41, %v6234_v62 }
 0xe0d   :  { %v8021_v55 = vadd.f32 %v6270_v6, %v6261_v11  ;;  %v8023_v48 = vadd.f32 %v6278_v20, %v6263_v1 }
 0xe0e   :  { %v6292_v29 = vadd.f32 %v6274_v42, %v6262_v57  ;;  %v6294_v31 = vadd.f32 %v6282_v43, %v6264_v10 }
 0xe0f   :  { %7013 = dma.done.wait [#allocation7 + $0x6], 4096 }
 0xe10   :  { %7014 = vsyncadd [#allocation7 + $0x6], 4294963200  ;;  %v6300_v51 = vpack.c.bf16 %v6292_v29, %v6288_v37  ;;  %v6302_v58 = vpack.c.bf16 %v6294_v31, %v6290_v4  ;;  %v6311_v35 = vld [vmem:[#allocation5 + $0x40] sm:$0xff]  ;;  %v6312_v53 = vld [vmem:[#allocation5 + $0x48] sm:$0xff]  ;;  %v6299_v2 = vpack.c.bf16 %v8021_v55, %v8017_v15  ;;  %v6301_v23 = vpack.c.bf16 %v8023_v48, %v8019_v28 }
 0xe11   :  { %v6327_v24 = vld [vmem:[#allocation5 + $0xc0] sm:$0xff]  ;;  %6583 = vmatprep.subr.bf16.mxu0 %v6311_v35  ;;  %v6328_v39 = vld [vmem:[#allocation5 + $0xc8] sm:$0xff]  ;;  %v6313_v32 = vld [vmem:[#allocation5 + $0x50] sm:$0xff] }
 0xe12   :  { %6374 = vmatprep.mubr.bf16.mxu0 %v6300_v51  ;;  %6415 = vmatprep.mubr.bf16.mxu1 %v6302_v58  ;;  %v6303_v33 = vld [vmem:[#allocation5] sm:$0xff]  ;;  %v6304_v9 = vld [vmem:[#allocation5 + $0x8] sm:$0xff]  ;;  %v6329_v27 = vld [vmem:[#allocation5 + $0xd0] sm:$0xff] }
 0xe13   :  { %6605 = vmatprep.subr.bf16.mxu1 %v6327_v24  ;;  %v6319_v30 = vld [vmem:[#allocation5 + $0x80] sm:$0xff]  ;;  %6584 = vmatpush3.bf16.msra.mxu0 %v6303_v33  ;;  %v6320_v14 = vld [vmem:[#allocation5 + $0x88] sm:$0xff]  ;;  %v6305_v3 = vld [vmem:[#allocation5 + $0x10] sm:$0xff] }
 0xe14   :  { %6606 = vmatpush3.bf16.msra.mxu1 %v6319_v30  ;;  %6585 = vmatprep.subr.bf16.mxu0 %v6312_v53  ;;  %v6321_v41 = vld [vmem:[#allocation5 + $0x90] sm:$0xff]  ;;  %v6314_v5 = vld [vmem:[#allocation5 + $0x58] sm:$0xff]  ;;  %v6315_v22 = vld [vmem:[#allocation5 + $0x60] sm:$0xff] }
 0xe15   :  { %6607 = vmatprep.subr.bf16.mxu1 %v6328_v39  ;;  %v6330_v6 = vld [vmem:[#allocation5 + $0xd8] sm:$0xff]  ;;  %v6331_v21 = vld [vmem:[#allocation5 + $0xe0] sm:$0xff]  ;;  %v6316_v40 = vld [vmem:[#allocation5 + $0x68] sm:$0xff] }
 0xe16   :  { %v6306_v19 = vld [vmem:[#allocation5 + $0x18] sm:$0xff]  ;;  %v6307_v38 = vld [vmem:[#allocation5 + $0x20] sm:$0xff]  ;;  %v6332_v43 = vld [vmem:[#allocation5 + $0xe8] sm:$0xff] }
 0xe17   :  { %6586 = vmatpush3.bf16.msra.mxu0 %v6304_v9  ;;  %v6322_v20 = vld [vmem:[#allocation5 + $0x98] sm:$0xff]  ;;  %v6323_v42 = vld [vmem:[#allocation5 + $0xa0] sm:$0xff]  ;;  %v6308_v7 = vld [vmem:[#allocation5 + $0x28] sm:$0xff] }
 0xe18   :  { %6608 = vmatpush3.bf16.msra.mxu1 %v6320_v14  ;;  %6587 = vmatprep.subr.bf16.mxu0 %v6313_v32  ;;  %v6324_v44 = vld [vmem:[#allocation5 + $0xa8] sm:$0xff]  ;;  %v6317_v8 = vld [vmem:[#allocation5 + $0x70] sm:$0xff]  ;;  %v6318_v46 = vld [vmem:[#allocation5 + $0x78] sm:$0xff] }
 0xe19   :  { %6609 = vmatprep.subr.bf16.mxu1 %v6329_v27  ;;  %v6333_v47 = vld [vmem:[#allocation5 + $0xf0] sm:$0xff]  ;;  %v6334_v60 = vld [vmem:[#allocation5 + $0xf8] sm:$0xff] }
 0xe1a   :  { %v6309_v54 = vld [vmem:[#allocation5 + $0x30] sm:$0xff]  ;;  %v6310_v13 = vld [vmem:[#allocation5 + $0x38] sm:$0xff] }
 0xe1b   :  { %6588 = vmatpush3.bf16.msra.mxu0 %v6305_v3  ;;  %v6325_v12 = vld [vmem:[#allocation5 + $0xb0] sm:$0xff]  ;;  %v6326_v49 = vld [vmem:[#allocation5 + $0xb8] sm:$0xff] }
 0xe1c   :  { %6610 = vmatpush3.bf16.msra.mxu1 %v6321_v41  ;;  %6589 = vmatprep.subr.bf16.mxu0 %v6314_v5  ;;  %v6573_v0 = vld [vmem:[#allocation16] ss:$0 sm:$0xff] }
 0xe1d   :  { %6611 = vmatprep.subr.bf16.mxu1 %v6330_v6 }
 0xe1f   :  { %6590 = vmatpush3.bf16.msra.mxu0 %v6306_v19 }
 0xe20   :  { %6612 = vmatpush3.bf16.msra.mxu1 %v6322_v20  ;;  %6591 = vmatprep.subr.bf16.mxu0 %v6315_v22 }
 0xe21   :  { %6613 = vmatprep.subr.bf16.mxu1 %v6331_v21 }
 0xe23   :  { %6592 = vmatpush3.bf16.msra.mxu0 %v6307_v38 }
 0xe24   :  { %6614 = vmatpush3.bf16.msra.mxu1 %v6323_v42  ;;  %6593 = vmatprep.subr.bf16.mxu0 %v6316_v40 }
 0xe25   :  { %6615 = vmatprep.subr.bf16.mxu1 %v6332_v43 }
 0xe27   :  { %6594 = vmatpush3.bf16.msra.mxu0 %v6308_v7 }
 0xe28   :  { %6616 = vmatpush3.bf16.msra.mxu1 %v6324_v44  ;;  %6595 = vmatprep.subr.bf16.mxu0 %v6317_v8 }
 0xe29   :  { %6617 = vmatprep.subr.bf16.mxu1 %v6333_v47 }
 0xe2b   :  { %6596 = vmatpush3.bf16.msra.mxu0 %v6309_v54 }
 0xe2c   :  { %6618 = vmatpush3.bf16.msra.mxu1 %v6325_v12  ;;  %6597 = vmatprep.subr.bf16.mxu0 %v6318_v46 }
 0xe2d   :  { %6619 = vmatprep.subr.bf16.mxu1 %v6334_v60 }
 0xe2f   :  { %6598 = vmatpush3.bf16.msra.mxu0 %v6310_v13 }
 0xe30   :  { %6620 = vmatpush3.bf16.msra.mxu1 %v6326_v49 }
 0xe32   :  { %6375 = vmatmul.mubr.bf16.vlgmr.msra.gmra.mrb[112].mxu0 %v6299_v2 }
 0xe33   :  { %6416 = vmatmul.mubr.bf16.vlgmr.msra.gmra.mrb[112].mxu1 %v6301_v23 }
 0xf05   :  { %v6599_v56 = vpop.f32.mrb[112].mxu0 }
 0xf06   :  { %v6621_v59 = vpop.f32.mrb[112].mxu1  ;;  %v6600_v16 = vpop.f32.mrb[113].mxu0 }
 0xf07   :  { %v6622_v17 = vpop.f32.mrb[113].mxu1  ;;  %v6601_v26 = vadd.f32 %v6600_v16, %v6599_v56  ;;  %v6602_v25 = vpop.f32.mrb[114].mxu0 }
 0xf08   :  { %v6623_v61 = vadd.f32 %v6622_v17, %v6621_v59  ;;  %v6624_v50 = vpop.f32.mrb[114].mxu1  ;;  %v6603_v45 = vpop.f32.mrb[115].mxu0 }
 0xf09   :  { %v6625_v36 = vpop.f32.mrb[115].mxu1  ;;  %v6377_v63 = vadd.f32 %v6601_v26, %v6573_v0  ;;  %v6604_v18 = vadd.f32 %v6603_v45, %v6602_v25 }
 0xf0a   :  { %v6626_v34 = vadd.f32 %v6625_v36, %v6624_v50 }
 0xf0b   :  { %v6418_v52 = vadd.f32 %v6623_v61, %v6377_v63  ;;  %v6380_v62 = vadd.f32 %v6604_v18, %v6573_v0 }
 0xf0d   :  { %v6424_v15 = vmax.f32 %v6418_v52, 0.0  ;;  %v6421_v28 = vadd.f32 %v6626_v34, %v6380_v62 }
 0xf0f   :  { %v6425_v11 = vmax.f32 %v6421_v28, 0.0 }
 0xf10   :  { %7015 = dma.done.wait [#allocation7 + $0x7], 1024 }
 0xf11   :  { %7016 = vsyncadd [#allocation7 + $0x7], 4294966272  ;;  %v7054_v1 = vmov 0.0   ;;  %vm7055_vm0 = vmmov 0   ;;  %v6430_v37 = vld [vmem:[#allocation6] sm:$0xff]  ;;  %v6431_v4 = vld [vmem:[#allocation6 + $0x8] sm:$0xff]  ;;  %v6429_v51 = vpack.c.bf16 %v6425_v11, %v6424_v15 }
 0xf12   :  { %6636 = vmatprep.subr.bf16.mxu0 %v7054_v1  ;;  %6652 = vmatprep.mubr.msk.bf16.mxu0 %vm7055_vm0, %v7054_v1  ;;  %v6432_v57 = vld [vmem:[#allocation6 + $0x10] sm:$0xff]  ;;  %v6433_v10 = vld [vmem:[#allocation6 + $0x18] sm:$0xff]  ;;  %v6434_v55 = vld [vmem:[#allocation6 + $0x20] sm:$0xff] }
 0xf13   :  { %6637 = vmatpush3.bf16.msra.mxu0 %v6430_v37  ;;  %v6435_v48 = vld [vmem:[#allocation6 + $0x28] sm:$0xff]  ;;  %v6436_v29 = vld [vmem:[#allocation6 + $0x30] sm:$0xff]  ;;  %v6437_v31 = vld [vmem:[#allocation6 + $0x38] sm:$0xff] }
 0xf14   :  { %6638 = vmatprep.subr.bf16.mxu0 %v7054_v1  ;;  %v6574_v58 = vld [vmem:[#allocation18] ss:$0 sm:$0xff] }
 0xf17   :  { %6639 = vmatpush3.bf16.msra.mxu0 %v6431_v4 }
 0xf18   :  { %6640 = vmatprep.subr.bf16.mxu0 %v7054_v1 }
 0xf1b   :  { %6641 = vmatpush3.bf16.msra.mxu0 %v6432_v57 }
 0xf1c   :  { %6642 = vmatprep.subr.bf16.mxu0 %v7054_v1 }
 0xf1f   :  { %6643 = vmatpush3.bf16.msra.mxu0 %v6433_v10 }
 0xf20   :  { %6644 = vmatprep.subr.bf16.mxu0 %v7054_v1 }
 0xf23   :  { %6645 = vmatpush3.bf16.msra.mxu0 %v6434_v55 }
 0xf24   :  { %6646 = vmatprep.subr.bf16.mxu0 %v7054_v1 }
 0xf27   :  { %6647 = vmatpush3.bf16.msra.mxu0 %v6435_v48 }
 0xf28   :  { %6648 = vmatprep.subr.bf16.mxu0 %v7054_v1 }
 0xf2b   :  { %6649 = vmatpush3.bf16.msra.mxu0 %v6436_v29 }
 0xf2c   :  { %6650 = vmatprep.subr.bf16.mxu0 %v7054_v1 }
 0xf2f   :  { %6651 = vmatpush3.bf16.msra.mxu0 %v6437_v31 }
 0xf32   :  { %6653 = vmatmul.mubr.bf16.vlgmr.msra.gmra.mrb[116].mxu0 %v6429_v51 }
0x1005   :  { %v6479_v35 = vpop.f32.mrb[116].mxu0 }
0x1006   :  { %v6480_v24 = vadd.f32 %v6574_v58, %v6479_v35  ;;  %v6654_v33 = vpop.f32.mrb[117].mxu0 }
0x1007   :  { %v6482_v30 = vpop.f32.mrb[118].mxu0 }
0x1008   :  { %6486 = vst [vmem:[%s8048_s13] sm:$0xff] %v6480_v24  ;;  %v6483_v53 = vadd.f32 %v6574_v58, %v6482_v30  ;;  %v6655_v39 = vpop.f32.mrb[119].mxu0 }
0x100a   :  { %6487 = vst [vmem:[%s8048_s13 + $0x8] sm:$0xff] %v6483_v53 }
0x100b   :  { %6492 = vsyncpa [#allocation9], 1 }
0x100c   :  { %6493 = vsyncpa [#allocation11], 1 }
0x100d   :  { %6494 = vsyncpa [#allocation14], 1 }
0x100e   :  { %6495 = vsyncpa [#allocation17], 1 }
0x100f   :  { %6496 = vsyncmov [#allocation7] }
0x1012   :  { %s6497_s20 = vpop.sfrf %6496 }
0x1013   :  { %p6575_p2 = scmp.ne.s32.totalorder %s6497_s20, 0 }
0x1015   :  { %6501 = shalt.err (%p6575_p2)  }
0x1016   :  { %6503 = vsyncmov [#allocation7 + $0x1] }
0x1019   :  { %s6504_s18 = vpop.sfrf %6503 }
0x101a   :  { %p6576_p3 = scmp.ne.s32.totalorder %s6504_s18, 0 }
0x101c   :  { %6508 = shalt.err (%p6576_p3)  }
0x101d   :  { %6510 = vsyncmov [#allocation7 + $0x2] }
0x1020   :  { %s6511_s10 = vpop.sfrf %6510 }
0x1021   :  { %p6577_p4 = scmp.ne.s32.totalorder %s6511_s10, 0 }
0x1023   :  { %6515 = shalt.err (%p6577_p4)  }
0x1024   :  { %6517 = vsyncmov [#allocation7 + $0x3] }
0x1027   :  { %s6518_s15 = vpop.sfrf %6517 }
0x1028   :  { %p6578_p5 = scmp.ne.s32.totalorder %s6518_s15, 0 }
0x102a   :  { %6522 = shalt.err (%p6578_p5)  }
0x102b   :  { %6524 = vsyncmov [#allocation7 + $0x4] }
0x102e   :  { %s6525_s13 = vpop.sfrf %6524 }
0x102f   :  { %p6579_p6 = scmp.ne.s32.totalorder %s6525_s13, 0 }
0x1031   :  { %6529 = shalt.err (%p6579_p6)  }
0x1032   :  { %6531 = vsyncmov [#allocation7 + $0x5] }
0x1035   :  { %s6532_s19 = vpop.sfrf %6531 }
0x1036   :  { %p6580_p7 = scmp.ne.s32.totalorder %s6532_s19, 0 }
0x1038   :  { %6536 = shalt.err (%p6580_p7)  }
0x1039   :  { %6538 = vsyncmov [#allocation7 + $0x6] }
0x103c   :  { %s6539_s8 = vpop.sfrf %6538 }
0x103d   :  { %p6581_p8 = scmp.ne.s32.totalorder %s6539_s8, 0 }
0x103f   :  { %6543 = shalt.err (%p6581_p8)  }
0x1040   :  { %6545 = vsyncmov [#allocation7 + $0x7] }
0x1043   :  { %s6546_s3 = vpop.sfrf %6545 }
0x1044   :  { %p6582_p9 = scmp.ne.s32.totalorder %s6546_s3, 0 }
0x1046   :  { %6550 = shalt.err (%p6582_p9)  }

</bundles_post_ra>
